<compile_context>
chip_gen: v7x
topology: tpu7x:2x2x1
jax: 0.10.0
libtpu: 0.0.40
codegen_flags: <defaults>
</compile_context>

<pallas_src>
import jax
import jax.numpy as jnp
from jax.experimental import pallas as pl
from jax.experimental.pallas import tpu as pltpu

EPS = 1e-3
K_BLOCK = 768            # 2304 = 3 * 768 -> 3-step reduction pipeline


def se_conv_bn_kernel(s_ref, w1_ref, b1_ref, x_ref, w2_ref, gamma_ref,
                      beta_ref, o_ref, acc_ref):
    k = pl.program_id(0)

    @pl.when(k == 0)
    def _():
        acc_ref[...] = jnp.zeros_like(acc_ref)

    # --- SE gate for this C_mid block (tiny; VPU broadcast-mul + reduce) ---
    w1_f32 = w1_ref[...].astype(jnp.float32)                    # [kblk, 96]
    logits = jnp.sum(w1_f32 * s_ref[...], axis=1, keepdims=True) + b1_ref[...]
    gate = jax.nn.sigmoid(logits)                               # [kblk, 1] f32

    # --- gated activations, broadcast over the 49 HW lanes ---
    y = (gate * x_ref[...]).astype(jnp.bfloat16)                # [kblk, 49]

    # --- partial 1x1 conv: [384, kblk] @ [kblk, 49], f32 accumulation ---
    acc_ref[...] += jnp.dot(w2_ref[...], y,
                            preferred_element_type=jnp.float32)

    # --- BatchNorm2d epilogue on the last reduction step ---
    @pl.when(k == pl.num_programs(0) - 1)
    def _():
        z = acc_ref[...]                                        # [384, 49] f32
        mean = jnp.mean(z, axis=1, keepdims=True)               # stats over N*H*W
        var = jnp.mean((z - mean) * (z - mean), axis=1, keepdims=True)  # biased
        inv = jax.lax.rsqrt(var + EPS)
        o_ref[...] = (z - mean) * inv * gamma_ref[...] + beta_ref[...]


def se_conv_bn(x952, x949, w1, b1, w2, gamma, beta):
    """x952: [1,96,1,1], x949: [1,2304,7,7] (NCHW, f32) -> [1,384,7,7] f32."""
    N, C_in, _, _ = x952.shape            # (1, 96, 1, 1)
    _, C_mid, H, W = x949.shape           # (1, 2304, 7, 7)
    C_out = w2.shape[0]                   # 384
    assert N == 1
    HW = H * W
    assert C_mid % K_BLOCK == 0
    k_steps = C_mid // K_BLOCK

    # Native-layout glue: contiguous reshapes only, no transposes.
    s_row = x952.reshape(1, C_in)                               # [1, 96]    f32
    x_mat = x949.reshape(C_mid, HW)                             # [2304, 49] f32
    w1_mat = w1.reshape(C_mid, C_in).astype(jnp.bfloat16)       # [2304, 96] bf16
    b1_col = b1.reshape(C_mid, 1)                               # [2304, 1]  f32
    w2_mat = w2.reshape(C_out, C_mid).astype(jnp.bfloat16)      # [384,2304] bf16
    gamma_col = gamma.reshape(C_out, 1)                         # [384, 1]   f32
    beta_col = beta.reshape(C_out, 1)                           # [384, 1]   f32

    out_mat = pl.pallas_call(
        se_conv_bn_kernel,
        out_shape=jax.ShapeDtypeStruct((C_out, HW), jnp.float32),
        grid_spec=pltpu.PrefetchScalarGridSpec(
            num_scalar_prefetch=0,
            grid=(k_steps,),
            in_specs=[
                pl.BlockSpec((1, C_in), lambda k: (0, 0)),          # s
                pl.BlockSpec((K_BLOCK, C_in), lambda k: (k, 0)),    # w1
                pl.BlockSpec((K_BLOCK, 1), lambda k: (k, 0)),       # b1
                pl.BlockSpec((K_BLOCK, HW), lambda k: (k, 0)),      # x
                pl.BlockSpec((C_out, K_BLOCK), lambda k: (0, k)),   # w2
                pl.BlockSpec((C_out, 1), lambda k: (0, 0)),         # gamma
                pl.BlockSpec((C_out, 1), lambda k: (0, 0)),         # beta
            ],
            out_specs=pl.BlockSpec((C_out, HW), lambda k: (0, 0)),
            scratch_shapes=[pltpu.VMEM((C_out, HW), jnp.float32)],
        ),
        compiler_params=pltpu.CompilerParams(
            dimension_semantics=("arbitrary",),   # reduction over C_mid
        ),
        # TODO(synk): on v7x a second "parallel" grid axis over C_out could
        # split the w2 read across the two TensorCores; skipped because the
        # replicated x/w1 traffic it implies would hurt single-TC v5e/v6e.
    )(s_row, w1_mat, b1_col, x_mat, w2_mat, gamma_col, beta_col)

    # [C_out, HW] is already NCHW-ordered for N=1: plain reshape, no transpose.
    return out_mat.reshape(1, C_out, H, W)


def _reference(x952, x949, w1, b1, w2, gamma, beta):
    """Pure-JAX f32 reference mirroring the PyTorch train-mode forward."""
    C_mid, C_in = w1.shape[0], w1.shape[1]
    C_out = w2.shape[0]
    s = x952.reshape(1, C_in)
    logits = s @ w1.reshape(C_mid, C_in).T + b1[None, :]
    gate = jax.nn.sigmoid(logits)                               # [1, C_mid]
    y = gate.reshape(1, C_mid, 1, 1) * x949
    z = jnp.einsum("nchw,oc->nohw", y, w2.reshape(C_out, C_mid))
    mean = z.mean(axis=(0, 2, 3), keepdims=True)
    var = ((z - mean) ** 2).mean(axis=(0, 2, 3), keepdims=True)
    zn = (z - mean) * jax.lax.rsqrt(var + EPS)
    return zn * gamma.reshape(1, C_out, 1, 1) + beta.reshape(1, C_out, 1, 1)


if __name__ == "__main__":
    key = jax.random.PRNGKey(0)
    k1, k2, k3, k4, k5, k6, k7 = jax.random.split(key, 7)

    # Inputs (shapes fixed by the module's 1x1-conv channel counts).
    x949 = jax.random.normal(k1, (1, 2304, 7, 7), dtype=jnp.float32)
    x952 = jax.random.normal(k2, (1, 96, 1, 1), dtype=jnp.float32)

    # Deterministic synthetic parameters (not a checkpoint load).
    w1 = jax.random.normal(k3, (2304, 96, 1, 1), dtype=jnp.float32) * 0.05
    b1 = jax.random.normal(k4, (2304,), dtype=jnp.float32) * 0.05
    w2 = jax.random.normal(k5, (384, 2304, 1, 1), dtype=jnp.float32) * 0.02
    gamma = 1.0 + 0.1 * jax.random.normal(k6, (384,), dtype=jnp.float32)
    beta = 0.1 * jax.random.normal(k7, (384,), dtype=jnp.float32)

    out = jax.jit(se_conv_bn)(x952, x949, w1, b1, w2, gamma, beta)
    jax.block_until_ready(out)
    assert out.shape == (1, 384, 7, 7)

    # Loose tolerance: bf16 weight quantization vs. the f32 reference.
    ref = _reference(x952, x949, w1, b1, w2, gamma, beta)
    max_err = float(jnp.max(jnp.abs(out - ref)))
    assert max_err < 0.2, f"max abs err {max_err}"
    print("KERNEL_OK")
</pallas_src>

<mosaic_0001>
module attributes {stable_mosaic.version = 11 : i64} {
  func.func @se_conv_bn_kernel(%arg0: i32, %arg1: memref<1x96xf32, #tpu.memory_space<vmem>>, %arg2: memref<768x96xbf16, #tpu.memory_space<vmem>>, %arg3: memref<768x1xf32, #tpu.memory_space<vmem>>, %arg4: memref<768x49xf32, #tpu.memory_space<vmem>>, %arg5: memref<384x768xbf16, #tpu.memory_space<vmem>>, %arg6: memref<384x1xf32, #tpu.memory_space<vmem>>, %arg7: memref<384x1xf32, #tpu.memory_space<vmem>>, %arg8: memref<384x49xf32, #tpu.memory_space<vmem>>, %arg9: memref<384x49xf32, #tpu.memory_space<vmem>>) attributes {dimension_semantics = [#tpu.dimension_semantics<arbitrary>], iteration_bounds = array<i64: 3>, scalar_prefetch = 0 : i64, scratch_operands = 1 : i64, tpu.core_type = #tpu.core_type<tc>, window_params = [{pipeline_mode = #tpu.pipeline_mode<synchronous>, transform_indices = @transform_0, window_bounds = array<i64: 1, 96>}, {transform_indices = @transform_1, window_bounds = array<i64: 768, 96>}, {transform_indices = @transform_2, window_bounds = array<i64: 768, 1>}, {transform_indices = @transform_3, window_bounds = array<i64: 768, 49>}, {transform_indices = @transform_4, window_bounds = array<i64: 384, 768>}, {pipeline_mode = #tpu.pipeline_mode<synchronous>, transform_indices = @transform_5, window_bounds = array<i64: 384, 1>}, {pipeline_mode = #tpu.pipeline_mode<synchronous>, transform_indices = @transform_6, window_bounds = array<i64: 384, 1>}, {pipeline_mode = #tpu.pipeline_mode<synchronous>, transform_indices = @transform_7, window_bounds = array<i64: 384, 49>}]} {
    %c0_i32 = arith.constant 0 : i32
    %0 = arith.cmpi eq, %arg0, %c0_i32 : i32
    %1 = arith.extui %0 : i1 to i32
    %c0_i32_0 = arith.constant 0 : i32
    %2 = arith.cmpi ne, %1, %c0_i32_0 : i32
    scf.if %2 {
      %cst_17 = arith.constant 0.000000e+00 : f32
      %29 = vector.broadcast %cst_17 : f32 to vector<384x49xf32>
      %c0_18 = arith.constant 0 : index
      %c0_19 = arith.constant 0 : index
      %30 = vector.load %arg9[%c0_18, %c0_19] : memref<384x49xf32, #tpu.memory_space<vmem>>, vector<384x49xf32>
      tpu.vector_store %arg9[%c0_18, %c0_19], %29 {strides = array<i32>} : memref<384x49xf32, #tpu.memory_space<vmem>>, vector<384x49xf32>,
    } else {
    }
    %c0 = arith.constant 0 : index
    %c0_1 = arith.constant 0 : index
    %3 = vector.load %arg2[%c0, %c0_1] : memref<768x96xbf16, #tpu.memory_space<vmem>>, vector<768x96xbf16>
    %4 = arith.extf %3 : vector<768x96xbf16> to vector<768x96xf32>
    %c0_2 = arith.constant 0 : index
    %c0_3 = arith.constant 0 : index
    %5 = vector.load %arg1[%c0_2, %c0_3] : memref<1x96xf32, #tpu.memory_space<vmem>>, vector<1x96xf32>
    %6 = vector.broadcast %5 : vector<1x96xf32> to vector<768x96xf32>
    %7 = arith.mulf %4, %6 : vector<768x96xf32>
    %cst = arith.constant dense<0.000000e+00> : vector<768xf32>
    %8 = vector.multi_reduction <add>, %7, %cst [1] : vector<768x96xf32> to vector<768xf32>
    %9 = vector.shape_cast %8 : vector<768xf32> to vector<768x1xf32>
    %c0_4 = arith.constant 0 : index
    %c0_5 = arith.constant 0 : index
    %10 = vector.load %arg3[%c0_4, %c0_5] : memref<768x1xf32, #tpu.memory_space<vmem>>, vector<768x1xf32>
    %11 = arith.addf %9, %10 : vector<768x1xf32>
    %12 = arith.negf %11 : vector<768x1xf32>
    %13 = math.exp %12 : vector<768x1xf32>
    %cst_6 = arith.constant 1.000000e+00 : f32
    %14 = vector.broadcast %cst_6 : f32 to vector<768x1xf32>
    %15 = arith.addf %14, %13 : vector<768x1xf32>
    %16 = arith.divf %14, %15 : vector<768x1xf32>
    %c0_7 = arith.constant 0 : index
    %c0_8 = arith.constant 0 : index
    %17 = vector.load %arg4[%c0_7, %c0_8] : memref<768x49xf32, #tpu.memory_space<vmem>>, vector<768x49xf32>
    %18 = vector.broadcast %16 : vector<768x1xf32> to vector<768x49xf32>
    %19 = arith.mulf %18, %17 : vector<768x49xf32>
    %20 = arith.truncf %19 : vector<768x49xf32> to vector<768x49xbf16>
    %c0_9 = arith.constant 0 : index
    %c0_10 = arith.constant 0 : index
    %21 = vector.load %arg9[%c0_9, %c0_10] : memref<384x49xf32, #tpu.memory_space<vmem>>, vector<384x49xf32>
    %c0_11 = arith.constant 0 : index
    %c0_12 = arith.constant 0 : index
    %22 = vector.load %arg5[%c0_11, %c0_12] : memref<384x768xbf16, #tpu.memory_space<vmem>>, vector<384x768xbf16>
    %cst_13 = arith.constant dense<0.000000e+00> : vector<384x49xf32>
    %23 = tpu.matmul %22, %20, %cst_13 {dimension_numbers = #tpu.dot_dimension_numbers<[1], [0], [0], [1], [0, 0, 1, 1], [], []>} : vector<384x768xbf16>, vector<768x49xbf16>, vector<384x49xf32> -> vector<384x49xf32>
    %24 = arith.addf %21, %23 : vector<384x49xf32>
    %c0_14 = arith.constant 0 : index
    %c0_15 = arith.constant 0 : index
    %25 = vector.load %arg9[%c0_14, %c0_15] : memref<384x49xf32, #tpu.memory_space<vmem>>, vector<384x49xf32>
    tpu.vector_store %arg9[%c0_14, %c0_15], %24 {strides = array<i32>} : memref<384x49xf32, #tpu.memory_space<vmem>>, vector<384x49xf32>,
    %c2_i32 = arith.constant 2 : i32
    %26 = arith.cmpi eq, %arg0, %c2_i32 : i32
    %27 = arith.extui %26 : i1 to i32
    %c0_i32_16 = arith.constant 0 : i32
    %28 = arith.cmpi ne, %27, %c0_i32_16 : i32
    scf.if %28 {
      %c0_17 = arith.constant 0 : index
      %c0_18 = arith.constant 0 : index
      %29 = vector.load %arg9[%c0_17, %c0_18] : memref<384x49xf32, #tpu.memory_space<vmem>>, vector<384x49xf32>
      %cst_19 = arith.constant dense<0.000000e+00> : vector<384xf32>
      %30 = vector.multi_reduction <add>, %29, %cst_19 [1] : vector<384x49xf32> to vector<384xf32>
      %31 = vector.shape_cast %30 : vector<384xf32> to vector<384x1xf32>
      %cst_20 = arith.constant 4.900000e+01 : f32
      %32 = vector.broadcast %cst_20 : f32 to vector<384x1xf32>
      %33 = arith.divf %31, %32 : vector<384x1xf32>
      %34 = vector.broadcast %33 : vector<384x1xf32> to vector<384x49xf32>
      %35 = arith.subf %29, %34 : vector<384x49xf32>
      %36 = vector.broadcast %33 : vector<384x1xf32> to vector<384x49xf32>
      %37 = arith.subf %29, %36 : vector<384x49xf32>
      %38 = arith.mulf %35, %37 : vector<384x49xf32>
      %cst_21 = arith.constant dense<0.000000e+00> : vector<384xf32>
      %39 = vector.multi_reduction <add>, %38, %cst_21 [1] : vector<384x49xf32> to vector<384xf32>
      %40 = vector.shape_cast %39 : vector<384xf32> to vector<384x1xf32>
      %cst_22 = arith.constant 4.900000e+01 : f32
      %41 = vector.broadcast %cst_22 : f32 to vector<384x1xf32>
      %42 = arith.divf %40, %41 : vector<384x1xf32>
      %cst_23 = arith.constant 1.000000e-03 : f32
      %43 = vector.broadcast %cst_23 : f32 to vector<384x1xf32>
      %44 = arith.addf %42, %43 : vector<384x1xf32>
      %45 = math.rsqrt %44 : vector<384x1xf32>
      %46 = vector.broadcast %33 : vector<384x1xf32> to vector<384x49xf32>
      %47 = arith.subf %29, %46 : vector<384x49xf32>
      %48 = vector.broadcast %45 : vector<384x1xf32> to vector<384x49xf32>
      %49 = arith.mulf %47, %48 : vector<384x49xf32>
      %c0_24 = arith.constant 0 : index
      %c0_25 = arith.constant 0 : index
      %50 = vector.load %arg6[%c0_24, %c0_25] : memref<384x1xf32, #tpu.memory_space<vmem>>, vector<384x1xf32>
      %51 = vector.broadcast %50 : vector<384x1xf32> to vector<384x49xf32>
      %52 = arith.mulf %49, %51 : vector<384x49xf32>
      %c0_26 = arith.constant 0 : index
      %c0_27 = arith.constant 0 : index
      %53 = vector.load %arg7[%c0_26, %c0_27] : memref<384x1xf32, #tpu.memory_space<vmem>>, vector<384x1xf32>
      %54 = vector.broadcast %53 : vector<384x1xf32> to vector<384x49xf32>
      %55 = arith.addf %52, %54 : vector<384x49xf32>
      %c0_28 = arith.constant 0 : index
      %c0_29 = arith.constant 0 : index
      %56 = vector.load %arg8[%c0_28, %c0_29] : memref<384x49xf32, #tpu.memory_space<vmem>>, vector<384x49xf32>
      tpu.vector_store %arg8[%c0_28, %c0_29], %55 {strides = array<i32>} : memref<384x49xf32, #tpu.memory_space<vmem>>, vector<384x49xf32>,
    } else {
    }
    return
  }
  func.func @transform_0(%arg0: i32) -> (i32, i32) {
    %c0_i32 = arith.constant 0 : i32
    %c0_i32_0 = arith.constant 0 : i32
    %c0_i32_1 = arith.constant 0 : i32
    return %c0_i32, %c0_i32_0 : i32, i32
  }
  func.func @transform_1(%arg0: i32) -> (i32, i32) {
    %c0_i32 = arith.constant 0 : i32
    %c0_i32_0 = arith.constant 0 : i32
    return %arg0, %c0_i32 : i32, i32
  }
  func.func @transform_2(%arg0: i32) -> (i32, i32) {
    %c0_i32 = arith.constant 0 : i32
    %c0_i32_0 = arith.constant 0 : i32
    return %arg0, %c0_i32 : i32, i32
  }
  func.func @transform_3(%arg0: i32) -> (i32, i32) {
    %c0_i32 = arith.constant 0 : i32
    %c0_i32_0 = arith.constant 0 : i32
    return %arg0, %c0_i32 : i32, i32
  }
  func.func @transform_4(%arg0: i32) -> (i32, i32) {
    %c0_i32 = arith.constant 0 : i32
    %c0_i32_0 = arith.constant 0 : i32
    return %c0_i32, %arg0 : i32, i32
  }
  func.func @transform_5(%arg0: i32) -> (i32, i32) {
    %c0_i32 = arith.constant 0 : i32
    %c0_i32_0 = arith.constant 0 : i32
    %c0_i32_1 = arith.constant 0 : i32
    return %c0_i32, %c0_i32_0 : i32, i32
  }
  func.func @transform_6(%arg0: i32) -> (i32, i32) {
    %c0_i32 = arith.constant 0 : i32
    %c0_i32_0 = arith.constant 0 : i32
    %c0_i32_1 = arith.constant 0 : i32
    return %c0_i32, %c0_i32_0 : i32, i32
  }
  func.func @transform_7(%arg0: i32) -> (i32, i32) {
    %c0_i32 = arith.constant 0 : i32
    %c0_i32_0 = arith.constant 0 : i32
    %c0_i32_1 = arith.constant 0 : i32
    return %c0_i32, %c0_i32_0 : i32, i32
  }
}

</mosaic_0001>

<bundles_post_ra>
// kernel: se_conv_bn.1
= control target key start
LH: loop header
LB: loop body
LE: loop exit
PB: predicated region body
PF: predicated region fallthrough
CT: control target
= control target key end

     0   :  { %s7236_s24 = smov 0   ;;  %s7238_s25 = smov 0   ;;  %s10249_s0 = inlined_call_operand.vmem [shape: f32[1,96], index: 0, kind: input, shape index: {}]   ;;  %s10250_s1 = inlined_call_operand.vmem [shape: bf16[2304,96], index: 1, kind: input, shape index: {}]   ;;  %s10251_s2 = inlined_call_operand.vmem [shape: f32[2304,1], index: 2, kind: input, shape index: {}]   ;;  %s10252_s3 = inlined_call_operand.vmem [shape: f32[2304,49], index: 3, kind: input, shape index: {}]   ;;  %s10253_s4 = inlined_call_operand.vmem [shape: bf16[384,2304], index: 4, kind: input, shape index: {}]   ;;  %s10254_s5 = inlined_call_operand.vmem [shape: f32[384,1], index: 5, kind: input, shape index: {}]   ;;  %s10255_s6 = inlined_call_operand.vmem [shape: f32[384,1], index: 6, kind: input, shape index: {}]   ;;  %s10256_s7 = inlined_call_operand.vmem [shape: f32[384,49], index: 7, kind: output, shape index: {}]  }
   0x1   :  { %s7240_s26 = smov 0  }
   0x2 LB: > { %s7252_s27 = sadd.s32 4294967295, %s7191_s26   ;;  %s7255_s28 = sadd.s32 1, %s7191_s26   ;;  %s7191_s26 = sphi %s7240_s26, %s10459_s26   ;;  %s7187_s25 = sphi %s7238_s25, %s10458_s25   ;;  %s7183_s24 = sphi %s7236_s24, %s10457_s24  }
   0x3   : > { %s120_s29 = ssub.s32 %s7191_s26, %s7255_s28  ;;  %s123_s30 = sadd.s32 1, %s7187_s25 }
   0x4   : > { %p121_p0 = scmp.eq.s32.totalorder %s120_s29, 0  ;;  %p130_p1 = scmp.ne.s32.totalorder %s7187_s25, %s7183_s24 }
   0x5   : > { %p131_p2 = scmp.eq.s32.totalorder %s7191_s26, 0  ;;  %p5916_p4 = scmp.ge.s32.totalorder %s7191_s26, 3 }
   0x6   : > { %s7264_s8 = scalar_select %p121_p0, %s7187_s25, %s123_s30  }
   0x7   : > { %p132_p3 = por %p131_p2, %p130_p1  ;;  %228 = sbr.rel (%p5916_p4) target bundleno = 91 (0x5b), region = 28 }
   0xe   : > { %258 = sbr.rel (!%p132_p3) target bundleno = 91 (0x5b), region = 44  ;;  %s260_s9 = sand.u32 (%p132_p3), 1, %s7187_s25  }
   0xf   : > { %s6167_s10 = smul.u32 (%p132_p3), 24, %s7191_s26 }
  0x10   : > { %s6439_s11 = smul.u32 (%p132_p3), 1152, %s260_s9 }
  0x11   : > { %s7272_s14 = scalar_lea.vmem (%p132_p3), %s10253_s4, %s6167_s10 }
  0x12   : > { %v278_v0 = vld [vmem:[%s7272_s14] sm:$0xff] (%p132_p3)  ;;  %v280_v1 = vld [vmem:[%s7272_s14 + $0x8] sm:$0xff] (%p132_p3)  ;;  %v282_v2 = vld [vmem:[%s7272_s14 + $0x10] sm:$0xff] (%p132_p3)  ;;  %s7277_s15 = scalar_lea.vmem (%p132_p3), [#allocation3], %s6439_s11 }
  0x13   : > { %279 = vst [vmem:[%s7277_s15] sm:$0xff] (%p132_p3), %v278_v0  ;;  %281 = vst [vmem:[%s7277_s15 + $0x8] sm:$0xff] (%p132_p3), %v280_v1  ;;  %v284_v3 = vld [vmem:[%s7272_s14 + $0x48] sm:$0xff] (%p132_p3)  ;;  %v286_v4 = vld [vmem:[%s7272_s14 + $0x50] sm:$0xff] (%p132_p3) }
  0x14   : > { %283 = vst [vmem:[%s7277_s15 + $0x10] sm:$0xff] (%p132_p3), %v282_v2  ;;  %v288_v5 = vld [vmem:[%s7272_s14 + $0x58] sm:$0xff] (%p132_p3)  ;;  %285 = vst [vmem:[%s7277_s15 + $0x18] sm:$0xff] (%p132_p3), %v284_v3  ;;  %v290_v6 = vld [vmem:[%s7272_s14 + $0x90] sm:$0xff] (%p132_p3) }
  0x15   : > { %287 = vst [vmem:[%s7277_s15 + $0x20] sm:$0xff] %v286_v4  ;;  %289 = vst [vmem:[%s7277_s15 + $0x28] sm:$0xff] %v288_v5  ;;  %v292_v7 = vld [vmem:[%s7272_s14 + $0x98] sm:$0xff]  ;;  %v294_v8 = vld [vmem:[%s7272_s14 + $0xa0] sm:$0xff] }
  0x16   : > { %291 = vst [vmem:[%s7277_s15 + $0x30] sm:$0xff] %v290_v6  ;;  %293 = vst [vmem:[%s7277_s15 + $0x38] sm:$0xff] %v292_v7  ;;  %v296_v9 = vld [vmem:[%s7272_s14 + $0xd8] sm:$0xff]  ;;  %v298_v10 = vld [vmem:[%s7272_s14 + $0xe0] sm:$0xff] }
  0x17   : > { %295 = vst [vmem:[%s7277_s15 + $0x40] sm:$0xff] %v294_v8  ;;  %v300_v11 = vld [vmem:[%s7272_s14 + $0xe8] sm:$0xff]  ;;  %297 = vst [vmem:[%s7277_s15 + $0x48] sm:$0xff] %v296_v9  ;;  %v302_v12 = vld [vmem:[%s7272_s14 + $0x120] sm:$0xff] }
  0x18   : > { %299 = vst [vmem:[%s7277_s15 + $0x50] sm:$0xff] %v298_v10  ;;  %301 = vst [vmem:[%s7277_s15 + $0x58] sm:$0xff] %v300_v11  ;;  %v304_v13 = vld [vmem:[%s7272_s14 + $0x128] sm:$0xff]  ;;  %v306_v14 = vld [vmem:[%s7272_s14 + $0x130] sm:$0xff] }
  0x19   : > { %303 = vst [vmem:[%s7277_s15 + $0x60] sm:$0xff] %v302_v12  ;;  %305 = vst [vmem:[%s7277_s15 + $0x68] sm:$0xff] %v304_v13  ;;  %v308_v15 = vld [vmem:[%s7272_s14 + $0x168] sm:$0xff]  ;;  %v310_v16 = vld [vmem:[%s7272_s14 + $0x170] sm:$0xff] }
  0x1a   : > { %307 = vst [vmem:[%s7277_s15 + $0x70] sm:$0xff] %v306_v14  ;;  %v312_v17 = vld [vmem:[%s7272_s14 + $0x178] sm:$0xff]  ;;  %309 = vst [vmem:[%s7277_s15 + $0x78] sm:$0xff] %v308_v15  ;;  %v314_v18 = vld [vmem:[%s7272_s14 + $0x1b0] sm:$0xff] }
  0x1b   : > { %311 = vst [vmem:[%s7277_s15 + $0x80] sm:$0xff] %v310_v16  ;;  %313 = vst [vmem:[%s7277_s15 + $0x88] sm:$0xff] %v312_v17  ;;  %v316_v19 = vld [vmem:[%s7272_s14 + $0x1b8] sm:$0xff]  ;;  %v318_v20 = vld [vmem:[%s7272_s14 + $0x1c0] sm:$0xff] }
  0x1c   : > { %315 = vst [vmem:[%s7277_s15 + $0x90] sm:$0xff] %v314_v18  ;;  %317 = vst [vmem:[%s7277_s15 + $0x98] sm:$0xff] %v316_v19  ;;  %v320_v21 = vld [vmem:[%s7272_s14 + $0x1f8] sm:$0xff]  ;;  %v322_v22 = vld [vmem:[%s7272_s14 + $0x200] sm:$0xff] }
  0x1d   : > { %319 = vst [vmem:[%s7277_s15 + $0xa0] sm:$0xff] %v318_v20  ;;  %v324_v23 = vld [vmem:[%s7272_s14 + $0x208] sm:$0xff]  ;;  %321 = vst [vmem:[%s7277_s15 + $0xa8] sm:$0xff] %v320_v21  ;;  %v326_v24 = vld [vmem:[%s7272_s14 + $0x240] sm:$0xff] }
  0x1e   : > { %323 = vst [vmem:[%s7277_s15 + $0xb0] sm:$0xff] %v322_v22  ;;  %325 = vst [vmem:[%s7277_s15 + $0xb8] sm:$0xff] %v324_v23  ;;  %v328_v25 = vld [vmem:[%s7272_s14 + $0x248] sm:$0xff]  ;;  %v330_v26 = vld [vmem:[%s7272_s14 + $0x250] sm:$0xff] }
  0x1f   : > { %327 = vst [vmem:[%s7277_s15 + $0xc0] sm:$0xff] %v326_v24  ;;  %329 = vst [vmem:[%s7277_s15 + $0xc8] sm:$0xff] %v328_v25  ;;  %v332_v27 = vld [vmem:[%s7272_s14 + $0x288] sm:$0xff]  ;;  %v334_v28 = vld [vmem:[%s7272_s14 + $0x290] sm:$0xff] }
  0x20   : > { %331 = vst [vmem:[%s7277_s15 + $0xd0] sm:$0xff] %v330_v26  ;;  %v336_v29 = vld [vmem:[%s7272_s14 + $0x298] sm:$0xff]  ;;  %333 = vst [vmem:[%s7277_s15 + $0xd8] sm:$0xff] %v332_v27  ;;  %v338_v30 = vld [vmem:[%s7272_s14 + $0x2d0] sm:$0xff] }
  0x21   : > { %335 = vst [vmem:[%s7277_s15 + $0xe0] sm:$0xff] %v334_v28  ;;  %337 = vst [vmem:[%s7277_s15 + $0xe8] sm:$0xff] %v336_v29  ;;  %v340_v31 = vld [vmem:[%s7272_s14 + $0x2d8] sm:$0xff]  ;;  %v342_v32 = vld [vmem:[%s7272_s14 + $0x2e0] sm:$0xff] }
  0x22   : > { %339 = vst [vmem:[%s7277_s15 + $0xf0] sm:$0xff] %v338_v30  ;;  %341 = vst [vmem:[%s7277_s15 + $0xf8] sm:$0xff] %v340_v31  ;;  %v344_v33 = vld [vmem:[%s7272_s14 + $0x318] sm:$0xff]  ;;  %v346_v34 = vld [vmem:[%s7272_s14 + $0x320] sm:$0xff] }
  0x23   : > { %343 = vst [vmem:[%s7277_s15 + $0x100] sm:$0xff] %v342_v32  ;;  %v348_v35 = vld [vmem:[%s7272_s14 + $0x328] sm:$0xff]  ;;  %345 = vst [vmem:[%s7277_s15 + $0x108] sm:$0xff] %v344_v33  ;;  %v350_v36 = vld [vmem:[%s7272_s14 + $0x360] sm:$0xff] }
  0x24   : > { %347 = vst [vmem:[%s7277_s15 + $0x110] sm:$0xff] %v346_v34  ;;  %349 = vst [vmem:[%s7277_s15 + $0x118] sm:$0xff] %v348_v35  ;;  %v352_v37 = vld [vmem:[%s7272_s14 + $0x368] sm:$0xff]  ;;  %v354_v38 = vld [vmem:[%s7272_s14 + $0x370] sm:$0xff] }
  0x25   : > { %351 = vst [vmem:[%s7277_s15 + $0x120] sm:$0xff] %v350_v36  ;;  %353 = vst [vmem:[%s7277_s15 + $0x128] sm:$0xff] %v352_v37  ;;  %v356_v39 = vld [vmem:[%s7272_s14 + $0x3a8] sm:$0xff]  ;;  %v358_v40 = vld [vmem:[%s7272_s14 + $0x3b0] sm:$0xff] }
  0x26   : > { %355 = vst [vmem:[%s7277_s15 + $0x130] sm:$0xff] %v354_v38  ;;  %v360_v41 = vld [vmem:[%s7272_s14 + $0x3b8] sm:$0xff]  ;;  %357 = vst [vmem:[%s7277_s15 + $0x138] sm:$0xff] %v356_v39  ;;  %v362_v42 = vld [vmem:[%s7272_s14 + $0x3f0] sm:$0xff] }
  0x27   : > { %359 = vst [vmem:[%s7277_s15 + $0x140] sm:$0xff] %v358_v40  ;;  %361 = vst [vmem:[%s7277_s15 + $0x148] sm:$0xff] %v360_v41  ;;  %v364_v43 = vld [vmem:[%s7272_s14 + $0x3f8] sm:$0xff]  ;;  %v366_v44 = vld [vmem:[%s7272_s14 + $0x400] sm:$0xff] }
  0x28   : > { %363 = vst [vmem:[%s7277_s15 + $0x150] sm:$0xff] %v362_v42  ;;  %365 = vst [vmem:[%s7277_s15 + $0x158] sm:$0xff] %v364_v43  ;;  %v368_v45 = vld [vmem:[%s7272_s14 + $0x438] sm:$0xff]  ;;  %v370_v46 = vld [vmem:[%s7272_s14 + $0x440] sm:$0xff] }
  0x29   : > { %367 = vst [vmem:[%s7277_s15 + $0x160] sm:$0xff] %v366_v44  ;;  %v372_v47 = vld [vmem:[%s7272_s14 + $0x448] sm:$0xff]  ;;  %369 = vst [vmem:[%s7277_s15 + $0x168] sm:$0xff] %v368_v45  ;;  %v374_v48 = vld [vmem:[%s7272_s14 + $0x480] sm:$0xff] }
  0x2a   : > { %371 = vst [vmem:[%s7277_s15 + $0x170] sm:$0xff] %v370_v46  ;;  %373 = vst [vmem:[%s7277_s15 + $0x178] sm:$0xff] %v372_v47  ;;  %v376_v49 = vld [vmem:[%s7272_s14 + $0x488] sm:$0xff]  ;;  %v378_v50 = vld [vmem:[%s7272_s14 + $0x490] sm:$0xff] }
  0x2b   : > { %375 = vst [vmem:[%s7277_s15 + $0x180] sm:$0xff] %v374_v48  ;;  %377 = vst [vmem:[%s7277_s15 + $0x188] sm:$0xff] %v376_v49  ;;  %v380_v51 = vld [vmem:[%s7272_s14 + $0x4c8] sm:$0xff]  ;;  %v382_v52 = vld [vmem:[%s7272_s14 + $0x4d0] sm:$0xff] }
  0x2c   : > { %379 = vst [vmem:[%s7277_s15 + $0x190] sm:$0xff] %v378_v50  ;;  %v384_v53 = vld [vmem:[%s7272_s14 + $0x4d8] sm:$0xff]  ;;  %381 = vst [vmem:[%s7277_s15 + $0x198] sm:$0xff] %v380_v51  ;;  %v386_v54 = vld [vmem:[%s7272_s14 + $0x510] sm:$0xff] }
  0x2d   : > { %383 = vst [vmem:[%s7277_s15 + $0x1a0] sm:$0xff] %v382_v52  ;;  %385 = vst [vmem:[%s7277_s15 + $0x1a8] sm:$0xff] %v384_v53  ;;  %v388_v55 = vld [vmem:[%s7272_s14 + $0x518] sm:$0xff]  ;;  %v390_v56 = vld [vmem:[%s7272_s14 + $0x520] sm:$0xff] }
  0x2e   : > { %387 = vst [vmem:[%s7277_s15 + $0x1b0] sm:$0xff] %v386_v54  ;;  %389 = vst [vmem:[%s7277_s15 + $0x1b8] sm:$0xff] %v388_v55  ;;  %v392_v57 = vld [vmem:[%s7272_s14 + $0x558] sm:$0xff]  ;;  %v394_v58 = vld [vmem:[%s7272_s14 + $0x560] sm:$0xff] }
  0x2f   : > { %391 = vst [vmem:[%s7277_s15 + $0x1c0] sm:$0xff] %v390_v56  ;;  %v396_v59 = vld [vmem:[%s7272_s14 + $0x568] sm:$0xff]  ;;  %393 = vst [vmem:[%s7277_s15 + $0x1c8] sm:$0xff] %v392_v57  ;;  %v398_v60 = vld [vmem:[%s7272_s14 + $0x5a0] sm:$0xff] }
  0x30   : > { %395 = vst [vmem:[%s7277_s15 + $0x1d0] sm:$0xff] %v394_v58  ;;  %397 = vst [vmem:[%s7277_s15 + $0x1d8] sm:$0xff] %v396_v59  ;;  %v400_v61 = vld [vmem:[%s7272_s14 + $0x5a8] sm:$0xff]  ;;  %v402_v62 = vld [vmem:[%s7272_s14 + $0x5b0] sm:$0xff] }
  0x31   : > { %399 = vst [vmem:[%s7277_s15 + $0x1e0] sm:$0xff] %v398_v60  ;;  %401 = vst [vmem:[%s7277_s15 + $0x1e8] sm:$0xff] %v400_v61  ;;  %v404_v63 = vld [vmem:[%s7272_s14 + $0x5e8] sm:$0xff]  ;;  %v406_v0 = vld [vmem:[%s7272_s14 + $0x5f0] sm:$0xff] }
  0x32   : > { %403 = vst [vmem:[%s7277_s15 + $0x1f0] sm:$0xff] %v402_v62  ;;  %v408_v1 = vld [vmem:[%s7272_s14 + $0x5f8] sm:$0xff]  ;;  %405 = vst [vmem:[%s7277_s15 + $0x1f8] sm:$0xff] %v404_v63  ;;  %v410_v2 = vld [vmem:[%s7272_s14 + $0x630] sm:$0xff] }
  0x33   : > { %407 = vst [vmem:[%s7277_s15 + $0x200] sm:$0xff] %v406_v0  ;;  %409 = vst [vmem:[%s7277_s15 + $0x208] sm:$0xff] %v408_v1  ;;  %v412_v3 = vld [vmem:[%s7272_s14 + $0x638] sm:$0xff]  ;;  %v414_v4 = vld [vmem:[%s7272_s14 + $0x640] sm:$0xff] }
  0x34   : > { %411 = vst [vmem:[%s7277_s15 + $0x210] sm:$0xff] %v410_v2  ;;  %413 = vst [vmem:[%s7277_s15 + $0x218] sm:$0xff] %v412_v3  ;;  %v416_v5 = vld [vmem:[%s7272_s14 + $0x678] sm:$0xff]  ;;  %v418_v6 = vld [vmem:[%s7272_s14 + $0x680] sm:$0xff] }
  0x35   : > { %415 = vst [vmem:[%s7277_s15 + $0x220] sm:$0xff] %v414_v4  ;;  %v420_v7 = vld [vmem:[%s7272_s14 + $0x688] sm:$0xff]  ;;  %417 = vst [vmem:[%s7277_s15 + $0x228] sm:$0xff] %v416_v5  ;;  %v422_v8 = vld [vmem:[%s7272_s14 + $0x6c0] sm:$0xff] }
  0x36   : > { %419 = vst [vmem:[%s7277_s15 + $0x230] sm:$0xff] %v418_v6  ;;  %421 = vst [vmem:[%s7277_s15 + $0x238] sm:$0xff] %v420_v7  ;;  %v424_v9 = vld [vmem:[%s7272_s14 + $0x6c8] sm:$0xff]  ;;  %v426_v10 = vld [vmem:[%s7272_s14 + $0x6d0] sm:$0xff] }
  0x37   : > { %423 = vst [vmem:[%s7277_s15 + $0x240] sm:$0xff] %v422_v8  ;;  %425 = vst [vmem:[%s7277_s15 + $0x248] sm:$0xff] %v424_v9  ;;  %v428_v11 = vld [vmem:[%s7272_s14 + $0x708] sm:$0xff]  ;;  %v430_v12 = vld [vmem:[%s7272_s14 + $0x710] sm:$0xff] }
  0x38   : > { %427 = vst [vmem:[%s7277_s15 + $0x250] sm:$0xff] %v426_v10  ;;  %v432_v13 = vld [vmem:[%s7272_s14 + $0x718] sm:$0xff]  ;;  %429 = vst [vmem:[%s7277_s15 + $0x258] sm:$0xff] %v428_v11  ;;  %v434_v14 = vld [vmem:[%s7272_s14 + $0x750] sm:$0xff] }
  0x39   : > { %431 = vst [vmem:[%s7277_s15 + $0x260] sm:$0xff] %v430_v12  ;;  %433 = vst [vmem:[%s7277_s15 + $0x268] sm:$0xff] %v432_v13  ;;  %v436_v15 = vld [vmem:[%s7272_s14 + $0x758] sm:$0xff]  ;;  %v438_v16 = vld [vmem:[%s7272_s14 + $0x760] sm:$0xff] }
  0x3a   : > { %435 = vst [vmem:[%s7277_s15 + $0x270] sm:$0xff] %v434_v14  ;;  %437 = vst [vmem:[%s7277_s15 + $0x278] sm:$0xff] %v436_v15  ;;  %v440_v17 = vld [vmem:[%s7272_s14 + $0x798] sm:$0xff]  ;;  %v442_v18 = vld [vmem:[%s7272_s14 + $0x7a0] sm:$0xff] }
  0x3b   : > { %439 = vst [vmem:[%s7277_s15 + $0x280] sm:$0xff] %v438_v16  ;;  %v444_v19 = vld [vmem:[%s7272_s14 + $0x7a8] sm:$0xff]  ;;  %441 = vst [vmem:[%s7277_s15 + $0x288] sm:$0xff] %v440_v17  ;;  %v446_v20 = vld [vmem:[%s7272_s14 + $0x7e0] sm:$0xff] }
  0x3c   : > { %443 = vst [vmem:[%s7277_s15 + $0x290] sm:$0xff] %v442_v18  ;;  %445 = vst [vmem:[%s7277_s15 + $0x298] sm:$0xff] %v444_v19  ;;  %v448_v21 = vld [vmem:[%s7272_s14 + $0x7e8] sm:$0xff]  ;;  %v450_v22 = vld [vmem:[%s7272_s14 + $0x7f0] sm:$0xff] }
  0x3d   : > { %447 = vst [vmem:[%s7277_s15 + $0x2a0] sm:$0xff] %v446_v20  ;;  %449 = vst [vmem:[%s7277_s15 + $0x2a8] sm:$0xff] %v448_v21  ;;  %v452_v23 = vld [vmem:[%s7272_s14 + $0x828] sm:$0xff]  ;;  %v454_v24 = vld [vmem:[%s7272_s14 + $0x830] sm:$0xff] }
  0x3e   : > { %451 = vst [vmem:[%s7277_s15 + $0x2b0] sm:$0xff] %v450_v22  ;;  %v456_v25 = vld [vmem:[%s7272_s14 + $0x838] sm:$0xff]  ;;  %453 = vst [vmem:[%s7277_s15 + $0x2b8] sm:$0xff] %v452_v23  ;;  %v458_v26 = vld [vmem:[%s7272_s14 + $0x870] sm:$0xff] }
  0x3f   : > { %455 = vst [vmem:[%s7277_s15 + $0x2c0] sm:$0xff] %v454_v24  ;;  %457 = vst [vmem:[%s7277_s15 + $0x2c8] sm:$0xff] %v456_v25  ;;  %v460_v27 = vld [vmem:[%s7272_s14 + $0x878] sm:$0xff]  ;;  %v462_v28 = vld [vmem:[%s7272_s14 + $0x880] sm:$0xff] }
  0x40   : > { %459 = vst [vmem:[%s7277_s15 + $0x2d0] sm:$0xff] %v458_v26  ;;  %461 = vst [vmem:[%s7277_s15 + $0x2d8] sm:$0xff] %v460_v27  ;;  %v464_v29 = vld [vmem:[%s7272_s14 + $0x8b8] sm:$0xff]  ;;  %v466_v30 = vld [vmem:[%s7272_s14 + $0x8c0] sm:$0xff] }
  0x41   : > { %463 = vst [vmem:[%s7277_s15 + $0x2e0] sm:$0xff] %v462_v28  ;;  %v468_v31 = vld [vmem:[%s7272_s14 + $0x8c8] sm:$0xff]  ;;  %465 = vst [vmem:[%s7277_s15 + $0x2e8] sm:$0xff] %v464_v29  ;;  %v470_v32 = vld [vmem:[%s7272_s14 + $0x900] sm:$0xff] }
  0x42   : > { %467 = vst [vmem:[%s7277_s15 + $0x2f0] sm:$0xff] %v466_v30  ;;  %469 = vst [vmem:[%s7277_s15 + $0x2f8] sm:$0xff] %v468_v31  ;;  %v472_v33 = vld [vmem:[%s7272_s14 + $0x908] sm:$0xff]  ;;  %v474_v34 = vld [vmem:[%s7272_s14 + $0x910] sm:$0xff] }
  0x43   : > { %471 = vst [vmem:[%s7277_s15 + $0x300] sm:$0xff] %v470_v32  ;;  %473 = vst [vmem:[%s7277_s15 + $0x308] sm:$0xff] %v472_v33  ;;  %v476_v35 = vld [vmem:[%s7272_s14 + $0x948] sm:$0xff]  ;;  %v478_v36 = vld [vmem:[%s7272_s14 + $0x950] sm:$0xff] }
  0x44   : > { %475 = vst [vmem:[%s7277_s15 + $0x310] sm:$0xff] %v474_v34  ;;  %v480_v37 = vld [vmem:[%s7272_s14 + $0x958] sm:$0xff]  ;;  %477 = vst [vmem:[%s7277_s15 + $0x318] sm:$0xff] %v476_v35  ;;  %v482_v38 = vld [vmem:[%s7272_s14 + $0x990] sm:$0xff] }
  0x45   : > { %479 = vst [vmem:[%s7277_s15 + $0x320] sm:$0xff] %v478_v36  ;;  %481 = vst [vmem:[%s7277_s15 + $0x328] sm:$0xff] %v480_v37  ;;  %v484_v39 = vld [vmem:[%s7272_s14 + $0x998] sm:$0xff]  ;;  %v486_v40 = vld [vmem:[%s7272_s14 + $0x9a0] sm:$0xff] }
  0x46   : > { %483 = vst [vmem:[%s7277_s15 + $0x330] sm:$0xff] %v482_v38  ;;  %485 = vst [vmem:[%s7277_s15 + $0x338] sm:$0xff] %v484_v39  ;;  %v488_v41 = vld [vmem:[%s7272_s14 + $0x9d8] sm:$0xff]  ;;  %v490_v42 = vld [vmem:[%s7272_s14 + $0x9e0] sm:$0xff] }
  0x47   : > { %487 = vst [vmem:[%s7277_s15 + $0x340] sm:$0xff] %v486_v40  ;;  %v492_v43 = vld [vmem:[%s7272_s14 + $0x9e8] sm:$0xff]  ;;  %489 = vst [vmem:[%s7277_s15 + $0x348] sm:$0xff] %v488_v41  ;;  %v494_v44 = vld [vmem:[%s7272_s14 + $0xa20] sm:$0xff] }
  0x48   : > { %491 = vst [vmem:[%s7277_s15 + $0x350] sm:$0xff] %v490_v42  ;;  %493 = vst [vmem:[%s7277_s15 + $0x358] sm:$0xff] %v492_v43  ;;  %v496_v45 = vld [vmem:[%s7272_s14 + $0xa28] sm:$0xff]  ;;  %v498_v46 = vld [vmem:[%s7272_s14 + $0xa30] sm:$0xff] }
  0x49   : > { %495 = vst [vmem:[%s7277_s15 + $0x360] sm:$0xff] %v494_v44  ;;  %497 = vst [vmem:[%s7277_s15 + $0x368] sm:$0xff] %v496_v45  ;;  %v500_v47 = vld [vmem:[%s7272_s14 + $0xa68] sm:$0xff]  ;;  %v502_v48 = vld [vmem:[%s7272_s14 + $0xa70] sm:$0xff] }
  0x4a   : > { %499 = vst [vmem:[%s7277_s15 + $0x370] sm:$0xff] %v498_v46  ;;  %v504_v49 = vld [vmem:[%s7272_s14 + $0xa78] sm:$0xff]  ;;  %501 = vst [vmem:[%s7277_s15 + $0x378] sm:$0xff] %v500_v47  ;;  %v506_v50 = vld [vmem:[%s7272_s14 + $0xab0] sm:$0xff] }
  0x4b   : > { %503 = vst [vmem:[%s7277_s15 + $0x380] sm:$0xff] %v502_v48  ;;  %505 = vst [vmem:[%s7277_s15 + $0x388] sm:$0xff] %v504_v49  ;;  %v508_v51 = vld [vmem:[%s7272_s14 + $0xab8] sm:$0xff]  ;;  %v510_v52 = vld [vmem:[%s7272_s14 + $0xac0] sm:$0xff] }
  0x4c   : > { %507 = vst [vmem:[%s7277_s15 + $0x390] sm:$0xff] %v506_v50  ;;  %509 = vst [vmem:[%s7277_s15 + $0x398] sm:$0xff] %v508_v51  ;;  %v512_v53 = vld [vmem:[%s7272_s14 + $0xaf8] sm:$0xff]  ;;  %v514_v54 = vld [vmem:[%s7272_s14 + $0xb00] sm:$0xff] }
  0x4d   : > { %511 = vst [vmem:[%s7277_s15 + $0x3a0] sm:$0xff] %v510_v52  ;;  %v516_v55 = vld [vmem:[%s7272_s14 + $0xb08] sm:$0xff]  ;;  %513 = vst [vmem:[%s7277_s15 + $0x3a8] sm:$0xff] %v512_v53  ;;  %v518_v56 = vld [vmem:[%s7272_s14 + $0xb40] sm:$0xff] }
  0x4e   : > { %515 = vst [vmem:[%s7277_s15 + $0x3b0] sm:$0xff] %v514_v54  ;;  %517 = vst [vmem:[%s7277_s15 + $0x3b8] sm:$0xff] %v516_v55  ;;  %v520_v57 = vld [vmem:[%s7272_s14 + $0xb48] sm:$0xff]  ;;  %v522_v58 = vld [vmem:[%s7272_s14 + $0xb50] sm:$0xff] }
  0x4f   : > { %519 = vst [vmem:[%s7277_s15 + $0x3c0] sm:$0xff] %v518_v56  ;;  %521 = vst [vmem:[%s7277_s15 + $0x3c8] sm:$0xff] %v520_v57  ;;  %v524_v59 = vld [vmem:[%s7272_s14 + $0xb88] sm:$0xff]  ;;  %v526_v60 = vld [vmem:[%s7272_s14 + $0xb90] sm:$0xff] }
  0x50   : > { %523 = vst [vmem:[%s7277_s15 + $0x3d0] sm:$0xff] %v522_v58  ;;  %v528_v61 = vld [vmem:[%s7272_s14 + $0xb98] sm:$0xff]  ;;  %525 = vst [vmem:[%s7277_s15 + $0x3d8] sm:$0xff] %v524_v59  ;;  %v530_v62 = vld [vmem:[%s7272_s14 + $0xbd0] sm:$0xff] }
  0x51   : > { %527 = vst [vmem:[%s7277_s15 + $0x3e0] sm:$0xff] %v526_v60  ;;  %529 = vst [vmem:[%s7277_s15 + $0x3e8] sm:$0xff] %v528_v61  ;;  %v532_v63 = vld [vmem:[%s7272_s14 + $0xbd8] sm:$0xff]  ;;  %v534_v0 = vld [vmem:[%s7272_s14 + $0xbe0] sm:$0xff] }
  0x52   : > { %531 = vst [vmem:[%s7277_s15 + $0x3f0] sm:$0xff] %v530_v62  ;;  %533 = vst [vmem:[%s7277_s15 + $0x3f8] sm:$0xff] %v532_v63  ;;  %v536_v1 = vld [vmem:[%s7272_s14 + $0xc18] sm:$0xff]  ;;  %v538_v2 = vld [vmem:[%s7272_s14 + $0xc20] sm:$0xff] }
  0x53   : > { %535 = vst [vmem:[%s7277_s15 + $0x400] sm:$0xff] %v534_v0  ;;  %v540_v3 = vld [vmem:[%s7272_s14 + $0xc28] sm:$0xff]  ;;  %537 = vst [vmem:[%s7277_s15 + $0x408] sm:$0xff] %v536_v1  ;;  %v542_v4 = vld [vmem:[%s7272_s14 + $0xc60] sm:$0xff] }
  0x54   : > { %539 = vst [vmem:[%s7277_s15 + $0x410] sm:$0xff] %v538_v2  ;;  %541 = vst [vmem:[%s7277_s15 + $0x418] sm:$0xff] %v540_v3  ;;  %v544_v5 = vld [vmem:[%s7272_s14 + $0xc68] sm:$0xff]  ;;  %v546_v6 = vld [vmem:[%s7272_s14 + $0xc70] sm:$0xff] }
  0x55   : > { %543 = vst [vmem:[%s7277_s15 + $0x420] sm:$0xff] %v542_v4  ;;  %545 = vst [vmem:[%s7277_s15 + $0x428] sm:$0xff] %v544_v5  ;;  %v548_v7 = vld [vmem:[%s7272_s14 + $0xca8] sm:$0xff]  ;;  %v550_v8 = vld [vmem:[%s7272_s14 + $0xcb0] sm:$0xff] }
  0x56   : > { %547 = vst [vmem:[%s7277_s15 + $0x430] sm:$0xff] %v546_v6  ;;  %v552_v9 = vld [vmem:[%s7272_s14 + $0xcb8] sm:$0xff]  ;;  %549 = vst [vmem:[%s7277_s15 + $0x438] sm:$0xff] %v548_v7  ;;  %v554_v10 = vld [vmem:[%s7272_s14 + $0xcf0] sm:$0xff] }
  0x57   : > { %551 = vst [vmem:[%s7277_s15 + $0x440] sm:$0xff] %v550_v8  ;;  %553 = vst [vmem:[%s7277_s15 + $0x448] sm:$0xff] %v552_v9  ;;  %v556_v11 = vld [vmem:[%s7272_s14 + $0xcf8] sm:$0xff]  ;;  %v558_v12 = vld [vmem:[%s7272_s14 + $0xd00] sm:$0xff] }
  0x58   : > { %555 = vst [vmem:[%s7277_s15 + $0x450] sm:$0xff] %v554_v10  ;;  %557 = vst [vmem:[%s7277_s15 + $0x458] sm:$0xff] %v556_v11  ;;  %v560_v13 = vld [vmem:[%s7272_s14 + $0xd38] sm:$0xff]  ;;  %v562_v14 = vld [vmem:[%s7272_s14 + $0xd40] sm:$0xff] }
  0x59   : > { %559 = vst [vmem:[%s7277_s15 + $0x460] sm:$0xff] %v558_v12  ;;  %v564_v15 = vld [vmem:[%s7272_s14 + $0xd48] sm:$0xff]  ;;  %561 = vst [vmem:[%s7277_s15 + $0x468] sm:$0xff] %v560_v13 }
  0x5a   : > { %563 = vst [vmem:[%s7277_s15 + $0x470] sm:$0xff] %v562_v14  ;;  %565 = vst [vmem:[%s7277_s15 + $0x478] sm:$0xff] %v564_v15 }
  0x5b PF: > { %p5918_p5 = scmp.ge.s32.totalorder %s7191_s26, 1  ;;  %p570_p6 = scmp.lt.s32.totalorder %s7191_s26, 4 }
  0x5d   : > { %p571_p7 = pnand %p5918_p5, %p570_p6 }
  0x5f   : > { %574 = sbr.rel (%p571_p7) target bundleno = 1675 (0x68b), region = 67 }
  0x66   : > { %s577_s16 = sand.u32 1, %s7183_s24   ;;  %s618_s17 = smul.u32 96, %s7252_s27 }
  0x67   : > { %s6440_s18 = smul.u32 1152, %s577_s16  ;;  %p5922_p9 = scmp.ne.s32.totalorder %s7252_s27, 0 }
  0x68   : > { %p619_p8 = scmp.lt.s32.totalorder %s618_s17, 287  ;;  %vm642_vm0 = vcmask (!%p5922_p9), 400384   ;;  %v7193_v16 = vmov (!%p5922_p9), 0.0  }
  0x69   : > { %s7583_s11 = scalar_lea.vmem [#allocation3], %s6440_s18  ;;  %641 = sbr.rel (%p5922_p9) target bundleno = 129 (0x81), region = 75  ;;  %643 = vst.msk [vmem:[#allocation2] sm:$0xff] (!%p5922_p9), %vm642_vm0, %v7193_v16  ;;  %644 = vst.msk [vmem:[#allocation2 + $0x8] sm:$0xff] (!%p5922_p9), %vm642_vm0, %v7193_v16 }
  0x6a   : > { %s10461_s17 = smov (!%p619_p8, %s618_s17), 287  ;;  %645 = vst.msk [vmem:[#allocation2 + $0x10] sm:$0xff] (!%p5922_p9), %vm642_vm0, %v7193_v16  ;;  %646 = vst.msk [vmem:[#allocation2 + $0x18] sm:$0xff] (!%p5922_p9), %vm642_vm0, %v7193_v16 }
  0x6b   : > { %s5919_s19 = sshll.u32 %s10461_s17, 2  ;;  %s5920_s20 = sshll.u32 %s10461_s17, 3  ;;  %647 = vst.msk [vmem:[#allocation2 + $0x20] sm:$0xff] (!%p5922_p9), %vm642_vm0, %v7193_v16  ;;  %648 = vst.msk [vmem:[#allocation2 + $0x28] sm:$0xff] (!%p5922_p9), %vm642_vm0, %v7193_v16 }
  0x6c   : > { %s7571_s23 = scalar_lea.vmem %s10250_s1, %s5919_s19  ;;  %s7576_s26 = scalar_lea.vmem %s10251_s2, %s5920_s20  ;;  %649 = vst.msk [vmem:[#allocation2 + $0x30] sm:$0xff] (!%p5922_p9), %vm642_vm0, %v7193_v16  ;;  %650 = vst.msk [vmem:[#allocation2 + $0x38] sm:$0xff] (!%p5922_p9), %vm642_vm0, %v7193_v16 }
  0x6d   : > { %s7581_s24 = scalar_lea.vmem %s10252_s3, %s5920_s20  ;;  %651 = vst.msk [vmem:[#allocation2 + $0x40] sm:$0xff] (!%p5922_p9), %vm642_vm0, %v7193_v16  ;;  %652 = vst.msk [vmem:[#allocation2 + $0x48] sm:$0xff] (!%p5922_p9), %vm642_vm0, %v7193_v16 }
  0x6e   : > { %653 = vst.msk [vmem:[#allocation2 + $0x50] sm:$0xff] (!%p5922_p9), %vm642_vm0, %v7193_v16  ;;  %654 = vst.msk [vmem:[#allocation2 + $0x58] sm:$0xff] (!%p5922_p9), %vm642_vm0, %v7193_v16 }
  0x6f   : > { %655 = vst.msk [vmem:[#allocation2 + $0x60] sm:$0xff] (!%p5922_p9), %vm642_vm0, %v7193_v16  ;;  %656 = vst.msk [vmem:[#allocation2 + $0x68] sm:$0xff] (!%p5922_p9), %vm642_vm0, %v7193_v16 }
  0x70   : > { %657 = vst.msk [vmem:[#allocation2 + $0x70] sm:$0xff] %vm642_vm0, %v7193_v16  ;;  %658 = vst.msk [vmem:[#allocation2 + $0x78] sm:$0xff] %vm642_vm0, %v7193_v16 }
  0x71   : > { %659 = vst.msk [vmem:[#allocation2 + $0x80] sm:$0xff] %vm642_vm0, %v7193_v16  ;;  %660 = vst.msk [vmem:[#allocation2 + $0x88] sm:$0xff] %vm642_vm0, %v7193_v16 }
  0x72   : > { %661 = vst.msk [vmem:[#allocation2 + $0x90] sm:$0xff] %vm642_vm0, %v7193_v16  ;;  %662 = vst.msk [vmem:[#allocation2 + $0x98] sm:$0xff] %vm642_vm0, %v7193_v16 }
  0x73   : > { %663 = vst.msk [vmem:[#allocation2 + $0xa0] sm:$0xff] %vm642_vm0, %v7193_v16  ;;  %664 = vst.msk [vmem:[#allocation2 + $0xa8] sm:$0xff] %vm642_vm0, %v7193_v16 }
  0x74   : > { %665 = vst.msk [vmem:[#allocation2 + $0xb0] sm:$0xff] %vm642_vm0, %v7193_v16  ;;  %666 = vst.msk [vmem:[#allocation2 + $0xb8] sm:$0xff] %vm642_vm0, %v7193_v16 }
  0x75   : > { %667 = vst.msk [vmem:[#allocation2 + $0xc0] sm:$0xff] %vm642_vm0, %v7193_v16  ;;  %668 = vst.msk [vmem:[#allocation2 + $0xc8] sm:$0xff] %vm642_vm0, %v7193_v16 }
  0x76   : > { %669 = vst.msk [vmem:[#allocation2 + $0xd0] sm:$0xff] %vm642_vm0, %v7193_v16  ;;  %670 = vst.msk [vmem:[#allocation2 + $0xd8] sm:$0xff] %vm642_vm0, %v7193_v16 }
  0x77   : > { %671 = vst.msk [vmem:[#allocation2 + $0xe0] sm:$0xff] %vm642_vm0, %v7193_v16  ;;  %672 = vst.msk [vmem:[#allocation2 + $0xe8] sm:$0xff] %vm642_vm0, %v7193_v16 }
  0x78   : > { %673 = vst.msk [vmem:[#allocation2 + $0xf0] sm:$0xff] %vm642_vm0, %v7193_v16  ;;  %674 = vst.msk [vmem:[#allocation2 + $0xf8] sm:$0xff] %vm642_vm0, %v7193_v16 }
  0x79   : > { %675 = vst.msk [vmem:[#allocation2 + $0x100] sm:$0xff] %vm642_vm0, %v7193_v16  ;;  %676 = vst.msk [vmem:[#allocation2 + $0x108] sm:$0xff] %vm642_vm0, %v7193_v16 }
  0x7a   : > { %677 = vst.msk [vmem:[#allocation2 + $0x110] sm:$0xff] %vm642_vm0, %v7193_v16  ;;  %678 = vst.msk [vmem:[#allocation2 + $0x118] sm:$0xff] %vm642_vm0, %v7193_v16 }
  0x7b   : > { %679 = vst.msk [vmem:[#allocation2 + $0x120] sm:$0xff] %vm642_vm0, %v7193_v16  ;;  %680 = vst.msk [vmem:[#allocation2 + $0x128] sm:$0xff] %vm642_vm0, %v7193_v16 }
  0x7c   : > { %681 = vst.msk [vmem:[#allocation2 + $0x130] sm:$0xff] %vm642_vm0, %v7193_v16  ;;  %682 = vst.msk [vmem:[#allocation2 + $0x138] sm:$0xff] %vm642_vm0, %v7193_v16 }
  0x7d   : > { %683 = vst.msk [vmem:[#allocation2 + $0x140] sm:$0xff] %vm642_vm0, %v7193_v16  ;;  %684 = vst.msk [vmem:[#allocation2 + $0x148] sm:$0xff] %vm642_vm0, %v7193_v16 }
  0x7e   : > { %685 = vst.msk [vmem:[#allocation2 + $0x150] sm:$0xff] %vm642_vm0, %v7193_v16  ;;  %686 = vst.msk [vmem:[#allocation2 + $0x158] sm:$0xff] %vm642_vm0, %v7193_v16 }
  0x7f   : > { %687 = vst.msk [vmem:[#allocation2 + $0x160] sm:$0xff] %vm642_vm0, %v7193_v16  ;;  %688 = vst.msk [vmem:[#allocation2 + $0x168] sm:$0xff] %vm642_vm0, %v7193_v16 }
  0x80   : > { %689 = vst.msk [vmem:[#allocation2 + $0x170] sm:$0xff] %vm642_vm0, %v7193_v16  ;;  %690 = vst.msk [vmem:[#allocation2 + $0x178] sm:$0xff] %vm642_vm0, %v7193_v16 }
  0x81 PF: > { %v6360_v17 = vld [vmem:[%s7571_s23 + $0x8] sm:$0xff]   ;;  %v7638_v18 = vld [vmem:[%s10249_s0] ss:$0 sm:$0xff]  ;;  %v6361_v24 = vld [vmem:[%s7571_s23 + $0x10] sm:$0xff]   ;;  %vm986_vm1 = vcmask 785408   ;;  %vm4398_vm2 = vcmask 400384  }
  0x82   : > { %v6169_v19 = vld [vmem:[%s7571_s23] sm:$0xff]   ;;  %v6174_v20 = vunpack.c.l.bf16 %v6360_v17  ;;  %v6175_v22 = vunpack.c.h.bf16 %v6360_v17  ;;  %v6179_v25 = vunpack.c.h.bf16 %v6361_v24  ;;  %v6178_v26 = vunpack.c.l.bf16 %v6361_v24  ;;  %v6362_v31 = vld [vmem:[%s7571_s23 + $0x18] sm:$0xff]   ;;  %v6364_v47 = vld [vmem:[%s7571_s23 + $0x28] sm:$0xff]   ;;  %p6164_p10 = scmp.ne.s32.totalorder %s7252_s27, 2 }
  0x83   : > { %v6170_v21 = vunpack.c.l.bf16 %v6169_v19  ;;  %v6171_v23 = vunpack.c.h.bf16 %v6169_v19  ;;  %v6183_v34 = vunpack.c.h.bf16 %v6362_v31  ;;  %v6182_v35 = vunpack.c.l.bf16 %v6362_v31  ;;  %v6363_v40 = vld [vmem:[%s7571_s23 + $0x20] sm:$0xff]   ;;  %v6365_v50 = vld [vmem:[%s7571_s23 + $0x30] sm:$0xff]   ;;  %v6366_v57 = vld [vmem:[%s7571_s23 + $0x38] sm:$0xff]  }
  0x84   : > { %v892_v27 = vmul.f32 %v6174_v20, %v7638_v18  ;;  %v893_v29 = vmul.f32 %v6175_v22, %v7638_v18  ;;  %v895_v38 = vmul.f32 %v6179_v25, %v7638_v18  ;;  %v894_v39 = vmul.f32 %v6178_v26, %v7638_v18  ;;  %v6367_v4 = vld [vmem:[%s7571_s23 + $0x40] sm:$0xff]   ;;  %v6368_v11 = vld [vmem:[%s7571_s23 + $0x48] sm:$0xff]   ;;  %v6369_v19 = vld [vmem:[%s7571_s23 + $0x50] sm:$0xff]  }
  0x85   : > { %v890_v28 = vmul.f32 %v6170_v21, %v7638_v18  ;;  %v891_v30 = vmul.f32 %v6171_v23, %v7638_v18  ;;  %v897_v41 = vmul.f32 %v6183_v34, %v7638_v18  ;;  %v896_v42 = vmul.f32 %v6182_v35, %v7638_v18  ;;  %v6370_v26 = vld [vmem:[%s7571_s23 + $0x58] sm:$0xff]  }
  0x86   : > { %v993_v32 = vsel %vm986_vm1, %v892_v27, 0.0  ;;  %v996_v36 = vsel %vm986_vm1, %v893_v29, 0.0  ;;  %v1002_v43 = vsel %vm986_vm1, %v895_v38, 0.0  ;;  %v999_v44 = vsel %vm986_vm1, %v894_v39, 0.0 }
  0x87   : > { %v987_v33 = vsel %vm986_vm1, %v890_v28, 0.0  ;;  %994 = vadd.xlane.f32.xlu1 %v993_v32  ;;  %v990_v37 = vsel %vm986_vm1, %v891_v30, 0.0  ;;  %v6187_v45 = vunpack.c.h.bf16 %v6363_v40  ;;  %v6186_v46 = vunpack.c.l.bf16 %v6363_v40  ;;  %v6372_v40 = vld [vmem:[%s7571_s23 + $0x68] sm:$0xff]  }
  0x88   : > { %988 = vadd.xlane.f32.xlu0 %v987_v33  ;;  %v1008_v48 = vsel %vm986_vm1, %v897_v41, 0.0  ;;  %v1005_v49 = vsel %vm986_vm1, %v896_v42, 0.0  ;;  %v6191_v53 = vunpack.c.h.bf16 %v6364_v47  ;;  %v6190_v54 = vunpack.c.l.bf16 %v6364_v47  ;;  %v6371_v33 = vld [vmem:[%s7571_s23 + $0x60] sm:$0xff]   ;;  %v6373_v47 = vld [vmem:[%s7571_s23 + $0x70] sm:$0xff]  }
  0x89   : > { %v899_v51 = vmul.f32 %v6187_v45, %v7638_v18  ;;  %v898_v52 = vmul.f32 %v6186_v46, %v7638_v18  ;;  %v6195_v55 = vunpack.c.h.bf16 %v6365_v50  ;;  %v6194_v56 = vunpack.c.l.bf16 %v6365_v50 }
  0x8a   : > { %v901_v60 = vmul.f32 %v6191_v53, %v7638_v18  ;;  %v900_v61 = vmul.f32 %v6190_v54, %v7638_v18  ;;  %v6199_v62 = vunpack.c.h.bf16 %v6366_v57  ;;  %v6198_v63 = vunpack.c.l.bf16 %v6366_v57  ;;  %v6374_v54 = vld [vmem:[%s7571_s23 + $0x78] sm:$0xff]  }
  0x8b   : > { %997 = vadd.xlane.f32.xlu1 %v996_v36  ;;  %v1014_v58 = vsel %vm986_vm1, %v899_v51, 0.0  ;;  %v1011_v59 = vsel %vm986_vm1, %v898_v52, 0.0  ;;  %v903_v2 = vmul.f32 %v6195_v55, %v7638_v18  ;;  %v902_v3 = vmul.f32 %v6194_v56, %v7638_v18 }
  0x8c   : > { %991 = vadd.xlane.f32.xlu0 %v990_v37  ;;  %v1020_v0 = vsel %vm986_vm1, %v901_v60, 0.0  ;;  %v1017_v1 = vsel %vm986_vm1, %v900_v61, 0.0  ;;  %v905_v5 = vmul.f32 %v6199_v62, %v7638_v18  ;;  %v6203_v6 = vunpack.c.h.bf16 %v6367_v4  ;;  %v6375_v61 = vld [vmem:[%s7571_s23 + $0x80] sm:$0xff]  }
  0x8d   : > { %v1026_v7 = vsel %vm986_vm1, %v903_v2, 0.0  ;;  %v1023_v8 = vsel %vm986_vm1, %v902_v3, 0.0  ;;  %v904_v9 = vmul.f32 %v6198_v63, %v7638_v18  ;;  %v6202_v10 = vunpack.c.l.bf16 %v6367_v4  ;;  %v6391_v4 = vld [vmem:[%s7571_s23 + $0x100] sm:$0xff]  }
  0x8e   : > { %v1032_v12 = vsel %vm986_vm1, %v905_v5, 0.0  ;;  %v907_v13 = vmul.f32 %v6203_v6, %v7638_v18  ;;  %v6207_v16 = vunpack.c.h.bf16 %v6368_v11  ;;  %v6206_v17 = vunpack.c.l.bf16 %v6368_v11  ;;  %v6376_v5 = vld [vmem:[%s7571_s23 + $0x88] sm:$0xff]  }
  0x8f   : > { %1003 = vadd.xlane.f32.xlu1 %v1002_v43  ;;  %v1029_v14 = vsel %vm986_vm1, %v904_v9, 0.0  ;;  %v906_v15 = vmul.f32 %v6202_v10, %v7638_v18  ;;  %v6211_v20 = vunpack.c.h.bf16 %v6369_v19  ;;  %v6210_v21 = vunpack.c.l.bf16 %v6369_v19 }
  0x90   : > { %1000 = vadd.xlane.f32.xlu0 %v999_v44  ;;  %v1038_v22 = vsel %vm986_vm1, %v907_v13, 0.0  ;;  %v909_v24 = vmul.f32 %v6207_v16, %v7638_v18  ;;  %v908_v25 = vmul.f32 %v6206_v17, %v7638_v18  ;;  %v6215_v28 = vunpack.c.h.bf16 %v6370_v26 }
  0x91   : > { %v1035_v23 = vsel %vm986_vm1, %v906_v15, 0.0  ;;  %v911_v27 = vmul.f32 %v6211_v20, %v7638_v18  ;;  %v910_v31 = vmul.f32 %v6210_v21, %v7638_v18  ;;  %v6214_v32 = vunpack.c.l.bf16 %v6370_v26  ;;  %v6377_v20 = vld [vmem:[%s7571_s23 + $0x90] sm:$0xff]  }
  0x92   : > { %v1044_v29 = vsel %vm986_vm1, %v909_v24, 0.0  ;;  %v1041_v30 = vsel %vm986_vm1, %v908_v25, 0.0  ;;  %v913_v34 = vmul.f32 %v6215_v28, %v7638_v18  ;;  %v6219_v35 = vunpack.c.h.bf16 %v6371_v33 }
  0x93   : > { %1009 = vadd.xlane.f32.xlu1 %v1008_v48  ;;  %v1050_v36 = vsel %vm986_vm1, %v911_v27, 0.0  ;;  %v1047_v37 = vsel %vm986_vm1, %v910_v31, 0.0  ;;  %v912_v38 = vmul.f32 %v6214_v32, %v7638_v18  ;;  %v6218_v39 = vunpack.c.l.bf16 %v6371_v33  ;;  %v6393_v27 = vld [vmem:[%s7571_s23 + $0x110] sm:$0xff]  }
  0x94   : > { %1006 = vadd.xlane.f32.xlu0 %v1005_v49  ;;  %v1056_v41 = vsel %vm986_vm1, %v913_v34, 0.0  ;;  %v915_v42 = vmul.f32 %v6219_v35, %v7638_v18  ;;  %v6223_v45 = vunpack.c.h.bf16 %v6372_v40  ;;  %v6222_v46 = vunpack.c.l.bf16 %v6372_v40  ;;  %v6394_v34 = vld [vmem:[%s7571_s23 + $0x118] sm:$0xff]  }
  0x95   : > { %v1053_v43 = vsel %vm986_vm1, %v912_v38, 0.0  ;;  %v914_v44 = vmul.f32 %v6218_v39, %v7638_v18  ;;  %v6227_v48 = vunpack.c.h.bf16 %v6373_v47  ;;  %v6226_v49 = vunpack.c.l.bf16 %v6373_v47 }
  0x96   : > { %v1062_v50 = vsel %vm986_vm1, %v915_v42, 0.0  ;;  %v917_v52 = vmul.f32 %v6223_v45, %v7638_v18  ;;  %v916_v53 = vmul.f32 %v6222_v46, %v7638_v18  ;;  %v6231_v56 = vunpack.c.h.bf16 %v6374_v54  ;;  %v7747_v42 = vld [vmem:[%s7571_s23 + $0x120] sm:$0xff]  }
  0x97   : > { %1015 = vadd.xlane.f32.xlu1 %v1014_v58  ;;  %v1059_v51 = vsel %vm986_vm1, %v914_v44, 0.0  ;;  %v919_v55 = vmul.f32 %v6227_v48, %v7638_v18  ;;  %v6230_v60 = vunpack.c.l.bf16 %v6374_v54  ;;  %v6235_v63 = vunpack.c.h.bf16 %v6375_v61 }
  0x98   : > { %1012 = vadd.xlane.f32.xlu0 %v1011_v59  ;;  %v1068_v57 = vsel %vm986_vm1, %v917_v52, 0.0  ;;  %v1065_v58 = vsel %vm986_vm1, %v916_v53, 0.0  ;;  %v918_v59 = vmul.f32 %v6226_v49, %v7638_v18  ;;  %v921_v62 = vmul.f32 %v6231_v56, %v7638_v18  ;;  %v6378_v49 = vld [vmem:[%s7571_s23 + $0x98] sm:$0xff]  }
  0x99   : > { %v920_v2 = vmul.f32 %v6230_v60, %v7638_v18  ;;  %v6234_v3 = vunpack.c.l.bf16 %v6375_v61  ;;  %v6299_v10 = vunpack.c.h.bf16 %v6391_v4  ;;  %v6298_v11 = vunpack.c.l.bf16 %v6391_v4 }
  0x9a   : > { %v1080_v6 = vsel %vm986_vm1, %v921_v62, 0.0  ;;  %v6239_v13 = vunpack.c.h.bf16 %v6376_v5  ;;  %v6307_v33 = vunpack.c.h.bf16 %v6393_v27  ;;  %v7194_v35 = vmov 0  }
  0x9b   : > { %1021 = vadd.xlane.f32.xlu1 %v1020_v0  ;;  %v1074_v0 = vsel %vm986_vm1, %v919_v55, 0.0  ;;  %v922_v9 = vmul.f32 %v6234_v3, %v7638_v18  ;;  %v955_v17 = vmul.f32 %v6299_v10, %v7638_v18  ;;  %v954_v19 = vmul.f32 %v6298_v11, %v7638_v18  ;;  %6469 = vset.pattern.permute.xlu0 %v7194_v35 }
  0x9c   : > { %1018 = vadd.xlane.f32.xlu0 %v1017_v1  ;;  %v1071_v1 = vsel %vm986_vm1, %v918_v59, 0.0  ;;  %v925_v21 = vmul.f32 %v6239_v13, %v7638_v18  ;;  %6468 = vset.pattern.permute.xlu1 %v7194_v35  ;;  %v959_v39 = vmul.f32 %v6307_v33, %v7638_v18  ;;  %v6243_v40 = vunpack.c.h.bf16 %v6377_v20 }
  0x9d   : > { %v1083_v16 = vsel %vm986_vm1, %v922_v9, 0.0  ;;  %v1179_v24 = vsel %vm986_vm1, %v954_v19, 0.0  ;;  %3675 = vmatprep.subr.bf16.mxu0 %v7194_v35  ;;  %6407 = vmatprep.subr.bf16.mxu1 %v7194_v35  ;;  %v6315_v44 = vunpack.c.h.bf16 %v7747_v42  ;;  %v6246_v52 = vunpack.c.l.bf16 %v6378_v49 }
  0x9e   : > { %v1194_v46 = vsel %vm986_vm1, %v959_v39, 0.0  ;;  %v927_v47 = vmul.f32 %v6243_v40, %v7638_v18  ;;  %v6247_v59 = vunpack.c.h.bf16 %v6378_v49 }
  0x9f   : > { %1027 = vadd.xlane.f32.xlu1 %v1026_v7  ;;  %v923_v7 = vmul.f32 %v6235_v63, %v7638_v18  ;;  %v963_v55 = vmul.f32 %v6315_v44, %v7638_v18 }
  0xa0   : > { %1024 = vadd.xlane.f32.xlu0 %v1023_v8  ;;  %v1077_v8 = vsel %vm986_vm1, %v920_v2, 0.0  ;;  %v1098_v53 = vsel %vm986_vm1, %v927_v47, 0.0  ;;  %v929_v2 = vmul.f32 %v6247_v59, %v7638_v18  ;;  %v7844_v59 = vld [vmem:[%s7571_s23 + $0xd0] sm:$0xff]  }
  0xa1   : > { %v1086_v15 = vsel %vm986_vm1, %v923_v7, 0.0  ;;  %v1206_v61 = vsel %vm986_vm1, %v963_v55, 0.0  ;;  %v6379_v7 = vld [vmem:[%s7571_s23 + $0xa0] sm:$0xff]  }
  0xa2   : > { %v6250_v9 = vunpack.c.l.bf16 %v6379_v7  ;;  %v1104_v11 = vsel %vm986_vm1, %v929_v2, 0.0  ;;  %v7853_v2 = vld [vmem:[%s7571_s23 + $0x150] sm:$0xff]  }
  0xa3   : > { %1033 = vadd.xlane.f32.xlu1 %v1032_v12  ;;  %v6392_v12 = vld [vmem:[%s7571_s23 + $0x108] sm:$0xff]  }
  0xa4   : > { %1030 = vadd.xlane.f32.xlu0 %v1029_v14  ;;  %v6238_v14 = vunpack.c.l.bf16 %v6376_v5  ;;  %v6303_v26 = vunpack.c.h.bf16 %v6392_v12  ;;  %v6310_v5 = vunpack.c.l.bf16 %v6394_v34 }
  0xa6   : > { %v924_v25 = vmul.f32 %v6238_v14, %v7638_v18  ;;  %v957_v32 = vmul.f32 %v6303_v26, %v7638_v18  ;;  %v960_v13 = vmul.f32 %v6310_v5, %v7638_v18 }
  0xa7   : > { %1039 = vadd.xlane.f32.xlu1 %v1038_v22  ;;  %v6302_v22 = vunpack.c.l.bf16 %v6392_v12 }
  0xa8   : > { %1036 = vadd.xlane.f32.xlu0 %v1035_v23  ;;  %v1182_v23 = vsel %vm986_vm1, %v955_v17, 0.0  ;;  %v1089_v31 = vsel %vm986_vm1, %v924_v25, 0.0  ;;  %v1188_v38 = vsel %vm986_vm1, %v957_v32, 0.0  ;;  %v6251_v17 = vunpack.c.h.bf16 %v6379_v7 }
  0xa9   : > { %v956_v28 = vmul.f32 %v6302_v22, %v7638_v18  ;;  %v1197_v19 = vsel %vm986_vm1, %v960_v13, 0.0  ;;  %v6314_v25 = vunpack.c.l.bf16 %v7747_v42 }
  0xab   : > { %1045 = vadd.xlane.f32.xlu1 %v1044_v29  ;;  %v6242_v29 = vunpack.c.l.bf16 %v6377_v20  ;;  %v962_v32 = vmul.f32 %v6314_v25, %v7638_v18 }
  0xac   : > { %1042 = vadd.xlane.f32.xlu0 %v1041_v30  ;;  %v1092_v30 = vsel %vm986_vm1, %v925_v21, 0.0 }
  0xaf   : > { %1051 = vadd.xlane.f32.xlu1 %v1050_v36  ;;  %v1185_v36 = vsel %vm986_vm1, %v956_v28, 0.0 }
  0xb0   : > { %1048 = vadd.xlane.f32.xlu0 %v1047_v37  ;;  %v926_v37 = vmul.f32 %v6242_v29, %v7638_v18 }
  0xb2   : > { %v1095_v45 = vsel %vm986_vm1, %v926_v37, 0.0 }
  0xb3   : > { %1057 = vadd.xlane.f32.xlu1 %v1056_v41  ;;  %v6311_v41 = vunpack.c.h.bf16 %v6394_v34 }
  0xb4   : > { %1054 = vadd.xlane.f32.xlu0 %v1053_v43  ;;  %v6306_v43 = vunpack.c.l.bf16 %v6393_v27 }
  0xb5   : > { %v961_v48 = vmul.f32 %v6311_v41, %v7638_v18  ;;  %v1203_v41 = vsel %vm986_vm1, %v962_v32, 0.0 }
  0xb7   : > { %1063 = vadd.xlane.f32.xlu1 %v1062_v50  ;;  %v7758_v50 = vld [vmem:[%s7571_s23 + $0xa8] sm:$0xff]   ;;  %v1200_v54 = vsel %vm986_vm1, %v961_v48, 0.0 }
  0xb8   : > { %1060 = vadd.xlane.f32.xlu0 %v1059_v51  ;;  %v958_v51 = vmul.f32 %v6306_v43, %v7638_v18  ;;  %v6254_v56 = vunpack.c.l.bf16 %v7758_v50 }
  0xba   : > { %v1191_v60 = vsel %vm986_vm1, %v958_v51, 0.0  ;;  %v932_v62 = vmul.f32 %v6254_v56, %v7638_v18 }
  0xbb   : > { %1069 = vadd.xlane.f32.xlu1 %v1068_v57  ;;  %v7766_v57 = vld [vmem:[%s7571_s23 + $0x128] sm:$0xff]  }
  0xbc   : > { %1066 = vadd.xlane.f32.xlu0 %v1065_v58  ;;  %v928_v58 = vmul.f32 %v6246_v52, %v7638_v18  ;;  %v6319_v63 = vunpack.c.h.bf16 %v7766_v57  ;;  %v1113_v3 = vsel %vm986_vm1, %v932_v62, 0.0  ;;  %v6318_v39 = vunpack.c.l.bf16 %v7766_v57  ;;  %v7835_v52 = vld [vmem:[%s7571_s23 + $0x148] sm:$0xff]  }
  0xbd   : > { %v6334_v32 = vunpack.c.l.bf16 %v7835_v52 }
  0xbe   : > { %v965_v4 = vmul.f32 %v6319_v63, %v7638_v18 }
  0xbf   : > { %1075 = vadd.xlane.f32.xlu1 %v1074_v0  ;;  %v7774_v0 = vld [vmem:[%s7571_s23 + $0xb0] sm:$0xff]  }
  0xc0   : > { %1072 = vadd.xlane.f32.xlu0 %v1071_v1  ;;  %v1101_v1 = vsel %vm986_vm1, %v928_v58, 0.0  ;;  %v1212_v12 = vsel %vm986_vm1, %v965_v4, 0.0  ;;  %v6259_v47 = vunpack.c.h.bf16 %v7774_v0  ;;  %v6335_v58 = vunpack.c.h.bf16 %v7835_v52 }
  0xc1   : > { %v6339_v4 = vunpack.c.h.bf16 %v7853_v2  ;;  %v6338_v52 = vunpack.c.l.bf16 %v7853_v2 }
  0xc2   : > { %v973_v63 = vmul.f32 %v6335_v58, %v7638_v18 }
  0xc3   : > { %1081 = vadd.xlane.f32.xlu1 %v1080_v6  ;;  %v6258_v6 = vunpack.c.l.bf16 %v7774_v0 }
  0xc4   : > { %1078 = vadd.xlane.f32.xlu0 %v1077_v8  ;;  %v7783_v8 = vld [vmem:[%s7571_s23 + $0x130] sm:$0xff]  }
  0xc5   : > { %v6323_v10 = vunpack.c.h.bf16 %v7783_v8  ;;  %v934_v14 = vmul.f32 %v6258_v6, %v7638_v18  ;;  %v1236_v6 = vsel %vm986_vm1, %v973_v63, 0.0 }
  0xc7   : > { %1087 = vadd.xlane.f32.xlu1 %v1086_v15  ;;  %v7791_v15 = vld [vmem:[%s7571_s23 + $0xb8] sm:$0xff]   ;;  %v1119_v20 = vsel %vm986_vm1, %v934_v14, 0.0  ;;  %v967_v21 = vmul.f32 %v6323_v10, %v7638_v18  ;;  %v975_v14 = vmul.f32 %v6339_v4, %v7638_v18  ;;  %v7944_v4 = vld [vmem:[%s7571_s23 + $0x170] sm:$0xff]  }
  0xc8   : > { %1084 = vadd.xlane.f32.xlu0 %v1083_v16  ;;  %v930_v16 = vmul.f32 %v6250_v9, %v7638_v18  ;;  %v6262_v22 = vunpack.c.l.bf16 %v7791_v15  ;;  %v6263_v0 = vunpack.c.h.bf16 %v7791_v15  ;;  %v7862_v9 = vld [vmem:[%s7571_s23 + $0xd8] sm:$0xff]  }
  0xc9   : > { %v1218_v27 = vsel %vm986_vm1, %v967_v21, 0.0  ;;  %v6278_v15 = vunpack.c.l.bf16 %v7862_v9  ;;  %v1242_v21 = vsel %vm986_vm1, %v975_v14, 0.0  ;;  %v6279_v2 = vunpack.c.h.bf16 %v7862_v9  ;;  %v1275_v14 = vld [vmem:[%s7576_s26] sm:$0xff] }
  0xca   : > { %v1107_v26 = vsel %vm986_vm1, %v930_v16, 0.0  ;;  %v936_v28 = vmul.f32 %v6262_v22, %v7638_v18  ;;  %v937_v7 = vmul.f32 %v6263_v0, %v7638_v18  ;;  %v7871_v16 = vld [vmem:[%s7571_s23 + $0x158] sm:$0xff]  }
  0xcb   : > { %1183 = vadd.xlane.f32.xlu1 %v1182_v23  ;;  %v7799_v23 = vld [vmem:[%s7571_s23 + $0x138] sm:$0xff]   ;;  %v944_v22 = vmul.f32 %v6278_v15, %v7638_v18 }
  0xcc   : > { %1180 = vadd.xlane.f32.xlu0 %v1179_v24  ;;  %v931_v24 = vmul.f32 %v6251_v17, %v7638_v18  ;;  %v6327_v29 = vunpack.c.h.bf16 %v7799_v23  ;;  %v1125_v33 = vsel %vm986_vm1, %v936_v28, 0.0 }
  0xce   : > { %v969_v34 = vmul.f32 %v6327_v29, %v7638_v18 }
  0xcf   : > { %1093 = vadd.xlane.f32.xlu1 %v1092_v30  ;;  %v7808_v30 = vld [vmem:[%s7571_s23 + $0xc0] sm:$0xff]  }
  0xd0   : > { %1090 = vadd.xlane.f32.xlu0 %v1089_v31  ;;  %v1110_v31 = vsel %vm986_vm1, %v931_v24, 0.0  ;;  %v6266_v37 = vunpack.c.l.bf16 %v7808_v30  ;;  %v1224_v42 = vsel %vm986_vm1, %v969_v34, 0.0  ;;  %v7880_v24 = vld [vmem:[%s7571_s23 + $0xe0] sm:$0xff]  }
  0xd2   : > { %v938_v44 = vmul.f32 %v6266_v37, %v7638_v18 }
  0xd3   : > { %1186 = vadd.xlane.f32.xlu1 %v1185_v36  ;;  %v6255_v36 = vunpack.c.h.bf16 %v7758_v50 }
  0xd4   : > { %1189 = vadd.xlane.f32.xlu0 %v1188_v38  ;;  %v7817_v38 = vld [vmem:[%s7571_s23 + $0x140] sm:$0xff]   ;;  %v1131_v49 = vsel %vm986_vm1, %v938_v44, 0.0 }
  0xd5   : > { %v6331_v40 = vunpack.c.h.bf16 %v7817_v38  ;;  %v933_v43 = vmul.f32 %v6255_v36, %v7638_v18 }
  0xd7   : > { %1096 = vadd.xlane.f32.xlu1 %v1095_v45  ;;  %v7826_v45 = vld [vmem:[%s7571_s23 + $0xc8] sm:$0xff]   ;;  %v1116_v48 = vsel %vm986_vm1, %v933_v43, 0.0  ;;  %v971_v50 = vmul.f32 %v6331_v40, %v7638_v18  ;;  %v6275_v43 = vunpack.c.h.bf16 %v7844_v59 }
  0xd8   : > { %1195 = vadd.xlane.f32.xlu0 %v1194_v46  ;;  %v964_v46 = vmul.f32 %v6318_v39, %v7638_v18  ;;  %v6270_v51 = vunpack.c.l.bf16 %v7826_v45  ;;  %v6271_v29 = vunpack.c.h.bf16 %v7826_v45 }
  0xd9   : > { %v1230_v56 = vsel %vm986_vm1, %v971_v50, 0.0  ;;  %v7913_v50 = vld [vmem:[%s7571_s23 + $0x168] sm:$0xff]  }
  0xda   : > { %v1209_v55 = vsel %vm986_vm1, %v964_v46, 0.0  ;;  %v940_v57 = vmul.f32 %v6270_v51, %v7638_v18  ;;  %v941_v39 = vmul.f32 %v6271_v29, %v7638_v18  ;;  %v943_v51 = vmul.f32 %v6275_v43, %v7638_v18 }
  0xdb   : > { %1099 = vadd.xlane.f32.xlu1 %v1098_v53  ;;  %v935_v53 = vmul.f32 %v6259_v47, %v7638_v18 }
  0xdc   : > { %1201 = vadd.xlane.f32.xlu0 %v1200_v54  ;;  %v6322_v54 = vunpack.c.l.bf16 %v7783_v8  ;;  %v1137_v62 = vsel %vm986_vm1, %v940_v57, 0.0  ;;  %v1140_v45 = vsel %vm986_vm1, %v941_v39, 0.0  ;;  %v7926_v57 = vld [vmem:[%s10249_s0] ss:$0 sm:$0xff] }
  0xdd   : > { %v945_v9 = vmul.f32 %v7926_v57, %v6279_v2  ;;  %v1283_v2 = vld [vmem:[%s7576_s26 + $0x40] sm:$0xff] }
  0xdf   : > { %1192 = vadd.xlane.f32.xlu1 %v1191_v60  ;;  %v1122_v60 = vsel %vm986_vm1, %v935_v53, 0.0 }
  0xe0   : > { %1207 = vadd.xlane.f32.xlu0 %v1206_v61  ;;  %v966_v61 = vmul.f32 %v6322_v54, %v7638_v18 }
  0xe2   : > { %v1215_v5 = vsel %vm986_vm1, %v966_v61, 0.0  ;;  %v974_v61 = vmul.f32 %v7926_v57, %v6338_v52  ;;  %v1281_v52 = vld [vmem:[%s7576_s26 + $0x30] sm:$0xff] }
  0xe3   : > { %1102 = vadd.xlane.f32.xlu1 %v1101_v1  ;;  %v6274_v1 = vunpack.c.l.bf16 %v7844_v59  ;;  %v7931_v59 = vld [vmem:[%s7571_s23 + $0xf0] sm:$0xff]  }
  0xe4   : > { %1114 = vadd.xlane.f32.xlu0 %v1113_v3  ;;  %v6326_v3 = vunpack.c.l.bf16 %v7799_v23  ;;  %v6343_v23 = vunpack.c.h.bf16 %v7871_v16 }
  0xe5   : > { %v942_v8 = vmul.f32 %v6274_v1, %v7638_v18 }
  0xe6   : > { %v968_v10 = vmul.f32 %v6326_v3, %v7638_v18  ;;  %v977_v28 = vmul.f32 %v6343_v23, %v7638_v18  ;;  %v6290_v3 = vunpack.c.l.bf16 %v7931_v59 }
  0xe7   : > { %1105 = vadd.xlane.f32.xlu1 %v1104_v11  ;;  %v6267_v11 = vunpack.c.h.bf16 %v7808_v30  ;;  %v1143_v13 = vsel %vm986_vm1, %v942_v8, 0.0  ;;  %v6282_v30 = vunpack.c.l.bf16 %v7880_v24  ;;  %v1239_v8 = vsel %vm986_vm1, %v974_v61, 0.0 }
  0xe8   : > { %1213 = vadd.xlane.f32.xlu0 %v1212_v12  ;;  %v1128_v12 = vsel %vm986_vm1, %v937_v7, 0.0  ;;  %v1248_v37 = vsel %vm986_vm1, %v977_v28, 0.0  ;;  %v6350_v61 = vunpack.c.l.bf16 %v7913_v50 }
  0xe9   : > { %v939_v17 = vmul.f32 %v6267_v11, %v7638_v18  ;;  %v946_v40 = vmul.f32 %v6282_v30, %v7638_v18 }
  0xeb   : > { %1198 = vadd.xlane.f32.xlu1 %v1197_v19  ;;  %v6330_v19 = vunpack.c.l.bf16 %v7817_v38  ;;  %v1134_v25 = vsel %vm986_vm1, %v939_v17, 0.0  ;;  %v1155_v46 = vsel %vm986_vm1, %v946_v40, 0.0  ;;  %v1280_v40 = vld [vmem:[%s7576_s26 + $0x28] sm:$0xff] }
  0xec   : > { %1120 = vadd.xlane.f32.xlu0 %v1119_v20  ;;  %v1221_v20 = vsel %vm986_vm1, %v968_v10, 0.0 }
  0xef   : > { %1108 = vadd.xlane.f32.xlu1 %v1107_v26  ;;  %v970_v26 = vmul.f32 %v6330_v19, %v7638_v18  ;;  %v1152_v19 = vsel %vm986_vm1, %v945_v9, 0.0 }
  0xf0   : > { %1219 = vadd.xlane.f32.xlu0 %v1218_v27  ;;  %v1149_v27 = vsel %vm986_vm1, %v944_v22, 0.0 }
  0xf1   : > { %v1227_v36 = vsel %vm986_vm1, %v970_v26, 0.0  ;;  %v7971_v26 = vld [vmem:[%s7571_s23 + $0x178] sm:$0xff]  }
  0xf3   : > { %1111 = vadd.xlane.f32.xlu1 %v1110_v31  ;;  %v7889_v31 = vld [vmem:[%s7571_s23 + $0x160] sm:$0xff]  }
  0xf4   : > { %1126 = vadd.xlane.f32.xlu0 %v1125_v33  ;;  %v6347_v33 = vunpack.c.h.bf16 %v7889_v31  ;;  %v6346_v28 = vunpack.c.l.bf16 %v7889_v31 }
  0xf7   : > { %1204 = vadd.xlane.f32.xlu1 %v1203_v41  ;;  %v7900_v41 = vld [vmem:[%s7571_s23 + $0xe8] sm:$0xff]  }
  0xf8   : > { %1225 = vadd.xlane.f32.xlu0 %v1224_v42  ;;  %v972_v42 = vmul.f32 %v6334_v32, %v7638_v18 }
  0xfa   : > { %v1233_v54 = vsel %vm986_vm1, %v972_v42, 0.0 }
  0xfb   : > { %1117 = vadd.xlane.f32.xlu1 %v1116_v48  ;;  %v979_v48 = vmul.f32 %v6347_v33, %v7638_v18  ;;  %v6351_v18 = vunpack.c.h.bf16 %v7913_v50  ;;  %v980_v50 = vmul.f32 %v7926_v57, %v6350_v61 }
  0xfc   : > { %1132 = vadd.xlane.f32.xlu0 %v1131_v49  ;;  %v6286_v49 = vunpack.c.l.bf16 %v7900_v41 }
  0xfd   : > { %v981_v1 = vmul.f32 %v7926_v57, %v6351_v18 }
  0xfe   : > { %v948_v58 = vmul.f32 %v7926_v57, %v6286_v49  ;;  %v6287_v49 = vunpack.c.h.bf16 %v7900_v41 }
  0xff   : > { %1210 = vadd.xlane.f32.xlu1 %v1209_v55  ;;  %v1254_v55 = vsel %vm986_vm1, %v979_v48, 0.0  ;;  %v1260_v10 = vsel %vm986_vm1, %v981_v1, 0.0 }
 0x100   : > { %1231 = vadd.xlane.f32.xlu0 %v1230_v56  ;;  %v1161_v63 = vsel %vm986_vm1, %v948_v58, 0.0  ;;  %v949_v41 = vmul.f32 %v7926_v57, %v6287_v49 }
 0x103   : > { %1123 = vadd.xlane.f32.xlu1 %v1122_v60  ;;  %v1146_v60 = vsel %vm986_vm1, %v943_v51, 0.0 }
 0x104   : > { %1138 = vadd.xlane.f32.xlu0 %v1137_v62 }
 0x107   : > { %1216 = vadd.xlane.f32.xlu1 %v1215_v5  ;;  %v6342_v5 = vunpack.c.l.bf16 %v7871_v16  ;;  %v6283_v16 = vunpack.c.h.bf16 %v7880_v24 }
 0x108   : > { %1237 = vadd.xlane.f32.xlu0 %v1236_v6  ;;  %v6355_v6 = vunpack.c.h.bf16 %v7944_v4 }
 0x109   : > { %v976_v15 = vmul.f32 %v7926_v57, %v6342_v5  ;;  %v947_v24 = vmul.f32 %v7926_v57, %v6283_v16  ;;  %v1279_v16 = vld [vmem:[%s7576_s26 + $0x20] sm:$0xff] }
 0x10a   : > { %v983_v22 = vmul.f32 %v7926_v57, %v6355_v6  ;;  %v1164_v6 = vsel %vm986_vm1, %v949_v41, 0.0  ;;  %v1291_v41 = vld [vmem:[%s7576_s26 + $0x80] sm:$0xff] }
 0x10b   : > { %1129 = vadd.xlane.f32.xlu1 %v1128_v12  ;;  %v950_v12 = vmul.f32 %v7926_v57, %v6290_v3  ;;  %v1245_v30 = vsel %vm986_vm1, %v976_v15, 0.0  ;;  %v1158_v31 = vsel %vm986_vm1, %v947_v24, 0.0  ;;  %v1276_v3 = vld [vmem:[%s7576_s26 + $0x8] sm:$0xff] }
 0x10c   : > { %1144 = vadd.xlane.f32.xlu0 %v1143_v13  ;;  %v7957_v13 = vld [vmem:[%s7571_s23 + $0xf8] sm:$0xff]   ;;  %v1266_v32 = vsel %vm986_vm1, %v983_v22, 0.0 }
 0x10d   : > { %v6294_v23 = vunpack.c.l.bf16 %v7957_v13 }
 0x10f   : > { %1222 = vadd.xlane.f32.xlu1 %v1221_v20  ;;  %v1167_v20 = vsel %vm986_vm1, %v950_v12, 0.0  ;;  %v1285_v12 = vld [vmem:[%s7576_s26 + $0x50] sm:$0xff] }
 0x110   : > { %1243 = vadd.xlane.f32.xlu0 %v1242_v21 }
 0x113   : > { %1135 = vadd.xlane.f32.xlu1 %v1134_v25 }
 0x114   : > { %1150 = vadd.xlane.f32.xlu0 %v1149_v27  ;;  %v7893_v34 = vpop.xlane.xlu1 %994  ;;  %v1278_v27 = vld [vmem:[%s7576_s26 + $0x18] sm:$0xff] }
 0x115   : > { %v989_v38 = vpop.xlane.xlu0 %988 }
 0x116   : > { %v1371_v25 = vadd.f32 %v1275_v14, %v989_v38 }
 0x117   : > { %1228 = vadd.xlane.f32.xlu1 %v1227_v36  ;;  %v952_v36 = vmul.f32 %v7926_v57, %v6294_v23  ;;  %v6354_v23 = vunpack.c.l.bf16 %v7944_v4 }
 0x118   : > { %1249 = vadd.xlane.f32.xlu0 %v1248_v37  ;;  %v7904_v44 = vpop.xlane.xlu1 %997  ;;  %v6359_v37 = vunpack.c.h.bf16 %v7971_v26  ;;  %v5924_v39 = vmul.f32 -1.442695, %v1371_v25 }
 0x119   : > { %v7908_v47 = vpop.xlane.xlu0 %991  ;;  %v1374_v38 = vadd.f32 %v1278_v27, %v7904_v44  ;;  %v1173_v43 = vsel %vm986_vm1, %v952_v36, 0.0  ;;  %v982_v4 = vmul.f32 %v7926_v57, %v6354_v23 }
 0x11a   : > { %v985_v48 = vmul.f32 %v7926_v57, %v6359_v37  ;;  %6686 = vpow2.f32 %v5924_v39  ;;  %v1372_v15 = vadd.f32 %v1276_v3, %v7908_v47  ;;  %v1287_v47 = vld [vmem:[%s7576_s26 + $0x60] sm:$0xff] }
 0x11b   : > { %1141 = vadd.xlane.f32.xlu1 %v1140_v45  ;;  %v5927_v44 = vmul.f32 -1.442695, %v1374_v38  ;;  %v6295_v38 = vunpack.c.h.bf16 %v7957_v13  ;;  %v1263_v13 = vsel %vm986_vm1, %v982_v4, 0.0 }
 0x11c   : > { %1156 = vadd.xlane.f32.xlu0 %v1155_v46  ;;  %v7917_v53 = vpop.xlane.xlu1 %1003  ;;  %v978_v46 = vmul.f32 %v7926_v57, %v6346_v28  ;;  %v1272_v18 = vsel %vm986_vm1, %v985_v48, 0.0  ;;  %v5925_v28 = vmul.f32 -1.442695, %v1372_v15  ;;  %v1288_v15 = vld [vmem:[%s7576_s26 + $0x68] sm:$0xff] }
 0x11d   : > { %v7921_v56 = vpop.xlane.xlu0 %1000  ;;  %v1376_v51 = vadd.f32 %v1280_v40, %v7917_v53  ;;  %6688 = vpow2.f32 %v5927_v44 }
 0x11e   : > { %v1251_v58 = vsel %vm986_vm1, %v978_v46, 0.0 }
 0x11f   : > { %1234 = vadd.xlane.f32.xlu1 %v1233_v54  ;;  %v1277_v54 = vld [vmem:[%s7576_s26 + $0x10] sm:$0xff] }
 0x120   : > { %1255 = vadd.xlane.f32.xlu0 %v1254_v55  ;;  %v7935_v62 = vpop.xlane.xlu1 %1009  ;;  %v1373_v1 = vadd.f32 %v1277_v54, %v7893_v34 }
 0x121   : > { %v7938_v0 = vpop.xlane.xlu0 %1006 }
 0x122   : > { %v1377_v53 = vadd.f32 %v1281_v52, %v7938_v0  ;;  %v5926_v34 = vmul.f32 -1.442695, %v1373_v1  ;;  %v1284_v52 = vld [vmem:[%s7576_s26 + $0x48] sm:$0xff]  ;;  %v1286_v1 = vld [vmem:[%s7576_s26 + $0x58] sm:$0xff] }
 0x123   : > { %1147 = vadd.xlane.f32.xlu1 %v1146_v60 }
 0x124   : > { %1162 = vadd.xlane.f32.xlu0 %v1161_v63  ;;  %v7948_v7 = vpop.xlane.xlu1 %1015  ;;  %v5929_v63 = vmul.f32 -1.442695, %v1376_v51  ;;  %v5930_v9 = vmul.f32 -1.442695, %v1377_v53  ;;  %v6687_v14 = vpop.eup %6686  ;;  %v953_v51 = vmul.f32 %v7926_v57, %v6295_v38  ;;  %v1292_v38 = vld [vmem:[%s7576_s26 + $0x88] sm:$0xff] }
 0x125   : > { %v7952_v11 = vpop.xlane.xlu0 %1012  ;;  %v1755_v27 = vadd.f32 1.0, %v6687_v14  ;;  %v1380_v53 = vadd.f32 %v1284_v52, %v7948_v7 }
 0x126   : > { %6690 = vpow2.f32 %v5929_v63  ;;  %v1379_v0 = vadd.f32 %v1283_v2, %v7952_v11 }
 0x127   : > { %1240 = vadd.xlane.f32.xlu1 %v1239_v8  ;;  %6692 = vpow2.f32 %v5930_v9  ;;  %v6689_v24 = vpop.eup %6688  ;;  %v1293_v9 = vld [vmem:[%s7576_s26 + $0x90] sm:$0xff]  ;;  %v5933_v14 = vmul.f32 -1.442695, %v1380_v53 }
 0x128   : > { %1261 = vadd.xlane.f32.xlu0 %v1260_v10  ;;  %v7962_v17 = vpop.xlane.xlu1 %1021  ;;  %v6291_v10 = vunpack.c.h.bf16 %v7931_v59  ;;  %v5932_v11 = vmul.f32 -1.442695, %v1379_v0  ;;  %6694 = vpow2.f32 %v5926_v34 }
 0x129   : > { %v7966_v21 = vpop.xlane.xlu0 %1018  ;;  %v1382_v7 = vadd.f32 %v1286_v1, %v7962_v17 }
 0x12a   : > { %v951_v59 = vmul.f32 %v7926_v57, %v6291_v10  ;;  %v1381_v25 = vadd.f32 %v1285_v12, %v7966_v21  ;;  %v1282_v21 = vld [vmem:[%s7576_s26 + $0x38] sm:$0xff]  ;;  %6696 = vpow2.f32 %v5932_v11  ;;  %v1295_v11 = vld [vmem:[%s7576_s26 + $0xa0] sm:$0xff] }
 0x12b   : > { %1153 = vadd.xlane.f32.xlu1 %v1152_v19  ;;  %6698 = vrcp.f32 %v1755_v27  ;;  %v1378_v48 = vadd.f32 %v1282_v21, %v7935_v62  ;;  %v5935_v27 = vmul.f32 -1.442695, %v1382_v7  ;;  %v1296_v7 = vld [vmem:[%s7576_s26 + $0xa8] sm:$0xff] }
 0x12c   : > { %1168 = vadd.xlane.f32.xlu0 %v1167_v20  ;;  %v7976_v29 = vpop.xlane.xlu1 %1027  ;;  %v1257_v20 = vsel %vm986_vm1, %v980_v50, 0.0  ;;  %v1170_v36 = vsel %vm986_vm1, %v951_v59, 0.0  ;;  %v5934_v39 = vmul.f32 -1.442695, %v1381_v25  ;;  %6700 = vpow2.f32 %v5925_v28 }
 0x12d   : > { %v7980_v33 = vpop.xlane.xlu0 %1024  ;;  %v5931_v63 = vmul.f32 -1.442695, %v1378_v48 }
 0x12e   : > { %v1383_v40 = vadd.f32 %v1287_v47, %v7980_v33  ;;  %v6358_v33 = vunpack.c.l.bf16 %v7971_v26  ;;  %6702 = vpow2.f32 %v5934_v39  ;;  %v1176_v26 = vsel %vm986_vm1, %v953_v51, 0.0 }
 0x12f   : > { %1246 = vadd.xlane.f32.xlu1 %v1245_v30  ;;  %v1375_v30 = vadd.f32 %v1279_v16, %v7921_v56  ;;  %v1289_v56 = vld [vmem:[%s7576_s26 + $0x70] sm:$0xff]  ;;  %v1384_v47 = vadd.f32 %v1288_v15, %v7976_v29 }
 0x130   : > { %1267 = vadd.xlane.f32.xlu0 %v1266_v32  ;;  %v7987_v42 = vpop.xlane.xlu1 %1033  ;;  %v5936_v54 = vmul.f32 -1.442695, %v1383_v40  ;;  %v1297_v40 = vld [vmem:[%s7576_s26 + $0xb0] sm:$0xff] }
 0x131   : > { %v7990_v45 = vpop.xlane.xlu0 %1030  ;;  %v5928_v46 = vmul.f32 -1.442695, %v1375_v30  ;;  %v1290_v30 = vld [vmem:[%s7576_s26 + $0x78] sm:$0xff] }
 0x133   : > { %1159 = vadd.xlane.f32.xlu1 %v1158_v31  ;;  %v1758_v31 = vadd.f32 1.0, %v6689_v24 }
 0x134   : > { %1174 = vadd.xlane.f32.xlu0 %v1173_v43  ;;  %v7998_v55 = vpop.xlane.xlu1 %1039  ;;  %v6691_v43 = vpop.eup %6690 }
 0x135   : > { %v8002_v60 = vpop.xlane.xlu0 %1036  ;;  %6704 = vrcp.f32 %v1758_v31  ;;  %v6693_v62 = vpop.eup %6692 }
 0x136   : > { %6706 = vpow2.f32 %v5928_v46  ;;  %v6695_v61 = vpop.eup %6694  ;;  %v1387_v50 = vadd.f32 %v1291_v41, %v8002_v60  ;;  %v1761_v10 = vadd.f32 1.0, %v6693_v62  ;;  %v1299_v41 = vld [vmem:[%s7576_s26 + $0xc0] sm:$0xff] }
 0x137   : > { %1252 = vadd.xlane.f32.xlu1 %v1251_v58  ;;  %v1385_v58 = vadd.f32 %v1289_v56, %v7990_v45  ;;  %v984_v45 = vmul.f32 %v7926_v57, %v6358_v33  ;;  %6708 = vpow2.f32 %v5936_v54  ;;  %v6697_v0 = vpop.eup %6696  ;;  %v1757_v34 = vadd.f32 1.0, %v6695_v61 }
 0x138   : > { %1273 = vadd.xlane.f32.xlu0 %v1272_v18  ;;  %v8010_v5 = vpop.xlane.xlu1 %1045  ;;  %v1760_v18 = vadd.f32 1.0, %v6691_v43  ;;  %v6699_v12 = vpop.eup %6698  ;;  %v5940_v59 = vmul.f32 -1.442695, %v1387_v50  ;;  %v1763_v17 = vadd.f32 1.0, %v6697_v0  ;;  %v5937_v56 = vmul.f32 -1.442695, %v1384_v47 }
 0x139   : > { %v8013_v8 = vpop.xlane.xlu0 %1042  ;;  %v1269_v57 = vsel %vm986_vm1, %v984_v45, 0.0  ;;  %v6701_v60 = vpop.eup %6700  ;;  %v1386_v43 = vadd.f32 %v1290_v30, %v7987_v42 }
 0x13a   : > { %6710 = vrcp.f32 %v1760_v18  ;;  %v1389_v23 = vadd.f32 %v1293_v9, %v8013_v8  ;;  %v6703_v25 = vpop.eup %6702  ;;  %v1756_v28 = vadd.f32 1.0, %v6701_v60 }
 0x13b   : > { %1165 = vadd.xlane.f32.xlu1 %v1164_v6  ;;  %v5938_v6 = vmul.f32 -1.442695, %v1385_v58  ;;  %6712 = vpow2.f32 %v5931_v63  ;;  %v1765_v29 = vadd.f32 1.0, %v6703_v25  ;;  %v5939_v62 = vmul.f32 -1.442695, %v1386_v43 }
 0x13c   : > { %v8021_v19 = vpop.xlane.xlu1 %1051  ;;  %v5942_v21 = vmul.f32 -1.442695, %v1389_v23  ;;  %v1303_v23 = vld [vmem:[%s7576_s26 + $0xe0] sm:$0xff] }
 0x13d   : > { %v8024_v22 = vpop.xlane.xlu0 %1048  ;;  %6714 = vpow2.f32 %v5938_v6  ;;  %v1392_v25 = vadd.f32 %v1296_v7, %v8021_v19  ;;  %v1304_v7 = vld [vmem:[%s7576_s26 + $0xe8] sm:$0xff] }
 0x13e   : > { %6716 = vrcp.f32 %v1761_v10  ;;  %v1391_v39 = vadd.f32 %v1295_v11, %v8024_v22  ;;  %v1294_v22 = vld [vmem:[%s7576_s26 + $0x98] sm:$0xff]  ;;  %v1301_v10 = vld [vmem:[%s7576_s26 + $0xd0] sm:$0xff] }
 0x13f   : > { %1258 = vadd.xlane.f32.xlu1 %v1257_v20  ;;  %6718 = vrcp.f32 %v1757_v34  ;;  %v6705_v24 = vpop.eup %6704  ;;  %v1390_v63 = vadd.f32 %v1294_v22, %v8010_v5 }
 0x140   : > { %v8031_v32 = vpop.xlane.xlu1 %1057  ;;  %6720 = vpow2.f32 %v5933_v14  ;;  %v6707_v8 = vpop.eup %6706  ;;  %v5944_v52 = vmul.f32 -1.442695, %v1391_v39  ;;  %v1305_v39 = vld [vmem:[%s7576_s26 + $0xf0] sm:$0xff] }
 0x141   : > { %v8034_v37 = vpop.xlane.xlu0 %1054  ;;  %6722 = vpow2.f32 %v5940_v59  ;;  %v6709_v31 = vpop.eup %6708  ;;  %v1759_v48 = vadd.f32 1.0, %v6707_v8  ;;  %v5943_v34 = vmul.f32 -1.442695, %v1390_v63 }
 0x142   : > { %6724 = vrcp.f32 %v1763_v17  ;;  %v1393_v54 = vadd.f32 %v1297_v40, %v8034_v37  ;;  %v1767_v18 = vadd.f32 1.0, %v6709_v31  ;;  %v5945_v40 = vmul.f32 -1.442695, %v1392_v25 }
 0x143   : > { %1171 = vadd.xlane.f32.xlu1 %v1170_v36  ;;  %6726 = vpow2.f32 %v5935_v27 }
 0x144   : > { %v8042_v49 = vpop.xlane.xlu1 %1063  ;;  %v6711_v46 = vpop.eup %6710  ;;  %6728 = vrcp.f32 %v1756_v28 }
 0x145   : > { %v8045_v44 = vpop.xlane.xlu0 %1060  ;;  %6730 = vpow2.f32 %v5942_v21  ;;  %v6713_v58 = vpop.eup %6712 }
 0x146   : > { %6732 = vrcp.f32 %v1765_v29  ;;  %v1395_v45 = vadd.f32 %v1299_v41, %v8045_v44  ;;  %v1762_v0 = vadd.f32 1.0, %v6713_v58  ;;  %v1308_v58 = vld [vmem:[%s7576_s26 + $0x108] sm:$0xff] }
 0x147   : > { %1264 = vadd.xlane.f32.xlu1 %v1263_v13  ;;  %v1388_v13 = vadd.f32 %v1292_v38, %v7998_v55  ;;  %v6715_v42 = vpop.eup %6714  ;;  %6734 = vpow2.f32 %v5937_v56 }
 0x148   : > { %v8054_v2 = vpop.xlane.xlu1 %1069  ;;  %v6717_v61 = vpop.eup %6716  ;;  %6736 = vrcp.f32 %v1759_v48  ;;  %v1769_v50 = vadd.f32 1.0, %v6715_v42  ;;  %v5948_v44 = vmul.f32 -1.442695, %v1395_v45 }
 0x149   : > { %v8057_v3 = vpop.xlane.xlu0 %1066  ;;  %v5941_v55 = vmul.f32 -1.442695, %v1388_v13  ;;  %v6719_v37 = vpop.eup %6718  ;;  %6738 = vpow2.f32 %v5944_v52  ;;  %v1300_v13 = vld [vmem:[%s7576_s26 + $0xc8] sm:$0xff] }
 0x14a   : > { %v6721_v6 = vpop.eup %6720  ;;  %6740 = vrcp.f32 %v1767_v18 }
 0x14b   : > { %1177 = vadd.xlane.f32.xlu1 %v1176_v26  ;;  %v5946_v26 = vmul.f32 -1.442695, %v1393_v54  ;;  %v6723_v9 = vpop.eup %6722  ;;  %6742 = vpow2.f32 %v5939_v62  ;;  %v1764_v11 = vadd.f32 1.0, %v6721_v6 }
 0x14c   : > { %v8064_v16 = vpop.xlane.xlu1 %1075  ;;  %v6725_v5 = vpop.eup %6724  ;;  %6744 = vpow2.f32 %v5941_v55  ;;  %v1771_v59 = vadd.f32 1.0, %v6723_v9 }
 0x14d   : > { %v8067_v20 = vpop.xlane.xlu0 %1072  ;;  %v6727_v15 = vpop.eup %6726  ;;  %6746 = vpow2.f32 %v5946_v26  ;;  %v1400_v25 = vadd.f32 %v1304_v7, %v8064_v16 }
 0x14e   : > { %2141 = vperm.xlu0 %6469, %v6699_v12   ;;  %v6729_v60 = vpop.eup %6728  ;;  %6748 = vrcp.f32 %v1769_v50  ;;  %v1766_v47 = vadd.f32 1.0, %v6727_v15  ;;  %v1399_v38 = vadd.f32 %v1303_v23, %v8067_v20 }
 0x14f   : > { %1270 = vadd.xlane.f32.xlu1 %v1269_v57  ;;  %v1397_v57 = vadd.f32 %v1301_v10, %v8057_v3  ;;  %v6731_v17 = vpop.eup %6730  ;;  %6750 = vrcp.f32 %v1762_v0  ;;  %v1340_v10 = vld [vmem:[%s7576_s26 + $0x208] sm:$0xff] }
 0x150   : > { %v8073_v36 = vpop.xlane.xlu1 %1081  ;;  %v6733_v27 = vpop.eup %6732  ;;  %6752 = vpow2.f32 %v5943_v34  ;;  %v1773_v19 = vadd.f32 1.0, %v6731_v17  ;;  %v5952_v22 = vmul.f32 -1.442695, %v1399_v38  ;;  %v1310_v17 = vld [vmem:[%s7576_s26 + $0x118] sm:$0xff] }
 0x151   : > { %v8075_v4 = vpop.xlane.xlu0 %1078  ;;  %v6735_v3 = vpop.eup %6734  ;;  %6754 = vpow2.f32 %v5948_v44  ;;  %v5950_v8 = vmul.f32 -1.442695, %v1397_v57 }
 0x152   : > { %2156 = vperm.xlu0 %6469, %v6705_v24   ;;  %v1298_v24 = vld [vmem:[%s7576_s26 + $0xb8] sm:$0xff]  ;;  %v6737_v21 = vpop.eup %6736  ;;  %6756 = vrcp.f32 %v1771_v59  ;;  %v1768_v43 = vadd.f32 1.0, %v6735_v3  ;;  %v1401_v52 = vadd.f32 %v1305_v39, %v8075_v4 }
 0x153   : > { %v6739_v29 = vpop.eup %6738  ;;  %6758 = vrcp.f32 %v1764_v11  ;;  %v1394_v31 = vadd.f32 %v1298_v24, %v8031_v32  ;;  %v1306_v24 = vld [vmem:[%s7576_s26 + $0xf8] sm:$0xff] }
 0x154   : > { %v8082_v51 = vpop.xlane.xlu1 %1087  ;;  %v6741_v56 = vpop.eup %6740  ;;  %6760 = vrcp.f32 %v1766_v47  ;;  %v1775_v32 = vadd.f32 1.0, %v6739_v29  ;;  %v5954_v45 = vmul.f32 -1.442695, %v1401_v52  ;;  %v1342_v39 = vld [vmem:[%s7576_s26 + $0x218] sm:$0xff] }
 0x155   : > { %v8084_v33 = vpop.xlane.xlu0 %1084  ;;  %v6743_v20 = vpop.eup %6742  ;;  %6762 = vpow2.f32 %v5950_v8  ;;  %v5947_v41 = vmul.f32 -1.442695, %v1394_v31  ;;  %v1404_v26 = vadd.f32 %v1308_v58, %v8082_v51  ;;  %v1402_v31 = vadd.f32 %v1306_v24, %v8073_v36 }
 0x156   : > { %2166 = vperm.xlu0 %6469, %v6711_v46   ;;  %v6745_v54 = vpop.eup %6744  ;;  %6764 = vrcp.f32 %v1773_v19  ;;  %v1770_v62 = vadd.f32 1.0, %v6743_v20  ;;  %v1307_v20 = vld [vmem:[%s7576_s26 + $0x100] sm:$0xff] }
 0x157   : > { %v6747_v18 = vpop.eup %6746  ;;  %6766 = vpow2.f32 %v5945_v40  ;;  %v1772_v0 = vadd.f32 1.0, %v6745_v54  ;;  %v5957_v57 = vmul.f32 -1.442695, %v1404_v26  ;;  %v5953_v40 = vmul.f32 -1.442695, %v1400_v25  ;;  %v1339_v54 = vld [vmem:[%s7576_s26 + $0x200] sm:$0xff] }
 0x158   : > { %v8090_v53 = vpop.xlane.xlu1 %1183  ;;  %v6749_v42 = vpop.eup %6748  ;;  %6768 = vrcp.f32 %v1768_v43  ;;  %v1777_v50 = vadd.f32 1.0, %v6747_v18  ;;  %v1312_v18 = vld [vmem:[%s7576_s26 + $0x128] sm:$0xff]  ;;  %v1309_v26 = vld [vmem:[%s7576_s26 + $0x110] sm:$0xff] }
 0x159   : > { %v8092_v1 = vpop.xlane.xlu0 %1180  ;;  %v6751_v4 = vpop.eup %6750  ;;  %6770 = vpow2.f32 %v5952_v22 }
 0x15a   : > { %2171 = vperm.xlu0 %6469, %v6717_v61   ;;  %v1396_v61 = vadd.f32 %v1300_v13, %v8042_v49  ;;  %v6753_v6 = vpop.eup %6752  ;;  %6772 = vrcp.f32 %v1775_v32 }
 0x15b   : > { %v6755_v9 = vpop.eup %6754  ;;  %6774 = vpow2.f32 %v5947_v41 }
 0x15c   : > { %v8097_v12 = vpop.xlane.xlu1 %1093  ;;  %v6757_v49 = vpop.eup %6756  ;;  %6776 = vrcp.f32 %v1770_v62  ;;  %v1779_v23 = vadd.f32 1.0, %v6755_v9  ;;  %v1403_v62 = vadd.f32 %v1307_v20, %v8084_v33  ;;  %v1311_v20 = vld [vmem:[%s7576_s26 + $0x120] sm:$0xff] }
 0x15d   : > { %v8099_v14 = vpop.xlane.xlu0 %1090  ;;  %v6759_v44 = vpop.eup %6758  ;;  %6778 = vpow2.f32 %v5954_v45 }
 0x15e   : > { %2181 = vperm.xlu0 %6469, %v6725_v5   ;;  %v5949_v5 = vmul.f32 -1.442695, %v1396_v61  ;;  %v6761_v59 = vpop.eup %6760  ;;  %6780 = vrcp.f32 %v1777_v50 }
 0x15f   : > { %v6763_v11 = vpop.eup %6762  ;;  %6782 = vrcp.f32 %v1772_v0  ;;  %v1344_v0 = vld [vmem:[%s7576_s26 + $0x228] sm:$0xff] }
 0x160   : > { %v8105_v28 = vpop.xlane.xlu1 %1186  ;;  %2146 = vperm.xlu1 %6468, %v6729_v60   ;;  %v1436_v60 = vadd.f32 %v1340_v10, %v8090_v53  ;;  %6784 = vpow2.f32 %v5949_v5  ;;  %v1781_v16 = vadd.f32 1.0, %v6763_v11  ;;  %v5956_v5 = vmul.f32 -1.442695, %v1403_v62  ;;  %v1314_v11 = vld [vmem:[%s7576_s26 + $0x138] sm:$0xff] }
 0x161   : > { %v8107_v30 = vpop.xlane.xlu0 %1189  ;;  %6786 = vpow2.f32 %v5957_v57 }
 0x162   : > { %2191 = vperm.xlu0 %6469, %v6733_v27   ;;  %v6765_v27 = vpop.eup %6764  ;;  %v5989_v38 = vmul.f32 -1.442695, %v1436_v60  ;;  %6788 = vrcp.f32 %v1779_v23  ;;  %v1438_v32 = vadd.f32 %v1342_v39, %v8107_v30  ;;  %v1346_v39 = vld [vmem:[%s7576_s26 + $0x238] sm:$0xff] }
 0x163   : > { %v6767_v53 = vpop.eup %6766 }
 0x164   : > { %v8112_v46 = vpop.xlane.xlu1 %1096  ;;  %2151 = vperm.xlu1 %6468, %v6719_v37   ;;  %v1302_v37 = vld [vmem:[%s7576_s26 + $0xd8] sm:$0xff]  ;;  %v6769_v19 = vpop.eup %6768  ;;  %v1776_v43 = vadd.f32 1.0, %v6767_v53  ;;  %v5991_v50 = vmul.f32 -1.442695, %v1438_v32 }
 0x165   : > { %v8114_v48 = vpop.xlane.xlu0 %1195  ;;  %v1398_v34 = vadd.f32 %v1302_v37, %v8054_v2  ;;  %v1774_v2 = vadd.f32 1.0, %v6753_v6  ;;  %v6771_v29 = vpop.eup %6770  ;;  %v1435_v37 = vadd.f32 %v1339_v54, %v8092_v1  ;;  %v1405_v1 = vadd.f32 %v1309_v26, %v8099_v14 }
 0x166   : > { %2201 = vperm.xlu0 %6469, %v6741_v56   ;;  %v6773_v56 = vpop.eup %6772  ;;  %v1783_v36 = vadd.f32 1.0, %v6771_v29 }
 0x167   : > { %v5951_v47 = vmul.f32 -1.442695, %v1398_v34  ;;  %6790 = vrcp.f32 %v1774_v2  ;;  %v6775_v22 = vpop.eup %6774  ;;  %v5988_v7 = vmul.f32 -1.442695, %v1435_v37  ;;  %v5958_v2 = vmul.f32 -1.442695, %v1405_v1 }
 0x168   : > { %v8120_v55 = vpop.xlane.xlu1 %1099  ;;  %2161 = vperm.xlu1 %6468, %v6737_v21   ;;  %v1406_v21 = vadd.f32 %v1310_v17, %v8097_v12  ;;  %v6777_v58 = vpop.eup %6776 }
 0x169   : > { %v8122_v63 = vpop.xlane.xlu0 %1201  ;;  %6792 = vpow2.f32 %v5951_v47  ;;  %v6779_v41 = vpop.eup %6778  ;;  %v1408_v10 = vadd.f32 %v1312_v18, %v8120_v55  ;;  %v1341_v47 = vld [vmem:[%s7576_s26 + $0x210] sm:$0xff] }
 0x16a   : > { %2211 = vperm.xlu0 %6469, %v6749_v42   ;;  %6794 = vpow2.f32 %v5989_v38  ;;  %v5959_v52 = vmul.f32 -1.442695, %v1406_v21  ;;  %v5955_v42 = vmul.f32 -1.442695, %v1402_v31  ;;  %v6781_v61 = vpop.eup %6780  ;;  %v1785_v33 = vadd.f32 1.0, %v6779_v41 }
 0x16b   : > { %6796 = vrcp.f32 %v1781_v16  ;;  %v6783_v6 = vpop.eup %6782  ;;  %v5961_v60 = vmul.f32 -1.442695, %v1408_v10  ;;  %v1437_v31 = vadd.f32 %v1341_v47, %v8105_v28  ;;  %v1442_v54 = vadd.f32 %v1346_v39, %v8122_v63 }
 0x16c   : > { %v8129_v15 = vpop.xlane.xlu1 %1192  ;;  %2176 = vperm.xlu1 %6468, %v6751_v4   ;;  %6798 = vpow2.f32 %v5953_v40  ;;  %v1778_v4 = vadd.f32 1.0, %v6775_v22  ;;  %v6785_v9 = vpop.eup %6784 }
 0x16d   : > { %v8131_v51 = vpop.xlane.xlu0 %1207  ;;  %6800 = vrcp.f32 %v1776_v43  ;;  %v5990_v41 = vmul.f32 -1.442695, %v1437_v31  ;;  %v5995_v26 = vmul.f32 -1.442695, %v1442_v54 }
 0x16e   : > { %2221 = vperm.xlu0 %6469, %v6757_v49   ;;  %6802 = vpow2.f32 %v5959_v52  ;;  %v6787_v49 = vpop.eup %6786 }
 0x16f   : > { %6804 = vrcp.f32 %v1783_v36  ;;  %v6789_v34 = vpop.eup %6788  ;;  %v1788_v17 = vadd.f32 1.0, %v6787_v49  ;;  %v1316_v36 = vld [vmem:[%s7576_s26 + $0x148] sm:$0xff] }
 0x170   : > { %v8137_v3 = vpop.xlane.xlu1 %1102  ;;  %2186 = vperm.xlu1 %6468, %v6759_v44   ;;  %6806 = vpow2.f32 %v5955_v42  ;;  %v1407_v42 = vadd.f32 %v1311_v20, %v8112_v46  ;;  %v1345_v20 = vld [vmem:[%s7576_s26 + $0x230] sm:$0xff] }
 0x171   : > { %v8139_v8 = vpop.xlane.xlu0 %1114  ;;  %6808 = vrcp.f32 %v1778_v4  ;;  %v6791_v55 = vpop.eup %6790 }
 0x172   : > { %2231 = vperm.xlu0 %6469, %v6765_v27   ;;  %6810 = vpow2.f32 %v5991_v50  ;;  %v1780_v27 = vadd.f32 1.0, %v6785_v9  ;;  %v1348_v9 = vld [vmem:[%s7576_s26 + $0x248] sm:$0xff]  ;;  %v5960_v46 = vmul.f32 -1.442695, %v1407_v42 }
 0x173   : > { %v6793_v23 = vpop.eup %6792  ;;  %6812 = vrcp.f32 %v1785_v33 }
 0x174   : > { %v8145_v13 = vpop.xlane.xlu1 %1105  ;;  %2196 = vperm.xlu1 %6468, %v6761_v59   ;;  %v1440_v59 = vadd.f32 %v1344_v0, %v8114_v48  ;;  %v6795_v14 = vpop.eup %6794  ;;  %6814 = vpow2.f32 %v5956_v5  ;;  %v1782_v40 = vadd.f32 1.0, %v6793_v23  ;;  %v1343_v5 = vld [vmem:[%s7576_s26 + $0x220] sm:$0xff] }
 0x175   : > { %v8147_v12 = vpop.xlane.xlu0 %1213  ;;  %v6797_v25 = vpop.eup %6796  ;;  %6816 = vpow2.f32 %v5988_v7  ;;  %v1410_v21 = vadd.f32 %v1314_v11, %v8145_v13  ;;  %v1820_v16 = vadd.f32 1.0, %v6795_v14  ;;  %v1318_v11 = vld [vmem:[%s7576_s26 + $0x158] sm:$0xff] }
 0x176   : > { %2241 = vperm.xlu0 %6469, %v6773_v56   ;;  %v6799_v38 = vpop.eup %6798  ;;  %6818 = vpow2.f32 %v5961_v60  ;;  %v5993_v48 = vmul.f32 -1.442695, %v1440_v59  ;;  %v1444_v60 = vadd.f32 %v1348_v9, %v8131_v51 }
 0x177   : > { %6820 = vrcp.f32 %v1788_v17  ;;  %v1784_v43 = vadd.f32 1.0, %v6799_v38  ;;  %v5963_v32 = vmul.f32 -1.442695, %v1410_v21  ;;  %v1317_v38 = vld [vmem:[%s7576_s26 + $0x150] sm:$0xff] }
 0x178   : > { %v8155_v45 = vpop.xlane.xlu1 %1198  ;;  %2206 = vperm.xlu1 %6468, %v6769_v19   ;;  %v6801_v19 = vpop.eup %6800  ;;  %6822 = vpow2.f32 %v5958_v2 }
 0x179   : > { %v8157_v30 = vpop.xlane.xlu0 %1120  ;;  %v6803_v29 = vpop.eup %6802  ;;  %6824 = vrcp.f32 %v1780_v27 }
 0x17a   : > { %2251 = vperm.xlu0 %6469, %v6781_v61   ;;  %v6805_v56 = vpop.eup %6804  ;;  %6826 = vpow2.f32 %v5993_v48  ;;  %v1790_v28 = vadd.f32 1.0, %v6803_v29  ;;  %v1350_v29 = vld [vmem:[%s7576_s26 + $0x258] sm:$0xff] }
 0x17b   : > { %v6807_v13 = vpop.eup %6806  ;;  %6828 = vrcp.f32 %v1820_v16 }
 0x17c   : > { %v8162_v44 = vpop.xlane.xlu1 %1108  ;;  %2216 = vperm.xlu1 %6468, %v6777_v58   ;;  %v6809_v58 = vpop.eup %6808  ;;  %6830 = vrcp.f32 %v1782_v40  ;;  %v1786_v61 = vadd.f32 1.0, %v6807_v13 }
 0x17d   : > { %v8164_v57 = vpop.xlane.xlu0 %1219  ;;  %v6811_v18 = vpop.eup %6810  ;;  %6832 = vrcp.f32 %v1784_v43 }
 0x17e   : > { %2261 = vperm.xlu0 %6469, %v6789_v34   ;;  %v6813_v62 = vpop.eup %6812  ;;  %6834 = vpow2.f32 %v5963_v32  ;;  %v1822_v10 = vadd.f32 1.0, %v6811_v18  ;;  %v1320_v18 = vld [vmem:[%s7576_s26 + $0x168] sm:$0xff] }
 0x17f   : > { %v6815_v63 = vpop.eup %6814  ;;  %6836 = vrcp.f32 %v1790_v28 }
 0x180   : > { %v1112_v24 = vpop.xlane.xlu1 %1111  ;;  %2226 = vperm.xlu1 %6468, %v6783_v6   ;;  %v6817_v50 = vpop.eup %6816  ;;  %6838 = vpow2.f32 %v5990_v41  ;;  %v1787_v49 = vadd.f32 1.0, %v6815_v63  ;;  %v1315_v63 = vld [vmem:[%s7576_s26 + $0x140] sm:$0xff] }
 0x181   : > { %v8169_v53 = vpop.xlane.xlu0 %1126  ;;  %v1412_v6 = vadd.f32 %v1316_v36, %v1112_v24  ;;  %v6819_v33 = vpop.eup %6818  ;;  %6840 = vrcp.f32 %v1786_v61  ;;  %v1819_v2 = vadd.f32 1.0, %v6817_v50 }
 0x182   : > { %2271 = vperm.xlu0 %6469, %v6797_v25   ;;  %v6821_v0 = vpop.eup %6820  ;;  %6842 = vpow2.f32 %v5995_v26  ;;  %v1792_v17 = vadd.f32 1.0, %v6819_v33  ;;  %v1439_v25 = vadd.f32 %v1343_v5, %v8129_v15  ;;  %v1411_v5 = vadd.f32 %v1315_v63, %v8162_v44 }
 0x183   : > { %v6823_v7 = vpop.eup %6822  ;;  %v5965_v59 = vmul.f32 -1.442695, %v1412_v6  ;;  %6844 = vrcp.f32 %v1822_v10  ;;  %v1319_v10 = vld [vmem:[%s7576_s26 + $0x160] sm:$0xff] }
 0x184   : > { %v8175_v22 = vpop.xlane.xlu1 %1204  ;;  %2236 = vperm.xlu1 %6468, %v6791_v55   ;;  %v1313_v55 = vld [vmem:[%s7576_s26 + $0x130] sm:$0xff]  ;;  %v6825_v23 = vpop.eup %6824  ;;  %6846 = vpow2.f32 %v5960_v46  ;;  %v1789_v47 = vadd.f32 1.0, %v6823_v7  ;;  %v5992_v31 = vmul.f32 -1.442695, %v1439_v25 }
 0x185   : > { %v8177_v52 = vpop.xlane.xlu0 %1225  ;;  %v6827_v14 = vpop.eup %6826  ;;  %6848 = vrcp.f32 %v1787_v49  ;;  %v1409_v24 = vadd.f32 %v1313_v55, %v8137_v3  ;;  %v1413_v3 = vadd.f32 %v1317_v38, %v8139_v8 }
 0x186   : > { %2281 = vperm.xlu0 %6469, %v6805_v56   ;;  %v6829_v27 = vpop.eup %6828  ;;  %6850 = vpow2.f32 %v5965_v59  ;;  %v1824_v15 = vadd.f32 1.0, %v6827_v14  ;;  %v1347_v59 = vld [vmem:[%s7576_s26 + $0x240] sm:$0xff] }
 0x187   : > { %v6831_v21 = vpop.eup %6830  ;;  %6852 = vrcp.f32 %v1792_v17  ;;  %v5962_v43 = vmul.f32 -1.442695, %v1409_v24  ;;  %v5966_v42 = vmul.f32 -1.442695, %v1413_v3  ;;  %v5964_v24 = vmul.f32 -1.442695, %v1411_v5 }
 0x188   : > { %v1118_v4 = vpop.xlane.xlu1 %1117  ;;  %2246 = vperm.xlu1 %6468, %v6801_v19   ;;  %v5997_v19 = vmul.f32 -1.442695, %v1444_v60  ;;  %v6833_v39 = vpop.eup %6832  ;;  %6854 = vrcp.f32 %v1819_v2  ;;  %v1415_v60 = vadd.f32 %v1319_v10, %v8157_v30  ;;  %v1443_v30 = vadd.f32 %v1347_v59, %v8175_v22  ;;  %v6475_v10 = vld [vmem:[%s7583_s11 + $0x4] ss:$24 sps:$4 sm:$0xff]  }
 0x189   : > { %v8182_v37 = vpop.xlane.xlu0 %1132  ;;  %v1414_v16 = vadd.f32 %v1318_v11, %v1118_v4  ;;  %v6835_v40 = vpop.eup %6834  ;;  %6856 = vrcp.f32 %v1789_v47  ;;  %3707 = vmatprep.mubr.bf16.mxu0 %v6475_v10  ;;  %v1351_v59 = vld [vmem:[%s7576_s26 + $0x260] sm:$0xff]  ;;  %v1360_v10 = vld [vmem:[%s7576_s26 + $0x2a8] sm:$0xff] }
 0x18a   : > { %2291 = vperm.xlu0 %6469, %v6813_v62   ;;  %v6837_v56 = vpop.eup %6836  ;;  %6858 = vpow2.f32 %v5997_v19  ;;  %v1794_v8 = vadd.f32 1.0, %v6835_v40  ;;  %v1441_v62 = vadd.f32 %v1345_v20, %v8155_v45  ;;  %v1352_v45 = vld [vmem:[%s7576_s26 + $0x268] sm:$0xff]  ;;  %v1354_v40 = vld [vmem:[%s7576_s26 + $0x278] sm:$0xff]  ;;  %v5996_v22 = vmul.f32 -1.442695, %v1443_v30 }
 0x18b   : > { %v6839_v32 = vpop.eup %6838  ;;  %v5967_v28 = vmul.f32 -1.442695, %v1414_v16  ;;  %6860 = vrcp.f32 %v1824_v15  ;;  %v1448_v14 = vadd.f32 %v1352_v45, %v8164_v57 }
 0x18c   : > { %v8186_v1 = vpop.xlane.xlu1 %1210  ;;  %2256 = vperm.xlu1 %6468, %v6809_v58   ;;  %v1446_v58 = vadd.f32 %v1350_v29, %v8147_v12  ;;  %v6841_v36 = vpop.eup %6840  ;;  %6862 = vpow2.f32 %v5992_v31  ;;  %v1821_v4 = vadd.f32 1.0, %v6839_v32  ;;  %v5994_v49 = vmul.f32 -1.442695, %v1441_v62 }
 0x18d   : > { %v8188_v34 = vpop.xlane.xlu0 %1231  ;;  %v6843_v41 = vpop.eup %6842  ;;  %6864 = vpow2.f32 %v5962_v43  ;;  %v6001_v16 = vmul.f32 -1.442695, %v1448_v14  ;;  %v1349_v43 = vld [vmem:[%s7576_s26 + $0x250] sm:$0xff] }
 0x18e   : > { %2306 = vperm.xlu0 %6469, %v6821_v0   ;;  %v6845_v61 = vpop.eup %6844  ;;  %v5999_v50 = vmul.f32 -1.442695, %v1446_v58  ;;  %6866 = vpow2.f32 %v5967_v28  ;;  %v1826_v46 = vadd.f32 1.0, %v6843_v41  ;;  %v6472_v58 = vld [vmem:[%s7583_s11 + $0x244] ss:$24 sps:$4 sm:$0xff]  }
 0x18f   : > { %v6847_v6 = vpop.eup %6846  ;;  %6868 = vrcp.f32 %v1794_v8  ;;  %3803 = vmatprep.mubr.bf16.mxu1 %v6472_v58 }
 0x190   : > { %v1124_v48 = vpop.xlane.xlu1 %1123  ;;  %2266 = vperm.xlu1 %6468, %v6825_v23   ;;  %v6849_v33 = vpop.eup %6848  ;;  %6870 = vpow2.f32 %v5966_v42  ;;  %v1791_v55 = vadd.f32 1.0, %v6847_v6  ;;  %v1324_v42 = vld [vmem:[%s7576_s26 + $0x188] sm:$0xff]  ;;  %v1321_v6 = vld [vmem:[%s7576_s26 + $0x170] sm:$0xff] }
 0x191   : > { %v8196_v51 = vpop.xlane.xlu0 %1138  ;;  %v1416_v9 = vadd.f32 %v1320_v18, %v1124_v48  ;;  %v6851_v0 = vpop.eup %6850  ;;  %6872 = vrcp.f32 %v1821_v4  ;;  %v5968_v48 = vmul.f32 -1.442695, %v1415_v60  ;;  %v1445_v4 = vadd.f32 %v1349_v43, %v8186_v1  ;;  %v1356_v1 = vld [vmem:[%s7576_s26 + $0x288] sm:$0xff] }
 0x192   : > { %2466 = vperm.xlu0 %6469, %v6829_v27   ;;  %v6853_v7 = vpop.eup %6852  ;;  %6874 = vpow2.f32 %v5999_v50  ;;  %v1796_v44 = vadd.f32 1.0, %v6851_v0  ;;  %v1322_v27 = vld [vmem:[%s7576_s26 + $0x178] sm:$0xff]  ;;  %v1417_v5 = vadd.f32 %v1321_v6, %v8169_v53 }
 0x193   : > { %v6855_v11 = vpop.eup %6854  ;;  %v5969_v2 = vmul.f32 -1.442695, %v1416_v9  ;;  %6876 = vrcp.f32 %v1826_v46 }
 0x194   : > { %v8201_v13 = vpop.xlane.xlu1 %1216  ;;  %2276 = vperm.xlu1 %6468, %v6831_v21   ;;  %v6857_v25 = vpop.eup %6856  ;;  %6878 = vpow2.f32 %v5994_v49  ;;  %v5970_v30 = vmul.f32 -1.442695, %v1417_v5 }
 0x195   : > { %v8203_v54 = vpop.xlane.xlu0 %1237  ;;  %v6859_v47 = vpop.eup %6858  ;;  %6880 = vrcp.f32 %v1791_v55 }
 0x196   : > { %2316 = vperm.xlu0 %6469, %v6837_v56   ;;  %v6861_v38 = vpop.eup %6860  ;;  %6882 = vpow2.f32 %v5969_v2  ;;  %v1828_v29 = vadd.f32 1.0, %v6859_v47  ;;  %v1326_v47 = vld [vmem:[%s7576_s26 + $0x198] sm:$0xff] }
 0x197   : > { %v6863_v57 = vpop.eup %6862  ;;  %6884 = vrcp.f32 %v1796_v44 }
 0x198   : > { %v1130_v26 = vpop.xlane.xlu1 %1129  ;;  %2286 = vperm.xlu1 %6468, %v6833_v39   ;;  %v6865_v15 = vpop.eup %6864  ;;  %6886 = vpow2.f32 %v5964_v24  ;;  %v1823_v56 = vadd.f32 1.0, %v6863_v57  ;;  %v1358_v57 = vld [vmem:[%s7576_s26 + $0x298] sm:$0xff] }
 0x199   : > { %v8209_v12 = vpop.xlane.xlu0 %1144  ;;  %v1418_v39 = vadd.f32 %v1322_v27, %v1130_v26  ;;  %v6867_v31 = vpop.eup %6866  ;;  %6888 = vpow2.f32 %v5968_v48 }
 0x19a   : > { %2476 = vperm.xlu0 %6469, %v6845_v61   ;;  %v6869_v3 = vpop.eup %6868  ;;  %6890 = vpow2.f32 %v6001_v16  ;;  %v1798_v41 = vadd.f32 1.0, %v6867_v31  ;;  %v1793_v61 = vadd.f32 1.0, %v6865_v15 }
 0x19b   : > { %v6871_v28 = vpop.eup %6870  ;;  %v5971_v8 = vmul.f32 -1.442695, %v1418_v39  ;;  %6892 = vrcp.f32 %v1828_v29 }
 0x19c   : > { %v8216_v23 = vpop.xlane.xlu1 %1222  ;;  %2296 = vperm.xlu1 %6468, %v6841_v36   ;;  %v1450_v36 = vadd.f32 %v1354_v40, %v8177_v52  ;;  %v6873_v18 = vpop.eup %6872  ;;  %6894 = vpow2.f32 %v5996_v22  ;;  %v1797_v26 = vadd.f32 1.0, %v6871_v28  ;;  %v1323_v22 = vld [vmem:[%s7576_s26 + $0x180] sm:$0xff]  ;;  %v1353_v28 = vld [vmem:[%s7576_s26 + $0x270] sm:$0xff] }
 0x19d   : > { %v8218_v17 = vpop.xlane.xlu0 %1243  ;;  %v6875_v62 = vpop.eup %6874  ;;  %6896 = vrcp.f32 %v1823_v56  ;;  %v1454_v56 = vadd.f32 %v1358_v57, %v8203_v54 }
 0x19e   : > { %2326 = vperm.xlu0 %6469, %v6853_v7   ;;  %v6877_v63 = vpop.eup %6876  ;;  %6898 = vpow2.f32 %v5971_v8  ;;  %v1830_v0 = vadd.f32 1.0, %v6875_v62  ;;  %v5998_v7 = vmul.f32 -1.442695, %v1445_v4 }
 0x19f   : > { %v6879_v9 = vpop.eup %6878  ;;  %6900 = vrcp.f32 %v1798_v41  ;;  %v1419_v41 = vadd.f32 %v1323_v22, %v8182_v37 }
 0x1a0   : > { %v1136_v21 = vpop.xlane.xlu1 %1135  ;;  %2301 = vperm.xlu1 %6468, %v6849_v33   ;;  %v6003_v33 = vmul.f32 -1.442695, %v1450_v36  ;;  %v6881_v45 = vpop.eup %6880  ;;  %6902 = vrcp.f32 %v1793_v61  ;;  %v1825_v60 = vadd.f32 1.0, %v6879_v9  ;;  %v1328_v61 = vld [vmem:[%s7576_s26 + $0x1a8] sm:$0xff] }
 0x1a1   : > { %v8223_v19 = vpop.xlane.xlu0 %1150  ;;  %v1420_v46 = vadd.f32 %v1324_v42, %v1136_v21  ;;  %v6883_v49 = vpop.eup %6882  ;;  %6904 = vrcp.f32 %v1797_v26  ;;  %v1449_v26 = vadd.f32 %v1353_v28, %v8216_v23 }
 0x1a2   : > { %2486 = vperm.xlu0 %6469, %v6861_v38   ;;  %v6885_v55 = vpop.eup %6884  ;;  %6906 = vpow2.f32 %v6003_v33  ;;  %v1800_v53 = vadd.f32 1.0, %v6883_v49  ;;  %v1447_v38 = vadd.f32 %v1351_v59, %v8201_v13  ;;  %v1325_v49 = vld [vmem:[%s7576_s26 + $0x190] sm:$0xff]  ;;  %v1355_v59 = vld [vmem:[%s7576_s26 + $0x280] sm:$0xff] }
 0x1a3   : > { %v6887_v2 = vpop.eup %6886  ;;  %v5973_v44 = vmul.f32 -1.442695, %v1420_v46  ;;  %6908 = vrcp.f32 %v1830_v0  ;;  %v5972_v46 = vmul.f32 -1.442695, %v1419_v41  ;;  %v6002_v23 = vmul.f32 -1.442695, %v1449_v26 }
 0x1a4   : > { %v8227_v20 = vpop.xlane.xlu1 %1228  ;;  %2461 = vperm.xlu1 %6468, %v6855_v11   ;;  %v6889_v27 = vpop.eup %6888  ;;  %6910 = vpow2.f32 %v5998_v7  ;;  %v1795_v21 = vadd.f32 1.0, %v6887_v2  ;;  %v6000_v13 = vmul.f32 -1.442695, %v1447_v38  ;;  %v1456_v7 = vadd.f32 %v1360_v10, %v8218_v17 }
 0x1a5   : > { %v8229_v32 = vpop.xlane.xlu0 %1249  ;;  %v6891_v24 = vpop.eup %6890  ;;  %6912 = vrcp.f32 %v1825_v60 }
 0x1a6   : > { %2336 = vperm.xlu0 %6469, %v6869_v3   ;;  %v6893_v48 = vpop.eup %6892  ;;  %6914 = vpow2.f32 %v5973_v44  ;;  %v1832_v31 = vadd.f32 1.0, %v6891_v24  ;;  %v1330_v24 = vld [vmem:[%s7576_s26 + $0x1b8] sm:$0xff]  ;;  %v6009_v38 = vmul.f32 -1.442695, %v1456_v7 }
 0x1a7   : > { %6916 = vrcp.f32 %v1800_v53 }
 0x1a8   : > { %v1142_v50 = vpop.xlane.xlu1 %1141  ;;  %2311 = vperm.xlu1 %6468, %v6857_v25   ;;  %v1452_v25 = vadd.f32 %v1356_v1, %v8188_v34  ;;  %v6895_v34 = vpop.eup %6894  ;;  %6918 = vpow2.f32 %v5970_v30 }
 0x1a9   : > { %v8236_v52 = vpop.xlane.xlu0 %1156  ;;  %v1422_v29 = vadd.f32 %v1326_v47, %v1142_v50  ;;  %v6897_v40 = vpop.eup %6896  ;;  %6920 = vrcp.f32 %v1795_v21  ;;  %v1827_v58 = vadd.f32 1.0, %v6895_v34  ;;  %v1799_v50 = vadd.f32 1.0, %v6889_v27 }
 0x1aa   : > { %2496 = vperm.xlu0 %6469, %v6877_v63   ;;  %v6005_v15 = vmul.f32 -1.442695, %v1452_v25  ;;  %v6899_v3 = vpop.eup %6898  ;;  %v6007_v63 = vmul.f32 -1.442695, %v1454_v56  ;;  %v1421_v27 = vadd.f32 %v1325_v49, %v8196_v51 }
 0x1ab   : > { %v6901_v43 = vpop.eup %6900  ;;  %v5975_v42 = vmul.f32 -1.442695, %v1422_v29  ;;  %v1802_v54 = vadd.f32 1.0, %v6899_v3  ;;  %v1362_v3 = vld [vmem:[%s7576_s26 + $0x2b8] sm:$0xff] }
 0x1ac   : > { %v8242_v11 = vpop.xlane.xlu1 %1234  ;;  %2471 = vperm.xlu1 %6468, %v6873_v18   ;;  %v6903_v18 = vpop.eup %6902  ;;  %6922 = vpow2.f32 %v6005_v15  ;;  %v5974_v29 = vmul.f32 -1.442695, %v1421_v27 }
 0x1ad   : > { %v8244_v14 = vpop.xlane.xlu0 %1255  ;;  %v8260_v62 = vpop.eup %6904  ;;  %6924 = vrcp.f32 %v1832_v31 }
 0x1ae   : > { %2346 = vperm.xlu0 %6469, %v6885_v55   ;;  %v6907_v4 = vpop.eup %6906  ;;  %6926 = vpow2.f32 %v6000_v13 }
 0x1af   : > { %v6909_v6 = vpop.eup %6908  ;;  %6928 = vrcp.f32 %v1827_v58  ;;  %v1834_v1 = vadd.f32 1.0, %v6907_v4 }
 0x1b0   : > { %v1148_v16 = vpop.xlane.xlu1 %1147  ;;  %2321 = vperm.xlu1 %6468, %v6881_v45   ;;  %v6911_v33 = vpop.eup %6910  ;;  %6930 = vpow2.f32 %v5975_v42  ;;  %v1458_v42 = vadd.f32 %v1362_v3, %v8229_v32 }
 0x1b1   : > { %v8250_v39 = vpop.xlane.xlu0 %1162  ;;  %v1424_v45 = vadd.f32 %v1328_v61, %v1148_v16  ;;  %v6913_v0 = vpop.eup %6912  ;;  %6932 = vrcp.f32 %v1802_v54  ;;  %v1829_v60 = vadd.f32 1.0, %v6911_v33  ;;  %v1327_v16 = vld [vmem:[%s7576_s26 + $0x1a0] sm:$0xff] }
 0x1b2   : > { %2506 = vperm.xlu0 %6469, %v6893_v48   ;;  %v6915_v5 = vpop.eup %6914  ;;  %6934 = vpow2.f32 %v6007_v63  ;;  %v1451_v48 = vadd.f32 %v1355_v59, %v8227_v20  ;;  %v1423_v13 = vadd.f32 %v1327_v16, %v8209_v12  ;;  %v1332_v63 = vld [vmem:[%s7576_s26 + $0x1c8] sm:$0xff] }
 0x1b3   : > { %v6917_v55 = vpop.eup %6916  ;;  %6936 = vrcp.f32 %v1799_v50  ;;  %v5977_v53 = vmul.f32 -1.442695, %v1424_v45  ;;  %v1804_v17 = vadd.f32 1.0, %v6915_v5  ;;  %v1359_v5 = vld [vmem:[%s7576_s26 + $0x2a0] sm:$0xff] }
 0x1b4   : > { %v8255_v36 = vpop.xlane.xlu1 %1240  ;;  %2481 = vperm.xlu1 %6468, %v6897_v40   ;;  %v6919_v44 = vpop.eup %6918  ;;  %6938 = vpow2.f32 %v5972_v46  ;;  %v6004_v56 = vmul.f32 -1.442695, %v1451_v48  ;;  %v5976_v50 = vmul.f32 -1.442695, %v1423_v13  ;;  %v6011_v46 = vmul.f32 -1.442695, %v1458_v42 }
 0x1b5   : > { %v8257_v8 = vpop.xlane.xlu0 %1261  ;;  %v6921_v47 = vpop.eup %6920  ;;  %6940 = vrcp.f32 %v1834_v1  ;;  %v1801_v57 = vadd.f32 1.0, %v6919_v44  ;;  %v1364_v1 = vld [vmem:[%s7576_s26 + $0x2c8] sm:$0xff] }
 0x1b6   : > { %2356 = vperm.xlu0 %6469, %v6901_v43   ;;  %v6923_v30 = vpop.eup %6922  ;;  %6942 = vpow2.f32 %v6002_v23  ;;  %v1357_v43 = vld [vmem:[%s7576_s26 + $0x290] sm:$0xff]  ;;  %v1460_v44 = vadd.f32 %v1364_v1, %v8244_v14 }
 0x1b7   : > { %v6925_v21 = vpop.eup %6924  ;;  %6944 = vrcp.f32 %v1829_v60  ;;  %v1836_v22 = vadd.f32 1.0, %v6923_v30  ;;  %v1453_v12 = vadd.f32 %v1357_v43, %v8242_v11 }
 0x1b8   : > { %v1154_v9 = vpop.xlane.xlu1 %1153  ;;  %2331 = vperm.xlu1 %6468, %v6903_v18   ;;  %v6927_v15 = vpop.eup %6926  ;;  %6946 = vpow2.f32 %v5977_v53 }
 0x1b9   : > { %v8265_v37 = vpop.xlane.xlu0 %1168  ;;  %v1426_v40 = vadd.f32 %v1330_v24, %v1154_v9  ;;  %v6929_v31 = vpop.eup %6928  ;;  %6948 = vrcp.f32 %v1804_v17  ;;  %v1831_v28 = vadd.f32 1.0, %v6927_v15  ;;  %v1455_v17 = vadd.f32 %v1359_v5, %v8255_v36  ;;  %v1334_v24 = vld [vmem:[%s7576_s26 + $0x1d8] sm:$0xff] }
 0x1ba   : > { %2516 = vperm.xlu0 %6469, %v6909_v6   ;;  %v6931_v20 = vpop.eup %6930  ;;  %6950 = vpow2.f32 %v6009_v38  ;;  %v6013_v15 = vmul.f32 -1.442695, %v1460_v44  ;;  %v1363_v44 = vld [vmem:[%s7576_s26 + $0x2c0] sm:$0xff] }
 0x1bb   : > { %v6933_v58 = vpop.eup %6932  ;;  %6952 = vrcp.f32 %v1801_v57  ;;  %v5979_v54 = vmul.f32 -1.442695, %v1426_v40  ;;  %v1806_v4 = vadd.f32 1.0, %v6931_v20  ;;  %v6008_v36 = vmul.f32 -1.442695, %v1455_v17  ;;  %v1338_v17 = vld [vmem:[%s7576_s26 + $0x1f8] sm:$0xff] }
 0x1bc   : > { %v8270_v2 = vpop.xlane.xlu1 %1246  ;;  %2491 = vperm.xlu1 %6468, %v6913_v0   ;;  %v6935_v41 = vpop.eup %6934  ;;  %6954 = vpow2.f32 %v5974_v29  ;;  %v6006_v0 = vmul.f32 -1.442695, %v1453_v12 }
 0x1bd   : > { %v8272_v25 = vpop.xlane.xlu0 %1267  ;;  %v6937_v61 = vpop.eup %6936  ;;  %6956 = vrcp.f32 %v1836_v22  ;;  %v1838_v9 = vadd.f32 1.0, %v6935_v41 }
 0x1be   : > { %2366 = vperm.xlu0 %6469, %v6917_v55   ;;  %v6939_v6 = vpop.eup %6938  ;;  %6958 = vpow2.f32 %v6004_v56  ;;  %v1329_v55 = vld [vmem:[%s7576_s26 + $0x1b0] sm:$0xff] }
 0x1bf   : > { %v6941_v10 = vpop.eup %6940  ;;  %6960 = vrcp.f32 %v1831_v28  ;;  %v1803_v38 = vadd.f32 1.0, %v6939_v6  ;;  %v1425_v48 = vadd.f32 %v1329_v55, %v8223_v19  ;;  %v1361_v28 = vld [vmem:[%s7576_s26 + $0x2b0] sm:$0xff] }
 0x1c0   : > { %v1160_v34 = vpop.xlane.xlu1 %1159  ;;  %2341 = vperm.xlu1 %6468, %v6921_v47   ;;  %v6943_v32 = vpop.eup %6942  ;;  %6962 = vpow2.f32 %v5979_v54 }
 0x1c1   : > { %v8278_v51 = vpop.xlane.xlu0 %1174  ;;  %v1428_v45 = vadd.f32 %v1332_v63, %v1160_v34  ;;  %v6945_v11 = vpop.eup %6944  ;;  %6964 = vrcp.f32 %v1806_v4  ;;  %v1833_v7 = vadd.f32 1.0, %v6943_v32  ;;  %v5978_v19 = vmul.f32 -1.442695, %v1425_v48  ;;  %v1368_v32 = vld [vmem:[%s7576_s26 + $0x2e8] sm:$0xff] }
 0x1c2   : > { %2526 = vperm.xlu0 %6469, %v6925_v21   ;;  %v6947_v49 = vpop.eup %6946  ;;  %6966 = vpow2.f32 %v5976_v50  ;;  %v1331_v50 = vld [vmem:[%s7576_s26 + $0x1c0] sm:$0xff] }
 0x1c3   : > { %v6949_v23 = vpop.eup %6948  ;;  %6968 = vrcp.f32 %v1838_v9  ;;  %v5981_v27 = vmul.f32 -1.442695, %v1428_v45  ;;  %v1808_v47 = vadd.f32 1.0, %v6947_v49  ;;  %v1427_v49 = vadd.f32 %v1331_v50, %v8236_v52 }
 0x1c4   : > { %v8283_v18 = vpop.xlane.xlu1 %1252  ;;  %2501 = vperm.xlu1 %6468, %v6929_v31   ;;  %v6951_v59 = vpop.eup %6950  ;;  %6970 = vpow2.f32 %v6011_v46  ;;  %v1366_v31 = vld [vmem:[%s7576_s26 + $0x2d8] sm:$0xff] }
 0x1c5   : > { %v8288_v26 = vpop.xlane.xlu0 %1273  ;;  %v6953_v53 = vpop.eup %6952  ;;  %6972 = vpow2.f32 %v6006_v0  ;;  %v1840_v57 = vadd.f32 1.0, %v6951_v59 }
 0x1c6   : > { %2376 = vperm.xlu0 %6469, %v6933_v58   ;;  %v6955_v30 = vpop.eup %6954  ;;  %6974 = vrcp.f32 %v1833_v7  ;;  %v1462_v58 = vadd.f32 %v1366_v31, %v8257_v8 }
 0x1c7   : > { %v6957_v21 = vpop.eup %6956  ;;  %6976 = vpow2.f32 %v5981_v27  ;;  %v1805_v12 = vadd.f32 1.0, %v6955_v30 }
 0x1c8   : > { %v1166_v33 = vpop.xlane.xlu1 %1165  ;;  %2351 = vperm.xlu1 %6468, %v8260_v62   ;;  %v6959_v14 = vpop.eup %6958  ;;  %6978 = vrcp.f32 %v1808_v47  ;;  %v2043_v47 = vld [vmem:[%s7581_s24] sm:$0xff] }
 0x1c9   : > { %v1430_v29 = vadd.f32 %v1334_v24, %v1166_v33  ;;  %v6961_v40 = vpop.eup %6960  ;;  %6980 = vrcp.f32 %v1803_v38  ;;  %v1835_v20 = vadd.f32 1.0, %v6959_v14  ;;  %v6015_v33 = vmul.f32 -1.442695, %v1462_v58  ;;  %v2044_v24 = vld [vmem:[%s7581_s24 + $0x8] sm:$0xff] }
 0x1ca   : > { %2536 = vperm.xlu0 %6469, %v6941_v10   ;;  %v6963_v22 = vpop.eup %6962  ;;  %6982 = vrcp.f32 %v1840_v57  ;;  %v1457_v10 = vadd.f32 %v1361_v28, %v8270_v2 }
 0x1cb   : > { %v6965_v3 = vpop.eup %6964  ;;  %6984 = vpow2.f32 %v6013_v15  ;;  %v5983_v41 = vmul.f32 -1.442695, %v1430_v29  ;;  %v1810_v54 = vadd.f32 1.0, %v6963_v22  ;;  %v1333_v15 = vld [vmem:[%s7576_s26 + $0x1d0] sm:$0xff] }
 0x1cc   : > { %v8294_v60 = vpop.xlane.xlu1 %1258  ;;  %2511 = vperm.xlu1 %6468, %v6945_v11   ;;  %v6967_v43 = vpop.eup %6966  ;;  %6986 = vpow2.f32 %v6008_v36  ;;  %v6010_v5 = vmul.f32 -1.442695, %v1457_v10 }
 0x1cd   : > { %v8296_v62 = vpop.permute.xlu0 %2141  ;;  %v6969_v42 = vpop.eup %6968  ;;  %6988 = vpow2.f32 %v5978_v19  ;;  %v1807_v6 = vadd.f32 1.0, %v6967_v43  ;;  %v1370_v19 = vld [vmem:[%s7576_s26 + $0x2f8] sm:$0xff] }
 0x1ce   : > { %2386 = vperm.xlu0 %6469, %v6949_v23   ;;  %v6971_v4 = vpop.eup %6970  ;;  %6990 = vrcp.f32 %v1835_v20  ;;  %v1464_v23 = vadd.f32 %v1368_v32, %v8272_v25  ;;  %v5980_v25 = vmul.f32 -1.442695, %v1427_v49  ;;  %v2619_v29 = vmul.f32 %v8296_v62, %v2043_v47 }
 0x1cf   : > { %v6973_v63 = vpop.eup %6972  ;;  %6992 = vpow2.f32 %v5983_v41  ;;  %v1842_v11 = vadd.f32 1.0, %v6971_v4  ;;  %v1429_v41 = vadd.f32 %v1333_v15, %v8250_v39  ;;  %v1466_v4 = vadd.f32 %v1370_v19, %v8288_v26 }
 0x1d0   : > { %v1172_v16 = vpop.xlane.xlu1 %1171  ;;  %2361 = vperm.xlu1 %6468, %v6937_v61   ;;  %v1336_v61 = vld [vmem:[%s7576_s26 + $0x1e8] sm:$0xff]  ;;  %v6975_v45 = vpop.eup %6974  ;;  %6994 = vrcp.f32 %v1810_v54  ;;  %v1837_v1 = vadd.f32 1.0, %v6973_v63  ;;  %v6017_v48 = vmul.f32 -1.442695, %v1464_v23 }
 0x1d1   : > { %v8302_v34 = vpop.permute.xlu0 %2156  ;;  %v1432_v46 = vadd.f32 %v1336_v61, %v1172_v16  ;;  %v6977_v0 = vpop.eup %6976  ;;  %6996 = vrcp.f32 %v1805_v12  ;;  %v1365_v12 = vld [vmem:[%s7576_s26 + $0x2d0] sm:$0xff] }
 0x1d2   : > { %2546 = vperm.xlu0 %6469, %v6957_v21   ;;  %v6979_v2 = vpop.eup %6978  ;;  %6998 = vrcp.f32 %v1807_v6  ;;  %v1812_v52 = vadd.f32 1.0, %v6977_v0  ;;  %v1459_v21 = vadd.f32 %v1363_v44, %v8283_v18  ;;  %v2045_v18 = vld [vmem:[%s7581_s24 + $0x10] sm:$0xff] }
 0x1d3   : > { %v6981_v59 = vpop.eup %6980  ;;  %7000 = vpow2.f32 %v6015_v33  ;;  %v5985_v27 = vmul.f32 -1.442695, %v1432_v46  ;;  %v2047_v33 = vld [vmem:[%s7581_s24 + $0x20] sm:$0xff] }
 0x1d4   : > { %v8305_v13 = vpop.xlane.xlu1 %1264  ;;  %2521 = vperm.xlu1 %6468, %v6961_v40   ;;  %7002 = vrcp.f32 %v1842_v11  ;;  %v6012_v62 = vmul.f32 -1.442695, %v1459_v21  ;;  %v1461_v11 = vadd.f32 %v1365_v12, %v8294_v60  ;;  %v2050_v60 = vld [vmem:[%s7581_s24 + $0x38] sm:$0xff]  ;;  %v1367_v21 = vld [vmem:[%s7576_s26 + $0x2e0] sm:$0xff] }
 0x1d5   : > { %v8307_v56 = vpop.permute.xlu0 %2166  ;;  %7004 = vrcp.f32 %v1837_v1 }
 0x1d6   : > { %2396 = vperm.xlu0 %6469, %v6965_v3   ;;  %7006 = vpow2.f32 %v6010_v5  ;;  %v2046_v3 = vld [vmem:[%s7581_s24 + $0x18] sm:$0xff]  ;;  %v6019_v5 = vmul.f32 -1.442695, %v1466_v4 }
 0x1d7   : > { %7008 = vpow2.f32 %v5985_v27  ;;  %v2622_v63 = vmul.f32 %v8302_v34, %v2046_v3 }
 0x1d8   : > { %v1178_v9 = vpop.xlane.xlu1 %1177  ;;  %2371 = vperm.xlu1 %6468, %v6953_v53   ;;  %v6983_v53 = vpop.eup %6982  ;;  %7010 = vrcp.f32 %v1812_v52 }
 0x1d9   : > { %v8314_v8 = vpop.permute.xlu0 %2171  ;;  %v6985_v30 = vpop.eup %6984  ;;  %v1434_v40 = vadd.f32 %v1338_v17, %v1178_v9  ;;  %7012 = vpow2.f32 %v5980_v25  ;;  %v2048_v9 = vld [vmem:[%s7581_s24 + $0x28] sm:$0xff] }
 0x1da   : > { %2556 = vperm.xlu0 %6469, %v6969_v42   ;;  %v6987_v38 = vpop.eup %6986  ;;  %v1844_v22 = vadd.f32 1.0, %v6985_v30  ;;  %7014 = vpow2.f32 %v6017_v48  ;;  %v2624_v23 = vmul.f32 %v8307_v56, %v2048_v9  ;;  %v1369_v9 = vld [vmem:[%s7576_s26 + $0x2f0] sm:$0xff] }
 0x1db   : > { %v6989_v14 = vpop.eup %6988  ;;  %v1839_v43 = vadd.f32 1.0, %v6987_v38  ;;  %v5987_v6 = vmul.f32 -1.442695, %v1434_v40  ;;  %v2052_v40 = vld [vmem:[%s7581_s24 + $0x48] sm:$0xff] }
 0x1dc   : > { %v8319_v7 = vpop.xlane.xlu1 %1270  ;;  %2531 = vperm.xlu1 %6468, %v6975_v45   ;;  %v6991_v31 = vpop.eup %6990  ;;  %7016 = vrcp.f32 %v1844_v22  ;;  %v1809_v46 = vadd.f32 1.0, %v6989_v14  ;;  %v5982_v45 = vmul.f32 -1.442695, %v1429_v41 }
 0x1dd   : > { %v8321_v55 = vpop.permute.xlu0 %2181  ;;  %v6993_v20 = vpop.eup %6992  ;;  %7018 = vrcp.f32 %v1839_v43  ;;  %v1337_v43 = vld [vmem:[%s7576_s26 + $0x1f0] sm:$0xff] }
 0x1de   : > { %2406 = vperm.xlu0 %6469, %v6979_v2   ;;  %v6995_v28 = vpop.eup %6994  ;;  %v1814_v39 = vadd.f32 1.0, %v6993_v20  ;;  %7020 = vpow2.f32 %v6012_v62  ;;  %v1335_v2 = vld [vmem:[%s7576_s26 + $0x1e0] sm:$0xff] }
 0x1df   : > { %v6997_v61 = vpop.eup %6996  ;;  %7022 = vpow2.f32 %v5987_v6  ;;  %v1431_v56 = vadd.f32 %v1335_v2, %v8265_v37  ;;  %v2051_v37 = vld [vmem:[%s7581_s24 + $0x40] sm:$0xff] }
 0x1e0   : > { %v2147_v57 = vpop.permute.xlu1 %2146  ;;  %2381 = vperm.xlu1 %6468, %v6981_v59   ;;  %v8341_v10 = vpop.eup %6998  ;;  %7024 = vrcp.f32 %v1814_v39 }
 0x1e1   : > { %v8328_v16 = vpop.permute.xlu0 %2191  ;;  %v2620_v36 = vmul.f32 %v2147_v57, %v2044_v24  ;;  %v7001_v32 = vpop.eup %7000  ;;  %7026 = vrcp.f32 %v1809_v46  ;;  %v6014_v24 = vmul.f32 -1.442695, %v1461_v11  ;;  %v5984_v22 = vmul.f32 -1.442695, %v1431_v56 }
 0x1e2   : > { %2566 = vperm.xlu0 %6469, %v6983_v53   ;;  %v7003_v34 = vpop.eup %7002  ;;  %v1846_v27 = vadd.f32 1.0, %v7001_v32  ;;  %v2049_v53 = vld [vmem:[%s7581_s24 + $0x30] sm:$0xff]  ;;  %7028 = vpow2.f32 %v5982_v45 }
 0x1e3   : > { %v2715_v58 = vpack.c.bf16 %v2620_v36, %v2619_v29  ;;  %v7005_v49 = vpop.eup %7004  ;;  %7030 = vpow2.f32 %v6019_v5  ;;  %v2625_v57 = vmul.f32 %v8314_v8, %v2049_v53  ;;  %v1463_v8 = vadd.f32 %v1367_v21, %v8305_v13  ;;  %v2054_v13 = vld [vmem:[%s7581_s24 + $0x58] sm:$0xff] }
 0x1e4   : > { %v2152_v42 = vpop.permute.xlu1 %2151  ;;  %2541 = vperm.xlu1 %6468, %v6991_v31   ;;  %v7007_v44 = vpop.eup %7006  ;;  %7032 = vrcp.f32 %v1846_v27 }
 0x1e5   : > { %v8336_v54 = vpop.permute.xlu0 %2201  ;;  %v2621_v50 = vmul.f32 %v2152_v42, %v2045_v18  ;;  %3676 = vmatpush1.bf16.msra.mxu0 %v2715_v58  ;;  %6423 = vmatpush1.bf16.msra.mxu1 %v2715_v58  ;;  %v7009_v52 = vpop.eup %7008  ;;  %v1841_v48 = vadd.f32 1.0, %v7007_v44  ;;  %7034 = vpow2.f32 %v6014_v24  ;;  %v2627_v58 = vmul.f32 %v8321_v55, %v2051_v37  ;;  %v2053_v42 = vld [vmem:[%s7581_s24 + $0x50] sm:$0xff] }
 0x1e6   : > { %2416 = vperm.xlu0 %6469, %v6995_v28   ;;  %3677 = vmatprep.subr.bf16.mxu0 %v7194_v35  ;;  %v7011_v17 = vpop.eup %7010  ;;  %v1816_v29 = vadd.f32 1.0, %v7009_v52  ;;  %v1433_v55 = vadd.f32 %v1337_v43, %v8278_v51  ;;  %v2055_v51 = vld [vmem:[%s7581_s24 + $0x60] sm:$0xff]  ;;  %v2058_v52 = vld [vmem:[%s7581_s24 + $0x78] sm:$0xff] }
 0x1e7   : > { %v2716_v26 = vpack.c.bf16 %v2622_v63, %v2621_v50  ;;  %6408 = vmatprep.subr.bf16.mxu1 %v7194_v35  ;;  %v7013_v38 = vpop.eup %7012  ;;  %7036 = vrcp.f32 %v1841_v48  ;;  %v6016_v63 = vmul.f32 -1.442695, %v1463_v8 }
 0x1e8   : > { %v2162_v0 = vpop.permute.xlu1 %2161  ;;  %2391 = vperm.xlu1 %6468, %v6997_v61   ;;  %v7015_v15 = vpop.eup %7014  ;;  %v1811_v20 = vadd.f32 1.0, %v7013_v38  ;;  %7038 = vrcp.f32 %v1816_v29 }
 0x1e9   : > { %v8348_v1 = vpop.permute.xlu0 %2211  ;;  %v2623_v59 = vmul.f32 %v2162_v0, %v2047_v33  ;;  %3678 = vmatpush1.bf16.msra.mxu0 %v2716_v26  ;;  %6424 = vmatpush1.bf16.msra.mxu1 %v2716_v26  ;;  %v7017_v31 = vpop.eup %7016  ;;  %v1848_v62 = vadd.f32 1.0, %v7015_v15  ;;  %7040 = vpow2.f32 %v5984_v22  ;;  %v2629_v33 = vmul.f32 %v8328_v16, %v2053_v42 }
 0x1ea   : > { %2576 = vperm.xlu0 %6469, %v7003_v34   ;;  %3679 = vmatprep.subr.bf16.mxu0 %v7194_v35  ;;  %v7019_v18 = vpop.eup %7018  ;;  %7042 = vrcp.f32 %v1811_v20  ;;  %v2056_v34 = vld [vmem:[%s7581_s24 + $0x68] sm:$0xff]  ;;  %v1465_v16 = vadd.f32 %v1369_v9, %v8319_v7 }
 0x1eb   : > { %v2717_v47 = vpack.c.bf16 %v2624_v23, %v2623_v59  ;;  %6409 = vmatprep.subr.bf16.mxu1 %v7194_v35  ;;  %v7021_v41 = vpop.eup %7020  ;;  %7044 = vrcp.f32 %v1848_v62  ;;  %v2631_v59 = vmul.f32 %v8336_v54, %v2055_v51 }
 0x1ec   : > { %v2177_v30 = vpop.permute.xlu1 %2176  ;;  %2551 = vperm.xlu1 %6468, %v7005_v49   ;;  %v7023_v61 = vpop.eup %7022  ;;  %v1843_v39 = vadd.f32 1.0, %v7021_v41  ;;  %v5986_v49 = vmul.f32 -1.442695, %v1433_v55  ;;  %7046 = vpow2.f32 %v6016_v63  ;;  %v6018_v54 = vmul.f32 -1.442695, %v1465_v16  ;;  %v2068_v16 = vld [vmem:[%s7581_s24 + $0xc8] sm:$0xff] }
 0x1ed   : > { %v8357_v25 = vpop.permute.xlu0 %2221  ;;  %v2626_v14 = vmul.f32 %v2177_v30, %v2050_v60  ;;  %3680 = vmatpush1.bf16.msra.mxu0 %v2717_v47  ;;  %6425 = vmatpush1.bf16.msra.mxu1 %v2717_v47  ;;  %v7025_v12 = vpop.eup %7024  ;;  %v1818_v26 = vadd.f32 1.0, %v7023_v61  ;;  %v2057_v60 = vld [vmem:[%s7581_s24 + $0x70] sm:$0xff]  ;;  %v2063_v61 = vld [vmem:[%s7581_s24 + $0xa0] sm:$0xff] }
 0x1ee   : > { %2426 = vperm.xlu0 %6469, %v7011_v17   ;;  %3681 = vmatprep.subr.bf16.mxu0 %v7194_v35  ;;  %7048 = vrcp.f32 %v1843_v39  ;;  %v2633_v38 = vmul.f32 %v8348_v1, %v2057_v60  ;;  %v2070_v60 = vld [vmem:[%s7581_s24 + $0xd8] sm:$0xff] }
 0x1ef   : > { %v2718_v36 = vpack.c.bf16 %v2626_v14, %v2625_v57  ;;  %6410 = vmatprep.subr.bf16.mxu1 %v7194_v35  ;;  %7050 = vrcp.f32 %v1818_v26  ;;  %v2059_v57 = vld [vmem:[%s7581_s24 + $0x80] sm:$0xff]  ;;  %v2060_v14 = vld [vmem:[%s7581_s24 + $0x88] sm:$0xff] }
 0x1f0   : > { %v2187_v19 = vpop.permute.xlu1 %2186  ;;  %2401 = vperm.xlu1 %6468, %v8341_v10   ;;  %v7027_v10 = vpop.eup %7026  ;;  %7052 = vpow2.f32 %v5986_v49  ;;  %v2067_v49 = vld [vmem:[%s7581_s24 + $0xc0] sm:$0xff] }
 0x1f1   : > { %v8367_v3 = vpop.permute.xlu0 %2231  ;;  %v2628_v28 = vmul.f32 %v2187_v19, %v2052_v40  ;;  %3682 = vmatpush1.bf16.msra.mxu0 %v2718_v36  ;;  %6426 = vmatpush1.bf16.msra.mxu1 %v2718_v36  ;;  %v7029_v46 = vpop.eup %7028  ;;  %v2061_v19 = vld [vmem:[%s7581_s24 + $0x90] sm:$0xff] }
 0x1f2   : > { %2586 = vperm.xlu0 %6469, %v7017_v31   ;;  %3683 = vmatprep.subr.bf16.mxu0 %v7194_v35  ;;  %v7031_v45 = vpop.eup %7030  ;;  %v1813_v23 = vadd.f32 1.0, %v7029_v46  ;;  %v2635_v31 = vmul.f32 %v8357_v25, %v2059_v57  ;;  %v2637_v62 = vmul.f32 %v8367_v3, %v2061_v19  ;;  %v2066_v46 = vld [vmem:[%s7581_s24 + $0xb8] sm:$0xff]  ;;  %v2076_v19 = vld [vmem:[%s7581_s24 + $0x108] sm:$0xff] }
 0x1f3   : > { %v2719_v4 = vpack.c.bf16 %v2628_v28, %v2627_v58  ;;  %6411 = vmatprep.subr.bf16.mxu1 %v7194_v35  ;;  %v7033_v0 = vpop.eup %7032  ;;  %v1850_v53 = vadd.f32 1.0, %v7031_v45 }
 0x1f4   : > { %v2197_v6 = vpop.permute.xlu1 %2196  ;;  %2561 = vperm.xlu1 %6468, %v7019_v18   ;;  %v7035_v27 = vpop.eup %7034  ;;  %7054 = vrcp.f32 %v1813_v23  ;;  %v2062_v18 = vld [vmem:[%s7581_s24 + $0x98] sm:$0xff] }
 0x1f5   : > { %v8376_v50 = vpop.permute.xlu0 %2241  ;;  %v2630_v32 = vmul.f32 %v2197_v6, %v2054_v13  ;;  %3684 = vmatpush1.bf16.msra.mxu0 %v2719_v4  ;;  %6427 = vmatpush1.bf16.msra.mxu1 %v2719_v4  ;;  %v7037_v7 = vpop.eup %7036  ;;  %v1845_v30 = vadd.f32 1.0, %v7035_v27  ;;  %7056 = vrcp.f32 %v1850_v53  ;;  %v2064_v4 = vld [vmem:[%s7581_s24 + $0xa8] sm:$0xff]  ;;  %v2069_v53 = vld [vmem:[%s7581_s24 + $0xd0] sm:$0xff] }
 0x1f6   : > { %2436 = vperm.xlu0 %6469, %v7025_v12   ;;  %3685 = vmatprep.subr.bf16.mxu0 %v7194_v35  ;;  %v7039_v17 = vpop.eup %7038  ;;  %7058 = vpow2.f32 %v6018_v54  ;;  %v2639_v39 = vmul.f32 %v8376_v50, %v2063_v61  ;;  %v2107_v61 = vld [vmem:[%s7581_s24 + $0x200] sm:$0xff] }
 0x1f7   : > { %v2720_v11 = vpack.c.bf16 %v2630_v32, %v2629_v33  ;;  %6412 = vmatprep.subr.bf16.mxu1 %v7194_v35  ;;  %v7041_v21 = vpop.eup %7040  ;;  %7060 = vrcp.f32 %v1845_v30  ;;  %v2065_v32 = vld [vmem:[%s7581_s24 + $0xb0] sm:$0xff]  ;;  %v2072_v30 = vld [vmem:[%s7581_s24 + $0xe8] sm:$0xff] }
 0x1f8   : > { %v2207_v2 = vpop.permute.xlu1 %2206  ;;  %2411 = vperm.xlu1 %6468, %v7027_v10   ;;  %v7043_v15 = vpop.eup %7042  ;;  %v1815_v36 = vadd.f32 1.0, %v7041_v21 }
 0x1f9   : > { %v8385_v5 = vpop.permute.xlu0 %2251  ;;  %v2632_v44 = vmul.f32 %v2207_v2, %v2056_v34  ;;  %3686 = vmatpush1.bf16.msra.mxu0 %v2720_v11  ;;  %6428 = vmatpush1.bf16.msra.mxu1 %v2720_v11  ;;  %v7045_v37 = vpop.eup %7044 }
 0x1fa   : > { %2596 = vperm.xlu0 %6469, %v7033_v0   ;;  %3687 = vmatprep.subr.bf16.mxu0 %v7194_v35  ;;  %v7047_v8 = vpop.eup %7046  ;;  %7062 = vrcp.f32 %v1815_v36  ;;  %v2641_v11 = vmul.f32 %v8385_v5, %v2065_v32 }
 0x1fb   : > { %v2721_v47 = vpack.c.bf16 %v2632_v44, %v2631_v59  ;;  %6413 = vmatprep.subr.bf16.mxu1 %v7194_v35  ;;  %v7049_v20 = vpop.eup %7048  ;;  %v1847_v25 = vadd.f32 1.0, %v7047_v8 }
 0x1fc   : > { %v2217_v56 = vpop.permute.xlu1 %2216  ;;  %2571 = vperm.xlu1 %6468, %v7037_v7   ;;  %v7051_v58 = vpop.eup %7050 }
 0x1fd   : > { %v8392_v24 = vpop.permute.xlu0 %2261  ;;  %v2634_v48 = vmul.f32 %v2217_v56, %v2058_v52  ;;  %3688 = vmatpush1.bf16.msra.mxu0 %v2721_v47  ;;  %6429 = vmatpush1.bf16.msra.mxu1 %v2721_v47  ;;  %v7053_v13 = vpop.eup %7052  ;;  %7064 = vrcp.f32 %v1847_v25 }
 0x1fe   : > { %2446 = vperm.xlu0 %6469, %v7039_v17   ;;  %3689 = vmatprep.subr.bf16.mxu0 %v7194_v35  ;;  %v7055_v12 = vpop.eup %7054  ;;  %v1817_v3 = vadd.f32 1.0, %v7053_v13  ;;  %v2643_v5 = vmul.f32 %v8392_v24, %v2067_v49  ;;  %v2071_v24 = vld [vmem:[%s7581_s24 + $0xe0] sm:$0xff]  ;;  %v2108_v13 = vld [vmem:[%s7581_s24 + $0x208] sm:$0xff] }
 0x1ff   : > { %v2722_v29 = vpack.c.bf16 %v2634_v48, %v2633_v38  ;;  %6414 = vmatprep.subr.bf16.mxu1 %v7194_v35  ;;  %v7057_v63 = vpop.eup %7056  ;;  %v6482_v49 = vld [vmem:[%s7583_s11 + $0x2a4] ss:$24 sps:$4 sm:$0xff]  }
 0x200   : > { %v2227_v40 = vpop.permute.xlu1 %2226  ;;  %2421 = vperm.xlu1 %6468, %v7043_v15   ;;  %v7059_v33 = vpop.eup %7058  ;;  %7066 = vrcp.f32 %v1817_v3  ;;  %v2078_v3 = vld [vmem:[%s7581_s24 + $0x118] sm:$0xff] }
 0x201   : > { %v8399_v1 = vpop.permute.xlu0 %2271  ;;  %v2636_v22 = vmul.f32 %v2227_v40, %v2060_v14  ;;  %3690 = vmatpush1.bf16.msra.mxu0 %v2722_v29  ;;  %6430 = vmatpush1.bf16.msra.mxu1 %v2722_v29  ;;  %v7061_v26 = vpop.eup %7060  ;;  %v1849_v50 = vadd.f32 1.0, %v7059_v33  ;;  %v2073_v29 = vld [vmem:[%s7581_s24 + $0xf0] sm:$0xff] }
 0x202   : > { %2606 = vperm.xlu0 %6469, %v7045_v37   ;;  %3691 = vmatprep.subr.bf16.mxu0 %v7194_v35  ;;  %v2645_v54 = vmul.f32 %v8399_v1, %v2069_v53  ;;  %v2074_v37 = vld [vmem:[%s7581_s24 + $0xf8] sm:$0xff] }
 0x203   : > { %v2723_v43 = vpack.c.bf16 %v2636_v22, %v2635_v31  ;;  %6415 = vmatprep.subr.bf16.mxu1 %v7194_v35  ;;  %7068 = vrcp.f32 %v1849_v50  ;;  %v2109_v50 = vld [vmem:[%s7581_s24 + $0x210] sm:$0xff] }
 0x204   : > { %v2237_v28 = vpop.permute.xlu1 %2236  ;;  %2581 = vperm.xlu1 %6468, %v7049_v20   ;;  %v7063_v2 = vpop.eup %7062 }
 0x205   : > { %v8406_v41 = vpop.permute.xlu0 %2281  ;;  %v2638_v42 = vmul.f32 %v2237_v28, %v2062_v18  ;;  %3692 = vmatpush1.bf16.msra.mxu0 %v2723_v43  ;;  %6431 = vmatpush1.bf16.msra.mxu1 %v2723_v43  ;;  %v2075_v18 = vld [vmem:[%s7581_s24 + $0x100] sm:$0xff] }
 0x206   : > { %2456 = vperm.xlu0 %6469, %v7051_v58   ;;  %3693 = vmatprep.subr.bf16.mxu0 %v7194_v35  ;;  %v2647_v14 = vmul.f32 %v8406_v41, %v2071_v24  ;;  %v6473_v28 = vld [vmem:[%s7583_s11] ss:$24 sps:$4 sm:$0xff]  }
 0x207   : > { %v2724_v55 = vpack.c.bf16 %v2638_v42, %v2637_v62  ;;  %6416 = vmatprep.subr.bf16.mxu1 %v7194_v35  ;;  %v7065_v52 = vpop.eup %7064  ;;  %v6470_v62 = vld [vmem:[%s7583_s11 + $0x240] ss:$24 sps:$4 sm:$0xff]   ;;  %v6479_v42 = vld [vmem:[%s7583_s11 + $0x34] ss:$24 sps:$4 sm:$0xff]  }
 0x208   : > { %v2247_v6 = vpop.permute.xlu1 %2246  ;;  %2431 = vperm.xlu1 %6468, %v7055_v12   ;;  %v6484_v24 = vld [vmem:[%s7583_s11 + $0x2a0] ss:$24 sps:$4 sm:$0xff]  }
 0x209   : > { %v8413_v10 = vpop.permute.xlu0 %2291  ;;  %v2640_v9 = vmul.f32 %v2247_v6, %v2064_v4  ;;  %3694 = vmatpush1.bf16.msra.mxu0 %v2724_v55  ;;  %6432 = vmatpush1.bf16.msra.mxu1 %v2724_v55  ;;  %v6476_v4 = vld [vmem:[%s7583_s11 + $0x274] ss:$24 sps:$4 sm:$0xff]  }
 0x20a   : > { %2616 = vperm.xlu0 %6469, %v7057_v63   ;;  %3695 = vmatprep.subr.bf16.mxu0 %v7194_v35  ;;  %v7067_v38 = vpop.eup %7066  ;;  %v2649_v22 = vmul.f32 %v8413_v10, %v2073_v29  ;;  %v2081_v29 = vld [vmem:[%s7581_s24 + $0x130] sm:$0xff] }
 0x20b   : > { %v2725_v51 = vpack.c.bf16 %v2640_v9, %v2639_v39  ;;  %6417 = vmatprep.subr.bf16.mxu1 %v7194_v35  ;;  %v2077_v39 = vld [vmem:[%s7581_s24 + $0x110] sm:$0xff] }
 0x20c   : > { %v2257_v34 = vpop.permute.xlu1 %2256  ;;  %2591 = vperm.xlu1 %6468, %v7061_v26  }
 0x20d   : > { %v8420_v45 = vpop.permute.xlu0 %2306  ;;  %v2642_v0 = vmul.f32 %v2257_v34, %v2066_v46  ;;  %3696 = vmatpush1.bf16.msra.mxu0 %v2725_v51  ;;  %6433 = vmatpush1.bf16.msra.mxu1 %v2725_v51  ;;  %v7069_v40 = vpop.eup %7068  ;;  %v6481_v46 = vld [vmem:[%s7583_s11 + $0x30] ss:$24 sps:$4 sm:$0xff]   ;;  %v6485_v34 = vld [vmem:[%s7583_s11 + $0x64] ss:$24 sps:$4 sm:$0xff]  }
 0x20e   : > { %3697 = vmatprep.subr.bf16.mxu0 %v7194_v35  ;;  %6418 = vmatprep.subr.bf16.mxu1 %v7194_v35  ;;  %v2652_v41 = vmul.f32 %v8420_v45, %v2076_v19  ;;  %v2110_v45 = vld [vmem:[%s7581_s24 + $0x218] sm:$0xff] }
 0x20f   : > { %v2726_v23 = vpack.c.bf16 %v2642_v0, %v2641_v11  ;;  %v6478_v11 = vld [vmem:[%s7583_s11 + $0x270] ss:$24 sps:$4 sm:$0xff]   ;;  %v2114_v19 = vld [vmem:[%s7581_s24 + $0x238] sm:$0xff] }
 0x210   : > { %v2267_v59 = vpop.permute.xlu1 %2266  ;;  %2441 = vperm.xlu1 %6468, %v7063_v2  }
 0x211   : > { %v8427_v44 = vpop.permute.xlu0 %2466  ;;  %v2644_v27 = vmul.f32 %v2267_v59, %v2068_v16  ;;  %3698 = vmatpush1.bf16.msra.mxu0 %v2726_v23  ;;  %6434 = vmatpush1.bf16.msra.mxu1 %v2726_v23 }
 0x212   : > { %3699 = vmatprep.subr.bf16.mxu0 %v7194_v35  ;;  %6419 = vmatprep.subr.bf16.mxu1 %v7194_v35  ;;  %v2684_v6 = vmul.f32 %v8427_v44, %v2108_v13  ;;  %v2080_v44 = vld [vmem:[%s7581_s24 + $0x128] sm:$0xff]  ;;  %v2083_v13 = vld [vmem:[%s7581_s24 + $0x140] sm:$0xff] }
 0x213   : > { %v2727_v7 = vpack.c.bf16 %v2644_v27, %v2643_v5  ;;  %v2079_v5 = vld [vmem:[%s7581_s24 + $0x120] sm:$0xff] }
 0x214   : > { %v2277_v47 = vpop.permute.xlu1 %2276  ;;  %2601 = vperm.xlu1 %6468, %v7065_v52   ;;  %v6487_v52 = vld [vmem:[%s7583_s11 + $0x60] ss:$24 sps:$4 sm:$0xff]  }
 0x215   : > { %v8434_v17 = vpop.permute.xlu0 %2316  ;;  %v2646_v56 = vmul.f32 %v2277_v47, %v2070_v60  ;;  %3700 = vmatpush1.bf16.msra.mxu0 %v2727_v7  ;;  %6435 = vmatpush1.bf16.msra.mxu1 %v2727_v7 }
 0x216   : > { %3701 = vmatprep.subr.bf16.mxu0 %v7194_v35  ;;  %6420 = vmatprep.subr.bf16.mxu1 %v7194_v35  ;;  %v2654_v26 = vmul.f32 %v8434_v17, %v2078_v3  ;;  %v6491_v17 = vld [vmem:[%s7583_s11 + $0x94] ss:$24 sps:$4 sm:$0xff]  }
 0x217   : > { %v2728_v48 = vpack.c.bf16 %v2646_v56, %v2645_v54  ;;  %v2112_v54 = vld [vmem:[%s7581_s24 + $0x228] sm:$0xff]  ;;  %v2111_v56 = vld [vmem:[%s7581_s24 + $0x220] sm:$0xff] }
 0x218   : > { %v2287_v21 = vpop.permute.xlu1 %2286  ;;  %2451 = vperm.xlu1 %6468, %v7067_v38   ;;  %v6488_v38 = vld [vmem:[%s7583_s11 + $0x2d4] ss:$24 sps:$4 sm:$0xff]  }
 0x219   : > { %v8441_v57 = vpop.permute.xlu0 %2476  ;;  %v2648_v15 = vmul.f32 %v2287_v21, %v2072_v30  ;;  %3702 = vmatpush1.bf16.msra.mxu0 %v2728_v48  ;;  %6436 = vmatpush1.bf16.msra.mxu1 %v2728_v48  ;;  %v2116_v3 = vld [vmem:[%s7581_s24 + $0x248] sm:$0xff] }
 0x21a   : > { %3703 = vmatprep.subr.bf16.mxu0 %v7194_v35  ;;  %6421 = vmatprep.subr.bf16.mxu1 %v7194_v35  ;;  %v2686_v23 = vmul.f32 %v8441_v57, %v2110_v45  ;;  %v2086_v45 = vld [vmem:[%s7581_s24 + $0x158] sm:$0xff] }
 0x21b   : > { %v2729_v1 = vpack.c.bf16 %v2648_v15, %v2647_v14  ;;  %v2082_v15 = vld [vmem:[%s7581_s24 + $0x138] sm:$0xff] }
 0x21c   : > { %v2297_v36 = vpop.permute.xlu1 %2296  ;;  %2611 = vperm.xlu1 %6468, %v7069_v40  }
 0x21d   : > { %v8448_v31 = vpop.permute.xlu0 %2326  ;;  %v2650_v8 = vmul.f32 %v2297_v36, %v2074_v37  ;;  %3704 = vmatpush1.bf16.msra.mxu0 %v2729_v1  ;;  %6437 = vmatpush1.bf16.msra.mxu1 %v2729_v1  ;;  %v6493_v36 = vld [vmem:[%s7583_s11 + $0x90] ss:$24 sps:$4 sm:$0xff]  }
 0x21e   : > { %3705 = vmatprep.subr.bf16.mxu0 %v7194_v35  ;;  %6422 = vmatprep.subr.bf16.mxu1 %v7194_v35  ;;  %v2656_v7 = vmul.f32 %v8448_v31, %v2080_v44  ;;  %v2118_v44 = vld [vmem:[%s7581_s24 + $0x258] sm:$0xff] }
 0x21f   : > { %v2730_v20 = vpack.c.bf16 %v2650_v8, %v2649_v22  ;;  %v6497_v8 = vld [vmem:[%s7583_s11 + $0xc4] ss:$24 sps:$4 sm:$0xff]  }
 0x220   : > { %v2302_v43 = vpop.permute.xlu1 %2301 }
 0x221   : > { %v8455_v58 = vpop.permute.xlu0 %2486  ;;  %v2651_v25 = vmul.f32 %v2302_v43, %v2075_v18  ;;  %3706 = vmatpush1.bf16.msra.mxu0 %v2730_v20  ;;  %6438 = vmatpush1.bf16.msra.mxu1 %v2730_v20  ;;  %v2113_v18 = vld [vmem:[%s7581_s24 + $0x230] sm:$0xff] }
 0x222   : > { %4125 = vmatprep.subr.bf16.mxu0 %v7194_v35  ;;  %3900 = vmatprep.subr.bf16.mxu1 %v7194_v35  ;;  %v2688_v57 = vmul.f32 %v8455_v58, %v2112_v54  ;;  %v6490_v20 = vld [vmem:[%s7583_s11 + $0x2d0] ss:$24 sps:$4 sm:$0xff]   ;;  %v6494_v58 = vld [vmem:[%s7583_s11 + $0x304] ss:$24 sps:$4 sm:$0xff]  }
 0x223   : > { %v2731_v12 = vpack.c.bf16 %v2652_v41, %v2651_v25  ;;  %v2088_v54 = vld [vmem:[%s7581_s24 + $0x168] sm:$0xff] }
 0x224   : > { %v2462_v55 = vpop.permute.xlu1 %2461  ;;  %3708 = vmatmul.mubr.bf16.vlgmr.msra.gmra.mrb[0].mxu0 %v6473_v28  ;;  %3804 = vmatmul.mubr.bf16.vlgmr.msra.gmra.mrb[0].mxu1 %v6470_v62 }
 0x225   : > { %v8466_v63 = vpop.permute.xlu0 %2336  ;;  %v2683_v10 = vmul.f32 %v2462_v55, %v2107_v61  ;;  %3715 = vmatprep.mubr.bf16.mxu0 %v6479_v42  ;;  %3901 = vmatpush1.bf16.msra.mxu1 %v2731_v12  ;;  %v2084_v42 = vld [vmem:[%s7581_s24 + $0x148] sm:$0xff]  ;;  %v6499_v55 = vld [vmem:[%s7583_s11 + $0xc0] ss:$24 sps:$4 sm:$0xff]  }
 0x226   : > { %3811 = vmatprep.mubr.bf16.mxu1 %v6476_v4  ;;  %3902 = vmatprep.subr.bf16.mxu1 %v7194_v35  ;;  %v2658_v31 = vmul.f32 %v8466_v63, %v2082_v15  ;;  %v2120_v15 = vld [vmem:[%s7581_s24 + $0x268] sm:$0xff] }
 0x227   : > { %v2747_v9 = vpack.c.bf16 %v2684_v6, %v2683_v10  ;;  %v6503_v10 = vld [vmem:[%s7583_s11 + $0xf4] ss:$24 sps:$4 sm:$0xff]  }
 0x228   : > { %v2312_v33 = vpop.permute.xlu1 %2311 }
 0x229   : > { %v8472_v32 = vpop.permute.xlu0 %2496  ;;  %v2653_v51 = vmul.f32 %v2312_v33, %v2077_v39  ;;  %4126 = vmatpush1.bf16.msra.mxu0 %v2747_v9  ;;  %v2115_v39 = vld [vmem:[%s7581_s24 + $0x240] sm:$0xff] }
 0x22a   : > { %4127 = vmatprep.subr.bf16.mxu0 %v7194_v35  ;;  %v2690_v25 = vmul.f32 %v8472_v32, %v2114_v19  ;;  %v6496_v9 = vld [vmem:[%s7583_s11 + $0x300] ss:$24 sps:$4 sm:$0xff]   ;;  %v6500_v32 = vld [vmem:[%s7583_s11 + $0x334] ss:$24 sps:$4 sm:$0xff]  }
 0x22b   : > { %v2732_v0 = vpack.c.bf16 %v2654_v26, %v2653_v51  ;;  %v2090_v19 = vld [vmem:[%s7581_s24 + $0x178] sm:$0xff] }
 0x22c   : > { %v2472_v16 = vpop.permute.xlu1 %2471  ;;  %3716 = vmatmul.mubr.bf16.gmra.mrb[4].mxu0 %v6481_v46  ;;  %3812 = vmatmul.mubr.bf16.gmra.mrb[4].mxu1 %v6478_v11 }
 0x22d   : > { %v8482_v2 = vpop.permute.xlu0 %2346  ;;  %v2685_v59 = vmul.f32 %v2472_v16, %v2109_v50  ;;  %3903 = vmatpush1.bf16.msra.mxu1 %v2732_v0  ;;  %3723 = vmatprep.mubr.bf16.mxu0 %v6485_v34  ;;  %v2085_v50 = vld [vmem:[%s7581_s24 + $0x150] sm:$0xff] }
 0x22e   : > { %3904 = vmatprep.subr.bf16.mxu1 %v7194_v35  ;;  %3819 = vmatprep.mubr.bf16.mxu1 %v6482_v49  ;;  %v2660_v63 = vmul.f32 %v8482_v2, %v2084_v42  ;;  %v6505_v16 = vld [vmem:[%s7583_s11 + $0xf0] ss:$24 sps:$4 sm:$0xff]   ;;  %v2122_v42 = vld [vmem:[%s7581_s24 + $0x278] sm:$0xff] }
 0x22f   : > { %v2748_v27 = vpack.c.bf16 %v2686_v23, %v2685_v59  ;;  %v6509_v59 = vld [vmem:[%s7583_s11 + $0x124] ss:$24 sps:$4 sm:$0xff]  }
 0x230   : > { %v2322_v53 = vpop.permute.xlu1 %2321 }
 0x231   : > { %v8488_v60 = vpop.permute.xlu0 %2506  ;;  %v2655_v47 = vmul.f32 %v2322_v53, %v2079_v5  ;;  %4128 = vmatpush1.bf16.msra.mxu0 %v2748_v27  ;;  %v2117_v5 = vld [vmem:[%s7581_s24 + $0x250] sm:$0xff] }
 0x232   : > { %4129 = vmatprep.subr.bf16.mxu0 %v7194_v35  ;;  %v2692_v51 = vmul.f32 %v8488_v60, %v2116_v3  ;;  %v6502_v27 = vld [vmem:[%s7583_s11 + $0x330] ss:$24 sps:$4 sm:$0xff]   ;;  %v6506_v60 = vld [vmem:[%s7583_s11 + $0x364] ss:$24 sps:$4 sm:$0xff]  }
 0x233   : > { %v2733_v30 = vpack.c.bf16 %v2656_v7, %v2655_v47  ;;  %v2092_v3 = vld [vmem:[%s7581_s24 + $0x188] sm:$0xff] }
 0x234   : > { %v2482_v48 = vpop.permute.xlu1 %2481  ;;  %3724 = vmatmul.mubr.bf16.gmra.mrb[8].mxu0 %v6487_v52  ;;  %3820 = vmatmul.mubr.bf16.gmra.mrb[8].mxu1 %v6484_v24 }
 0x235   : > { %v8498_v21 = vpop.permute.xlu0 %2356  ;;  %v2687_v14 = vmul.f32 %v2482_v48, %v2111_v56  ;;  %3905 = vmatpush1.bf16.msra.mxu1 %v2733_v30  ;;  %3731 = vmatprep.mubr.bf16.mxu0 %v6491_v17  ;;  %v2087_v56 = vld [vmem:[%s7581_s24 + $0x160] sm:$0xff] }
 0x236   : > { %3906 = vmatprep.subr.bf16.mxu1 %v7194_v35  ;;  %3827 = vmatprep.mubr.bf16.mxu1 %v6488_v38  ;;  %v2662_v2 = vmul.f32 %v8498_v21, %v2086_v45  ;;  %v6511_v48 = vld [vmem:[%s7583_s11 + $0x120] ss:$24 sps:$4 sm:$0xff]   ;;  %v2124_v45 = vld [vmem:[%s7581_s24 + $0x288] sm:$0xff] }
 0x237   : > { %v2749_v37 = vpack.c.bf16 %v2688_v57, %v2687_v14  ;;  %v6515_v14 = vld [vmem:[%s7583_s11 + $0x154] ss:$24 sps:$4 sm:$0xff]  }
 0x238   : > { %v2332_v40 = vpop.permute.xlu1 %2331 }
 0x239   : > { %v8504_v1 = vpop.permute.xlu0 %2516  ;;  %v2657_v22 = vmul.f32 %v2332_v40, %v2081_v29  ;;  %4130 = vmatpush1.bf16.msra.mxu0 %v2749_v37  ;;  %v2119_v29 = vld [vmem:[%s7581_s24 + $0x260] sm:$0xff] }
 0x23a   : > { %4131 = vmatprep.subr.bf16.mxu0 %v7194_v35  ;;  %v2694_v47 = vmul.f32 %v8504_v1, %v2118_v44  ;;  %v6508_v37 = vld [vmem:[%s7583_s11 + $0x360] ss:$24 sps:$4 sm:$0xff]   ;;  %v6512_v1 = vld [vmem:[%s7583_s11 + $0x394] ss:$24 sps:$4 sm:$0xff]  }
 0x23b   : > { %v2734_v43 = vpack.c.bf16 %v2658_v31, %v2657_v22  ;;  %v2094_v44 = vld [vmem:[%s7581_s24 + $0x198] sm:$0xff] }
 0x23c   : > { %v2492_v28 = vpop.permute.xlu1 %2491  ;;  %3732 = vmatmul.mubr.bf16.gmra.mrb[12].mxu0 %v6493_v36  ;;  %3828 = vmatmul.mubr.bf16.gmra.mrb[12].mxu1 %v6490_v20 }
 0x23d   : > { %v8514_v41 = vpop.permute.xlu0 %2366  ;;  %v2689_v62 = vmul.f32 %v2492_v28, %v2113_v18  ;;  %3907 = vmatpush1.bf16.msra.mxu1 %v2734_v43  ;;  %3739 = vmatprep.mubr.bf16.mxu0 %v6497_v8  ;;  %v2089_v18 = vld [vmem:[%s7581_s24 + $0x170] sm:$0xff] }
 0x23e   : > { %3908 = vmatprep.subr.bf16.mxu1 %v7194_v35  ;;  %3835 = vmatprep.mubr.bf16.mxu1 %v6494_v58  ;;  %v2664_v21 = vmul.f32 %v8514_v41, %v2088_v54  ;;  %v6517_v28 = vld [vmem:[%s7583_s11 + $0x150] ss:$24 sps:$4 sm:$0xff]  }
 0x23f   : > { %v2750_v61 = vpack.c.bf16 %v2690_v25, %v2689_v62  ;;  %v6521_v62 = vld [vmem:[%s7583_s11 + $0x184] ss:$24 sps:$4 sm:$0xff]  }
 0x240   : > { %v2342_v4 = vpop.permute.xlu1 %2341 }
 0x241   : > { %v8520_v12 = vpop.permute.xlu0 %2526  ;;  %v2659_v6 = vmul.f32 %v2342_v4, %v2083_v13  ;;  %4132 = vmatpush1.bf16.msra.mxu0 %v2750_v61  ;;  %v2121_v13 = vld [vmem:[%s7581_s24 + $0x270] sm:$0xff] }
 0x242   : > { %4133 = vmatprep.subr.bf16.mxu0 %v7194_v35  ;;  %v2696_v22 = vmul.f32 %v8520_v12, %v2120_v15  ;;  %v6514_v61 = vld [vmem:[%s7583_s11 + $0x390] ss:$24 sps:$4 sm:$0xff]   ;;  %v6518_v12 = vld [vmem:[%s7583_s11 + $0x3c4] ss:$24 sps:$4 sm:$0xff]  }
 0x243   : > { %v2735_v33 = vpack.c.bf16 %v2660_v63, %v2659_v6  ;;  %v2095_v15 = vld [vmem:[%s7581_s24 + $0x1a0] sm:$0xff] }
 0x244   : > { %v2502_v46 = vpop.permute.xlu1 %2501  ;;  %3740 = vmatmul.mubr.bf16.gmra.mrb[16].mxu0 %v6499_v55  ;;  %3836 = vmatmul.mubr.bf16.gmra.mrb[16].mxu1 %v6496_v9 }
 0x245   : > { %v8530_v26 = vpop.permute.xlu0 %2376  ;;  %v2691_v34 = vmul.f32 %v2502_v46, %v2115_v39  ;;  %3909 = vmatpush1.bf16.msra.mxu1 %v2735_v33  ;;  %3747 = vmatprep.mubr.bf16.mxu0 %v6503_v10  ;;  %v2091_v39 = vld [vmem:[%s7581_s24 + $0x180] sm:$0xff] }
 0x246   : > { %3910 = vmatprep.subr.bf16.mxu1 %v7194_v35  ;;  %3843 = vmatprep.mubr.bf16.mxu1 %v6500_v32  ;;  %v2666_v41 = vmul.f32 %v8530_v26, %v2090_v19  ;;  %v6523_v46 = vld [vmem:[%s7583_s11 + $0x180] ss:$24 sps:$4 sm:$0xff]  }
 0x247   : > { %v2751_v11 = vpack.c.bf16 %v2692_v51, %v2691_v34  ;;  %v6527_v34 = vld [vmem:[%s7583_s11 + $0x1b4] ss:$24 sps:$4 sm:$0xff]   ;;  %v2127_v19 = vld [vmem:[%s7581_s24 + $0x2a0] sm:$0xff] }
 0x248   : > { %v2352_v0 = vpop.permute.xlu1 %2351 }
 0x249   : > { %v8536_v49 = vpop.permute.xlu0 %2536  ;;  %v2661_v23 = vmul.f32 %v2352_v0, %v2085_v50  ;;  %4134 = vmatpush1.bf16.msra.mxu0 %v2751_v11  ;;  %v2123_v50 = vld [vmem:[%s7581_s24 + $0x280] sm:$0xff] }
 0x24a   : > { %4135 = vmatprep.subr.bf16.mxu0 %v7194_v35  ;;  %v2698_v6 = vmul.f32 %v8536_v49, %v2122_v42  ;;  %v6520_v11 = vld [vmem:[%s7583_s11 + $0x3c0] ss:$24 sps:$4 sm:$0xff]   ;;  %v6524_v49 = vld [vmem:[%s7583_s11 + $0x3f4] ss:$24 sps:$4 sm:$0xff]  }
 0x24b   : > { %v2736_v53 = vpack.c.bf16 %v2662_v2, %v2661_v23  ;;  %v2097_v42 = vld [vmem:[%s7581_s24 + $0x1b0] sm:$0xff] }
 0x24c   : > { %v2512_v52 = vpop.permute.xlu1 %2511  ;;  %3748 = vmatmul.mubr.bf16.gmra.mrb[20].mxu0 %v6505_v16  ;;  %3844 = vmatmul.mubr.bf16.gmra.mrb[20].mxu1 %v6502_v27 }
 0x24d   : > { %v8546_v7 = vpop.permute.xlu0 %2386  ;;  %v2693_v17 = vmul.f32 %v2512_v52, %v2117_v5  ;;  %3911 = vmatpush1.bf16.msra.mxu1 %v2736_v53  ;;  %3755 = vmatprep.mubr.bf16.mxu0 %v6509_v59  ;;  %v2093_v5 = vld [vmem:[%s7581_s24 + $0x190] sm:$0xff] }
 0x24e   : > { %3912 = vmatprep.subr.bf16.mxu1 %v7194_v35  ;;  %3851 = vmatprep.mubr.bf16.mxu1 %v6506_v60  ;;  %v2668_v26 = vmul.f32 %v8546_v7, %v2092_v3  ;;  %v6529_v60 = vld [vmem:[%s7583_s11 + $0x1b0] ss:$24 sps:$4 sm:$0xff]  }
 0x24f   : > { %v2752_v24 = vpack.c.bf16 %v2694_v47, %v2693_v17  ;;  %v6533_v47 = vld [vmem:[%s7583_s11 + $0x1e4] ss:$24 sps:$4 sm:$0xff]   ;;  %v6538_v3 = vld [vmem:[%s7583_s11 + $0x450] ss:$24 sps:$4 sm:$0xff]  }
 0x250   : > { %v2362_v30 = vpop.permute.xlu1 %2361  ;;  %v2126_v17 = vld [vmem:[%s7581_s24 + $0x298] sm:$0xff] }
 0x251   : > { %v8552_v38 = vpop.permute.xlu0 %2546  ;;  %v2663_v57 = vmul.f32 %v2362_v30, %v2087_v56  ;;  %4136 = vmatpush1.bf16.msra.mxu0 %v2752_v24  ;;  %v2125_v56 = vld [vmem:[%s7581_s24 + $0x290] sm:$0xff] }
 0x252   : > { %4137 = vmatprep.subr.bf16.mxu0 %v7194_v35  ;;  %v2700_v23 = vmul.f32 %v8552_v38, %v2124_v45  ;;  %v6526_v24 = vld [vmem:[%s7583_s11 + $0x3f0] ss:$24 sps:$4 sm:$0xff]   ;;  %v6530_v38 = vld [vmem:[%s7583_s11 + $0x424] ss:$24 sps:$4 sm:$0xff]  }
 0x253   : > { %v2737_v40 = vpack.c.bf16 %v2664_v21, %v2663_v57 }
 0x254   : > { %v2522_v36 = vpop.permute.xlu1 %2521  ;;  %3756 = vmatmul.mubr.bf16.gmra.mrb[24].mxu0 %v6511_v48  ;;  %3852 = vmatmul.mubr.bf16.gmra.mrb[24].mxu1 %v6508_v37 }
 0x255   : > { %v8562_v31 = vpop.permute.xlu0 %2396  ;;  %v2695_v8 = vmul.f32 %v2522_v36, %v2119_v29  ;;  %3913 = vmatpush1.bf16.msra.mxu1 %v2737_v40  ;;  %3763 = vmatprep.mubr.bf16.mxu0 %v6515_v14  ;;  %v2096_v14 = vld [vmem:[%s7581_s24 + $0x1a8] sm:$0xff] }
 0x256   : > { %3914 = vmatprep.subr.bf16.mxu1 %v7194_v35  ;;  %3859 = vmatprep.mubr.bf16.mxu1 %v6512_v1  ;;  %v2670_v52 = vmul.f32 %v8562_v31, %v2094_v44  ;;  %v6535_v1 = vld [vmem:[%s7583_s11 + $0x1e0] ss:$24 sps:$4 sm:$0xff]  }
 0x257   : > { %v2753_v20 = vpack.c.bf16 %v2696_v22, %v2695_v8  ;;  %v6539_v22 = vld [vmem:[%s7583_s11 + $0x214] ss:$24 sps:$4 sm:$0xff]  }
 0x258   : > { %v2372_v43 = vpop.permute.xlu1 %2371  ;;  %v2128_v8 = vld [vmem:[%s7581_s24 + $0x2a8] sm:$0xff] }
 0x259   : > { %v8568_v58 = vpop.permute.xlu0 %2556  ;;  %v2665_v25 = vmul.f32 %v2372_v43, %v2089_v18  ;;  %4138 = vmatpush1.bf16.msra.mxu0 %v2753_v20  ;;  %v6532_v18 = vld [vmem:[%s7583_s11 + $0x420] ss:$24 sps:$4 sm:$0xff]   ;;  %v6536_v43 = vld [vmem:[%s7583_s11 + $0x454] ss:$24 sps:$4 sm:$0xff]  }
 0x25a   : > { %4139 = vmatprep.subr.bf16.mxu0 %v7194_v35  ;;  %v2702_v21 = vmul.f32 %v8568_v58, %v2126_v17 }
 0x25b   : > { %v2738_v4 = vpack.c.bf16 %v2666_v41, %v2665_v25  ;;  %v2098_v25 = vld [vmem:[%s7581_s24 + $0x1b8] sm:$0xff] }
 0x25c   : > { %v2532_v55 = vpop.permute.xlu1 %2531  ;;  %3764 = vmatmul.mubr.bf16.gmra.mrb[28].mxu0 %v6517_v28  ;;  %3860 = vmatmul.mubr.bf16.gmra.mrb[28].mxu1 %v6514_v61 }
 0x25d   : > { %v8578_v63 = vpop.permute.xlu0 %2406  ;;  %v2697_v10 = vmul.f32 %v2532_v55, %v2121_v13  ;;  %3915 = vmatpush1.bf16.msra.mxu1 %v2738_v4  ;;  %3771 = vmatprep.mubr.bf16.mxu0 %v6521_v62  ;;  %v6541_v4 = vld [vmem:[%s7583_s11 + $0x210] ss:$24 sps:$4 sm:$0xff]  }
 0x25e   : > { %3916 = vmatprep.subr.bf16.mxu1 %v7194_v35  ;;  %3867 = vmatprep.mubr.bf16.mxu1 %v6518_v12  ;;  %v2672_v36 = vmul.f32 %v8578_v63, %v2096_v14  ;;  %v6547_v63 = vld [vmem:[%s7583_s11 + $0x14] ss:$24 sps:$4 sm:$0xff]   ;;  %v2103_v14 = vld [vmem:[%s7581_s24 + $0x1e0] sm:$0xff] }
 0x25f   : > { %v2754_v9 = vpack.c.bf16 %v2698_v6, %v2697_v10  ;;  %v2130_v6 = vld [vmem:[%s7581_s24 + $0x2b8] sm:$0xff]  ;;  %v2129_v10 = vld [vmem:[%s7581_s24 + $0x2b0] sm:$0xff] }
 0x260   : > { %v2382_v33 = vpop.permute.xlu1 %2381 }
 0x261   : > { %v8584_v32 = vpop.permute.xlu0 %2566  ;;  %v2667_v51 = vmul.f32 %v2382_v33, %v2091_v39  ;;  %4140 = vmatpush1.bf16.msra.mxu0 %v2754_v9  ;;  %v6544_v9 = vld [vmem:[%s7583_s11 + $0xc] ss:$24 sps:$4 sm:$0xff]  }
 0x262   : > { %4141 = vmatprep.subr.bf16.mxu0 %v7194_v35  ;;  %v2704_v28 = vmul.f32 %v8584_v32, %v2128_v8 }
 0x263   : > { %v2739_v0 = vpack.c.bf16 %v2668_v26, %v2667_v51  ;;  %v2100_v51 = vld [vmem:[%s7581_s24 + $0x1c8] sm:$0xff] }
 0x264   : > { %v2542_v16 = vpop.permute.xlu1 %2541  ;;  %3772 = vmatmul.mubr.bf16.gmra.mrb[32].mxu0 %v6523_v46  ;;  %3868 = vmatmul.mubr.bf16.gmra.mrb[32].mxu1 %v6520_v11 }
 0x265   : > { %v8594_v2 = vpop.permute.xlu0 %2416  ;;  %v2699_v59 = vmul.f32 %v2542_v16, %v2123_v50  ;;  %3917 = vmatpush1.bf16.msra.mxu1 %v2739_v0  ;;  %3779 = vmatprep.mubr.bf16.mxu0 %v6527_v34  ;;  %v2099_v34 = vld [vmem:[%s7581_s24 + $0x1c0] sm:$0xff] }
 0x266   : > { %3918 = vmatprep.subr.bf16.mxu1 %v7194_v35  ;;  %3875 = vmatprep.mubr.bf16.mxu1 %v6524_v49  ;;  %v2674_v12 = vmul.f32 %v8594_v2, %v2098_v25  ;;  %v2132_v49 = vld [vmem:[%s7581_s24 + $0x2c8] sm:$0xff]  ;;  %v2131_v2 = vld [vmem:[%s7581_s24 + $0x2c0] sm:$0xff] }
 0x267   : > { %v2755_v27 = vpack.c.bf16 %v2700_v23, %v2699_v59 }
 0x268   : > { %v2392_v53 = vpop.permute.xlu1 %2391 }
 0x269   : > { %v2669_v7 = vmul.f32 %v2392_v53, %v2093_v5  ;;  %4142 = vmatpush1.bf16.msra.mxu0 %v2755_v27  ;;  %v2577_v54 = vpop.permute.xlu0 %2576  ;;  %v2102_v27 = vld [vmem:[%s7581_s24 + $0x1d8] sm:$0xff]  ;;  %v2101_v53 = vld [vmem:[%s7581_s24 + $0x1d0] sm:$0xff] }
 0x26a   : > { %4143 = vmatprep.subr.bf16.mxu0 %v7194_v35  ;;  %v2706_v46 = vmul.f32 %v2577_v54, %v2130_v6  ;;  %v2134_v54 = vld [vmem:[%s7581_s24 + $0x2d8] sm:$0xff] }
 0x26b   : > { %v2740_v30 = vpack.c.bf16 %v2670_v52, %v2669_v7  ;;  %v6548_v6 = vld [vmem:[%s7583_s11 + $0x3c] ss:$24 sps:$4 sm:$0xff]  }
 0x26c   : > { %v2552_v48 = vpop.permute.xlu1 %2551  ;;  %3780 = vmatmul.mubr.bf16.gmra.mrb[36].mxu0 %v6529_v60  ;;  %3876 = vmatmul.mubr.bf16.gmra.mrb[36].mxu1 %v6526_v24 }
 0x26d   : > { %v2701_v57 = vmul.f32 %v2552_v48, %v2125_v56  ;;  %3919 = vmatpush1.bf16.msra.mxu1 %v2740_v30  ;;  %3787 = vmatprep.mubr.bf16.mxu0 %v6533_v47  ;;  %v2427_v37 = vpop.permute.xlu0 %2426  ;;  %v2133_v56 = vld [vmem:[%s7581_s24 + $0x2d0] sm:$0xff] }
 0x26e   : > { %3920 = vmatprep.subr.bf16.mxu1 %v7194_v35  ;;  %3883 = vmatprep.mubr.bf16.mxu1 %v6530_v38  ;;  %v2676_v11 = vmul.f32 %v2427_v37, %v2100_v51  ;;  %v6559_v51 = vld [vmem:[%s7583_s11 + $0x70] ss:$24 sps:$4 sm:$0xff]  }
 0x26f   : > { %v2756_v29 = vpack.c.bf16 %v2702_v21, %v2701_v57  ;;  %v2104_v21 = vld [vmem:[%s7581_s24 + $0x1e8] sm:$0xff] }
 0x270   : > { %v2402_v40 = vpop.permute.xlu1 %2401 }
 0x271   : > { %v2671_v31 = vmul.f32 %v2402_v40, %v2095_v15  ;;  %4144 = vmatpush1.bf16.msra.mxu0 %v2756_v29  ;;  %v2587_v62 = vpop.permute.xlu0 %2586 }
 0x272   : > { %4145 = vmatprep.subr.bf16.mxu0 %v7194_v35  ;;  %v2708_v44 = vmul.f32 %v2587_v62, %v2132_v49  ;;  %v2138_v62 = vld [vmem:[%s7581_s24 + $0x2f8] sm:$0xff]  ;;  %v6568_v49 = vld [vmem:[%s7583_s11 + $0xc8] ss:$24 sps:$4 sm:$0xff]  }
 0x273   : > { %v2741_v20 = vpack.c.bf16 %v2672_v36, %v2671_v31  ;;  %v2135_v36 = vld [vmem:[%s7581_s24 + $0x2e0] sm:$0xff] }
 0x274   : > { %v2562_v58 = vpop.permute.xlu1 %2561  ;;  %3788 = vmatmul.mubr.bf16.gmra.mrb[40].mxu0 %v6535_v1  ;;  %3884 = vmatmul.mubr.bf16.gmra.mrb[40].mxu1 %v6532_v18  ;;  %v2136_v1 = vld [vmem:[%s7581_s24 + $0x2e8] sm:$0xff] }
 0x275   : > { %v2703_v41 = vmul.f32 %v2562_v58, %v2127_v19  ;;  %3921 = vmatpush1.bf16.msra.mxu1 %v2741_v20  ;;  %3795 = vmatprep.mubr.bf16.mxu0 %v6539_v22  ;;  %v2437_v33 = vpop.permute.xlu0 %2436  ;;  %v2106_v20 = vld [vmem:[%s7581_s24 + $0x1f8] sm:$0xff] }
 0x276   : > { %3922 = vmatprep.subr.bf16.mxu1 %v7194_v35  ;;  %3891 = vmatprep.mubr.bf16.mxu1 %v6536_v43  ;;  %v2678_v47 = vmul.f32 %v2437_v33, %v2102_v27  ;;  %v2105_v43 = vld [vmem:[%s7581_s24 + $0x1f0] sm:$0xff]  ;;  %v6553_v33 = vld [vmem:[%s7583_s11 + $0x40] ss:$24 sps:$4 sm:$0xff]  }
 0x277   : > { %v2757_v13 = vpack.c.bf16 %v2704_v28, %v2703_v41  ;;  %v6581_v27 = vld [vmem:[%s7583_s11 + $0x134] ss:$24 sps:$4 sm:$0xff]  }
 0x278   : > { %v2412_v61 = vpop.permute.xlu1 %2411 }
 0x279   : > { %v2673_v55 = vmul.f32 %v2412_v61, %v2097_v42  ;;  %4146 = vmatpush1.bf16.msra.mxu0 %v2757_v13  ;;  %v2597_v16 = vpop.permute.xlu0 %2596  ;;  %v2137_v13 = vld [vmem:[%s7581_s24 + $0x2f0] sm:$0xff] }
 0x27a   : > { %4147 = vmatprep.subr.bf16.mxu0 %v7194_v35  ;;  %v2710_v38 = vmul.f32 %v2597_v16, %v2134_v54  ;;  %v6572_v16 = vld [vmem:[%s7583_s11 + $0xfc] ss:$24 sps:$4 sm:$0xff]   ;;  %v6589_v54 = vld [vmem:[%s7583_s11 + $0x160] ss:$24 sps:$4 sm:$0xff]  }
 0x27b   : > { %v2742_v39 = vpack.c.bf16 %v2674_v12, %v2673_v55  ;;  %v6542_v12 = vld [vmem:[%s7583_s11 + $0x8] ss:$24 sps:$4 sm:$0xff]  }
 0x27c   : > { %v2572_v32 = vpop.permute.xlu1 %2571  ;;  %3796 = vmatmul.mubr.bf16.gmra.mrb[44].mxu0 %v6541_v4  ;;  %3892 = vmatmul.mubr.bf16.gmra.mrb[44].mxu1 %v6538_v3  ;;  %v6545_v3 = vld [vmem:[%s7583_s11 + $0x10] ss:$24 sps:$4 sm:$0xff]  }
 0x27d   : > { %v2705_v26 = vmul.f32 %v2572_v32, %v2129_v10  ;;  %3923 = vmatpush1.bf16.msra.mxu1 %v2742_v39  ;;  %4157 = vmatprep.mubr.bf16.mxu0 %v6547_v63  ;;  %v2447_v52 = vpop.permute.xlu0 %2446  ;;  %v6551_v39 = vld [vmem:[%s7583_s11 + $0x44] ss:$24 sps:$4 sm:$0xff]   ;;  %v6557_v32 = vld [vmem:[%s7583_s11 + $0x74] ss:$24 sps:$4 sm:$0xff]  }
 0x27e   : > { %3924 = vmatprep.subr.bf16.mxu1 %v7194_v35  ;;  %3932 = vmatprep.mubr.bf16.mxu1 %v6544_v9  ;;  %v2680_v37 = vmul.f32 %v2447_v52, %v2104_v21  ;;  %v6554_v9 = vld [vmem:[%s7583_s11 + $0x6c] ss:$24 sps:$4 sm:$0xff]   ;;  %v6583_v52 = vld [vmem:[%s7583_s11 + $0x130] ss:$24 sps:$4 sm:$0xff]  }
 0x27f   : > { %v2758_v45 = vpack.c.bf16 %v2706_v46, %v2705_v26  ;;  %v6556_v46 = vld [vmem:[%s7583_s11 + $0x68] ss:$24 sps:$4 sm:$0xff]   ;;  %v6560_v26 = vld [vmem:[%s7583_s11 + $0x9c] ss:$24 sps:$4 sm:$0xff]   ;;  %v6598_v21 = vld [vmem:[%s7583_s11 + $0x1b8] ss:$24 sps:$4 sm:$0xff]  }
 0x280   : > { %v2422_v50 = vpop.permute.xlu1 %2421 }
 0x281   : > { %v2675_v0 = vmul.f32 %v2422_v50, %v2099_v34  ;;  %4148 = vmatpush1.bf16.msra.mxu0 %v2758_v45  ;;  %v2607_v57 = vpop.permute.xlu0 %2606  ;;  %v6563_v34 = vld [vmem:[%s7583_s11 + $0xa4] ss:$24 sps:$4 sm:$0xff]   ;;  %v6562_v45 = vld [vmem:[%s7583_s11 + $0x98] ss:$24 sps:$4 sm:$0xff]  }
 0x282   : > { %4149 = vmatprep.subr.bf16.mxu0 %v7194_v35  ;;  %v2712_v19 = vmul.f32 %v2607_v57, %v2136_v1  ;;  %v6566_v50 = vld [vmem:[%s7583_s11 + $0xcc] ss:$24 sps:$4 sm:$0xff]  }
 0x283   : > { %v2743_v23 = vpack.c.bf16 %v2676_v11, %v2675_v0  ;;  %v6565_v11 = vld [vmem:[%s7583_s11 + $0xa0] ss:$24 sps:$4 sm:$0xff]   ;;  %v6569_v0 = vld [vmem:[%s7583_s11 + $0xd4] ss:$24 sps:$4 sm:$0xff]   ;;  %v6611_v1 = vld [vmem:[%s7583_s11 + $0x224] ss:$24 sps:$4 sm:$0xff]  }
 0x284   : > { %v2582_v59 = vpop.permute.xlu1 %2581  ;;  %v6602_v57 = vld [vmem:[%s7583_s11 + $0x1ec] ss:$24 sps:$4 sm:$0xff]  }
 0x285   : > { %v2707_v5 = vmul.f32 %v2582_v59, %v2131_v2  ;;  %3925 = vmatpush1.bf16.msra.mxu1 %v2743_v23  ;;  %v2457_v22 = vpop.permute.xlu0 %2456  ;;  %v6571_v2 = vld [vmem:[%s7583_s11 + $0xd0] ss:$24 sps:$4 sm:$0xff]   ;;  %v6575_v23 = vld [vmem:[%s7583_s11 + $0x104] ss:$24 sps:$4 sm:$0xff]  }
 0x286   : > { %3926 = vmatprep.subr.bf16.mxu1 %v7194_v35  ;;  %v2682_v41 = vmul.f32 %v2457_v22, %v2106_v20  ;;  %v6574_v59 = vld [vmem:[%s7583_s11 + $0xf8] ss:$24 sps:$4 sm:$0xff]   ;;  %v6617_v20 = vld [vmem:[%s7583_s11 + $0x254] ss:$24 sps:$4 sm:$0xff]  }
 0x287   : > { %v2759_v60 = vpack.c.bf16 %v2708_v44, %v2707_v5  ;;  %v6578_v44 = vld [vmem:[%s7583_s11 + $0x12c] ss:$24 sps:$4 sm:$0xff]   ;;  %v6577_v5 = vld [vmem:[%s7583_s11 + $0x100] ss:$24 sps:$4 sm:$0xff]  }
 0x288   : > { %v2432_v7 = vpop.permute.xlu1 %2431 }
 0x289   : > { %v2677_v17 = vmul.f32 %v2432_v7, %v2101_v53  ;;  %4150 = vmatpush1.bf16.msra.mxu0 %v2759_v60  ;;  %v2617_v42 = vpop.permute.xlu0 %2616  ;;  %v6580_v53 = vld [vmem:[%s7583_s11 + $0x128] ss:$24 sps:$4 sm:$0xff]   ;;  %v6584_v60 = vld [vmem:[%s7583_s11 + $0x15c] ss:$24 sps:$4 sm:$0xff]  }
 0x28a   : > { %4151 = vmatprep.subr.bf16.mxu0 %v7194_v35  ;;  %v2714_v55 = vmul.f32 %v2617_v42, %v2138_v62  ;;  %v6587_v7 = vld [vmem:[%s7583_s11 + $0x164] ss:$24 sps:$4 sm:$0xff]   ;;  %v6616_v62 = vld [vmem:[%s7583_s11 + $0x248] ss:$24 sps:$4 sm:$0xff]  }
 0x28b   : > { %v2744_v24 = vpack.c.bf16 %v2678_v47, %v2677_v17  ;;  %v6586_v47 = vld [vmem:[%s7583_s11 + $0x158] ss:$24 sps:$4 sm:$0xff]   ;;  %v6590_v17 = vld [vmem:[%s7583_s11 + $0x18c] ss:$24 sps:$4 sm:$0xff]   ;;  %v6620_v42 = vld [vmem:[%s7583_s11 + $0x27c] ss:$24 sps:$4 sm:$0xff]  }
 0x28c   : > { %v2592_v30 = vpop.permute.xlu1 %2591 }
 0x28d   : > { %v2709_v48 = vmul.f32 %v2592_v30, %v2133_v56  ;;  %3927 = vmatpush1.bf16.msra.mxu1 %v2744_v24  ;;  %v6593_v56 = vld [vmem:[%s7583_s11 + $0x194] ss:$24 sps:$4 sm:$0xff]   ;;  %v6592_v24 = vld [vmem:[%s7583_s11 + $0x188] ss:$24 sps:$4 sm:$0xff]  }
 0x28e   : > { %3928 = vmatprep.subr.bf16.mxu1 %v7194_v35  ;;  %v6596_v30 = vld [vmem:[%s7583_s11 + $0x1bc] ss:$24 sps:$4 sm:$0xff]  }
 0x28f   : > { %v2760_v15 = vpack.c.bf16 %v2710_v38, %v2709_v48  ;;  %v6595_v38 = vld [vmem:[%s7583_s11 + $0x190] ss:$24 sps:$4 sm:$0xff]   ;;  %v6599_v48 = vld [vmem:[%s7583_s11 + $0x1c4] ss:$24 sps:$4 sm:$0xff]  }
 0x290   : > { %v2442_v29 = vpop.permute.xlu1 %2441 }
 0x291   : > { %v2679_v40 = vmul.f32 %v2442_v29, %v2103_v14  ;;  %4152 = vmatpush1.bf16.msra.mxu0 %v2760_v15  ;;  %v6601_v14 = vld [vmem:[%s7583_s11 + $0x1c0] ss:$24 sps:$4 sm:$0xff]   ;;  %v6605_v15 = vld [vmem:[%s7583_s11 + $0x1f4] ss:$24 sps:$4 sm:$0xff]  }
 0x292   : > { %4153 = vmatprep.subr.bf16.mxu0 %v7194_v35  ;;  %v6604_v29 = vld [vmem:[%s7583_s11 + $0x1e8] ss:$24 sps:$4 sm:$0xff]  }
 0x293   : > { %v2745_v31 = vpack.c.bf16 %v2680_v37, %v2679_v40  ;;  %v6608_v37 = vld [vmem:[%s7583_s11 + $0x21c] ss:$24 sps:$4 sm:$0xff]   ;;  %v6607_v40 = vld [vmem:[%s7583_s11 + $0x1f0] ss:$24 sps:$4 sm:$0xff]  }
 0x294   : > { %v2602_v8 = vpop.permute.xlu1 %2601 }
 0x295   : > { %v2711_v18 = vmul.f32 %v2602_v8, %v2135_v36  ;;  %3929 = vmatpush1.bf16.msra.mxu1 %v2745_v31  ;;  %v6610_v36 = vld [vmem:[%s7583_s11 + $0x218] ss:$24 sps:$4 sm:$0xff]   ;;  %v6614_v31 = vld [vmem:[%s7583_s11 + $0x24c] ss:$24 sps:$4 sm:$0xff]  }
 0x296   : > { %3930 = vmatprep.subr.bf16.mxu1 %v7194_v35  ;;  %v6613_v8 = vld [vmem:[%s7583_s11 + $0x220] ss:$24 sps:$4 sm:$0xff]  }
 0x297   : > { %v2761_v58 = vpack.c.bf16 %v2712_v19, %v2711_v18 }
 0x298   : > { %v2452_v28 = vpop.permute.xlu1 %2451 }
 0x299   : > { %v2681_v25 = vmul.f32 %v2452_v28, %v2105_v43  ;;  %4154 = vmatpush1.bf16.msra.mxu0 %v2761_v58 }
 0x29a   : > { %4155 = vmatprep.subr.bf16.mxu0 %v7194_v35  ;;  %v6550_v35 = vld [vmem:[%s7583_s11 + $0x38] ss:$24 sps:$4 sm:$0xff]  }
 0x29b   : > { %v2746_v61 = vpack.c.bf16 %v2682_v41, %v2681_v25 }
 0x29c   : > { %v2612_v4 = vpop.permute.xlu1 %2611 }
 0x29d   : > { %v2713_v63 = vmul.f32 %v2612_v4, %v2137_v13  ;;  %3931 = vmatpush1.bf16.msra.mxu1 %v2746_v61  ;;  %v6619_v61 = vld [vmem:[%s7583_s11 + $0x250] ss:$24 sps:$4 sm:$0xff]  }
 0x29f   : > { %v2762_v10 = vpack.c.bf16 %v2714_v55, %v2713_v63 }
 0x2a0   : > { %3933 = vmatmul.mubr.bf16.vlgmr.msra.gmra.mrb[48].mxu1 %v6542_v12  ;;  %v6623_v12 = vld [vmem:[%s7583_s11 + $0x284] ss:$24 sps:$4 sm:$0xff]  }
 0x2a1   : > { %4156 = vmatpush1.bf16.msra.mxu0 %v2762_v10  ;;  %3940 = vmatprep.mubr.bf16.mxu1 %v6548_v6 }
 0x2a4   : > { %4158 = vmatmul.mubr.bf16.vlgmr.msra.gmra.mrb[48].mxu0 %v6545_v3 }
 0x2a5   : > { %4165 = vmatprep.mubr.bf16.mxu0 %v6551_v39  ;;  %v6622_v39 = vld [vmem:[%s7583_s11 + $0x278] ss:$24 sps:$4 sm:$0xff]  }
 0x2a8   : > { %3941 = vmatmul.mubr.bf16.gmra.mrb[52].mxu1 %v6550_v35 }
 0x2a9   : > { %3948 = vmatprep.mubr.bf16.mxu1 %v6554_v9  ;;  %v6626_v9 = vld [vmem:[%s7583_s11 + $0x2ac] ss:$24 sps:$4 sm:$0xff]  }
 0x2ac   : > { %4166 = vmatmul.mubr.bf16.gmra.mrb[52].mxu0 %v6553_v33 }
 0x2ad   : > { %4173 = vmatprep.mubr.bf16.mxu0 %v6557_v32  ;;  %v6625_v32 = vld [vmem:[%s7583_s11 + $0x280] ss:$24 sps:$4 sm:$0xff]  }
 0x2b0   : > { %3949 = vmatmul.mubr.bf16.gmra.mrb[56].mxu1 %v6556_v46 }
 0x2b1   : > { %3956 = vmatprep.mubr.bf16.mxu1 %v6560_v26  ;;  %v6629_v26 = vld [vmem:[%s7583_s11 + $0x2b4] ss:$24 sps:$4 sm:$0xff]  }
 0x2b4   : > { %4174 = vmatmul.mubr.bf16.gmra.mrb[56].mxu0 %v6559_v51 }
 0x2b5   : > { %4181 = vmatprep.mubr.bf16.mxu0 %v6563_v34 }
 0x2b8   : > { %3957 = vmatmul.mubr.bf16.gmra.mrb[60].mxu1 %v6562_v45 }
 0x2b9   : > { %3964 = vmatprep.mubr.bf16.mxu1 %v6566_v50 }
 0x2bc   : > { %4182 = vmatmul.mubr.bf16.gmra.mrb[60].mxu0 %v6565_v11 }
 0x2bd   : > { %4189 = vmatprep.mubr.bf16.mxu0 %v6569_v0  ;;  %v6628_v0 = vld [vmem:[%s7583_s11 + $0x2a8] ss:$24 sps:$4 sm:$0xff]  }
 0x2c0   : > { %3965 = vmatmul.mubr.bf16.gmra.mrb[64].mxu1 %v6568_v49 }
 0x2c1   : > { %3972 = vmatprep.mubr.bf16.mxu1 %v6572_v16  ;;  %v6632_v16 = vld [vmem:[%s7583_s11 + $0x2dc] ss:$24 sps:$4 sm:$0xff]  }
 0x2c4   : > { %4190 = vmatmul.mubr.bf16.gmra.mrb[64].mxu0 %v6571_v2 }
 0x2c5   : > { %4197 = vmatprep.mubr.bf16.mxu0 %v6575_v23  ;;  %v6631_v23 = vld [vmem:[%s7583_s11 + $0x2b0] ss:$24 sps:$4 sm:$0xff]  }
 0x2c8   : > { %3973 = vmatmul.mubr.bf16.gmra.mrb[68].mxu1 %v6574_v59 }
 0x2c9   : > { %3980 = vmatprep.mubr.bf16.mxu1 %v6578_v44  ;;  %v6635_v44 = vld [vmem:[%s7583_s11 + $0x2e4] ss:$24 sps:$4 sm:$0xff]  }
 0x2cc   : > { %4198 = vmatmul.mubr.bf16.gmra.mrb[68].mxu0 %v6577_v5 }
 0x2cd   : > { %4205 = vmatprep.mubr.bf16.mxu0 %v6581_v27 }
 0x2d0   : > { %3981 = vmatmul.mubr.bf16.gmra.mrb[72].mxu1 %v6580_v53 }
 0x2d1   : > { %3988 = vmatprep.mubr.bf16.mxu1 %v6584_v60 }
 0x2d4   : > { %4206 = vmatmul.mubr.bf16.gmra.mrb[72].mxu0 %v6583_v52 }
 0x2d5   : > { %4213 = vmatprep.mubr.bf16.mxu0 %v6587_v7  ;;  %v6634_v7 = vld [vmem:[%s7583_s11 + $0x2d8] ss:$24 sps:$4 sm:$0xff]  }
 0x2d8   : > { %3989 = vmatmul.mubr.bf16.gmra.mrb[76].mxu1 %v6586_v47 }
 0x2d9   : > { %3996 = vmatprep.mubr.bf16.mxu1 %v6590_v17  ;;  %v6638_v17 = vld [vmem:[%s7583_s11 + $0x30c] ss:$24 sps:$4 sm:$0xff]  }
 0x2dc   : > { %4214 = vmatmul.mubr.bf16.gmra.mrb[76].mxu0 %v6589_v54 }
 0x2dd   : > { %4221 = vmatprep.mubr.bf16.mxu0 %v6593_v56  ;;  %v6637_v56 = vld [vmem:[%s7583_s11 + $0x2e0] ss:$24 sps:$4 sm:$0xff]  }
 0x2e0   : > { %3997 = vmatmul.mubr.bf16.gmra.mrb[80].mxu1 %v6592_v24 }
 0x2e1   : > { %4004 = vmatprep.mubr.bf16.mxu1 %v6596_v30  ;;  %v6641_v30 = vld [vmem:[%s7583_s11 + $0x314] ss:$24 sps:$4 sm:$0xff]  }
 0x2e4   : > { %4222 = vmatmul.mubr.bf16.gmra.mrb[80].mxu0 %v6595_v38 }
 0x2e5   : > { %4229 = vmatprep.mubr.bf16.mxu0 %v6599_v48 }
 0x2e8   : > { %4005 = vmatmul.mubr.bf16.gmra.mrb[84].mxu1 %v6598_v21 }
 0x2e9   : > { %4012 = vmatprep.mubr.bf16.mxu1 %v6602_v57 }
 0x2ec   : > { %4230 = vmatmul.mubr.bf16.gmra.mrb[84].mxu0 %v6601_v14 }
 0x2ed   : > { %4237 = vmatprep.mubr.bf16.mxu0 %v6605_v15  ;;  %v6640_v15 = vld [vmem:[%s7583_s11 + $0x308] ss:$24 sps:$4 sm:$0xff]  }
 0x2f0   : > { %4013 = vmatmul.mubr.bf16.gmra.mrb[88].mxu1 %v6604_v29 }
 0x2f1   : > { %4020 = vmatprep.mubr.bf16.mxu1 %v6608_v37  ;;  %v6644_v37 = vld [vmem:[%s7583_s11 + $0x33c] ss:$24 sps:$4 sm:$0xff]  }
 0x2f4   : > { %4238 = vmatmul.mubr.bf16.gmra.mrb[88].mxu0 %v6607_v40 }
 0x2f5   : > { %4245 = vmatprep.mubr.bf16.mxu0 %v6611_v1  ;;  %v6643_v1 = vld [vmem:[%s7583_s11 + $0x310] ss:$24 sps:$4 sm:$0xff]  }
 0x2f7   : > { %v8702_v22 = vpop.f32.mrb[0].mxu0  ;;  %v8705_v19 = vpop.f32.mrb[0].mxu1 }
 0x2f8   : > { %4021 = vmatmul.mubr.bf16.gmra.mrb[92].mxu1 %v6610_v36  ;;  %v3711_v18 = vpop.f32.mrb[1].mxu0  ;;  %v3807_v43 = vpop.f32.mrb[1].mxu1 }
 0x2f9   : > { %4028 = vmatprep.mubr.bf16.mxu1 %v6614_v31  ;;  %v8708_v58 = vpop.f32.mrb[2].mxu0  ;;  %v8710_v28 = vpop.f32.mrb[2].mxu1  ;;  %v6647_v31 = vld [vmem:[%s7583_s11 + $0x344] ss:$24 sps:$4 sm:$0xff]  }
 0x2fa   : > { %v3714_v41 = vpop.f32.mrb[3].mxu0  ;;  %v3810_v25 = vpop.f32.mrb[3].mxu1 }
 0x2fb   : > { %v6646_v25 = vld [vmem:[%s7583_s11 + $0x338] ss:$24 sps:$4 sm:$0xff]  }
 0x2fc   : > { %4246 = vmatmul.mubr.bf16.gmra.mrb[92].mxu0 %v6613_v8 }
 0x2fd   : > { %4253 = vmatprep.mubr.bf16.mxu0 %v6617_v20 }
 0x2ff   : > { %v8714_v13 = vpop.f32.mrb[4].mxu0  ;;  %v8718_v55 = vpop.f32.mrb[4].mxu1 }
 0x300   : > { %4029 = vmatmul.mubr.bf16.gmra.mrb[96].mxu1 %v6616_v62  ;;  %v3719_v4 = vpop.f32.mrb[5].mxu0  ;;  %v3815_v6 = vpop.f32.mrb[5].mxu1 }
 0x301   : > { %4036 = vmatprep.mubr.bf16.mxu1 %v6620_v42  ;;  %v8720_v63 = vpop.f32.mrb[6].mxu0  ;;  %v8722_v3 = vpop.f32.mrb[6].mxu1  ;;  %v6650_v42 = vld [vmem:[%s7583_s11 + $0x36c] ss:$24 sps:$4 sm:$0xff]   ;;  %v6649_v4 = vld [vmem:[%s7583_s11 + $0x340] ss:$24 sps:$4 sm:$0xff]  }
 0x302   : > { %v3722_v10 = vpop.f32.mrb[7].mxu0  ;;  %v3818_v35 = vpop.f32.mrb[7].mxu1  ;;  %v6653_v6 = vld [vmem:[%s7583_s11 + $0x374] ss:$24 sps:$4 sm:$0xff]  }
 0x304   : > { %4254 = vmatmul.mubr.bf16.gmra.mrb[96].mxu0 %v6619_v61 }
 0x305   : > { %4261 = vmatprep.mubr.bf16.mxu0 %v6623_v12 }
 0x307   : > { %v8726_v33 = vpop.f32.mrb[8].mxu0  ;;  %v8730_v51 = vpop.f32.mrb[8].mxu1 }
 0x308   : > { %4037 = vmatmul.mubr.bf16.gmra.mrb[100].mxu1 %v6622_v39  ;;  %v3727_v46 = vpop.f32.mrb[9].mxu0  ;;  %v3823_v45 = vpop.f32.mrb[9].mxu1 }
 0x309   : > { %4044 = vmatprep.mubr.bf16.mxu1 %v6626_v9  ;;  %v8732_v34 = vpop.f32.mrb[10].mxu0  ;;  %v8734_v11 = vpop.f32.mrb[10].mxu1  ;;  %v6652_v46 = vld [vmem:[%s7583_s11 + $0x368] ss:$24 sps:$4 sm:$0xff]   ;;  %v6656_v45 = vld [vmem:[%s7583_s11 + $0x39c] ss:$24 sps:$4 sm:$0xff]  }
 0x30a   : > { %v3730_v50 = vpop.f32.mrb[11].mxu0  ;;  %v3826_v49 = vpop.f32.mrb[11].mxu1 }
 0x30c   : > { %4262 = vmatmul.mubr.bf16.gmra.mrb[100].mxu0 %v6625_v32 }
 0x30d   : > { %4269 = vmatprep.mubr.bf16.mxu0 %v6629_v26 }
 0x30f   : > { %v8738_v2 = vpop.f32.mrb[12].mxu0  ;;  %v8742_v5 = vpop.f32.mrb[12].mxu1 }
 0x310   : > { %4045 = vmatmul.mubr.bf16.gmra.mrb[104].mxu1 %v6628_v0  ;;  %v3735_v59 = vpop.f32.mrb[13].mxu0  ;;  %v3831_v53 = vpop.f32.mrb[13].mxu1  ;;  %v6655_v0 = vld [vmem:[%s7583_s11 + $0x370] ss:$24 sps:$4 sm:$0xff]  }
 0x311   : > { %4052 = vmatprep.mubr.bf16.mxu1 %v6632_v16  ;;  %v8744_v27 = vpop.f32.mrb[14].mxu0  ;;  %v8746_v52 = vpop.f32.mrb[14].mxu1  ;;  %v6659_v16 = vld [vmem:[%s7583_s11 + $0x3a4] ss:$24 sps:$4 sm:$0xff]  }
 0x312   : > { %v3738_v60 = vpop.f32.mrb[15].mxu0  ;;  %v3834_v47 = vpop.f32.mrb[15].mxu1 }
 0x314   : > { %4270 = vmatmul.mubr.bf16.gmra.mrb[104].mxu0 %v6631_v23 }
 0x315   : > { %4277 = vmatprep.mubr.bf16.mxu0 %v6635_v44 }
 0x317   : > { %v8750_v54 = vpop.f32.mrb[16].mxu0  ;;  %v8754_v38 = vpop.f32.mrb[16].mxu1 }
 0x318   : > { %4053 = vmatmul.mubr.bf16.gmra.mrb[108].mxu1 %v6634_v7  ;;  %v3743_v24 = vpop.f32.mrb[17].mxu0  ;;  %v3839_v21 = vpop.f32.mrb[17].mxu1  ;;  %v6658_v7 = vld [vmem:[%s7583_s11 + $0x398] ss:$24 sps:$4 sm:$0xff]  }
 0x319   : > { %4060 = vmatprep.mubr.bf16.mxu1 %v6638_v17  ;;  %v8756_v48 = vpop.f32.mrb[18].mxu0  ;;  %v8758_v14 = vpop.f32.mrb[18].mxu1  ;;  %v6662_v17 = vld [vmem:[%s7583_s11 + $0x3cc] ss:$24 sps:$4 sm:$0xff]   ;;  %v6661_v24 = vld [vmem:[%s7583_s11 + $0x3a0] ss:$24 sps:$4 sm:$0xff]  }
 0x31a   : > { %v3746_v57 = vpop.f32.mrb[19].mxu0  ;;  %v3842_v29 = vpop.f32.mrb[19].mxu1  ;;  %v6665_v21 = vld [vmem:[%s7583_s11 + $0x3d4] ss:$24 sps:$4 sm:$0xff]  }
 0x31c   : > { %4278 = vmatmul.mubr.bf16.gmra.mrb[108].mxu0 %v6637_v56 }
 0x31d   : > { %4285 = vmatprep.mubr.bf16.mxu0 %v6641_v30 }
 0x31f   : > { %v8762_v40 = vpop.f32.mrb[20].mxu0  ;;  %v8766_v8 = vpop.f32.mrb[20].mxu1 }
 0x320   : > { %4061 = vmatmul.mubr.bf16.gmra.mrb[112].mxu1 %v6640_v15  ;;  %v3751_v36 = vpop.f32.mrb[21].mxu0  ;;  %v3847_v20 = vpop.f32.mrb[21].mxu1 }
 0x321   : > { %4068 = vmatprep.mubr.bf16.mxu1 %v6644_v37  ;;  %v8768_v18 = vpop.f32.mrb[22].mxu0  ;;  %v8770_v41 = vpop.f32.mrb[22].mxu1  ;;  %v6664_v36 = vld [vmem:[%s7583_s11 + $0x3c8] ss:$24 sps:$4 sm:$0xff]   ;;  %v6668_v20 = vld [vmem:[%s7583_s11 + $0x3fc] ss:$24 sps:$4 sm:$0xff]  }
 0x322   : > { %v3754_v43 = vpop.f32.mrb[23].mxu0  ;;  %v3850_v62 = vpop.f32.mrb[23].mxu1 }
 0x324   : > { %4286 = vmatmul.mubr.bf16.gmra.mrb[112].mxu0 %v6643_v1 }
 0x325   : > { %4293 = vmatprep.mubr.bf16.mxu0 %v6647_v31 }
 0x327   : > { %v8774_v61 = vpop.f32.mrb[24].mxu0  ;;  %v8778_v10 = vpop.f32.mrb[24].mxu1 }
 0x328   : > { %4069 = vmatmul.mubr.bf16.gmra.mrb[116].mxu1 %v6646_v25  ;;  %v3759_v12 = vpop.f32.mrb[25].mxu0  ;;  %v3855_v35 = vpop.f32.mrb[25].mxu1  ;;  %v6667_v25 = vld [vmem:[%s7583_s11 + $0x3d0] ss:$24 sps:$4 sm:$0xff]  }
 0x329   : > { %4076 = vmatprep.mubr.bf16.mxu1 %v6650_v42  ;;  %v8780_v39 = vpop.f32.mrb[26].mxu0  ;;  %v8782_v32 = vpop.f32.mrb[26].mxu1  ;;  %v6671_v42 = vld [vmem:[%s7583_s11 + $0x404] ss:$24 sps:$4 sm:$0xff]  }
 0x32a   : > { %v3762_v9 = vpop.f32.mrb[27].mxu0  ;;  %v3858_v26 = vpop.f32.mrb[27].mxu1 }
 0x32c   : > { %4294 = vmatmul.mubr.bf16.gmra.mrb[116].mxu0 %v6649_v4 }
 0x32d   : > { %4301 = vmatprep.mubr.bf16.mxu0 %v6653_v6 }
 0x32f   : > { %v8786_v50 = vpop.f32.mrb[28].mxu0  ;;  %v8790_v23 = vpop.f32.mrb[28].mxu1 }
 0x330   : > { %4077 = vmatmul.mubr.bf16.gmra.mrb[120].mxu1 %v6652_v46  ;;  %v3767_v49 = vpop.f32.mrb[29].mxu0  ;;  %v3863_v44 = vpop.f32.mrb[29].mxu1  ;;  %v6670_v46 = vld [vmem:[%s7583_s11 + $0x3f8] ss:$24 sps:$4 sm:$0xff]  }
 0x331   : > { %4084 = vmatprep.mubr.bf16.mxu1 %v6656_v45  ;;  %v8792_v59 = vpop.f32.mrb[30].mxu0  ;;  %v8794_v60 = vpop.f32.mrb[30].mxu1  ;;  %v6674_v45 = vld [vmem:[%s7583_s11 + $0x42c] ss:$24 sps:$4 sm:$0xff]   ;;  %v6673_v49 = vld [vmem:[%s7583_s11 + $0x400] ss:$24 sps:$4 sm:$0xff]  }
 0x332   : > { %v3770_v53 = vpop.f32.mrb[31].mxu0  ;;  %v3866_v47 = vpop.f32.mrb[31].mxu1  ;;  %v6677_v44 = vld [vmem:[%s7583_s11 + $0x434] ss:$24 sps:$4 sm:$0xff]  }
 0x334   : > { %4302 = vmatmul.mubr.bf16.gmra.mrb[120].mxu0 %v6655_v0 }
 0x335   : > { %4309 = vmatprep.mubr.bf16.mxu0 %v6659_v16 }
 0x337   : > { %v8798_v56 = vpop.f32.mrb[32].mxu0  ;;  %v8802_v57 = vpop.f32.mrb[32].mxu1 }
 0x338   : > { %4085 = vmatmul.mubr.bf16.gmra.mrb[124].mxu1 %v6658_v7  ;;  %v3775_v30 = vpop.f32.mrb[33].mxu0  ;;  %v3871_v29 = vpop.f32.mrb[33].mxu1 }
 0x339   : > { %4092 = vmatprep.mubr.bf16.mxu1 %v6662_v17  ;;  %v8804_v15 = vpop.f32.mrb[34].mxu0  ;;  %v8806_v1 = vpop.f32.mrb[34].mxu1  ;;  %v6676_v30 = vld [vmem:[%s7583_s11 + $0x428] ss:$24 sps:$4 sm:$0xff]   ;;  %v6680_v29 = vld [vmem:[%s7583_s11 + $0x45c] ss:$24 sps:$4 sm:$0xff]  }
 0x33a   : > { %v3778_v37 = vpop.f32.mrb[35].mxu0  ;;  %v3874_v31 = vpop.f32.mrb[35].mxu1 }
 0x33c   : > { %4310 = vmatmul.mubr.bf16.gmra.mrb[124].mxu0 %v6661_v24 }
 0x33d   : > { %4317 = vmatprep.mubr.bf16.mxu0 %v6665_v21 }
 0x33f   : > { %v8810_v43 = vpop.f32.mrb[36].mxu0  ;;  %v8814_v4 = vpop.f32.mrb[36].mxu1 }
 0x340   : > { %4093 = vmatmul.mubr.bf16.gmra.mrb[128].mxu1 %v6664_v36  ;;  %v3783_v62 = vpop.f32.mrb[37].mxu0  ;;  %v3879_v6 = vpop.f32.mrb[37].mxu1  ;;  %v6679_v36 = vld [vmem:[%s7583_s11 + $0x430] ss:$24 sps:$4 sm:$0xff]  }
 0x341   : > { %4100 = vmatprep.mubr.bf16.mxu1 %v6668_v20  ;;  %v8816_v12 = vpop.f32.mrb[38].mxu0  ;;  %v8818_v9 = vpop.f32.mrb[38].mxu1  ;;  %v6683_v20 = vld [vmem:[%s7583_s11 + $0x464] ss:$24 sps:$4 sm:$0xff]  }
 0x342   : > { %v3786_v35 = vpop.f32.mrb[39].mxu0  ;;  %v3882_v26 = vpop.f32.mrb[39].mxu1 }
 0x344   : > { %4318 = vmatmul.mubr.bf16.gmra.mrb[128].mxu0 %v6667_v25 }
 0x345   : > { %4325 = vmatprep.mubr.bf16.mxu0 %v6671_v42 }
 0x347   : > { %v8822_v0 = vpop.f32.mrb[40].mxu0  ;;  %v8826_v53 = vpop.f32.mrb[40].mxu1 }
 0x348   : > { %4101 = vmatmul.mubr.bf16.gmra.mrb[132].mxu1 %v6670_v46  ;;  %v3791_v16 = vpop.f32.mrb[41].mxu0  ;;  %v3887_v47 = vpop.f32.mrb[41].mxu1  ;;  %v6682_v46 = vld [vmem:[%s7583_s11 + $0x458] ss:$24 sps:$4 sm:$0xff]  }
 0x349   : > { %4108 = vmatprep.mubr.bf16.mxu1 %v6674_v45  ;;  %v8828_v7 = vpop.f32.mrb[42].mxu0  ;;  %v8830_v24 = vpop.f32.mrb[42].mxu1  ;;  %v6685_v45 = vld [vmem:[%s7583_s11 + $0x460] ss:$24 sps:$4 sm:$0xff]  }
 0x34a   : > { %v3794_v17 = vpop.f32.mrb[43].mxu0  ;;  %v3890_v21 = vpop.f32.mrb[43].mxu1 }
 0x34b   : > { %v2763_v21 = vld [vmem:[#allocation2] sm:$0xff] }
 0x34c   : > { %4326 = vmatmul.mubr.bf16.gmra.mrb[132].mxu0 %v6673_v49 }
 0x34d   : > { %4333 = vmatprep.mubr.bf16.mxu0 %v6677_v44 }
 0x34f   : > { %v8834_v37 = vpop.f32.mrb[44].mxu0  ;;  %v8838_v25 = vpop.f32.mrb[44].mxu1 }
 0x350   : > { %4109 = vmatmul.mubr.bf16.gmra.mrb[136].mxu1 %v6676_v30  ;;  %v3799_v31 = vpop.f32.mrb[45].mxu0  ;;  %v3895_v42 = vpop.f32.mrb[45].mxu1 }
 0x351   : > { %4116 = vmatprep.mubr.bf16.mxu1 %v6680_v29  ;;  %v8840_v62 = vpop.f32.mrb[46].mxu0  ;;  %v8842_v35 = vpop.f32.mrb[46].mxu1 }
 0x352   : > { %v3802_v6 = vpop.f32.mrb[47].mxu0  ;;  %10289 = vst [vmem:[#allocation4_spill] sm:$0xff] %v8842_v35  ;;  %v3898_v26 = vpop.f32.mrb[47].mxu1 }
 0x354   : > { %4334 = vmatmul.mubr.bf16.gmra.mrb[136].mxu0 %v6679_v36  ;;  %v2764_v36 = vld [vmem:[#allocation2 + $0x8] sm:$0xff] }
 0x355   : > { %4341 = vmatprep.mubr.bf16.mxu0 %v6683_v20 }
 0x358   : > { %4117 = vmatmul.mubr.bf16.gmra.mrb[140].mxu1 %v6682_v46 }
 0x35c   : > { %4342 = vmatmul.mubr.bf16.gmra.mrb[140].mxu0 %v6685_v45 }
 0x373   : > { %v3934_v49 = vpop.f32.mrb[48].mxu1 }
 0x374   : > { %v3935_v16 = vadd.f32 %v3934_v49, %v8702_v22  ;;  %v3936_v44 = vpop.f32.mrb[49].mxu1 }
 0x375   : > { %v3937_v47 = vpop.f32.mrb[50].mxu1 }
 0x376   : > { %v3938_v17 = vadd.f32 %v3937_v47, %v8708_v58  ;;  %v3939_v30 = vpop.f32.mrb[51].mxu1  ;;  %v2765_v47 = vld [vmem:[#allocation2 + $0x10] sm:$0xff] }
 0x377   : > { %v4159_v29 = vpop.f32.mrb[48].mxu0 }
 0x378   : > { %v4160_v31 = vadd.f32 %v4159_v29, %v3935_v16  ;;  %v4161_v42 = vpop.f32.mrb[49].mxu0 }
 0x379   : > { %v4162_v6 = vpop.f32.mrb[50].mxu0 }
 0x37a   : > { %v4350_v26 = vadd.f32 %v4160_v31, %v2763_v21  ;;  %v4163_v20 = vadd.f32 %v4162_v6, %v3938_v17  ;;  %v4164_v46 = vpop.f32.mrb[51].mxu0  ;;  %v2766_v21 = vld [vmem:[#allocation2 + $0x18] sm:$0xff] }
 0x37b   : > { %v3942_v35 = vpop.f32.mrb[52].mxu1 }
 0x37c   : > { %4399 = vst.msk [vmem:[#allocation2] sm:$0xff] %vm4398_vm2, %v4350_v26  ;;  %v4351_v45 = vadd.f32 %v4163_v20, %v2764_v36  ;;  %v3943_v22 = vadd.f32 %v3942_v35, %v8714_v13  ;;  %v3944_v49 = vpop.f32.mrb[53].mxu1 }
 0x37d   : > { %v3945_v44 = vpop.f32.mrb[54].mxu1 }
 0x37e   : > { %4400 = vst.msk [vmem:[#allocation2 + $0x8] sm:$0xff] %vm4398_vm2, %v4351_v45  ;;  %v3946_v58 = vadd.f32 %v3945_v44, %v8720_v63  ;;  %v3947_v16 = vpop.f32.mrb[55].mxu1 }
 0x37f   : > { %v4167_v30 = vpop.f32.mrb[52].mxu0 }
 0x380   : > { %v4168_v29 = vadd.f32 %v4167_v30, %v3943_v22  ;;  %v4169_v42 = vpop.f32.mrb[53].mxu0  ;;  %v2767_v22 = vld [vmem:[#allocation2 + $0x20] sm:$0xff] }
 0x381   : > { %v4170_v17 = vpop.f32.mrb[54].mxu0 }
 0x382   : > { %v4352_v31 = vadd.f32 %v4168_v29, %v2765_v47  ;;  %v4171_v6 = vadd.f32 %v4170_v17, %v3946_v58  ;;  %v4172_v46 = vpop.f32.mrb[55].mxu0  ;;  %v2768_v47 = vld [vmem:[#allocation2 + $0x28] sm:$0xff] }
 0x383   : > { %v3950_v26 = vpop.f32.mrb[56].mxu1 }
 0x384   : > { %4401 = vst.msk [vmem:[#allocation2 + $0x10] sm:$0xff] %vm4398_vm2, %v4352_v31  ;;  %v4353_v13 = vadd.f32 %v4171_v6, %v2766_v21  ;;  %v3951_v35 = vadd.f32 %v3950_v26, %v8726_v33  ;;  %v3952_v36 = vpop.f32.mrb[57].mxu1  ;;  %v2769_v26 = vld [vmem:[#allocation2 + $0x30] sm:$0xff] }
 0x385   : > { %v3953_v20 = vpop.f32.mrb[58].mxu1 }
 0x386   : > { %4402 = vst.msk [vmem:[#allocation2 + $0x18] sm:$0xff] %vm4398_vm2, %v4353_v13  ;;  %v3954_v63 = vadd.f32 %v3953_v20, %v8732_v34  ;;  %v3955_v45 = vpop.f32.mrb[59].mxu1  ;;  %v2770_v20 = vld [vmem:[#allocation2 + $0x38] sm:$0xff] }
 0x387   : > { %v4175_v49 = vpop.f32.mrb[56].mxu0 }
 0x388   : > { %v4176_v44 = vadd.f32 %v4175_v49, %v3951_v35  ;;  %v4177_v16 = vpop.f32.mrb[57].mxu0 }
 0x389   : > { %v4178_v58 = vpop.f32.mrb[58].mxu0 }
 0x38a   : > { %v4354_v30 = vadd.f32 %v4176_v44, %v2767_v22  ;;  %v4179_v29 = vadd.f32 %v4178_v58, %v3954_v63  ;;  %v4180_v42 = vpop.f32.mrb[59].mxu0 }
 0x38b   : > { %v3958_v17 = vpop.f32.mrb[60].mxu1 }
 0x38c   : > { %4403 = vst.msk [vmem:[#allocation2 + $0x20] sm:$0xff] %vm4398_vm2, %v4354_v30  ;;  %v4355_v33 = vadd.f32 %v4179_v29, %v2768_v47  ;;  %v3959_v21 = vadd.f32 %v3958_v17, %v8738_v2  ;;  %v3960_v31 = vpop.f32.mrb[61].mxu1  ;;  %v2771_v29 = vld [vmem:[#allocation2 + $0x40] sm:$0xff] }
 0x38d   : > { %v3961_v6 = vpop.f32.mrb[62].mxu1 }
 0x38e   : > { %4404 = vst.msk [vmem:[#allocation2 + $0x28] sm:$0xff] %vm4398_vm2, %v4355_v33  ;;  %v3962_v34 = vadd.f32 %v3961_v6, %v8744_v27  ;;  %v3963_v46 = vpop.f32.mrb[63].mxu1 }
 0x38f   : > { %v4183_v13 = vpop.f32.mrb[60].mxu0 }
 0x390   : > { %v4184_v35 = vadd.f32 %v4183_v13, %v3959_v21  ;;  %v4185_v36 = vpop.f32.mrb[61].mxu0  ;;  %v2772_v21 = vld [vmem:[#allocation2 + $0x48] sm:$0xff] }
 0x391   : > { %v4186_v63 = vpop.f32.mrb[62].mxu0 }
 0x392   : > { %v4356_v45 = vadd.f32 %v4184_v35, %v2769_v26  ;;  %v4187_v22 = vadd.f32 %v4186_v63, %v3962_v34  ;;  %v4188_v49 = vpop.f32.mrb[63].mxu0  ;;  %v2773_v63 = vld [vmem:[#allocation2 + $0x50] sm:$0xff] }
 0x393   : > { %v3966_v44 = vpop.f32.mrb[64].mxu1 }
 0x394   : > { %4405 = vst.msk [vmem:[#allocation2 + $0x30] sm:$0xff] %vm4398_vm2, %v4356_v45  ;;  %v4357_v2 = vadd.f32 %v4187_v22, %v2770_v20  ;;  %v3967_v16 = vadd.f32 %v3966_v44, %v8750_v54  ;;  %v3968_v47 = vpop.f32.mrb[65].mxu1  ;;  %v2774_v44 = vld [vmem:[#allocation2 + $0x58] sm:$0xff] }
 0x395   : > { %v3969_v58 = vpop.f32.mrb[66].mxu1 }
 0x396   : > { %4406 = vst.msk [vmem:[#allocation2 + $0x38] sm:$0xff] %vm4398_vm2, %v4357_v2  ;;  %v3970_v27 = vadd.f32 %v3969_v58, %v8756_v48  ;;  %v3971_v30 = vpop.f32.mrb[67].mxu1 }
 0x397   : > { %v4191_v42 = vpop.f32.mrb[64].mxu0 }
 0x398   : > { %v4192_v17 = vadd.f32 %v4191_v42, %v3967_v16  ;;  %v4193_v33 = vpop.f32.mrb[65].mxu0 }
 0x399   : > { %v4194_v31 = vpop.f32.mrb[66].mxu0  ;;  %v2775_v33 = vld [vmem:[#allocation2 + $0x60] sm:$0xff] }
 0x39a   : > { %v4358_v6 = vadd.f32 %v4192_v17, %v2771_v29  ;;  %v4195_v34 = vadd.f32 %v4194_v31, %v3970_v27  ;;  %v4196_v46 = vpop.f32.mrb[67].mxu0 }
 0x39b   : > { %v3974_v26 = vpop.f32.mrb[68].mxu1 }
 0x39c   : > { %4407 = vst.msk [vmem:[#allocation2 + $0x40] sm:$0xff] %vm4398_vm2, %v4358_v6  ;;  %v4359_v54 = vadd.f32 %v4195_v34, %v2772_v21  ;;  %v3975_v13 = vadd.f32 %v3974_v26, %v8762_v40  ;;  %v3976_v35 = vpop.f32.mrb[69].mxu1  ;;  %v2776_v34 = vld [vmem:[#allocation2 + $0x68] sm:$0xff] }
 0x39d   : > { %v3977_v36 = vpop.f32.mrb[70].mxu1 }
 0x39e   : > { %4408 = vst.msk [vmem:[#allocation2 + $0x48] sm:$0xff] %vm4398_vm2, %v4359_v54  ;;  %v3978_v48 = vadd.f32 %v3977_v36, %v8768_v18  ;;  %v3979_v20 = vpop.f32.mrb[71].mxu1 }
 0x39f   : > { %v4199_v45 = vpop.f32.mrb[68].mxu0 }
 0x3a0   : > { %v4200_v22 = vadd.f32 %v4199_v45, %v3975_v13  ;;  %v4201_v49 = vpop.f32.mrb[69].mxu0  ;;  %v2777_v45 = vld [vmem:[#allocation2 + $0x70] sm:$0xff] }
 0x3a1   : > { %v4202_v2 = vpop.f32.mrb[70].mxu0 }
 0x3a2   : > { %v4360_v16 = vadd.f32 %v4200_v22, %v2773_v63  ;;  %v4203_v47 = vadd.f32 %v4202_v2, %v3978_v48  ;;  %v4204_v58 = vpop.f32.mrb[71].mxu0  ;;  %v2778_v2 = vld [vmem:[#allocation2 + $0x78] sm:$0xff] }
 0x3a3   : > { %v3982_v27 = vpop.f32.mrb[72].mxu1 }
 0x3a4   : > { %4409 = vst.msk [vmem:[#allocation2 + $0x50] sm:$0xff] %vm4398_vm2, %v4360_v16  ;;  %v4361_v40 = vadd.f32 %v4203_v47, %v2774_v44  ;;  %v3983_v30 = vadd.f32 %v3982_v27, %v8774_v61  ;;  %v3984_v29 = vpop.f32.mrb[73].mxu1 }
 0x3a5   : > { %v3985_v42 = vpop.f32.mrb[74].mxu1 }
 0x3a6   : > { %4410 = vst.msk [vmem:[#allocation2 + $0x58] sm:$0xff] %vm4398_vm2, %v4361_v40  ;;  %v3986_v18 = vadd.f32 %v3985_v42, %v8780_v39  ;;  %v3987_v17 = vpop.f32.mrb[75].mxu1 }
 0x3a7   : > { %v4207_v21 = vpop.f32.mrb[72].mxu0  ;;  %v2779_v17 = vld [vmem:[#allocation2 + $0x80] sm:$0xff] }
 0x3a8   : > { %v4208_v31 = vadd.f32 %v4207_v21, %v3983_v30  ;;  %v4209_v6 = vpop.f32.mrb[73].mxu0 }
 0x3a9   : > { %v4210_v46 = vpop.f32.mrb[74].mxu0  ;;  %v2780_v6 = vld [vmem:[#allocation2 + $0x88] sm:$0xff] }
 0x3aa   : > { %v4362_v26 = vadd.f32 %v4208_v31, %v2775_v33  ;;  %v4211_v54 = vadd.f32 %v4210_v46, %v3986_v18  ;;  %v4212_v13 = vpop.f32.mrb[75].mxu0 }
 0x3ab   : > { %v3990_v35 = vpop.f32.mrb[76].mxu1 }
 0x3ac   : > { %4411 = vst.msk [vmem:[#allocation2 + $0x60] sm:$0xff] %vm4398_vm2, %v4362_v26  ;;  %v4363_v61 = vadd.f32 %v4211_v54, %v2776_v34  ;;  %v3991_v36 = vadd.f32 %v3990_v35, %v8786_v50  ;;  %v3992_v48 = vpop.f32.mrb[77].mxu1 }
 0x3ad   : > { %v3993_v20 = vpop.f32.mrb[78].mxu1 }
 0x3ae   : > { %4412 = vst.msk [vmem:[#allocation2 + $0x68] sm:$0xff] %vm4398_vm2, %v4363_v61  ;;  %v3994_v39 = vadd.f32 %v3993_v20, %v8792_v59  ;;  %v3995_v63 = vpop.f32.mrb[79].mxu1  ;;  %v2781_v20 = vld [vmem:[#allocation2 + $0x90] sm:$0xff] }
 0x3af   : > { %v4215_v22 = vpop.f32.mrb[76].mxu0 }
 0x3b0   : > { %v4216_v49 = vadd.f32 %v4215_v22, %v3991_v36  ;;  %v4217_v44 = vpop.f32.mrb[77].mxu0  ;;  %v2782_v22 = vld [vmem:[#allocation2 + $0x98] sm:$0xff] }
 0x3b1   : > { %v4218_v16 = vpop.f32.mrb[78].mxu0 }
 0x3b2   : > { %v4364_v47 = vadd.f32 %v4216_v49, %v2777_v45  ;;  %v4219_v58 = vadd.f32 %v4218_v16, %v3994_v39  ;;  %v4220_v27 = vpop.f32.mrb[79].mxu0 }
 0x3b3   : > { %v3998_v40 = vpop.f32.mrb[80].mxu1 }
 0x3b4   : > { %4413 = vst.msk [vmem:[#allocation2 + $0x70] sm:$0xff] %vm4398_vm2, %v4364_v47  ;;  %v4365_v50 = vadd.f32 %v4219_v58, %v2778_v2  ;;  %v3999_v30 = vadd.f32 %v3998_v40, %v8798_v56  ;;  %v4000_v29 = vpop.f32.mrb[81].mxu1 }
 0x3b5   : > { %v4001_v42 = vpop.f32.mrb[82].mxu1 }
 0x3b6   : > { %4414 = vst.msk [vmem:[#allocation2 + $0x78] sm:$0xff] %vm4398_vm2, %v4365_v50  ;;  %v4002_v59 = vadd.f32 %v4001_v42, %v8804_v15  ;;  %v4003_v18 = vpop.f32.mrb[83].mxu1 }
 0x3b7   : > { %v4223_v33 = vpop.f32.mrb[80].mxu0  ;;  %v2784_v18 = vld [vmem:[#allocation2 + $0xa8] sm:$0xff] }
 0x3b8   : > { %v4224_v21 = vadd.f32 %v4223_v33, %v3999_v30  ;;  %v4225_v31 = vpop.f32.mrb[81].mxu0  ;;  %v2783_v30 = vld [vmem:[#allocation2 + $0xa0] sm:$0xff] }
 0x3b9   : > { %v4226_v34 = vpop.f32.mrb[82].mxu0 }
 0x3ba   : > { %v4366_v46 = vadd.f32 %v4224_v21, %v2779_v17  ;;  %v4227_v26 = vadd.f32 %v4226_v34, %v4002_v59  ;;  %v4228_v54 = vpop.f32.mrb[83].mxu0 }
 0x3bb   : > { %v4006_v13 = vpop.f32.mrb[84].mxu1 }
 0x3bc   : > { %4415 = vst.msk [vmem:[#allocation2 + $0x80] sm:$0xff] %vm4398_vm2, %v4366_v46  ;;  %v4367_v56 = vadd.f32 %v4227_v26, %v2780_v6  ;;  %v4007_v35 = vadd.f32 %v4006_v13, %v8810_v43  ;;  %v4008_v61 = vpop.f32.mrb[85].mxu1  ;;  %v2785_v13 = vld [vmem:[#allocation2 + $0xb0] sm:$0xff] }
 0x3bd   : > { %v4009_v36 = vpop.f32.mrb[86].mxu1 }
 0x3be   : > { %4416 = vst.msk [vmem:[#allocation2 + $0x88] sm:$0xff] %vm4398_vm2, %v4367_v56  ;;  %v4010_v15 = vadd.f32 %v4009_v36, %v8816_v12  ;;  %v4011_v48 = vpop.f32.mrb[87].mxu1  ;;  %v2786_v36 = vld [vmem:[#allocation2 + $0xb8] sm:$0xff] }
 0x3bf   : > { %v4231_v39 = vpop.f32.mrb[84].mxu0 }
 0x3c0   : > { %v4232_v63 = vadd.f32 %v4231_v39, %v4007_v35  ;;  %v4233_v45 = vpop.f32.mrb[85].mxu0 }
 0x3c1   : > { %v4234_v49 = vpop.f32.mrb[86].mxu0 }
 0x3c2   : > { %v4368_v44 = vadd.f32 %v4232_v63, %v2781_v20  ;;  %v4235_v2 = vadd.f32 %v4234_v49, %v4010_v15  ;;  %v4236_v16 = vpop.f32.mrb[87].mxu0 }
 0x3c3   : > { %v4014_v47 = vpop.f32.mrb[88].mxu1 }
 0x3c4   : > { %4417 = vst.msk [vmem:[#allocation2 + $0x90] sm:$0xff] %vm4398_vm2, %v4368_v44  ;;  %v4369_v43 = vadd.f32 %v4235_v2, %v2782_v22  ;;  %v4015_v58 = vadd.f32 %v4014_v47, %v8822_v0  ;;  %v4016_v27 = vpop.f32.mrb[89].mxu1  ;;  %v2787_v2 = vld [vmem:[#allocation2 + $0xc0] sm:$0xff] }
 0x3c5   : > { %v4017_v40 = vpop.f32.mrb[90].mxu1 }
 0x3c6   : > { %4418 = vst.msk [vmem:[#allocation2 + $0x98] sm:$0xff] %vm4398_vm2, %v4369_v43  ;;  %v4018_v12 = vadd.f32 %v4017_v40, %v8828_v7  ;;  %v4019_v50 = vpop.f32.mrb[91].mxu1 }
 0x3c7   : > { %v4239_v29 = vpop.f32.mrb[88].mxu0 }
 0x3c8   : > { %v4240_v42 = vadd.f32 %v4239_v29, %v4015_v58  ;;  %v4241_v59 = vpop.f32.mrb[89].mxu0  ;;  %v2788_v58 = vld [vmem:[#allocation2 + $0xc8] sm:$0xff] }
 0x3c9   : > { %v4242_v17 = vpop.f32.mrb[90].mxu0 }
 0x3ca   : > { %v4370_v33 = vadd.f32 %v4240_v42, %v2783_v30  ;;  %v4243_v21 = vadd.f32 %v4242_v17, %v4018_v12  ;;  %v4244_v31 = vpop.f32.mrb[91].mxu0  ;;  %v2789_v17 = vld [vmem:[#allocation2 + $0xd0] sm:$0xff] }
 0x3cb   : > { %v4022_v6 = vpop.f32.mrb[92].mxu1 }
 0x3cc   : > { %4419 = vst.msk [vmem:[#allocation2 + $0xa0] sm:$0xff] %vm4398_vm2, %v4370_v33  ;;  %v4371_v0 = vadd.f32 %v4243_v21, %v2784_v18  ;;  %v4023_v34 = vadd.f32 %v4022_v6, %v8834_v37  ;;  %v4024_v46 = vpop.f32.mrb[93].mxu1  ;;  %v2790_v6 = vld [vmem:[#allocation2 + $0xd8] sm:$0xff] }
 0x3cd   : > { %v4025_v26 = vpop.f32.mrb[94].mxu1 }
 0x3ce   : > { %4420 = vst.msk [vmem:[#allocation2 + $0xa8] sm:$0xff] %vm4398_vm2, %v4371_v0  ;;  %v4026_v7 = vadd.f32 %v4025_v26, %v8840_v62  ;;  %v4027_v54 = vpop.f32.mrb[95].mxu1 }
 0x3cf   : > { %v4247_v56 = vpop.f32.mrb[92].mxu0 }
 0x3d0   : > { %v4248_v35 = vadd.f32 %v4247_v56, %v4023_v34  ;;  %v4249_v61 = vpop.f32.mrb[93].mxu0 }
 0x3d1   : > { %v4250_v15 = vpop.f32.mrb[94].mxu0  ;;  %v2791_v61 = vld [vmem:[#allocation2 + $0xe0] sm:$0xff] }
 0x3d2   : > { %v4372_v48 = vadd.f32 %v4248_v35, %v2785_v13  ;;  %v4251_v20 = vadd.f32 %v4250_v15, %v4026_v7  ;;  %v4252_v39 = vpop.f32.mrb[95].mxu0 }
 0x3d3   : > { %v4030_v63 = vpop.f32.mrb[96].mxu1 }
 0x3d4   : > { %4421 = vst.msk [vmem:[#allocation2 + $0xb0] sm:$0xff] %vm4398_vm2, %v4372_v48  ;;  %v4373_v37 = vadd.f32 %v4251_v20, %v2786_v36  ;;  %v4031_v45 = vadd.f32 %v4030_v63, %v8705_v19  ;;  %v4032_v22 = vpop.f32.mrb[97].mxu1  ;;  %v2792_v20 = vld [vmem:[#allocation2 + $0xe8] sm:$0xff] }
 0x3d5   : > { %v4033_v49 = vpop.f32.mrb[98].mxu1 }
 0x3d6   : > { %4422 = vst.msk [vmem:[#allocation2 + $0xb8] sm:$0xff] %vm4398_vm2, %v4373_v37  ;;  %v4034_v62 = vadd.f32 %v4033_v49, %v8710_v28  ;;  %v4035_v44 = vpop.f32.mrb[99].mxu1 }
 0x3d7   : > { %v4255_v16 = vpop.f32.mrb[96].mxu0 }
 0x3d8   : > { %v4256_v47 = vadd.f32 %v4255_v16, %v4031_v45  ;;  %v4257_v43 = vpop.f32.mrb[97].mxu0  ;;  %v2793_v16 = vld [vmem:[#allocation2 + $0xf0] sm:$0xff] }
 0x3d9   : > { %v4258_v27 = vpop.f32.mrb[98].mxu0 }
 0x3da   : > { %v4374_v40 = vadd.f32 %v4256_v47, %v2787_v2  ;;  %v4259_v12 = vadd.f32 %v4258_v27, %v4034_v62  ;;  %v4260_v50 = vpop.f32.mrb[99].mxu0  ;;  %v2794_v27 = vld [vmem:[#allocation2 + $0xf8] sm:$0xff] }
 0x3db   : > { %v4038_v30 = vpop.f32.mrb[100].mxu1 }
 0x3dc   : > { %4423 = vst.msk [vmem:[#allocation2 + $0xc0] sm:$0xff] %vm4398_vm2, %v4374_v40  ;;  %v4375_v19 = vadd.f32 %v4259_v12, %v2788_v58  ;;  %v4039_v29 = vadd.f32 %v4038_v30, %v8718_v55  ;;  %v4040_v42 = vpop.f32.mrb[101].mxu1 }
 0x3dd   : > { %v4041_v59 = vpop.f32.mrb[102].mxu1 }
 0x3de   : > { %4424 = vst.msk [vmem:[#allocation2 + $0xc8] sm:$0xff] %vm4398_vm2, %v4375_v19  ;;  %v4042_v28 = vadd.f32 %v4041_v59, %v8722_v3  ;;  %v4043_v18 = vpop.f32.mrb[103].mxu1 }
 0x3df   : > { %v4263_v33 = vpop.f32.mrb[100].mxu0  ;;  %v2795_v18 = vld [vmem:[#allocation2 + $0x100] sm:$0xff] }
 0x3e0   : > { %v4264_v21 = vadd.f32 %v4263_v33, %v4039_v29  ;;  %v4265_v31 = vpop.f32.mrb[101].mxu0 }
 0x3e1   : > { %v4266_v0 = vpop.f32.mrb[102].mxu0  ;;  %v2796_v31 = vld [vmem:[#allocation2 + $0x108] sm:$0xff] }
 0x3e2   : > { %v4376_v34 = vadd.f32 %v4264_v21, %v2789_v17  ;;  %v4267_v46 = vadd.f32 %v4266_v0, %v4042_v28  ;;  %v4268_v26 = vpop.f32.mrb[103].mxu0 }
 0x3e3   : > { %v4046_v7 = vpop.f32.mrb[104].mxu1 }
 0x3e4   : > { %4425 = vst.msk [vmem:[#allocation2 + $0xd0] sm:$0xff] %vm4398_vm2, %v4376_v34  ;;  %v4377_v55 = vadd.f32 %v4267_v46, %v2790_v6  ;;  %v4047_v54 = vadd.f32 %v4046_v7, %v8730_v51  ;;  %v4048_v13 = vpop.f32.mrb[105].mxu1 }
 0x3e5   : > { %v4049_v56 = vpop.f32.mrb[106].mxu1 }
 0x3e6   : > { %4426 = vst.msk [vmem:[#allocation2 + $0xd8] sm:$0xff] %vm4398_vm2, %v4377_v55  ;;  %v4050_v3 = vadd.f32 %v4049_v56, %v8734_v11  ;;  %v4051_v35 = vpop.f32.mrb[107].mxu1  ;;  %v2797_v56 = vld [vmem:[#allocation2 + $0x110] sm:$0xff] }
 0x3e7   : > { %v4271_v36 = vpop.f32.mrb[104].mxu0 }
 0x3e8   : > { %v4272_v15 = vadd.f32 %v4271_v36, %v4047_v54  ;;  %v4273_v48 = vpop.f32.mrb[105].mxu0  ;;  %v2798_v36 = vld [vmem:[#allocation2 + $0x118] sm:$0xff] }
 0x3e9   : > { %v4274_v39 = vpop.f32.mrb[106].mxu0 }
 0x3ea   : > { %v4378_v63 = vadd.f32 %v4272_v15, %v2791_v61  ;;  %v4275_v37 = vadd.f32 %v4274_v39, %v4050_v3  ;;  %v4276_v45 = vpop.f32.mrb[107].mxu0 }
 0x3eb   : > { %v4054_v22 = vpop.f32.mrb[108].mxu1 }
 0x3ec   : > { %4427 = vst.msk [vmem:[#allocation2 + $0xe0] sm:$0xff] %vm4398_vm2, %v4378_v63  ;;  %v4379_v51 = vadd.f32 %v4275_v37, %v2792_v20  ;;  %v4055_v49 = vadd.f32 %v4054_v22, %v8742_v5  ;;  %v4056_v62 = vpop.f32.mrb[109].mxu1 }
 0x3ed   : > { %v4057_v44 = vpop.f32.mrb[110].mxu1 }
 0x3ee   : > { %4428 = vst.msk [vmem:[#allocation2 + $0xe8] sm:$0xff] %vm4398_vm2, %v4379_v51  ;;  %v4058_v11 = vadd.f32 %v4057_v44, %v8746_v52  ;;  %v4059_v2 = vpop.f32.mrb[111].mxu1 }
 0x3ef   : > { %v4279_v47 = vpop.f32.mrb[108].mxu0  ;;  %v2800_v2 = vld [vmem:[#allocation2 + $0x128] sm:$0xff] }
 0x3f0   : > { %v4280_v43 = vadd.f32 %v4279_v47, %v4055_v49  ;;  %v4281_v58 = vpop.f32.mrb[109].mxu0  ;;  %v2799_v49 = vld [vmem:[#allocation2 + $0x120] sm:$0xff] }
 0x3f1   : > { %v4282_v40 = vpop.f32.mrb[110].mxu0 }
 0x3f2   : > { %v4380_v12 = vadd.f32 %v4280_v43, %v2793_v16  ;;  %v4283_v50 = vadd.f32 %v4282_v40, %v4058_v11  ;;  %v4284_v30 = vpop.f32.mrb[111].mxu0 }
 0x3f3   : > { %v4062_v19 = vpop.f32.mrb[112].mxu1 }
 0x3f4   : > { %4429 = vst.msk [vmem:[#allocation2 + $0xf0] sm:$0xff] %vm4398_vm2, %v4380_v12  ;;  %v4381_v5 = vadd.f32 %v4283_v50, %v2794_v27  ;;  %v4063_v29 = vadd.f32 %v4062_v19, %v8754_v38  ;;  %v4064_v42 = vpop.f32.mrb[113].mxu1  ;;  %v2801_v19 = vld [vmem:[#allocation2 + $0x130] sm:$0xff] }
 0x3f5   : > { %v4065_v59 = vpop.f32.mrb[114].mxu1 }
 0x3f6   : > { %4430 = vst.msk [vmem:[#allocation2 + $0xf8] sm:$0xff] %vm4398_vm2, %v4381_v5  ;;  %v4066_v52 = vadd.f32 %v4065_v59, %v8758_v14  ;;  %v4067_v28 = vpop.f32.mrb[115].mxu1  ;;  %v2802_v59 = vld [vmem:[#allocation2 + $0x138] sm:$0xff] }
 0x3f7   : > { %v4287_v17 = vpop.f32.mrb[112].mxu0 }
 0x3f8   : > { %v4288_v33 = vadd.f32 %v4287_v17, %v4063_v29  ;;  %v4289_v21 = vpop.f32.mrb[113].mxu0 }
 0x3f9   : > { %v4290_v6 = vpop.f32.mrb[114].mxu0 }
 0x3fa   : > { %v4382_v0 = vadd.f32 %v4288_v33, %v2795_v18  ;;  %v4291_v34 = vadd.f32 %v4290_v6, %v4066_v52  ;;  %v4292_v46 = vpop.f32.mrb[115].mxu0 }
 0x3fb   : > { %v4070_v26 = vpop.f32.mrb[116].mxu1 }
 0x3fc   : > { %4431 = vst.msk [vmem:[#allocation2 + $0x100] sm:$0xff] %vm4398_vm2, %v4382_v0  ;;  %v4383_v38 = vadd.f32 %v4291_v34, %v2796_v31  ;;  %v4071_v7 = vadd.f32 %v4070_v26, %v8766_v8  ;;  %v4072_v55 = vpop.f32.mrb[117].mxu1  ;;  %v2803_v34 = vld [vmem:[#allocation2 + $0x140] sm:$0xff] }
 0x3fd   : > { %v4073_v54 = vpop.f32.mrb[118].mxu1 }
 0x3fe   : > { %4432 = vst.msk [vmem:[#allocation2 + $0x108] sm:$0xff] %vm4398_vm2, %v4383_v38  ;;  %v4074_v14 = vadd.f32 %v4073_v54, %v8770_v41  ;;  %v4075_v13 = vpop.f32.mrb[119].mxu1 }
 0x3ff   : > { %v4295_v3 = vpop.f32.mrb[116].mxu0 }
 0x400   : > { %v4296_v35 = vadd.f32 %v4295_v3, %v4071_v7  ;;  %v4297_v61 = vpop.f32.mrb[117].mxu0  ;;  %v2804_v7 = vld [vmem:[#allocation2 + $0x148] sm:$0xff] }
 0x401   : > { %v4298_v15 = vpop.f32.mrb[118].mxu0 }
 0x402   : > { %v4384_v48 = vadd.f32 %v4296_v35, %v2797_v56  ;;  %v4299_v20 = vadd.f32 %v4298_v15, %v4074_v14  ;;  %v4300_v39 = vpop.f32.mrb[119].mxu0  ;;  %v2805_v15 = vld [vmem:[#allocation2 + $0x150] sm:$0xff] }
 0x403   : > { %v4078_v63 = vpop.f32.mrb[120].mxu1 }
 0x404   : > { %4433 = vst.msk [vmem:[#allocation2 + $0x110] sm:$0xff] %vm4398_vm2, %v4384_v48  ;;  %v4385_v8 = vadd.f32 %v4299_v20, %v2798_v36  ;;  %v4079_v37 = vadd.f32 %v4078_v63, %v8778_v10  ;;  %v4080_v45 = vpop.f32.mrb[121].mxu1  ;;  %v2806_v63 = vld [vmem:[#allocation2 + $0x158] sm:$0xff] }
 0x405   : > { %v4081_v22 = vpop.f32.mrb[122].mxu1 }
 0x406   : > { %4434 = vst.msk [vmem:[#allocation2 + $0x118] sm:$0xff] %vm4398_vm2, %v4385_v8  ;;  %v4082_v41 = vadd.f32 %v4081_v22, %v8782_v32  ;;  %v4083_v51 = vpop.f32.mrb[123].mxu1 }
 0x407   : > { %v4303_v62 = vpop.f32.mrb[120].mxu0 }
 0x408   : > { %v4304_v44 = vadd.f32 %v4303_v62, %v4079_v37  ;;  %v4305_v11 = vpop.f32.mrb[121].mxu0 }
 0x409   : > { %v4306_v16 = vpop.f32.mrb[122].mxu0  ;;  %v2807_v11 = vld [vmem:[#allocation2 + $0x160] sm:$0xff] }
 0x40a   : > { %v4386_v47 = vadd.f32 %v4304_v44, %v2799_v49  ;;  %v4307_v43 = vadd.f32 %v4306_v16, %v4082_v41  ;;  %v4308_v58 = vpop.f32.mrb[123].mxu0 }
 0x40b   : > { %v4086_v27 = vpop.f32.mrb[124].mxu1 }
 0x40c   : > { %4435 = vst.msk [vmem:[#allocation2 + $0x120] sm:$0xff] %vm4398_vm2, %v4386_v47  ;;  %v4387_v10 = vadd.f32 %v4307_v43, %v2800_v2  ;;  %v4087_v40 = vadd.f32 %v4086_v27, %v8790_v23  ;;  %v4088_v12 = vpop.f32.mrb[125].mxu1  ;;  %v2808_v43 = vld [vmem:[#allocation2 + $0x168] sm:$0xff] }
 0x40d   : > { %v4089_v50 = vpop.f32.mrb[126].mxu1 }
 0x40e   : > { %4436 = vst.msk [vmem:[#allocation2 + $0x128] sm:$0xff] %vm4398_vm2, %v4387_v10  ;;  %v4090_v32 = vadd.f32 %v4089_v50, %v8794_v60  ;;  %v4091_v30 = vpop.f32.mrb[127].mxu1 }
 0x40f   : > { %v4311_v5 = vpop.f32.mrb[124].mxu0 }
 0x410   : > { %v4312_v29 = vadd.f32 %v4311_v5, %v4087_v40  ;;  %v4313_v42 = vpop.f32.mrb[125].mxu0 }
 0x411   : > { %v4314_v52 = vpop.f32.mrb[126].mxu0 }
 0x412   : > { %v4388_v28 = vadd.f32 %v4312_v29, %v2801_v19  ;;  %v4315_v18 = vadd.f32 %v4314_v52, %v4090_v32  ;;  %v4316_v17 = vpop.f32.mrb[127].mxu0  ;;  %v2809_v29 = vld [vmem:[#allocation2 + $0x170] sm:$0xff] }
 0x413   : > { %v4094_v33 = vpop.f32.mrb[128].mxu1 }
 0x414   : > { %4437 = vst.msk [vmem:[#allocation2 + $0x130] sm:$0xff] %vm4398_vm2, %v4388_v28  ;;  %v4389_v23 = vadd.f32 %v4315_v18, %v2802_v59  ;;  %v4095_v21 = vadd.f32 %v4094_v33, %v8802_v57  ;;  %v4096_v31 = vpop.f32.mrb[129].mxu1  ;;  %v2810_v28 = vld [vmem:[#allocation2 + $0x178] sm:$0xff] }
 0x415   : > { %v4097_v6 = vpop.f32.mrb[130].mxu1 }
 0x416   : > { %4438 = vst.msk [vmem:[#allocation2 + $0x138] sm:$0xff] %vm4398_vm2, %v4389_v23  ;;  %v4098_v60 = vadd.f32 %v4097_v6, %v8806_v1  ;;  %v4099_v0 = vpop.f32.mrb[131].mxu1 }
 0x417   : > { %v4319_v46 = vpop.f32.mrb[128].mxu0 }
 0x418   : > { %v4320_v26 = vadd.f32 %v4319_v46, %v4095_v21  ;;  %v4321_v38 = vpop.f32.mrb[129].mxu0 }
 0x419   : > { %v4322_v55 = vpop.f32.mrb[130].mxu0 }
 0x41a   : > { %v4390_v54 = vadd.f32 %v4320_v26, %v2803_v34  ;;  %v4323_v14 = vadd.f32 %v4322_v55, %v4098_v60  ;;  %v4324_v13 = vpop.f32.mrb[131].mxu0 }
 0x41b   : > { %v4102_v56 = vpop.f32.mrb[132].mxu1 }
 0x41c   : > { %4439 = vst.msk [vmem:[#allocation2 + $0x140] sm:$0xff] %vm4398_vm2, %v4390_v54  ;;  %v4391_v57 = vadd.f32 %v4323_v14, %v2804_v7  ;;  %v4103_v3 = vadd.f32 %v4102_v56, %v8814_v4  ;;  %v4104_v35 = vpop.f32.mrb[133].mxu1 }
 0x41d   : > { %v4105_v61 = vpop.f32.mrb[134].mxu1 }
 0x41e   : > { %4440 = vst.msk [vmem:[#allocation2 + $0x148] sm:$0xff] %vm4398_vm2, %v4391_v57  ;;  %v4106_v1 = vadd.f32 %v4105_v61, %v8818_v9  ;;  %v4107_v36 = vpop.f32.mrb[135].mxu1 }
 0x41f   : > { %v4327_v48 = vpop.f32.mrb[132].mxu0 }
 0x420   : > { %v4328_v20 = vadd.f32 %v4327_v48, %v4103_v3  ;;  %v4329_v39 = vpop.f32.mrb[133].mxu0 }
 0x421   : > { %v4330_v8 = vpop.f32.mrb[134].mxu0 }
 0x422   : > { %v4392_v37 = vadd.f32 %v4328_v20, %v2805_v15  ;;  %v4331_v45 = vadd.f32 %v4330_v8, %v4106_v1  ;;  %v4332_v22 = vpop.f32.mrb[135].mxu0 }
 0x423   : > { %v4110_v41 = vpop.f32.mrb[136].mxu1 }
 0x424   : > { %4441 = vst.msk [vmem:[#allocation2 + $0x150] sm:$0xff] %vm4398_vm2, %v4392_v37  ;;  %v4393_v4 = vadd.f32 %v4331_v45, %v2806_v63  ;;  %v4111_v51 = vadd.f32 %v4110_v41, %v8826_v53  ;;  %v4112_v49 = vpop.f32.mrb[137].mxu1 }
 0x425   : > { %v4113_v62 = vpop.f32.mrb[138].mxu1 }
 0x426   : > { %4442 = vst.msk [vmem:[#allocation2 + $0x158] sm:$0xff] %vm4398_vm2, %v4393_v4  ;;  %v4114_v9 = vadd.f32 %v4113_v62, %v8830_v24  ;;  %v4115_v44 = vpop.f32.mrb[139].mxu1  ;;  %v10290_v24 = vld [vmem:[#allocation4_spill] sm:$0xff] }
 0x427   : > { %v4335_v2 = vpop.f32.mrb[136].mxu0 }
 0x428   : > { %v4336_v16 = vadd.f32 %v4335_v2, %v4111_v51  ;;  %v4337_v47 = vpop.f32.mrb[137].mxu0 }
 0x429   : > { %v4338_v58 = vpop.f32.mrb[138].mxu0 }
 0x42a   : > { %v4394_v27 = vadd.f32 %v4336_v16, %v2807_v11  ;;  %v4339_v10 = vadd.f32 %v4338_v58, %v4114_v9  ;;  %v4340_v40 = vpop.f32.mrb[139].mxu0 }
 0x42b   : > { %v4118_v12 = vpop.f32.mrb[140].mxu1 }
 0x42c   : > { %4443 = vst.msk [vmem:[#allocation2 + $0x160] sm:$0xff] %vm4398_vm2, %v4394_v27  ;;  %v4395_v53 = vadd.f32 %v4339_v10, %v2808_v43  ;;  %v4119_v50 = vadd.f32 %v4118_v12, %v8838_v25  ;;  %v4120_v32 = vpop.f32.mrb[141].mxu1 }
 0x42d   : > { %v4121_v30 = vpop.f32.mrb[142].mxu1 }
 0x42e   : > { %4444 = vst.msk [vmem:[#allocation2 + $0x168] sm:$0xff] %vm4398_vm2, %v4395_v53  ;;  %v4122_v19 = vadd.f32 %v4121_v30, %v10290_v24  ;;  %v4123_v5 = vpop.f32.mrb[143].mxu1 }
 0x42f   : > { %v4343_v42 = vpop.f32.mrb[140].mxu0 }
 0x430   : > { %v4344_v59 = vadd.f32 %v4343_v42, %v4119_v50  ;;  %v4345_v52 = vpop.f32.mrb[141].mxu0  ;;  %4450 = sbr.rel (%p6164_p10) target bundleno = 1675 (0x68b), region = 79 }
 0x431   : > { %v4346_v18 = vpop.f32.mrb[142].mxu0 }
 0x432   : > { %v4396_v17 = vadd.f32 %v4344_v59, %v2809_v29  ;;  %v4347_v33 = vadd.f32 %v4346_v18, %v4122_v19  ;;  %v4348_v23 = vpop.f32.mrb[143].mxu0 }
 0x434   : > { %4445 = vst.msk [vmem:[#allocation2 + $0x170] sm:$0xff] %vm4398_vm2, %v4396_v17  ;;  %v4397_v21 = vadd.f32 %v4347_v33, %v2810_v28 }
 0x436   : > { %4446 = vst.msk [vmem:[#allocation2 + $0x178] sm:$0xff] %vm4398_vm2, %v4397_v21 }
 0x437   : > { %v8943_v25 = vld [vmem:[#allocation2] sm:$0xff]  ;;  %v8945_v31 = vld [vmem:[#allocation2 + $0x10] sm:$0xff]  ;;  %v8947_v6 = vld [vmem:[#allocation2 + $0x8] sm:$0xff] }
 0x438   : > { %v4499_v60 = vsel %vm4398_vm2, %v8943_v25, 0.0  ;;  %v4505_v0 = vsel %vm4398_vm2, %v8945_v31, 0.0  ;;  %v8953_v34 = vld [vmem:[#allocation2 + $0x18] sm:$0xff]  ;;  %v4502_v46 = vsel %vm4398_vm2, %v8947_v6, 0.0  ;;  %v8959_v38 = vld [vmem:[#allocation2 + $0x20] sm:$0xff]  ;;  %v8961_v7 = vld [vmem:[#allocation2 + $0x28] sm:$0xff] }
 0x439   : > { %4500 = vadd.xlane.f32.xlu0 %v4499_v60  ;;  %4506 = vadd.xlane.f32.xlu1 %v4505_v0  ;;  %v4508_v26 = vsel %vm4398_vm2, %v8953_v34, 0.0  ;;  %v4511_v55 = vsel %vm4398_vm2, %v8959_v38, 0.0  ;;  %v4514_v54 = vsel %vm4398_vm2, %v8961_v7, 0.0  ;;  %v8967_v14 = vld [vmem:[#allocation2 + $0x30] sm:$0xff]  ;;  %v8969_v13 = vld [vmem:[#allocation2 + $0x38] sm:$0xff]  ;;  %v8975_v3 = vld [vmem:[#allocation2 + $0x40] sm:$0xff] }
 0x43a   : > { %v4517_v56 = vsel %vm4398_vm2, %v8967_v14, 0.0  ;;  %v4520_v57 = vsel %vm4398_vm2, %v8969_v13, 0.0  ;;  %v8977_v35 = vld [vmem:[#allocation2 + $0x48] sm:$0xff]  ;;  %v4523_v61 = vsel %vm4398_vm2, %v8975_v3, 0.0  ;;  %v8983_v36 = vld [vmem:[#allocation2 + $0x50] sm:$0xff]  ;;  %v8985_v15 = vld [vmem:[#allocation2 + $0x58] sm:$0xff] }
 0x43b   : > { %v4526_v1 = vsel %vm4398_vm2, %v8977_v35, 0.0  ;;  %v4529_v48 = vsel %vm4398_vm2, %v8983_v36, 0.0  ;;  %v4532_v20 = vsel %vm4398_vm2, %v8985_v15, 0.0  ;;  %v8991_v39 = vld [vmem:[#allocation2 + $0x60] sm:$0xff]  ;;  %v8993_v63 = vld [vmem:[#allocation2 + $0x68] sm:$0xff]  ;;  %v8999_v45 = vld [vmem:[#allocation2 + $0x70] sm:$0xff] }
 0x43c   : > { %v4535_v8 = vsel %vm4398_vm2, %v8991_v39, 0.0  ;;  %v4538_v37 = vsel %vm4398_vm2, %v8993_v63, 0.0  ;;  %v9001_v22 = vld [vmem:[#allocation2 + $0x78] sm:$0xff]  ;;  %v4541_v41 = vsel %vm4398_vm2, %v8999_v45, 0.0  ;;  %v9007_v51 = vld [vmem:[#allocation2 + $0x80] sm:$0xff]  ;;  %v9009_v49 = vld [vmem:[#allocation2 + $0x88] sm:$0xff] }
 0x43d   : > { %4503 = vadd.xlane.f32.xlu0 %v4502_v46  ;;  %4509 = vadd.xlane.f32.xlu1 %v4508_v26  ;;  %v4544_v4 = vsel %vm4398_vm2, %v9001_v22, 0.0  ;;  %v4547_v62 = vsel %vm4398_vm2, %v9007_v51, 0.0  ;;  %v4550_v9 = vsel %vm4398_vm2, %v9009_v49, 0.0  ;;  %v9015_v44 = vld [vmem:[#allocation2 + $0x90] sm:$0xff]  ;;  %v9017_v11 = vld [vmem:[#allocation2 + $0x98] sm:$0xff]  ;;  %v9023_v47 = vld [vmem:[#allocation2 + $0xa0] sm:$0xff] }
 0x43e   : > { %v4553_v2 = vsel %vm4398_vm2, %v9015_v44, 0.0  ;;  %v4556_v16 = vsel %vm4398_vm2, %v9017_v11, 0.0  ;;  %v9025_v43 = vld [vmem:[#allocation2 + $0xa8] sm:$0xff]  ;;  %v4559_v58 = vsel %vm4398_vm2, %v9023_v47, 0.0  ;;  %v9031_v10 = vld [vmem:[#allocation2 + $0xb0] sm:$0xff]  ;;  %v9033_v40 = vld [vmem:[#allocation2 + $0xb8] sm:$0xff] }
 0x43f   : > { %v4562_v27 = vsel %vm4398_vm2, %v9025_v43, 0.0  ;;  %v4565_v12 = vsel %vm4398_vm2, %v9031_v10, 0.0  ;;  %v4568_v53 = vsel %vm4398_vm2, %v9033_v40, 0.0  ;;  %v9039_v50 = vld [vmem:[#allocation2 + $0xc0] sm:$0xff]  ;;  %v9041_v32 = vld [vmem:[#allocation2 + $0xc8] sm:$0xff]  ;;  %v9047_v19 = vld [vmem:[#allocation2 + $0xd0] sm:$0xff] }
 0x440   : > { %v4571_v30 = vsel %vm4398_vm2, %v9039_v50, 0.0  ;;  %v4574_v24 = vsel %vm4398_vm2, %v9041_v32, 0.0  ;;  %v9049_v5 = vld [vmem:[#allocation2 + $0xd8] sm:$0xff]  ;;  %v4577_v29 = vsel %vm4398_vm2, %v9047_v19, 0.0  ;;  %v9055_v59 = vld [vmem:[#allocation2 + $0xe0] sm:$0xff]  ;;  %v9057_v52 = vld [vmem:[#allocation2 + $0xe8] sm:$0xff] }
 0x441   : > { %4512 = vadd.xlane.f32.xlu0 %v4511_v55  ;;  %4515 = vadd.xlane.f32.xlu1 %v4514_v54  ;;  %v4580_v42 = vsel %vm4398_vm2, %v9049_v5, 0.0  ;;  %v4583_v28 = vsel %vm4398_vm2, %v9055_v59, 0.0  ;;  %v4586_v18 = vsel %vm4398_vm2, %v9057_v52, 0.0  ;;  %v9063_v17 = vld [vmem:[#allocation2 + $0xf0] sm:$0xff]  ;;  %v9065_v33 = vld [vmem:[#allocation2 + $0xf8] sm:$0xff]  ;;  %v9071_v60 = vld [vmem:[#allocation2 + $0x100] sm:$0xff] }
 0x442   : > { %v4589_v23 = vsel %vm4398_vm2, %v9063_v17, 0.0  ;;  %v4592_v21 = vsel %vm4398_vm2, %v9065_v33, 0.0  ;;  %v9073_v0 = vld [vmem:[#allocation2 + $0x108] sm:$0xff]  ;;  %v4595_v46 = vsel %vm4398_vm2, %v9071_v60, 0.0  ;;  %v9079_v55 = vld [vmem:[#allocation2 + $0x110] sm:$0xff]  ;;  %v9081_v54 = vld [vmem:[#allocation2 + $0x118] sm:$0xff] }
 0x443   : > { %v4598_v26 = vsel %vm4398_vm2, %v9073_v0, 0.0 }
 0x445   : > { %4518 = vadd.xlane.f32.xlu0 %v4517_v56  ;;  %4521 = vadd.xlane.f32.xlu1 %v4520_v57  ;;  %v4601_v56 = vsel %vm4398_vm2, %v9079_v55, 0.0  ;;  %v4604_v57 = vsel %vm4398_vm2, %v9081_v54, 0.0 }
 0x449   : > { %4524 = vadd.xlane.f32.xlu0 %v4523_v61  ;;  %4527 = vadd.xlane.f32.xlu1 %v4526_v1  ;;  %v9087_v61 = vld [vmem:[#allocation2 + $0x120] sm:$0xff]  ;;  %v9089_v1 = vld [vmem:[#allocation2 + $0x128] sm:$0xff] }
 0x44d   : > { %4530 = vadd.xlane.f32.xlu0 %v4529_v48  ;;  %4533 = vadd.xlane.f32.xlu1 %v4532_v20  ;;  %v4607_v48 = vsel %vm4398_vm2, %v9087_v61, 0.0  ;;  %v4610_v20 = vsel %vm4398_vm2, %v9089_v1, 0.0 }
 0x451   : > { %4536 = vadd.xlane.f32.xlu0 %v4535_v8  ;;  %4539 = vadd.xlane.f32.xlu1 %v4538_v37  ;;  %v9095_v8 = vld [vmem:[#allocation2 + $0x130] sm:$0xff]  ;;  %v9097_v37 = vld [vmem:[#allocation2 + $0x138] sm:$0xff] }
 0x455   : > { %4542 = vadd.xlane.f32.xlu0 %v4541_v41  ;;  %4545 = vadd.xlane.f32.xlu1 %v4544_v4  ;;  %v4613_v41 = vsel %vm4398_vm2, %v9095_v8, 0.0  ;;  %v4616_v4 = vsel %vm4398_vm2, %v9097_v37, 0.0 }
 0x459   : > { %4548 = vadd.xlane.f32.xlu0 %v4547_v62  ;;  %4551 = vadd.xlane.f32.xlu1 %v4550_v9  ;;  %v9103_v62 = vld [vmem:[#allocation2 + $0x140] sm:$0xff]  ;;  %v9105_v9 = vld [vmem:[#allocation2 + $0x148] sm:$0xff] }
 0x45d   : > { %4554 = vadd.xlane.f32.xlu0 %v4553_v2  ;;  %4557 = vadd.xlane.f32.xlu1 %v4556_v16  ;;  %v4619_v2 = vsel %vm4398_vm2, %v9103_v62, 0.0  ;;  %v4622_v16 = vsel %vm4398_vm2, %v9105_v9, 0.0 }
 0x461   : > { %4560 = vadd.xlane.f32.xlu0 %v4559_v58  ;;  %4563 = vadd.xlane.f32.xlu1 %v4562_v27  ;;  %v9111_v58 = vld [vmem:[#allocation2 + $0x150] sm:$0xff]  ;;  %v9113_v27 = vld [vmem:[#allocation2 + $0x158] sm:$0xff] }
 0x465   : > { %4566 = vadd.xlane.f32.xlu0 %v4565_v12  ;;  %4569 = vadd.xlane.f32.xlu1 %v4568_v53  ;;  %v4625_v12 = vsel %vm4398_vm2, %v9111_v58, 0.0  ;;  %v4628_v53 = vsel %vm4398_vm2, %v9113_v27, 0.0 }
 0x469   : > { %4572 = vadd.xlane.f32.xlu0 %v4571_v30  ;;  %4575 = vadd.xlane.f32.xlu1 %v4574_v24  ;;  %v9119_v30 = vld [vmem:[#allocation2 + $0x160] sm:$0xff]  ;;  %v9121_v24 = vld [vmem:[#allocation2 + $0x168] sm:$0xff] }
 0x46d   : > { %4578 = vadd.xlane.f32.xlu0 %v4577_v29  ;;  %4581 = vadd.xlane.f32.xlu1 %v4580_v42  ;;  %v4631_v29 = vsel %vm4398_vm2, %v9119_v30, 0.0  ;;  %v4634_v42 = vsel %vm4398_vm2, %v9121_v24, 0.0 }
 0x471   : > { %4584 = vadd.xlane.f32.xlu0 %v4583_v28  ;;  %4587 = vadd.xlane.f32.xlu1 %v4586_v18  ;;  %v9127_v28 = vld [vmem:[#allocation2 + $0x170] sm:$0xff]  ;;  %v9129_v18 = vld [vmem:[#allocation2 + $0x178] sm:$0xff] }
 0x475   : > { %4590 = vadd.xlane.f32.xlu0 %v4589_v23  ;;  %4593 = vadd.xlane.f32.xlu1 %v4592_v21  ;;  %v4637_v23 = vsel %vm4398_vm2, %v9127_v28, 0.0  ;;  %v4640_v21 = vsel %vm4398_vm2, %v9129_v18, 0.0 }
 0x479   : > { %4596 = vadd.xlane.f32.xlu0 %v4595_v46  ;;  %4599 = vadd.xlane.f32.xlu1 %v4598_v26  ;;  %v7195_v46 = vmov 0  }
 0x47a   : > { %7072 = vset.pattern.permute.xlu1 %v7195_v46  ;;  %7071 = vset.pattern.permute.xlu0 %v7195_v46 }
 0x47d   : > { %4602 = vadd.xlane.f32.xlu0 %v4601_v56  ;;  %4605 = vadd.xlane.f32.xlu1 %v4604_v57 }
 0x481   : > { %4608 = vadd.xlane.f32.xlu0 %v4607_v48  ;;  %4611 = vadd.xlane.f32.xlu1 %v4610_v20 }
 0x485   : > { %4614 = vadd.xlane.f32.xlu0 %v4613_v41  ;;  %4617 = vadd.xlane.f32.xlu1 %v4616_v4 }
 0x489   : > { %4620 = vadd.xlane.f32.xlu0 %v4619_v2  ;;  %4623 = vadd.xlane.f32.xlu1 %v4622_v16 }
 0x48d   : > { %4626 = vadd.xlane.f32.xlu0 %v4625_v12  ;;  %4629 = vadd.xlane.f32.xlu1 %v4628_v53 }
 0x491   : > { %4632 = vadd.xlane.f32.xlu0 %v4631_v29  ;;  %4635 = vadd.xlane.f32.xlu1 %v4634_v42 }
 0x495   : > { %4638 = vadd.xlane.f32.xlu0 %v4637_v23  ;;  %4641 = vadd.xlane.f32.xlu1 %v4640_v21 }
 0x4c6   : > { %v4501_v26 = vpop.xlane.xlu0 %4500  ;;  %v4507_v56 = vpop.xlane.xlu1 %4506 }
 0x4c7   : > { %v4644_v57 = vmul.f32 0.020408163, %v4501_v26  ;;  %v4646_v48 = vmul.f32 0.020408163, %v4507_v56 }
 0x4c9   : > { %v9136_v20 = vsub.f32 %v8943_v25, %v4644_v57  ;;  %v9139_v41 = vsub.f32 %v8945_v31, %v4646_v48 }
 0x4ca   : > { %v4504_v4 = vpop.xlane.xlu0 %4503  ;;  %v4510_v2 = vpop.xlane.xlu1 %4509 }
 0x4cb   : > { %v4645_v16 = vmul.f32 0.020408163, %v4504_v4  ;;  %v4647_v12 = vmul.f32 0.020408163, %v4510_v2  ;;  %v4740_v53 = vmul.f32 %v9136_v20, %v9136_v20  ;;  %v4742_v29 = vmul.f32 %v9139_v41, %v9139_v41 }
 0x4cd   : > { %v4788_v42 = vsel %vm4398_vm2, %v4740_v53, 0.0  ;;  %v9147_v23 = vsub.f32 %v8947_v6, %v4645_v16  ;;  %v9150_v25 = vsub.f32 %v8953_v34, %v4647_v12  ;;  %v4794_v46 = vsel %vm4398_vm2, %v4742_v29, 0.0 }
 0x4ce   : > { %4789 = vadd.xlane.f32.xlu0 %v4788_v42  ;;  %v4513_v31 = vpop.xlane.xlu0 %4512  ;;  %v4516_v21 = vpop.xlane.xlu1 %4515 }
 0x4cf   : > { %v4648_v26 = vmul.f32 0.020408163, %v4513_v31  ;;  %v4649_v56 = vmul.f32 0.020408163, %v4516_v21  ;;  %v4741_v57 = vmul.f32 %v9147_v23, %v9147_v23  ;;  %v4743_v48 = vmul.f32 %v9150_v25, %v9150_v25 }
 0x4d1   : > { %v4791_v4 = vsel %vm4398_vm2, %v4741_v57, 0.0  ;;  %v9159_v6 = vsub.f32 %v8959_v38, %v4648_v26  ;;  %v9162_v34 = vsub.f32 %v8961_v7, %v4649_v56  ;;  %v4797_v12 = vsel %vm4398_vm2, %v4743_v48, 0.0 }
 0x4d2   : > { %4795 = vadd.xlane.f32.xlu0 %v4794_v46  ;;  %4792 = vadd.xlane.f32.xlu1 %v4791_v4  ;;  %v4519_v2 = vpop.xlane.xlu0 %4518  ;;  %v4522_v16 = vpop.xlane.xlu1 %4521 }
 0x4d3   : > { %v4650_v53 = vmul.f32 0.020408163, %v4519_v2  ;;  %v4651_v29 = vmul.f32 0.020408163, %v4522_v16  ;;  %v4744_v42 = vmul.f32 %v9159_v6, %v9159_v6  ;;  %v4745_v31 = vmul.f32 %v9162_v34, %v9162_v34 }
 0x4d5   : > { %v4800_v38 = vsel %vm4398_vm2, %v4744_v42, 0.0  ;;  %v9171_v21 = vsub.f32 %v8967_v14, %v4650_v53  ;;  %v9174_v7 = vsub.f32 %v8969_v13, %v4651_v29  ;;  %v4803_v56 = vsel %vm4398_vm2, %v4745_v31, 0.0 }
 0x4d6   : > { %4798 = vadd.xlane.f32.xlu1 %v4797_v12  ;;  %4801 = vadd.xlane.f32.xlu0 %v4800_v38  ;;  %v4525_v46 = vpop.xlane.xlu0 %4524  ;;  %v4528_v26 = vpop.xlane.xlu1 %4527 }
 0x4d7   : > { %10291 = vst [vmem:[#allocation5_spill] sm:$0xff] %v9171_v21  ;;  %v4652_v57 = vmul.f32 0.020408163, %v4525_v46  ;;  %v4653_v48 = vmul.f32 0.020408163, %v4528_v26  ;;  %v4746_v4 = vmul.f32 %v9171_v21, %v9171_v21  ;;  %v4747_v2 = vmul.f32 %v9174_v7, %v9174_v7 }
 0x4d9   : > { %v4806_v14 = vsel %vm4398_vm2, %v4746_v4, 0.0  ;;  %v9183_v16 = vsub.f32 %v8975_v3, %v4652_v57  ;;  %v9186_v13 = vsub.f32 %v8977_v35, %v4653_v48  ;;  %v4809_v29 = vsel %vm4398_vm2, %v4747_v2, 0.0 }
 0x4da   : > { %4804 = vadd.xlane.f32.xlu1 %v4803_v56  ;;  %4807 = vadd.xlane.f32.xlu0 %v4806_v14  ;;  %v4531_v12 = vpop.xlane.xlu0 %4530  ;;  %v4534_v53 = vpop.xlane.xlu1 %4533 }
 0x4db   : > { %10292 = vst [vmem:[#allocation6_spill] sm:$0xff] %v9183_v16  ;;  %v4654_v42 = vmul.f32 0.020408163, %v4531_v12  ;;  %v4655_v31 = vmul.f32 0.020408163, %v4534_v53  ;;  %v4748_v38 = vmul.f32 %v9183_v16, %v9183_v16  ;;  %v4749_v46 = vmul.f32 %v9186_v13, %v9186_v13 }
 0x4dd   : > { %v4812_v3 = vsel %vm4398_vm2, %v4748_v38, 0.0  ;;  %v9195_v26 = vsub.f32 %v8983_v36, %v4654_v42  ;;  %v9198_v35 = vsub.f32 %v8985_v15, %v4655_v31  ;;  %v4815_v48 = vsel %vm4398_vm2, %v4749_v46, 0.0 }
 0x4de   : > { %4810 = vadd.xlane.f32.xlu1 %v4809_v29  ;;  %4813 = vadd.xlane.f32.xlu0 %v4812_v3  ;;  %v4537_v56 = vpop.xlane.xlu0 %4536  ;;  %v4540_v57 = vpop.xlane.xlu1 %4539 }
 0x4df   : > { %10293 = vst [vmem:[#allocation7_spill] sm:$0xff] %v9195_v26  ;;  %v4656_v4 = vmul.f32 0.020408163, %v4537_v56  ;;  %v4657_v2 = vmul.f32 0.020408163, %v4540_v57  ;;  %v4750_v14 = vmul.f32 %v9195_v26, %v9195_v26  ;;  %v4751_v12 = vmul.f32 %v9198_v35, %v9198_v35 }
 0x4e1   : > { %v4818_v36 = vsel %vm4398_vm2, %v4750_v14, 0.0  ;;  %v9207_v53 = vsub.f32 %v8991_v39, %v4656_v4  ;;  %v9210_v15 = vsub.f32 %v8993_v63, %v4657_v2  ;;  %v4821_v31 = vsel %vm4398_vm2, %v4751_v12, 0.0 }
 0x4e2   : > { %4816 = vadd.xlane.f32.xlu1 %v4815_v48  ;;  %4819 = vadd.xlane.f32.xlu0 %v4818_v36  ;;  %v4543_v29 = vpop.xlane.xlu0 %4542  ;;  %v4546_v42 = vpop.xlane.xlu1 %4545 }
 0x4e3   : > { %10294 = vst [vmem:[#allocation8_spill] sm:$0xff] %v9207_v53  ;;  %v4658_v38 = vmul.f32 0.020408163, %v4543_v29  ;;  %v4659_v46 = vmul.f32 0.020408163, %v4546_v42  ;;  %v4752_v3 = vmul.f32 %v9207_v53, %v9207_v53  ;;  %v4753_v56 = vmul.f32 %v9210_v15, %v9210_v15 }
 0x4e5   : > { %v4824_v39 = vsel %vm4398_vm2, %v4752_v3, 0.0  ;;  %v9219_v57 = vsub.f32 %v8999_v45, %v4658_v38  ;;  %v9222_v63 = vsub.f32 %v9001_v22, %v4659_v46  ;;  %v4827_v2 = vsel %vm4398_vm2, %v4753_v56, 0.0 }
 0x4e6   : > { %4822 = vadd.xlane.f32.xlu1 %v4821_v31  ;;  %4825 = vadd.xlane.f32.xlu0 %v4824_v39  ;;  %v4549_v48 = vpop.xlane.xlu0 %4548  ;;  %v4552_v4 = vpop.xlane.xlu1 %4551 }
 0x4e7   : > { %10295 = vst [vmem:[#allocation9_spill] sm:$0xff] %v9219_v57  ;;  %v4660_v14 = vmul.f32 0.020408163, %v4549_v48  ;;  %v4661_v12 = vmul.f32 0.020408163, %v4552_v4  ;;  %v4754_v36 = vmul.f32 %v9219_v57, %v9219_v57  ;;  %v4755_v29 = vmul.f32 %v9222_v63, %v9222_v63 }
 0x4e9   : > { %v4830_v45 = vsel %vm4398_vm2, %v4754_v36, 0.0  ;;  %v9231_v42 = vsub.f32 %v9007_v51, %v4660_v14  ;;  %v9234_v22 = vsub.f32 %v9009_v49, %v4661_v12  ;;  %v4833_v46 = vsel %vm4398_vm2, %v4755_v29, 0.0 }
 0x4ea   : > { %4828 = vadd.xlane.f32.xlu1 %v4827_v2  ;;  %4831 = vadd.xlane.f32.xlu0 %v4830_v45  ;;  %v4555_v31 = vpop.xlane.xlu0 %4554  ;;  %v4558_v38 = vpop.xlane.xlu1 %4557 }
 0x4eb   : > { %10296 = vst [vmem:[#allocation10_spill] sm:$0xff] %v9231_v42  ;;  %v4662_v3 = vmul.f32 0.020408163, %v4555_v31  ;;  %v4663_v56 = vmul.f32 0.020408163, %v4558_v38  ;;  %v4756_v39 = vmul.f32 %v9231_v42, %v9231_v42  ;;  %v4757_v48 = vmul.f32 %v9234_v22, %v9234_v22 }
 0x4ed   : > { %v4836_v51 = vsel %vm4398_vm2, %v4756_v39, 0.0  ;;  %v9243_v4 = vsub.f32 %v9015_v44, %v4662_v3  ;;  %v9246_v49 = vsub.f32 %v9017_v11, %v4663_v56  ;;  %v4839_v12 = vsel %vm4398_vm2, %v4757_v48, 0.0 }
 0x4ee   : > { %4834 = vadd.xlane.f32.xlu1 %v4833_v46  ;;  %4837 = vadd.xlane.f32.xlu0 %v4836_v51  ;;  %v4561_v2 = vpop.xlane.xlu0 %4560  ;;  %v4564_v14 = vpop.xlane.xlu1 %4563 }
 0x4ef   : > { %10297 = vst [vmem:[#allocation11_spill] sm:$0xff] %v9243_v4  ;;  %10298 = vst [vmem:[#allocation12_spill] sm:$0xff] %v9246_v49  ;;  %v4664_v36 = vmul.f32 0.020408163, %v4561_v2  ;;  %v4665_v29 = vmul.f32 0.020408163, %v4564_v14  ;;  %v4758_v45 = vmul.f32 %v9243_v4, %v9243_v4  ;;  %v4759_v31 = vmul.f32 %v9246_v49, %v9246_v49 }
 0x4f1   : > { %v4842_v44 = vsel %vm4398_vm2, %v4758_v45, 0.0  ;;  %v9255_v38 = vsub.f32 %v9023_v47, %v4664_v36  ;;  %v9258_v11 = vsub.f32 %v9025_v43, %v4665_v29  ;;  %v4845_v56 = vsel %vm4398_vm2, %v4759_v31, 0.0 }
 0x4f2   : > { %4840 = vadd.xlane.f32.xlu1 %v4839_v12  ;;  %4843 = vadd.xlane.f32.xlu0 %v4842_v44  ;;  %v4567_v46 = vpop.xlane.xlu0 %4566  ;;  %v4570_v3 = vpop.xlane.xlu1 %4569 }
 0x4f3   : > { %10299 = vst [vmem:[#allocation13_spill] sm:$0xff] %v9255_v38  ;;  %10300 = vst [vmem:[#allocation14_spill] sm:$0xff] %v9258_v11  ;;  %v4666_v39 = vmul.f32 0.020408163, %v4567_v46  ;;  %v4667_v48 = vmul.f32 0.020408163, %v4570_v3  ;;  %v4760_v51 = vmul.f32 %v9255_v38, %v9255_v38  ;;  %v4761_v2 = vmul.f32 %v9258_v11, %v9258_v11 }
 0x4f5   : > { %v4848_v47 = vsel %vm4398_vm2, %v4760_v51, 0.0  ;;  %v9267_v14 = vsub.f32 %v9031_v10, %v4666_v39  ;;  %v9270_v43 = vsub.f32 %v9033_v40, %v4667_v48  ;;  %v4851_v29 = vsel %vm4398_vm2, %v4761_v2, 0.0 }
 0x4f6   : > { %4846 = vadd.xlane.f32.xlu1 %v4845_v56  ;;  %4849 = vadd.xlane.f32.xlu0 %v4848_v47  ;;  %v4573_v12 = vpop.xlane.xlu0 %4572  ;;  %v4576_v36 = vpop.xlane.xlu1 %4575 }
 0x4f7   : > { %10301 = vst [vmem:[#allocation15_spill] sm:$0xff] %v9267_v14  ;;  %10302 = vst [vmem:[#allocation16_spill] sm:$0xff] %v9270_v43  ;;  %v4668_v45 = vmul.f32 0.020408163, %v4573_v12  ;;  %v4669_v31 = vmul.f32 0.020408163, %v4576_v36  ;;  %v4762_v44 = vmul.f32 %v9267_v14, %v9267_v14  ;;  %v4763_v46 = vmul.f32 %v9270_v43, %v9270_v43 }
 0x4f9   : > { %v4854_v10 = vsel %vm4398_vm2, %v4762_v44, 0.0  ;;  %v9279_v3 = vsub.f32 %v9039_v50, %v4668_v45  ;;  %v9282_v40 = vsub.f32 %v9041_v32, %v4669_v31  ;;  %v4857_v48 = vsel %vm4398_vm2, %v4763_v46, 0.0 }
 0x4fa   : > { %4852 = vadd.xlane.f32.xlu1 %v4851_v29  ;;  %4855 = vadd.xlane.f32.xlu0 %v4854_v10  ;;  %v4579_v56 = vpop.xlane.xlu0 %4578  ;;  %v4582_v39 = vpop.xlane.xlu1 %4581 }
 0x4fb   : > { %10303 = vst [vmem:[#allocation17_spill] sm:$0xff] %v9279_v3  ;;  %10304 = vst [vmem:[#allocation18_spill] sm:$0xff] %v9282_v40  ;;  %v4670_v51 = vmul.f32 0.020408163, %v4579_v56  ;;  %v4671_v2 = vmul.f32 0.020408163, %v4582_v39  ;;  %v4764_v47 = vmul.f32 %v9279_v3, %v9279_v3  ;;  %v4765_v12 = vmul.f32 %v9282_v40, %v9282_v40 }
 0x4fd   : > { %v4860_v50 = vsel %vm4398_vm2, %v4764_v47, 0.0  ;;  %v9291_v36 = vsub.f32 %v9047_v19, %v4670_v51  ;;  %v9294_v32 = vsub.f32 %v9049_v5, %v4671_v2  ;;  %v4863_v31 = vsel %vm4398_vm2, %v4765_v12, 0.0 }
 0x4fe   : > { %4858 = vadd.xlane.f32.xlu1 %v4857_v48  ;;  %4861 = vadd.xlane.f32.xlu0 %v4860_v50  ;;  %v4585_v29 = vpop.xlane.xlu0 %4584  ;;  %v4588_v45 = vpop.xlane.xlu1 %4587 }
 0x4ff   : > { %10305 = vst [vmem:[#allocation19_spill] sm:$0xff] %v9291_v36  ;;  %10306 = vst [vmem:[#allocation20_spill] sm:$0xff] %v9294_v32  ;;  %v4672_v44 = vmul.f32 0.020408163, %v4585_v29  ;;  %v4673_v46 = vmul.f32 0.020408163, %v4588_v45  ;;  %v4766_v10 = vmul.f32 %v9291_v36, %v9291_v36  ;;  %v4767_v56 = vmul.f32 %v9294_v32, %v9294_v32 }
 0x501   : > { %v4866_v19 = vsel %vm4398_vm2, %v4766_v10, 0.0  ;;  %v9303_v39 = vsub.f32 %v9055_v59, %v4672_v44  ;;  %v9306_v5 = vsub.f32 %v9057_v52, %v4673_v46  ;;  %v4869_v2 = vsel %vm4398_vm2, %v4767_v56, 0.0 }
 0x502   : > { %4864 = vadd.xlane.f32.xlu1 %v4863_v31  ;;  %4867 = vadd.xlane.f32.xlu0 %v4866_v19  ;;  %v4591_v48 = vpop.xlane.xlu0 %4590  ;;  %v4594_v51 = vpop.xlane.xlu1 %4593 }
 0x503   : > { %10307 = vst [vmem:[#allocation21_spill] sm:$0xff] %v9303_v39  ;;  %10308 = vst [vmem:[#allocation22_spill] sm:$0xff] %v9306_v5  ;;  %v4674_v47 = vmul.f32 0.020408163, %v4591_v48  ;;  %v4675_v12 = vmul.f32 0.020408163, %v4594_v51  ;;  %v4768_v50 = vmul.f32 %v9303_v39, %v9303_v39  ;;  %v4769_v29 = vmul.f32 %v9306_v5, %v9306_v5 }
 0x505   : > { %v4872_v59 = vsel %vm4398_vm2, %v4768_v50, 0.0  ;;  %v9315_v45 = vsub.f32 %v9063_v17, %v4674_v47  ;;  %v9318_v52 = vsub.f32 %v9065_v33, %v4675_v12  ;;  %v4875_v46 = vsel %vm4398_vm2, %v4769_v29, 0.0 }
 0x506   : > { %4870 = vadd.xlane.f32.xlu1 %v4869_v2  ;;  %4873 = vadd.xlane.f32.xlu0 %v4872_v59  ;;  %v4597_v31 = vpop.xlane.xlu0 %4596  ;;  %v4600_v44 = vpop.xlane.xlu1 %4599 }
 0x507   : > { %10309 = vst [vmem:[#allocation23_spill] sm:$0xff] %v9315_v45  ;;  %10310 = vst [vmem:[#allocation24_spill] sm:$0xff] %v9318_v52  ;;  %v4676_v10 = vmul.f32 0.020408163, %v4597_v31  ;;  %v4677_v56 = vmul.f32 0.020408163, %v4600_v44  ;;  %v4770_v19 = vmul.f32 %v9315_v45, %v9315_v45  ;;  %v4771_v48 = vmul.f32 %v9318_v52, %v9318_v52 }
 0x509   : > { %v4878_v17 = vsel %vm4398_vm2, %v4770_v19, 0.0  ;;  %v9327_v51 = vsub.f32 %v9071_v60, %v4676_v10  ;;  %v9330_v33 = vsub.f32 %v9073_v0, %v4677_v56  ;;  %v4881_v12 = vsel %vm4398_vm2, %v4771_v48, 0.0 }
 0x50a   : > { %4876 = vadd.xlane.f32.xlu1 %v4875_v46  ;;  %4879 = vadd.xlane.f32.xlu0 %v4878_v17  ;;  %v4603_v2 = vpop.xlane.xlu0 %4602  ;;  %v4606_v47 = vpop.xlane.xlu1 %4605 }
 0x50b   : > { %10311 = vst [vmem:[#allocation25_spill] sm:$0xff] %v9327_v51  ;;  %10312 = vst [vmem:[#allocation26_spill] sm:$0xff] %v9330_v33  ;;  %v4678_v50 = vmul.f32 0.020408163, %v4603_v2  ;;  %v4679_v29 = vmul.f32 0.020408163, %v4606_v47  ;;  %v4772_v59 = vmul.f32 %v9327_v51, %v9327_v51  ;;  %v4773_v31 = vmul.f32 %v9330_v33, %v9330_v33 }
 0x50d   : > { %v4884_v60 = vsel %vm4398_vm2, %v4772_v59, 0.0  ;;  %v9339_v44 = vsub.f32 %v9079_v55, %v4678_v50  ;;  %v9342_v0 = vsub.f32 %v9081_v54, %v4679_v29  ;;  %v4887_v56 = vsel %vm4398_vm2, %v4773_v31, 0.0 }
 0x50e   : > { %4882 = vadd.xlane.f32.xlu1 %v4881_v12  ;;  %4885 = vadd.xlane.f32.xlu0 %v4884_v60  ;;  %v4609_v46 = vpop.xlane.xlu0 %4608  ;;  %v4612_v10 = vpop.xlane.xlu1 %4611 }
 0x50f   : > { %10313 = vst [vmem:[#allocation27_spill] sm:$0xff] %v9339_v44  ;;  %10314 = vst [vmem:[#allocation28_spill] sm:$0xff] %v9342_v0  ;;  %v4680_v19 = vmul.f32 0.020408163, %v4609_v46  ;;  %v4681_v48 = vmul.f32 0.020408163, %v4612_v10  ;;  %v4774_v17 = vmul.f32 %v9339_v44, %v9339_v44  ;;  %v4775_v2 = vmul.f32 %v9342_v0, %v9342_v0 }
 0x511   : > { %v4890_v55 = vsel %vm4398_vm2, %v4774_v17, 0.0  ;;  %v9351_v47 = vsub.f32 %v9087_v61, %v4680_v19  ;;  %v9354_v54 = vsub.f32 %v9089_v1, %v4681_v48  ;;  %v4893_v29 = vsel %vm4398_vm2, %v4775_v2, 0.0 }
 0x512   : > { %4888 = vadd.xlane.f32.xlu1 %v4887_v56  ;;  %4891 = vadd.xlane.f32.xlu0 %v4890_v55  ;;  %v4615_v12 = vpop.xlane.xlu0 %4614  ;;  %v4618_v50 = vpop.xlane.xlu1 %4617 }
 0x513   : > { %10315 = vst [vmem:[#allocation29_spill] sm:$0xff] %v9351_v47  ;;  %10316 = vst [vmem:[#allocation30_spill] sm:$0xff] %v9354_v54  ;;  %v4682_v59 = vmul.f32 0.020408163, %v4615_v12  ;;  %v4683_v31 = vmul.f32 0.020408163, %v4618_v50  ;;  %v4776_v60 = vmul.f32 %v9351_v47, %v9351_v47  ;;  %v4777_v46 = vmul.f32 %v9354_v54, %v9354_v54 }
 0x515   : > { %v4896_v61 = vsel %vm4398_vm2, %v4776_v60, 0.0  ;;  %v9363_v10 = vsub.f32 %v9095_v8, %v4682_v59  ;;  %v9366_v1 = vsub.f32 %v9097_v37, %v4683_v31  ;;  %v4899_v48 = vsel %vm4398_vm2, %v4777_v46, 0.0 }
 0x516   : > { %4894 = vadd.xlane.f32.xlu1 %v4893_v29  ;;  %4897 = vadd.xlane.f32.xlu0 %v4896_v61  ;;  %v4621_v56 = vpop.xlane.xlu0 %4620  ;;  %v4624_v19 = vpop.xlane.xlu1 %4623 }
 0x517   : > { %10317 = vst [vmem:[#allocation31_spill] sm:$0xff] %v9363_v10  ;;  %10318 = vst [vmem:[#allocation32_spill] sm:$0xff] %v9366_v1  ;;  %v4684_v17 = vmul.f32 0.020408163, %v4621_v56  ;;  %v4685_v2 = vmul.f32 0.020408163, %v4624_v19  ;;  %v4778_v55 = vmul.f32 %v9363_v10, %v9363_v10  ;;  %v4779_v12 = vmul.f32 %v9366_v1, %v9366_v1 }
 0x519   : > { %v4902_v8 = vsel %vm4398_vm2, %v4778_v55, 0.0  ;;  %v9375_v50 = vsub.f32 %v9103_v62, %v4684_v17  ;;  %v9378_v37 = vsub.f32 %v9105_v9, %v4685_v2  ;;  %v4905_v31 = vsel %vm4398_vm2, %v4779_v12, 0.0 }
 0x51a   : > { %4900 = vadd.xlane.f32.xlu1 %v4899_v48  ;;  %4903 = vadd.xlane.f32.xlu0 %v4902_v8  ;;  %v4627_v29 = vpop.xlane.xlu0 %4626  ;;  %v4630_v59 = vpop.xlane.xlu1 %4629 }
 0x51b   : > { %10319 = vst [vmem:[#allocation33_spill] sm:$0xff] %v9378_v37  ;;  %v4686_v60 = vmul.f32 0.020408163, %v4627_v29  ;;  %v4687_v46 = vmul.f32 0.020408163, %v4630_v59  ;;  %v4780_v61 = vmul.f32 %v9375_v50, %v9375_v50  ;;  %v4781_v56 = vmul.f32 %v9378_v37, %v9378_v37 }
 0x51d   : > { %v4908_v62 = vsel %vm4398_vm2, %v4780_v61, 0.0  ;;  %v9387_v19 = vsub.f32 %v9111_v58, %v4686_v60  ;;  %v9390_v9 = vsub.f32 %v9113_v27, %v4687_v46  ;;  %v4911_v2 = vsel %vm4398_vm2, %v4781_v56, 0.0 }
 0x51e   : > { %4906 = vadd.xlane.f32.xlu1 %v4905_v31  ;;  %4909 = vadd.xlane.f32.xlu0 %v4908_v62  ;;  %v4633_v48 = vpop.xlane.xlu0 %4632  ;;  %v4636_v17 = vpop.xlane.xlu1 %4635 }
 0x51f   : > { %10320 = vst [vmem:[#allocation34_spill] sm:$0xff] %v9390_v9  ;;  %v4688_v55 = vmul.f32 0.020408163, %v4633_v48  ;;  %v4689_v12 = vmul.f32 0.020408163, %v4636_v17  ;;  %v4782_v8 = vmul.f32 %v9387_v19, %v9387_v19  ;;  %v4783_v29 = vmul.f32 %v9390_v9, %v9390_v9 }
 0x521   : > { %v4914_v58 = vsel %vm4398_vm2, %v4782_v8, 0.0  ;;  %v9399_v59 = vsub.f32 %v9119_v30, %v4688_v55  ;;  %v9402_v27 = vsub.f32 %v9121_v24, %v4689_v12  ;;  %v4917_v46 = vsel %vm4398_vm2, %v4783_v29, 0.0  ;;  %v5124_v29 = vld [vmem:[%s10254_s5] sm:$0xff] }
 0x522   : > { %4912 = vadd.xlane.f32.xlu1 %v4911_v2  ;;  %4915 = vadd.xlane.f32.xlu0 %v4914_v58  ;;  %v4639_v31 = vpop.xlane.xlu0 %4638  ;;  %v4642_v60 = vpop.xlane.xlu1 %4641  ;;  %v5126_v58 = vld [vmem:[%s10254_s5 + $0x10] sm:$0xff] }
 0x523   : > { %10321 = vst [vmem:[#allocation35_spill] sm:$0xff] %v9402_v27  ;;  %v4690_v61 = vmul.f32 0.020408163, %v4639_v31  ;;  %v4691_v56 = vmul.f32 0.020408163, %v4642_v60  ;;  %v4784_v62 = vmul.f32 %v9399_v59, %v9399_v59  ;;  %v4785_v48 = vmul.f32 %v9402_v27, %v9402_v27  ;;  %v5133_v31 = vld [vmem:[%s10254_s5 + $0x48] sm:$0xff] }
 0x524   : > { %v5127_v60 = vld [vmem:[%s10254_s5 + $0x18] sm:$0xff] }
 0x525   : > { %v4920_v30 = vsel %vm4398_vm2, %v4784_v62, 0.0  ;;  %v9411_v17 = vsub.f32 %v9127_v28, %v4690_v61  ;;  %v9414_v24 = vsub.f32 %v9129_v18, %v4691_v56  ;;  %v4923_v2 = vsel %vm4398_vm2, %v4785_v48, 0.0  ;;  %v5125_v18 = vld [vmem:[%s10254_s5 + $0x8] sm:$0xff]  ;;  %v5128_v61 = vld [vmem:[%s10254_s5 + $0x20] sm:$0xff]  ;;  %v5139_v48 = vld [vmem:[%s10254_s5 + $0x78] sm:$0xff] }
 0x526   : > { %4918 = vadd.xlane.f32.xlu1 %v4917_v46  ;;  %4921 = vadd.xlane.f32.xlu0 %v4920_v30  ;;  %v5135_v46 = vld [vmem:[%s10254_s5 + $0x58] sm:$0xff]  ;;  %v5137_v56 = vld [vmem:[%s10254_s5 + $0x68] sm:$0xff]  ;;  %v5130_v30 = vld [vmem:[%s10254_s5 + $0x30] sm:$0xff] }
 0x527   : > { %10322 = vst [vmem:[#allocation36_spill] sm:$0xff] %v9414_v24  ;;  %v4786_v55 = vmul.f32 %v9411_v17, %v9411_v17  ;;  %v4787_v12 = vmul.f32 %v9414_v24, %v9414_v24  ;;  %v5129_v62 = vld [vmem:[%s10254_s5 + $0x28] sm:$0xff] }
 0x529   : > { %v4926_v8 = vsel %vm4398_vm2, %v4786_v55, 0.0  ;;  %v4929_v28 = vsel %vm4398_vm2, %v4787_v12, 0.0  ;;  %v5131_v55 = vld [vmem:[%s10254_s5 + $0x38] sm:$0xff] }
 0x52a   : > { %4924 = vadd.xlane.f32.xlu1 %v4923_v2  ;;  %4927 = vadd.xlane.f32.xlu0 %v4926_v8  ;;  %v5141_v2 = vld [vmem:[%s10254_s5 + $0x88] sm:$0xff]  ;;  %v5143_v12 = vld [vmem:[%s10254_s5 + $0x98] sm:$0xff]  ;;  %v5132_v8 = vld [vmem:[%s10254_s5 + $0x40] sm:$0xff] }
 0x52e   : > { %4930 = vadd.xlane.f32.xlu1 %v4929_v28  ;;  %v5145_v28 = vld [vmem:[%s10254_s5 + $0xa8] sm:$0xff] }
 0x53f   : > { %5179 = vperm.xlu1 %7072, %v5125_v18  }
 0x540   : > { %5174 = vperm.xlu0 %7071, %v5124_v29   ;;  %v5134_v29 = vld [vmem:[%s10254_s5 + $0x50] sm:$0xff] }
 0x543   : > { %5184 = vperm.xlu1 %7072, %v5126_v58   ;;  %v5147_v58 = vld [vmem:[%s10254_s5 + $0xb8] sm:$0xff] }
 0x544   : > { %5219 = vperm.xlu0 %7071, %v5133_v31  }
 0x547   : > { %5189 = vperm.xlu1 %7072, %v5127_v60  }
 0x548   : > { %5229 = vperm.xlu0 %7071, %v5135_v46   ;;  %v5136_v46 = vld [vmem:[%s10254_s5 + $0x60] sm:$0xff] }
 0x54b   : > { %5194 = vperm.xlu1 %7072, %v5128_v61   ;;  %v5149_v61 = vld [vmem:[%s10254_s5 + $0xc8] sm:$0xff] }
 0x54c   : > { %5239 = vperm.xlu0 %7071, %v5137_v56  }
 0x54f   : > { %5199 = vperm.xlu1 %7072, %v5129_v62  }
 0x550   : > { %5249 = vperm.xlu0 %7071, %v5139_v48   ;;  %v5138_v48 = vld [vmem:[%s10254_s5 + $0x70] sm:$0xff] }
 0x553   : > { %5204 = vperm.xlu1 %7072, %v5130_v30   ;;  %v5151_v30 = vld [vmem:[%s10254_s5 + $0xd8] sm:$0xff] }
 0x554   : > { %5259 = vperm.xlu0 %7071, %v5141_v2  }
 0x557   : > { %5209 = vperm.xlu1 %7072, %v5131_v55  }
 0x558   : > { %5269 = vperm.xlu0 %7071, %v5143_v12   ;;  %v5140_v12 = vld [vmem:[%s10254_s5 + $0x80] sm:$0xff] }
 0x55b   : > { %5214 = vperm.xlu1 %7072, %v5132_v8   ;;  %v9471_v18 = vpop.xlane.xlu0 %4789  ;;  %v5153_v8 = vld [vmem:[%s10254_s5 + $0xe8] sm:$0xff] }
 0x55c   : > { %5279 = vperm.xlu0 %7071, %v5145_v28  }
 0x55f   : > { %5224 = vperm.xlu1 %7072, %v5134_v29   ;;  %v9479_v31 = vpop.xlane.xlu1 %4792  ;;  %v9481_v60 = vpop.xlane.xlu0 %4795 }
 0x560   : > { %5289 = vperm.xlu0 %7071, %v5147_v58   ;;  %v5142_v58 = vld [vmem:[%s10254_s5 + $0x90] sm:$0xff] }
 0x563   : > { %5234 = vperm.xlu1 %7072, %v5136_v46   ;;  %v9489_v56 = vpop.xlane.xlu1 %4798  ;;  %v9491_v62 = vpop.xlane.xlu0 %4801  ;;  %v5155_v46 = vld [vmem:[%s10254_s5 + $0xf8] sm:$0xff] }
 0x564   : > { %5299 = vperm.xlu0 %7071, %v5149_v61  }
 0x567   : > { %5244 = vperm.xlu1 %7072, %v5138_v48   ;;  %v9499_v2 = vpop.xlane.xlu1 %4804  ;;  %v9501_v55 = vpop.xlane.xlu0 %4807 }
 0x568   : > { %5309 = vperm.xlu0 %7071, %v5151_v30   ;;  %v5144_v30 = vld [vmem:[%s10254_s5 + $0xa0] sm:$0xff] }
 0x56b   : > { %5254 = vperm.xlu1 %7072, %v5140_v12   ;;  %v9509_v28 = vpop.xlane.xlu1 %4810  ;;  %v9511_v29 = vpop.xlane.xlu0 %4813  ;;  %v5157_v12 = vld [vmem:[%s10254_s5 + $0x108] sm:$0xff] }
 0x56c   : > { %5319 = vperm.xlu0 %7071, %v5153_v8  }
 0x56f   : > { %5264 = vperm.xlu1 %7072, %v5142_v58   ;;  %v9519_v61 = vpop.xlane.xlu1 %4816  ;;  %v9521_v48 = vpop.xlane.xlu0 %4819  ;;  %v5146_v58 = vld [vmem:[%s10254_s5 + $0xb0] sm:$0xff] }
 0x570   : > { %5329 = vperm.xlu0 %7071, %v5155_v46   ;;  %v5159_v46 = vld [vmem:[%s10254_s5 + $0x118] sm:$0xff] }
 0x573   : > { %5274 = vperm.xlu1 %7072, %v5144_v30   ;;  %v9529_v8 = vpop.xlane.xlu1 %4822  ;;  %v9531_v10 = vpop.xlane.xlu0 %4825  ;;  %v5148_v30 = vld [vmem:[%s10254_s5 + $0xc0] sm:$0xff] }
 0x574   : > { %5339 = vperm.xlu0 %7071, %v5157_v12   ;;  %v5161_v12 = vld [vmem:[%s10254_s5 + $0x128] sm:$0xff] }
 0x577   : > { %5284 = vperm.xlu1 %7072, %v5146_v58   ;;  %v9539_v47 = vpop.xlane.xlu1 %4828  ;;  %v9541_v24 = vpop.xlane.xlu0 %4831  ;;  %v5150_v58 = vld [vmem:[%s10254_s5 + $0xd0] sm:$0xff] }
 0x578   : > { %5349 = vperm.xlu0 %7071, %v5159_v46   ;;  %v5163_v46 = vld [vmem:[%s10254_s5 + $0x138] sm:$0xff] }
 0x57b   : > { %5294 = vperm.xlu1 %7072, %v5148_v30   ;;  %v9549_v44 = vpop.xlane.xlu1 %4834  ;;  %v9551_v27 = vpop.xlane.xlu0 %4837  ;;  %v5152_v30 = vld [vmem:[%s10254_s5 + $0xe0] sm:$0xff] }
 0x57c   : > { %5359 = vperm.xlu0 %7071, %v5161_v12   ;;  %v5165_v12 = vld [vmem:[%s10254_s5 + $0x148] sm:$0xff] }
 0x57f   : > { %5304 = vperm.xlu1 %7072, %v5150_v58   ;;  %v9559_v51 = vpop.xlane.xlu1 %4840  ;;  %v9561_v9 = vpop.xlane.xlu0 %4843  ;;  %v5154_v58 = vld [vmem:[%s10254_s5 + $0xf0] sm:$0xff] }
 0x580   : > { %10323 = vst [vmem:[#allocation37_spill] sm:$0xff] %v9561_v9  ;;  %5369 = vperm.xlu0 %7071, %v5163_v46   ;;  %v5167_v46 = vld [vmem:[%s10254_s5 + $0x158] sm:$0xff] }
 0x583   : > { %5314 = vperm.xlu1 %7072, %v5152_v30   ;;  %v9569_v45 = vpop.xlane.xlu1 %4846  ;;  %v9571_v37 = vpop.xlane.xlu0 %4849  ;;  %v5156_v30 = vld [vmem:[%s10254_s5 + $0x100] sm:$0xff] }
 0x584   : > { %10324 = vst [vmem:[#allocation38_spill] sm:$0xff] %v9571_v37  ;;  %5379 = vperm.xlu0 %7071, %v5165_v12   ;;  %v5169_v12 = vld [vmem:[%s10254_s5 + $0x168] sm:$0xff] }
 0x587   : > { %5324 = vperm.xlu1 %7072, %v5154_v58   ;;  %v9579_v39 = vpop.xlane.xlu1 %4852  ;;  %v9581_v1 = vpop.xlane.xlu0 %4855  ;;  %v5158_v58 = vld [vmem:[%s10254_s5 + $0x110] sm:$0xff] }
 0x588   : > { %10325 = vst [vmem:[#allocation39_spill] sm:$0xff] %v9581_v1  ;;  %5389 = vperm.xlu0 %7071, %v5167_v46   ;;  %v5171_v46 = vld [vmem:[%s10254_s5 + $0x178] sm:$0xff] }
 0x58b   : > { %5334 = vperm.xlu1 %7072, %v5156_v30   ;;  %v9589_v36 = vpop.xlane.xlu1 %4858  ;;  %v9591_v54 = vpop.xlane.xlu0 %4861  ;;  %v5160_v30 = vld [vmem:[%s10254_s5 + $0x120] sm:$0xff] }
 0x58c   : > { %10326 = vst [vmem:[#allocation40_spill] sm:$0xff] %v9591_v54  ;;  %5399 = vperm.xlu0 %7071, %v5169_v12   ;;  %v5461_v12 = vld [vmem:[%s10255_s6 + $0x8] sm:$0xff] }
 0x58f   : > { %5344 = vperm.xlu1 %7072, %v5158_v58   ;;  %v9599_v3 = vpop.xlane.xlu1 %4864  ;;  %v9601_v0 = vpop.xlane.xlu0 %4867  ;;  %v5162_v58 = vld [vmem:[%s10254_s5 + $0x130] sm:$0xff] }
 0x590   : > { %10327 = vst [vmem:[#allocation41_spill] sm:$0xff] %v9601_v0  ;;  %5409 = vperm.xlu0 %7071, %v5171_v46   ;;  %v5463_v46 = vld [vmem:[%s10255_s6 + $0x18] sm:$0xff] }
 0x593   : > { %5354 = vperm.xlu1 %7072, %v5160_v30   ;;  %v9609_v14 = vpop.xlane.xlu1 %4870  ;;  %v9611_v33 = vpop.xlane.xlu0 %4873  ;;  %v5164_v30 = vld [vmem:[%s10254_s5 + $0x140] sm:$0xff] }
 0x594   : > { %10328 = vst [vmem:[#allocation42_spill] sm:$0xff] %v9611_v33  ;;  %5515 = vperm.xlu0 %7071, %v5461_v12   ;;  %v5465_v12 = vld [vmem:[%s10255_s6 + $0x28] sm:$0xff] }
 0x597   : > { %5364 = vperm.xlu1 %7072, %v5162_v58   ;;  %v9619_v38 = vpop.xlane.xlu1 %4876  ;;  %v9621_v52 = vpop.xlane.xlu0 %4879  ;;  %v5166_v58 = vld [vmem:[%s10254_s5 + $0x150] sm:$0xff] }
 0x598   : > { %10329 = vst [vmem:[#allocation43_spill] sm:$0xff] %v9619_v38  ;;  %10330 = vst [vmem:[#allocation44_spill] sm:$0xff] %v9621_v52  ;;  %5525 = vperm.xlu0 %7071, %v5463_v46   ;;  %v5467_v46 = vld [vmem:[%s10255_s6 + $0x38] sm:$0xff] }
 0x59b   : > { %5374 = vperm.xlu1 %7072, %v5164_v30   ;;  %v9629_v4 = vpop.xlane.xlu1 %4882  ;;  %v9631_v33 = vpop.xlane.xlu0 %4885  ;;  %v5168_v30 = vld [vmem:[%s10254_s5 + $0x160] sm:$0xff] }
 0x59c   : > { %10331 = vst [vmem:[#allocation45_spill] sm:$0xff] %v9629_v4  ;;  %10332 = vst [vmem:[#allocation46_spill] sm:$0xff] %v9631_v33  ;;  %5535 = vperm.xlu0 %7071, %v5465_v12   ;;  %v5469_v12 = vld [vmem:[%s10255_s6 + $0x48] sm:$0xff] }
 0x59f   : > { %5384 = vperm.xlu1 %7072, %v5166_v58   ;;  %v9639_v52 = vpop.xlane.xlu1 %4888  ;;  %v9641_v5 = vpop.xlane.xlu0 %4891  ;;  %v5170_v58 = vld [vmem:[%s10254_s5 + $0x170] sm:$0xff] }
 0x5a0   : > { %10333 = vst [vmem:[#allocation47_spill] sm:$0xff] %v9639_v52  ;;  %10334 = vst [vmem:[#allocation48_spill] sm:$0xff] %v9641_v5  ;;  %5545 = vperm.xlu0 %7071, %v5467_v46   ;;  %v5471_v46 = vld [vmem:[%s10255_s6 + $0x58] sm:$0xff] }
 0x5a3   : > { %5394 = vperm.xlu1 %7072, %v5168_v30   ;;  %v9649_v33 = vpop.xlane.xlu1 %4894  ;;  %v9651_v42 = vpop.xlane.xlu0 %4897  ;;  %v5460_v30 = vld [vmem:[%s10255_s6] sm:$0xff] }
 0x5a4   : > { %10335 = vst [vmem:[#allocation49_spill] sm:$0xff] %v9649_v33  ;;  %10336 = vst [vmem:[#allocation50_spill] sm:$0xff] %v9651_v42  ;;  %5555 = vperm.xlu0 %7071, %v5469_v12   ;;  %v5473_v12 = vld [vmem:[%s10255_s6 + $0x68] sm:$0xff] }
 0x5a7   : > { %5404 = vperm.xlu1 %7072, %v5170_v58   ;;  %v9659_v5 = vpop.xlane.xlu1 %4900  ;;  %v9661_v0 = vpop.xlane.xlu0 %4903  ;;  %v5462_v58 = vld [vmem:[%s10255_s6 + $0x10] sm:$0xff] }
 0x5a8   : > { %10337 = vst [vmem:[#allocation51_spill] sm:$0xff] %v9659_v5  ;;  %10338 = vst [vmem:[#allocation52_spill] sm:$0xff] %v9661_v0  ;;  %5565 = vperm.xlu0 %7071, %v5471_v46   ;;  %v5475_v46 = vld [vmem:[%s10255_s6 + $0x78] sm:$0xff] }
 0x5ab   : > { %5510 = vperm.xlu1 %7072, %v5460_v30   ;;  %v9669_v42 = vpop.xlane.xlu1 %4906  ;;  %v9671_v32 = vpop.xlane.xlu0 %4909  ;;  %v5464_v30 = vld [vmem:[%s10255_s6 + $0x20] sm:$0xff] }
 0x5ac   : > { %10339 = vst [vmem:[#allocation53_spill] sm:$0xff] %v9669_v42  ;;  %5575 = vperm.xlu0 %7071, %v5473_v12   ;;  %v5477_v12 = vld [vmem:[%s10255_s6 + $0x88] sm:$0xff] }
 0x5af   : > { %5520 = vperm.xlu1 %7072, %v5462_v58   ;;  %v9679_v0 = vpop.xlane.xlu1 %4912  ;;  %v9681_v57 = vpop.xlane.xlu0 %4915  ;;  %v5466_v58 = vld [vmem:[%s10255_s6 + $0x30] sm:$0xff] }
 0x5b0   : > { %10340 = vst [vmem:[#allocation54_spill] sm:$0xff] %v9679_v0  ;;  %5585 = vperm.xlu0 %7071, %v5475_v46   ;;  %v5479_v46 = vld [vmem:[%s10255_s6 + $0x98] sm:$0xff] }
 0x5b3   : > { %5530 = vperm.xlu1 %7072, %v5464_v30   ;;  %v9689_v42 = vpop.xlane.xlu1 %4918  ;;  %v9694_v0 = vpop.xlane.xlu0 %4921  ;;  %v5468_v30 = vld [vmem:[%s10255_s6 + $0x40] sm:$0xff] }
 0x5b4   : > { %10341 = vst [vmem:[#allocation55_spill] sm:$0xff] %v9689_v42  ;;  %5595 = vperm.xlu0 %7071, %v5477_v12   ;;  %v5481_v12 = vld [vmem:[%s10255_s6 + $0xa8] sm:$0xff] }
 0x5b7   : > { %5540 = vperm.xlu1 %7072, %v5466_v58   ;;  %v9699_v5 = vpop.xlane.xlu1 %4924  ;;  %v9707_v42 = vpop.xlane.xlu0 %4927  ;;  %v5470_v58 = vld [vmem:[%s10255_s6 + $0x50] sm:$0xff] }
 0x5b8   : > { %10342 = vst [vmem:[#allocation56_spill] sm:$0xff] %v9699_v5  ;;  %5605 = vperm.xlu0 %7071, %v5479_v46   ;;  %v5483_v46 = vld [vmem:[%s10255_s6 + $0xb8] sm:$0xff] }
 0x5bb   : > { %5550 = vperm.xlu1 %7072, %v5468_v30   ;;  %v9709_v54 = vpop.xlane.xlu1 %4930  ;;  %v5472_v30 = vld [vmem:[%s10255_s6 + $0x60] sm:$0xff] }
 0x5bc   : > { %10343 = vst [vmem:[#allocation57_spill] sm:$0xff] %v9709_v54  ;;  %5615 = vperm.xlu0 %7071, %v5481_v12   ;;  %v5485_v12 = vld [vmem:[%s10255_s6 + $0xc8] sm:$0xff] }
 0x5bf   : > { %5560 = vperm.xlu1 %7072, %v5470_v58   ;;  %v9717_v5 = vpop.permute.xlu1 %5179  ;;  %v9719_v40 = vpop.permute.xlu0 %5174  ;;  %v5474_v58 = vld [vmem:[%s10255_s6 + $0x70] sm:$0xff] }
 0x5c0   : > { %5625 = vperm.xlu0 %7071, %v5483_v46   ;;  %v5487_v46 = vld [vmem:[%s10255_s6 + $0xd8] sm:$0xff] }
 0x5c3   : > { %5570 = vperm.xlu1 %7072, %v5472_v30   ;;  %v9727_v54 = vpop.permute.xlu1 %5184  ;;  %v9729_v53 = vpop.permute.xlu0 %5219  ;;  %v5476_v30 = vld [vmem:[%s10255_s6 + $0x80] sm:$0xff] }
 0x5c4   : > { %5635 = vperm.xlu0 %7071, %v5485_v12   ;;  %v5489_v12 = vld [vmem:[%s10255_s6 + $0xe8] sm:$0xff] }
 0x5c7   : > { %5580 = vperm.xlu1 %7072, %v5474_v58   ;;  %v9737_v33 = vpop.permute.xlu1 %5189  ;;  %v9739_v1 = vpop.permute.xlu0 %5229  ;;  %v5478_v58 = vld [vmem:[%s10255_s6 + $0x90] sm:$0xff] }
 0x5c8   : > { %5645 = vperm.xlu0 %7071, %v5487_v46   ;;  %v5491_v46 = vld [vmem:[%s10255_s6 + $0xf8] sm:$0xff] }
 0x5cb   : > { %5590 = vperm.xlu1 %7072, %v5476_v30   ;;  %v9747_v43 = vpop.permute.xlu1 %5194  ;;  %v9749_v26 = vpop.permute.xlu0 %5239  ;;  %v5480_v30 = vld [vmem:[%s10255_s6 + $0xa0] sm:$0xff] }
 0x5cc   : > { %10344 = vst [vmem:[#allocation58_spill] sm:$0xff] %v9747_v43  ;;  %5655 = vperm.xlu0 %7071, %v5489_v12   ;;  %v5493_v12 = vld [vmem:[%s10255_s6 + $0x108] sm:$0xff] }
 0x5cf   : > { %5600 = vperm.xlu1 %7072, %v5478_v58   ;;  %v9757_v52 = vpop.permute.xlu1 %5199  ;;  %v9759_v37 = vpop.permute.xlu0 %5249  ;;  %v5482_v58 = vld [vmem:[%s10255_s6 + $0xb0] sm:$0xff] }
 0x5d0   : > { %5665 = vperm.xlu0 %7071, %v5491_v46   ;;  %v5495_v46 = vld [vmem:[%s10255_s6 + $0x118] sm:$0xff] }
 0x5d3   : > { %5610 = vperm.xlu1 %7072, %v5480_v30   ;;  %v9767_v11 = vpop.permute.xlu1 %5204  ;;  %v9769_v16 = vpop.permute.xlu0 %5259  ;;  %v5484_v30 = vld [vmem:[%s10255_s6 + $0xc0] sm:$0xff] }
 0x5d4   : > { %10345 = vst [vmem:[#allocation59_spill] sm:$0xff] %v9767_v11  ;;  %10346 = vst [vmem:[#allocation60_spill] sm:$0xff] %v9769_v16  ;;  %5675 = vperm.xlu0 %7071, %v5493_v12   ;;  %v5497_v12 = vld [vmem:[%s10255_s6 + $0x128] sm:$0xff] }
 0x5d7   : > { %5620 = vperm.xlu1 %7072, %v5482_v58   ;;  %v9777_v4 = vpop.permute.xlu1 %5209  ;;  %v9779_v9 = vpop.permute.xlu0 %5269  ;;  %v5486_v58 = vld [vmem:[%s10255_s6 + $0xd0] sm:$0xff] }
 0x5d8   : > { %10347 = vst [vmem:[#allocation61_spill] sm:$0xff] %v9779_v9  ;;  %5685 = vperm.xlu0 %7071, %v5495_v46   ;;  %v5499_v46 = vld [vmem:[%s10255_s6 + $0x138] sm:$0xff] }
 0x5db   : > { %5630 = vperm.xlu1 %7072, %v5484_v30   ;;  %v9787_v11 = vpop.permute.xlu1 %5214  ;;  %v9789_v49 = vpop.permute.xlu0 %5279  ;;  %v5488_v30 = vld [vmem:[%s10255_s6 + $0xe0] sm:$0xff] }
 0x5dc   : > { %10348 = vst [vmem:[#allocation62_spill] sm:$0xff] %v9787_v11  ;;  %10349 = vst [vmem:[#allocation63_spill] sm:$0xff] %v9789_v49  ;;  %5695 = vperm.xlu0 %7071, %v5497_v12   ;;  %v5501_v12 = vld [vmem:[%s10255_s6 + $0x148] sm:$0xff] }
 0x5df   : > { %5640 = vperm.xlu1 %7072, %v5486_v58   ;;  %v9797_v9 = vpop.permute.xlu1 %5224  ;;  %v9799_v21 = vpop.permute.xlu0 %5289  ;;  %v5490_v58 = vld [vmem:[%s10255_s6 + $0xf0] sm:$0xff] }
 0x5e0   : > { %10350 = vst [vmem:[#allocation64_spill] sm:$0xff] %v9797_v9  ;;  %10351 = vst [vmem:[#allocation65_spill] sm:$0xff] %v9799_v21  ;;  %5705 = vperm.xlu0 %7071, %v5499_v46   ;;  %v5503_v46 = vld [vmem:[%s10255_s6 + $0x158] sm:$0xff] }
 0x5e3   : > { %5650 = vperm.xlu1 %7072, %v5488_v30   ;;  %v9807_v49 = vpop.permute.xlu1 %5234  ;;  %v9809_v11 = vpop.permute.xlu0 %5299  ;;  %v5492_v30 = vld [vmem:[%s10255_s6 + $0x100] sm:$0xff] }
 0x5e4   : > { %10352 = vst [vmem:[#allocation66_spill] sm:$0xff] %v9807_v49  ;;  %10353 = vst [vmem:[#allocation67_spill] sm:$0xff] %v9809_v11  ;;  %5715 = vperm.xlu0 %7071, %v5501_v12   ;;  %v5505_v12 = vld [vmem:[%s10255_s6 + $0x168] sm:$0xff] }
 0x5e7   : > { %5660 = vperm.xlu1 %7072, %v5490_v58   ;;  %v9817_v21 = vpop.permute.xlu1 %5244  ;;  %v9819_v9 = vpop.permute.xlu0 %5309  ;;  %v5494_v58 = vld [vmem:[%s10255_s6 + $0x110] sm:$0xff] }
 0x5e8   : > { %10354 = vst [vmem:[#allocation68_spill] sm:$0xff] %v9817_v21  ;;  %10355 = vst [vmem:[#allocation69_spill] sm:$0xff] %v9819_v9  ;;  %5725 = vperm.xlu0 %7071, %v5503_v46   ;;  %v5507_v46 = vld [vmem:[%s10255_s6 + $0x178] sm:$0xff] }
 0x5eb   : > { %5670 = vperm.xlu1 %7072, %v5492_v30   ;;  %v9827_v11 = vpop.permute.xlu1 %5254  ;;  %v9829_v49 = vpop.permute.xlu0 %5319  ;;  %v5496_v30 = vld [vmem:[%s10255_s6 + $0x120] sm:$0xff] }
 0x5ec   : > { %10356 = vst [vmem:[#allocation70_spill] sm:$0xff] %v9827_v11  ;;  %10357 = vst [vmem:[#allocation71_spill] sm:$0xff] %v9829_v49  ;;  %5735 = vperm.xlu0 %7071, %v5505_v12   ;;  %v5498_v11 = vld [vmem:[%s10255_s6 + $0x130] sm:$0xff] }
 0x5ef   : > { %5680 = vperm.xlu1 %7072, %v5494_v58   ;;  %v9837_v9 = vpop.permute.xlu1 %5264  ;;  %v9839_v21 = vpop.permute.xlu0 %5329 }
 0x5f0   : > { %10358 = vst [vmem:[#allocation72_spill] sm:$0xff] %v9837_v9  ;;  %10359 = vst [vmem:[#allocation73_spill] sm:$0xff] %v9839_v21  ;;  %5745 = vperm.xlu0 %7071, %v5507_v46   ;;  %v5500_v46 = vld [vmem:[%s10255_s6 + $0x140] sm:$0xff]  ;;  %v4933_v21 = vmul.f32 0.020408163, %v9479_v31 }
 0x5f1   : > { %v5504_v31 = vld [vmem:[%s10255_s6 + $0x160] sm:$0xff] }
 0x5f3   : > { %5690 = vperm.xlu1 %7072, %v5496_v30   ;;  %v9844_v12 = vpop.permute.xlu1 %5274  ;;  %v9846_v49 = vpop.permute.xlu0 %5339 }
 0x5f4   : > { %10360 = vst [vmem:[#allocation74_spill] sm:$0xff] %v9844_v12  ;;  %10361 = vst [vmem:[#allocation75_spill] sm:$0xff] %v9846_v49  ;;  %v5502_v49 = vld [vmem:[%s10255_s6 + $0x150] sm:$0xff] }
 0x5f7   : > { %5700 = vperm.xlu1 %7072, %v5498_v11   ;;  %v9851_v58 = vpop.permute.xlu1 %5284  ;;  %v9853_v9 = vpop.permute.xlu0 %5349  ;;  %v4981_v11 = vadd.f32 0.001, %v4933_v21  ;;  %v5506_v21 = vld [vmem:[%s10255_s6 + $0x170] sm:$0xff] }
 0x5f8   : > { %10362 = vst [vmem:[#allocation76_spill] sm:$0xff] %v9851_v58  ;;  %10363 = vst [vmem:[#allocation77_spill] sm:$0xff] %v9853_v9  ;;  %v4935_v58 = vmul.f32 0.020408163, %v9489_v56 }
 0x5f9   : > { %7073 = vrsqrt.f32 %v4981_v11 }
 0x5fb   : > { %5710 = vperm.xlu1 %7072, %v5500_v46   ;;  %v9859_v30 = vpop.permute.xlu1 %5294  ;;  %v9861_v12 = vpop.permute.xlu0 %5359  ;;  %v4983_v46 = vadd.f32 0.001, %v4935_v58 }
 0x5fc   : > { %10364 = vst [vmem:[#allocation78_spill] sm:$0xff] %v9859_v30  ;;  %10365 = vst [vmem:[#allocation79_spill] sm:$0xff] %v9861_v12  ;;  %v4937_v12 = vmul.f32 0.020408163, %v9499_v2 }
 0x5fd   : > { %7075 = vrsqrt.f32 %v4983_v46 }
 0x5fe   : > { %v4985_v56 = vadd.f32 0.001, %v4937_v12 }
 0x5ff   : > { %5720 = vperm.xlu1 %7072, %v5502_v49   ;;  %v9867_v9 = vpop.permute.xlu1 %5304  ;;  %v9869_v38 = vpop.permute.xlu0 %5369  ;;  %v4972_v49 = vmul.f32 0.020408163, %v9671_v32 }
 0x600   : > { %10366 = vst [vmem:[#allocation80_spill] sm:$0xff] %v9867_v9  ;;  %10367 = vst [vmem:[#allocation81_spill] sm:$0xff] %v9869_v38  ;;  %v4939_v38 = vmul.f32 0.020408163, %v9509_v28  ;;  %7077 = vrsqrt.f32 %v4985_v56  ;;  %v4976_v28 = vmul.f32 0.020408163, %v9694_v0 }
 0x601   : > { %v5020_v2 = vadd.f32 0.001, %v4972_v49  ;;  %v4945_v0 = vmul.f32 0.020408163, %v9539_v47 }
 0x603   : > { %5730 = vperm.xlu1 %7072, %v5504_v31   ;;  %v9875_v30 = vpop.permute.xlu1 %5314  ;;  %v9877_v16 = vpop.permute.xlu0 %5379  ;;  %v4974_v31 = vmul.f32 0.020408163, %v9681_v57  ;;  %7079 = vrsqrt.f32 %v5020_v2  ;;  %v4978_v2 = vmul.f32 0.020408163, %v9707_v42  ;;  %v4993_v47 = vadd.f32 0.001, %v4945_v0 }
 0x604   : > { %10368 = vst [vmem:[#allocation82_spill] sm:$0xff] %v9875_v30  ;;  %10369 = vst [vmem:[#allocation83_spill] sm:$0xff] %v9877_v16  ;;  %v4987_v16 = vadd.f32 0.001, %v4939_v38  ;;  %v4941_v30 = vmul.f32 0.020408163, %v9519_v61  ;;  %v7074_v32 = vpop.eup %7073 }
 0x605   : > { %v5022_v12 = vadd.f32 0.001, %v4974_v31  ;;  %v4932_v38 = vmul.f32 0.020408163, %v9471_v18  ;;  %v5077_v61 = vmul.f32 %v7074_v32, %v9147_v23  ;;  %v5026_v23 = vadd.f32 0.001, %v4978_v2 }
 0x606   : > { %7081 = vrsqrt.f32 %v4987_v16  ;;  %v4989_v46 = vadd.f32 0.001, %v4941_v30  ;;  %v4934_v32 = vmul.f32 0.020408163, %v9481_v60 }
 0x607   : > { %5740 = vperm.xlu1 %7072, %v5506_v21   ;;  %v9884_v11 = vpop.permute.xlu1 %5324  ;;  %v9886_v58 = vpop.permute.xlu0 %5389  ;;  %v4943_v21 = vmul.f32 0.020408163, %v9529_v8  ;;  %7083 = vrsqrt.f32 %v5022_v12  ;;  %v5413_v31 = vmul.f32 %v9717_v5, %v5077_v61  ;;  %v4947_v12 = vmul.f32 0.020408163, %v9549_v44 }
 0x608   : > { %v7076_v56 = vpop.eup %7075  ;;  %7085 = vrsqrt.f32 %v4989_v46 }
 0x609   : > { %v4991_v16 = vadd.f32 0.001, %v4943_v21  ;;  %v4936_v21 = vmul.f32 0.020408163, %v9491_v62 }
 0x60b   : > { %v9890_v9 = vpop.permute.xlu1 %5334  ;;  %v9892_v43 = vpop.permute.xlu0 %5399 }
 0x60c   : > { %10370 = vst [vmem:[#allocation84_spill] sm:$0xff] %v9890_v9  ;;  %10371 = vst [vmem:[#allocation85_spill] sm:$0xff] %v9892_v43  ;;  %v5024_v43 = vadd.f32 0.001, %v4976_v28  ;;  %v7078_v9 = vpop.eup %7077 }
 0x60d   : > { %v7080_v5 = vpop.eup %7079 }
 0x60e   : > { %7087 = vrsqrt.f32 %v5024_v43  ;;  %v5081_v43 = vmul.f32 %v7078_v9, %v9162_v34  ;;  %v5116_v44 = vmul.f32 %v7080_v5, %v9375_v50  ;;  %v4949_v34 = vmul.f32 0.020408163, %v9559_v51 }
 0x60f   : > { %v9896_v49 = vpop.permute.xlu1 %5344  ;;  %v9898_v57 = vpop.permute.xlu0 %5409  ;;  %7089 = vrsqrt.f32 %v4991_v16  ;;  %v4984_v16 = vadd.f32 0.001, %v4936_v21 }
 0x610   : > { %10372 = vst [vmem:[#allocation86_spill] sm:$0xff] %v9896_v49  ;;  %10373 = vst [vmem:[#allocation87_spill] sm:$0xff] %v9898_v57  ;;  %v4980_v49 = vadd.f32 0.001, %v4932_v38  ;;  %v5079_v57 = vmul.f32 %v7076_v56, %v9150_v25  ;;  %v7082_v60 = vpop.eup %7081 }
 0x611   : > { %v7084_v38 = vpop.eup %7083  ;;  %v5083_v56 = vmul.f32 %v7082_v60, %v9174_v7  ;;  %v4997_v7 = vadd.f32 0.001, %v4949_v34 }
 0x612   : > { %v5415_v42 = vmul.f32 %v9737_v33, %v5079_v57  ;;  %7091 = vrsqrt.f32 %v4980_v49  ;;  %v4982_v33 = vadd.f32 0.001, %v4934_v32  ;;  %v5417_v57 = vmul.f32 %v9757_v52, %v5081_v43  ;;  %v7086_v52 = vpop.eup %7085 }
 0x613   : > { %v9905_v8 = vpop.permute.xlu1 %5354  ;;  %v5516_v30 = vpop.permute.xlu0 %5515  ;;  %7093 = vrsqrt.f32 %v5026_v23  ;;  %v4995_v49 = vadd.f32 0.001, %v4947_v12  ;;  %v5419_v0 = vmul.f32 %v9777_v4, %v5083_v56  ;;  %v5118_v51 = vmul.f32 %v7084_v38, %v9387_v19 }
 0x614   : > { %v5749_v18 = vadd.f32 %v5516_v30, %v5413_v31  ;;  %7095 = vrsqrt.f32 %v4993_v47  ;;  %v4938_v31 = vmul.f32 0.020408163, %v9501_v55  ;;  %v4951_v30 = vmul.f32 0.020408163, %v9569_v45 }
 0x615   : > { %7097 = vrsqrt.f32 %v4982_v33  ;;  %v5085_v55 = vmul.f32 %v7086_v52, %v9186_v13  ;;  %v4940_v12 = vmul.f32 0.020408163, %v9511_v29  ;;  %v4953_v43 = vmul.f32 0.020408163, %v9579_v39 }
 0x616   : > { %5797 = vst.msk [vmem:[%s10256_s7 + $0x8] sm:$0xff] %vm4398_vm2, %v5749_v18  ;;  %7099 = vrsqrt.f32 %v4995_v49  ;;  %v4986_v5 = vadd.f32 0.001, %v4938_v31  ;;  %v4999_v13 = vadd.f32 0.001, %v4951_v30 }
 0x617   : > { %v9915_v28 = vpop.permute.xlu1 %5364  ;;  %v5526_v25 = vpop.permute.xlu0 %5525  ;;  %7101 = vrsqrt.f32 %v4984_v16  ;;  %v5421_v19 = vmul.f32 %v9729_v53, %v5085_v55  ;;  %v4944_v52 = vmul.f32 0.020408163, %v9531_v10 }
 0x618   : > { %v5751_v46 = vadd.f32 %v5526_v25, %v5415_v42  ;;  %v7088_v50 = vpop.eup %7087  ;;  %7103 = vrsqrt.f32 %v4997_v7 }
 0x619   : > { %v7090_v4 = vpop.eup %7089  ;;  %v5120_v45 = vmul.f32 %v7088_v50, %v9399_v59  ;;  %7105 = vrsqrt.f32 %v4986_v5  ;;  %v5001_v59 = vadd.f32 0.001, %v4953_v43 }
 0x61a   : > { %5799 = vst.msk [vmem:[%s10256_s7 + $0x18] sm:$0xff] %vm4398_vm2, %v5751_v46  ;;  %v5087_v33 = vmul.f32 %v7090_v4, %v9198_v35  ;;  %7107 = vrsqrt.f32 %v4999_v13  ;;  %v4955_v35 = vmul.f32 0.020408163, %v9589_v36  ;;  %v10375_v13 = vld [vmem:[#allocation60_spill] sm:$0xff] }
 0x61b   : > { %v5375_v9 = vpop.permute.xlu1 %5374  ;;  %v5536_v61 = vpop.permute.xlu0 %5535 }
 0x61c   : > { %v9927_v2 = vmul.f32 %v5375_v9, %v5116_v44  ;;  %v5753_v62 = vadd.f32 %v5536_v61, %v5417_v57  ;;  %v7092_v47 = vpop.eup %7091  ;;  %v4988_v57 = vadd.f32 0.001, %v4940_v12  ;;  %v4942_v44 = vmul.f32 0.020408163, %v9521_v48 }
 0x61d   : > { %v7094_v25 = vpop.eup %7093  ;;  %v5423_v38 = vmul.f32 %v9739_v1, %v5087_v33  ;;  %v5076_v61 = vmul.f32 %v7092_v47, %v9136_v20  ;;  %v5003_v20 = vadd.f32 0.001, %v4955_v35  ;;  %v10377_v33 = vld [vmem:[#allocation5_spill] sm:$0xff] }
 0x61e   : > { %5801 = vst.msk [vmem:[%s10256_s7 + $0x28] sm:$0xff] %vm4398_vm2, %v5753_v62  ;;  %v7096_v53 = vpop.eup %7095  ;;  %v5122_v39 = vmul.f32 %v7094_v25, %v9411_v17  ;;  %7109 = vrsqrt.f32 %v4988_v57  ;;  %v4990_v31 = vadd.f32 0.001, %v4942_v44 }
 0x61f   : > { %v5385_v18 = vpop.permute.xlu1 %5384  ;;  %v5546_v23 = vpop.permute.xlu0 %5545  ;;  %v5089_v48 = vmul.f32 %v7096_v53, %v9210_v15  ;;  %v5412_v17 = vmul.f32 %v9719_v40, %v5076_v61  ;;  %7111 = vrsqrt.f32 %v5001_v59  ;;  %v4957_v15 = vmul.f32 0.020408163, %v9599_v3  ;;  %v10378_v53 = vld [vmem:[#allocation12_spill] sm:$0xff]  ;;  %v10379_v59 = vld [vmem:[#allocation37_spill] sm:$0xff] }
 0x620   : > { %v9938_v32 = vmul.f32 %v5385_v18, %v5118_v51  ;;  %v5755_v42 = vadd.f32 %v5546_v23, %v5419_v0  ;;  %v7098_v9 = vpop.eup %7097  ;;  %7113 = vrsqrt.f32 %v4990_v31  ;;  %v4946_v18 = vmul.f32 0.020408163, %v9541_v24  ;;  %v10381_v61 = vld [vmem:[#allocation61_spill] sm:$0xff] }
 0x621   : > { %v7100_v62 = vpop.eup %7099  ;;  %v5425_v16 = vmul.f32 %v9749_v26, %v5089_v48  ;;  %v5078_v10 = vmul.f32 %v7098_v9, %v9139_v41  ;;  %v4992_v26 = vadd.f32 0.001, %v4944_v52  ;;  %7115 = vrsqrt.f32 %v5003_v20  ;;  %v10383_v20 = vld [vmem:[#allocation6_spill] sm:$0xff] }
 0x622   : > { %5803 = vst.msk [vmem:[%s10256_s7 + $0x38] sm:$0xff] %vm4398_vm2, %v5755_v42  ;;  %v7102_v51 = vpop.eup %7101  ;;  %v5091_v50 = vmul.f32 %v7100_v62, %v9222_v63  ;;  %v5005_v63 = vadd.f32 0.001, %v4957_v15  ;;  %v4959_v3 = vmul.f32 0.020408163, %v9609_v14  ;;  %v10382_v62 = vld [vmem:[#allocation45_spill] sm:$0xff] }
 0x623   : > { %v5395_v46 = vpop.permute.xlu1 %5394  ;;  %v5556_v60 = vpop.permute.xlu0 %5555  ;;  %v5414_v23 = vmul.f32 %v9727_v54, %v5078_v10  ;;  %v5080_v54 = vmul.f32 %v7102_v51, %v9159_v6  ;;  %7117 = vrsqrt.f32 %v4992_v26  ;;  %v4994_v12 = vadd.f32 0.001, %v4946_v18  ;;  %v10386_v26 = vld [vmem:[#allocation62_spill] sm:$0xff] }
 0x624   : > { %v9949_v21 = vmul.f32 %v5395_v46, %v5120_v45  ;;  %v5757_v29 = vadd.f32 %v5556_v60, %v5421_v19  ;;  %v7104_v30 = vpop.eup %7103  ;;  %v5427_v55 = vmul.f32 %v9759_v37, %v5091_v50  ;;  %v4948_v19 = vmul.f32 0.020408163, %v9551_v27  ;;  %v10374_v45 = vld [vmem:[#allocation58_spill] sm:$0xff] }
 0x625   : > { %v7106_v41 = vpop.eup %7105  ;;  %v5093_v37 = vmul.f32 %v7104_v30, %v9234_v22  ;;  %v5416_v25 = vmul.f32 %v10374_v45, %v5080_v54  ;;  %7119 = vrsqrt.f32 %v5005_v63  ;;  %v5007_v6 = vadd.f32 0.001, %v4959_v3  ;;  %v10376_v22 = vld [vmem:[#allocation43_spill] sm:$0xff] }
 0x626   : > { %5805 = vst.msk [vmem:[%s10256_s7 + $0x48] sm:$0xff] %vm4398_vm2, %v5757_v29  ;;  %v7108_v47 = vpop.eup %7107  ;;  %v4961_v14 = vmul.f32 0.020408163, %v10376_v22  ;;  %v5082_v29 = vmul.f32 %v7106_v41, %v10377_v33  ;;  %v4950_v35 = vmul.f32 0.020408163, %v10379_v59  ;;  %7121 = vrsqrt.f32 %v4994_v12  ;;  %v10388_v3 = vld [vmem:[#allocation47_spill] sm:$0xff] }
 0x627   : > { %v5405_v49 = vpop.permute.xlu1 %5404  ;;  %v5566_v34 = vpop.permute.xlu0 %5565  ;;  %v5429_v43 = vmul.f32 %v10375_v13, %v5093_v37  ;;  %v5095_v57 = vmul.f32 %v7108_v47, %v10378_v53  ;;  %7123 = vrsqrt.f32 %v5007_v6  ;;  %v4963_v52 = vmul.f32 0.020408163, %v10382_v62  ;;  %v10389_v37 = vld [vmem:[#allocation7_spill] sm:$0xff]  ;;  %v10392_v6 = vld [vmem:[#allocation64_spill] sm:$0xff] }
 0x628   : > { %v9961_v56 = vmul.f32 %v5405_v49, %v5122_v39  ;;  %v5759_v1 = vadd.f32 %v5566_v34, %v5423_v38  ;;  %v7110_v60 = vpop.eup %7109  ;;  %v4996_v49 = vadd.f32 0.001, %v4948_v19  ;;  %v10380_v34 = vld [vmem:[#allocation59_spill] sm:$0xff] }
 0x629   : > { %v7112_v39 = vpop.eup %7111  ;;  %v5418_v9 = vmul.f32 %v10380_v34, %v5082_v29  ;;  %v5431_v48 = vmul.f32 %v10381_v61, %v5095_v57  ;;  %v5084_v15 = vmul.f32 %v7110_v60, %v10383_v20  ;;  %v5011_v63 = vadd.f32 0.001, %v4963_v52  ;;  %v10391_v13 = vld [vmem:[#allocation39_spill] sm:$0xff]  ;;  %v10394_v60 = vld [vmem:[#allocation49_spill] sm:$0xff] }
 0x62a   : > { %5807 = vst.msk [vmem:[%s10256_s7 + $0x58] sm:$0xff] %vm4398_vm2, %v5759_v1  ;;  %v5009_v1 = vadd.f32 0.001, %v4961_v14  ;;  %7125 = vrsqrt.f32 %v4996_v49  ;;  %v10393_v14 = vld [vmem:[#allocation65_spill] sm:$0xff]  ;;  %v4967_v33 = vmul.f32 0.020408163, %v10394_v60 }
 0x62b   : > { %v5511_v36 = vpop.permute.xlu1 %5510  ;;  %v5576_v0 = vpop.permute.xlu0 %5575  ;;  %v5420_v18 = vmul.f32 %v10386_v26, %v5084_v15  ;;  %v10399_v52 = vld [vmem:[#allocation67_spill] sm:$0xff] }
 0x62c   : > { %v5748_v7 = vadd.f32 %v5511_v36, %v5412_v17  ;;  %v5761_v40 = vadd.f32 %v5576_v0, %v5425_v16  ;;  %v7114_v16 = vpop.eup %7113  ;;  %v10384_v36 = vld [vmem:[#allocation14_spill] sm:$0xff]  ;;  %7127 = vrsqrt.f32 %v5009_v1 }
 0x62d   : > { %v5097_v0 = vmul.f32 %v7112_v39, %v10384_v36  ;;  %v7116_v50 = vpop.eup %7115  ;;  %v10396_v39 = vld [vmem:[#allocation18_spill] sm:$0xff] }
 0x62e   : > { %5796 = vst.msk [vmem:[%s10256_s7] sm:$0xff] %vm4398_vm2, %v5748_v7  ;;  %5809 = vst.msk [vmem:[%s10256_s7 + $0x68] sm:$0xff] %vm4398_vm2, %v5761_v40  ;;  %v4998_v7 = vadd.f32 0.001, %v4950_v35  ;;  %v10385_v40 = vld [vmem:[#allocation38_spill] sm:$0xff]  ;;  %v7118_v41 = vpop.eup %7117 }
 0x62f   : > { %v5521_v24 = vpop.permute.xlu1 %5520  ;;  %v5586_v42 = vpop.permute.xlu0 %5585  ;;  %v4952_v30 = vmul.f32 0.020408163, %v10385_v40  ;;  %v10398_v1 = vld [vmem:[#allocation66_spill] sm:$0xff] }
 0x630   : > { %v5750_v4 = vadd.f32 %v5521_v24, %v5414_v23  ;;  %v5763_v5 = vadd.f32 %v5586_v42, %v5427_v55  ;;  %v10387_v23 = vld [vmem:[#allocation63_spill] sm:$0xff]  ;;  %v4965_v24 = vmul.f32 0.020408163, %v10388_v3  ;;  %v7120_v45 = vpop.eup %7119  ;;  %7129 = vrsqrt.f32 %v4998_v7  ;;  %v10405_v3 = vld [vmem:[#allocation69_spill] sm:$0xff] }
 0x631   : > { %v5433_v55 = vmul.f32 %v10387_v23, %v5097_v0  ;;  %7131 = vrsqrt.f32 %v5011_v63  ;;  %v7122_v57 = vpop.eup %7121  ;;  %v5101_v59 = vmul.f32 %v7120_v45, %v10396_v39  ;;  %v10403_v23 = vld [vmem:[#allocation41_spill] sm:$0xff]  ;;  %v10408_v45 = vld [vmem:[#allocation22_spill] sm:$0xff] }
 0x632   : > { %5798 = vst.msk [vmem:[%s10256_s7 + $0x10] sm:$0xff] %vm4398_vm2, %v5750_v4  ;;  %5811 = vst.msk [vmem:[%s10256_s7 + $0x78] sm:$0xff] %vm4398_vm2, %v5763_v5  ;;  %v5086_v4 = vmul.f32 %v7114_v16, %v10389_v37  ;;  %v10390_v5 = vld [vmem:[#allocation16_spill] sm:$0xff]  ;;  %v7124_v34 = vpop.eup %7123  ;;  %v10400_v16 = vld [vmem:[#allocation51_spill] sm:$0xff] }
 0x633   : > { %v5531_v46 = vpop.permute.xlu1 %5530  ;;  %v5596_v27 = vpop.permute.xlu0 %5595  ;;  %v5099_v47 = vmul.f32 %v7116_v50, %v10390_v5  ;;  %v4969_v20 = vmul.f32 0.020408163, %v10400_v16  ;;  %v10402_v50 = vld [vmem:[#allocation20_spill] sm:$0xff]  ;;  %v10406_v37 = vld [vmem:[#allocation53_spill] sm:$0xff] }
 0x634   : > { %v5752_v44 = vadd.f32 %v5531_v46, %v5416_v25  ;;  %v5765_v38 = vadd.f32 %v5596_v27, %v5429_v43  ;;  %v5000_v25 = vadd.f32 0.001, %v4952_v30  ;;  %v4954_v43 = vmul.f32 0.020408163, %v10391_v13  ;;  %v7126_v0 = vpop.eup %7125 }
 0x635   : > { %v5422_v22 = vmul.f32 %v10392_v6, %v5086_v4  ;;  %v5435_v46 = vmul.f32 %v10393_v14, %v5099_v47  ;;  %v5013_v27 = vadd.f32 0.001, %v4965_v24  ;;  %v5103_v7 = vmul.f32 %v7124_v34, %v10402_v50  ;;  %v10409_v14 = vld [vmem:[#allocation42_spill] sm:$0xff]  ;;  %v10414_v34 = vld [vmem:[#allocation24_spill] sm:$0xff] }
 0x636   : > { %5800 = vst.msk [vmem:[%s10256_s7 + $0x20] sm:$0xff] %vm4398_vm2, %v5752_v44  ;;  %5813 = vst.msk [vmem:[%s10256_s7 + $0x88] sm:$0xff] %vm4398_vm2, %v5765_v38  ;;  %v10395_v44 = vld [vmem:[#allocation8_spill] sm:$0xff]  ;;  %7133 = vrsqrt.f32 %v5000_v25  ;;  %v7128_v26 = vpop.eup %7127  ;;  %v4971_v4 = vmul.f32 0.020408163, %v10406_v37  ;;  %v10423_v37 = vld [vmem:[#allocation75_spill] sm:$0xff] }
 0x637   : > { %v5541_v31 = vpop.permute.xlu1 %5540  ;;  %v5606_v17 = vpop.permute.xlu0 %5605  ;;  %v5088_v38 = vmul.f32 %v7118_v41, %v10395_v44  ;;  %7135 = vrsqrt.f32 %v5013_v27  ;;  %v10404_v41 = vld [vmem:[#allocation68_spill] sm:$0xff]  ;;  %v5439_v24 = vmul.f32 %v10405_v3, %v5103_v7  ;;  %v5105_v25 = vmul.f32 %v7128_v26, %v10408_v45  ;;  %v10410_v27 = vld [vmem:[#allocation70_spill] sm:$0xff] }
 0x638   : > { %v5754_v51 = vadd.f32 %v5541_v31, %v5418_v9  ;;  %v5767_v10 = vadd.f32 %v5606_v17, %v5431_v48  ;;  %v10397_v9 = vld [vmem:[#allocation40_spill] sm:$0xff]  ;;  %v5002_v48 = vadd.f32 0.001, %v4954_v43  ;;  %v5437_v31 = vmul.f32 %v10399_v52, %v5101_v59  ;;  %v10420_v26 = vld [vmem:[#allocation26_spill] sm:$0xff] }
 0x639   : > { %v4956_v61 = vmul.f32 0.020408163, %v10397_v9  ;;  %v5424_v62 = vmul.f32 %v10398_v1, %v5088_v38  ;;  %v5015_v17 = vadd.f32 0.001, %v4967_v33  ;;  %v10411_v33 = vld [vmem:[#allocation71_spill] sm:$0xff]  ;;  %v10421_v3 = vld [vmem:[#allocation46_spill] sm:$0xff] }
 0x63a   : > { %5802 = vst.msk [vmem:[%s10256_s7 + $0x30] sm:$0xff] %vm4398_vm2, %v5754_v51  ;;  %5815 = vst.msk [vmem:[%s10256_s7 + $0x98] sm:$0xff] %vm4398_vm2, %v5767_v10  ;;  %v10401_v51 = vld [vmem:[#allocation9_spill] sm:$0xff]  ;;  %7137 = vrsqrt.f32 %v5002_v48 }
 0x63b   : > { %v5551_v42 = vpop.permute.xlu1 %5550  ;;  %v5616_v54 = vpop.permute.xlu0 %5615  ;;  %v5090_v10 = vmul.f32 %v7122_v57, %v10401_v51  ;;  %7139 = vrsqrt.f32 %v5015_v17  ;;  %v10412_v57 = vld [vmem:[#allocation54_spill] sm:$0xff]  ;;  %v10416_v17 = vld [vmem:[#allocation72_spill] sm:$0xff] }
 0x63c   : > { %v5756_v12 = vadd.f32 %v5551_v42, %v5420_v18  ;;  %v5769_v19 = vadd.f32 %v5616_v54, %v5433_v55  ;;  %v5004_v18 = vadd.f32 0.001, %v4956_v61  ;;  %v4958_v55 = vmul.f32 0.020408163, %v10403_v23  ;;  %v7130_v42 = vpop.eup %7129 }
 0x63d   : > { %v5426_v63 = vmul.f32 %v10404_v41, %v5090_v10  ;;  %v5017_v54 = vadd.f32 0.001, %v4969_v20  ;;  %v7132_v6 = vpop.eup %7131  ;;  %v4973_v44 = vmul.f32 0.020408163, %v10412_v57  ;;  %v10417_v20 = vld [vmem:[#allocation73_spill] sm:$0xff] }
 0x63e   : > { %5804 = vst.msk [vmem:[%s10256_s7 + $0x40] sm:$0xff] %vm4398_vm2, %v5756_v12  ;;  %5817 = vst.msk [vmem:[%s10256_s7 + $0xa8] sm:$0xff] %vm4398_vm2, %v5769_v19  ;;  %v10407_v12 = vld [vmem:[#allocation10_spill] sm:$0xff]  ;;  %7141 = vrsqrt.f32 %v5004_v18  ;;  %v5107_v9 = vmul.f32 %v7132_v6, %v10414_v34  ;;  %v10426_v6 = vld [vmem:[#allocation28_spill] sm:$0xff] }
 0x63f   : > { %v5561_v29 = vpop.permute.xlu1 %5560  ;;  %v5626_v53 = vpop.permute.xlu0 %5625  ;;  %v5092_v19 = vmul.f32 %v7126_v0, %v10407_v12  ;;  %7143 = vrsqrt.f32 %v5017_v54  ;;  %v10418_v0 = vld [vmem:[#allocation55_spill] sm:$0xff]  ;;  %v10424_v12 = vld [vmem:[#allocation56_spill] sm:$0xff] }
 0x640   : > { %v5758_v35 = vadd.f32 %v5561_v29, %v5422_v22  ;;  %v5771_v49 = vadd.f32 %v5626_v53, %v5435_v46  ;;  %v5006_v22 = vadd.f32 0.001, %v4958_v55  ;;  %v4960_v46 = vmul.f32 0.020408163, %v10409_v14  ;;  %v7134_v59 = vpop.eup %7133 }
 0x641   : > { %v5428_v60 = vmul.f32 %v10410_v27, %v5092_v19  ;;  %v5441_v29 = vmul.f32 %v10411_v33, %v5105_v25  ;;  %v5019_v53 = vadd.f32 0.001, %v4971_v4  ;;  %v7136_v1 = vpop.eup %7135  ;;  %v4975_v51 = vmul.f32 0.020408163, %v10418_v0  ;;  %v10427_v33 = vld [vmem:[#allocation48_spill] sm:$0xff] }
 0x642   : > { %5806 = vst.msk [vmem:[%s10256_s7 + $0x50] sm:$0xff] %vm4398_vm2, %v5758_v35  ;;  %5819 = vst.msk [vmem:[%s10256_s7 + $0xb8] sm:$0xff] %vm4398_vm2, %v5771_v49  ;;  %v10413_v35 = vld [vmem:[#allocation11_spill] sm:$0xff]  ;;  %7145 = vrsqrt.f32 %v5006_v22  ;;  %v5109_v18 = vmul.f32 %v7136_v1, %v10420_v26  ;;  %v4977_v19 = vmul.f32 0.020408163, %v10424_v12  ;;  %v10432_v1 = vld [vmem:[#allocation30_spill] sm:$0xff] }
 0x643   : > { %v5571_v15 = vpop.permute.xlu1 %5570  ;;  %v5636_v36 = vpop.permute.xlu0 %5635  ;;  %v5094_v49 = vmul.f32 %v7130_v42, %v10413_v35  ;;  %7147 = vrsqrt.f32 %v5019_v53  ;;  %v10422_v42 = vld [vmem:[#allocation74_spill] sm:$0xff]  ;;  %v10428_v53 = vld [vmem:[#allocation76_spill] sm:$0xff]  ;;  %v10436_v26 = vld [vmem:[#allocation19_spill] sm:$0xff] }
 0x644   : > { %v5760_v40 = vadd.f32 %v5571_v15, %v5424_v62  ;;  %v5773_v30 = vadd.f32 %v5636_v36, %v5437_v31  ;;  %v10415_v62 = vld [vmem:[#allocation44_spill] sm:$0xff]  ;;  %v5008_v31 = vadd.f32 0.001, %v4960_v46  ;;  %v5443_v15 = vmul.f32 %v10417_v20, %v5107_v9  ;;  %v7138_v7 = vpop.eup %7137  ;;  %v10433_v20 = vld [vmem:[#allocation78_spill] sm:$0xff] }
 0x645   : > { %v4962_v52 = vmul.f32 0.020408163, %v10415_v62  ;;  %v5430_v16 = vmul.f32 %v10416_v17, %v5094_v49  ;;  %v5021_v36 = vadd.f32 0.001, %v4973_v44  ;;  %v7140_v41 = vpop.eup %7139  ;;  %v5445_v4 = vmul.f32 %v10423_v37, %v5109_v18  ;;  %v10429_v44 = vld [vmem:[#allocation77_spill] sm:$0xff] }
 0x646   : > { %5808 = vst.msk [vmem:[%s10256_s7 + $0x60] sm:$0xff] %vm4398_vm2, %v5760_v40  ;;  %5821 = vst.msk [vmem:[%s10256_s7 + $0xc8] sm:$0xff] %vm4398_vm2, %v5773_v30  ;;  %v10419_v40 = vld [vmem:[#allocation13_spill] sm:$0xff]  ;;  %7149 = vrsqrt.f32 %v5008_v31  ;;  %v5111_v22 = vmul.f32 %v7140_v41, %v10426_v6 }
 0x647   : > { %v5581_v5 = vpop.permute.xlu1 %5580  ;;  %v5646_v47 = vpop.permute.xlu0 %5645  ;;  %v5096_v30 = vmul.f32 %v7134_v59, %v10419_v40  ;;  %7151 = vrsqrt.f32 %v5021_v36  ;;  %v10430_v59 = vld [vmem:[#allocation57_spill] sm:$0xff]  ;;  %v10434_v36 = vld [vmem:[#allocation79_spill] sm:$0xff] }
 0x648   : > { %v5762_v13 = vadd.f32 %v5581_v5, %v5426_v63  ;;  %v5775_v43 = vadd.f32 %v5646_v47, %v5439_v24  ;;  %v5010_v63 = vadd.f32 0.001, %v4962_v52  ;;  %v4964_v24 = vmul.f32 0.020408163, %v10421_v3  ;;  %v7142_v5 = vpop.eup %7141 }
 0x649   : > { %v5432_v54 = vmul.f32 %v10422_v42, %v5096_v30  ;;  %v5023_v47 = vadd.f32 0.001, %v4975_v51  ;;  %v7144_v27 = vpop.eup %7143  ;;  %v4979_v35 = vmul.f32 0.020408163, %v10430_v59  ;;  %v10435_v51 = vld [vmem:[#allocation50_spill] sm:$0xff] }
 0x64a   : > { %5810 = vst.msk [vmem:[%s10256_s7 + $0x70] sm:$0xff] %vm4398_vm2, %v5762_v13  ;;  %5823 = vst.msk [vmem:[%s10256_s7 + $0xd8] sm:$0xff] %vm4398_vm2, %v5775_v43  ;;  %v10425_v13 = vld [vmem:[#allocation15_spill] sm:$0xff]  ;;  %7153 = vrsqrt.f32 %v5010_v63  ;;  %v5113_v62 = vmul.f32 %v7144_v27, %v10432_v1  ;;  %v10443_v27 = vld [vmem:[#allocation82_spill] sm:$0xff] }
 0x64b   : > { %v5591_v38 = vpop.permute.xlu1 %5590  ;;  %v5656_v39 = vpop.permute.xlu0 %5655  ;;  %v5098_v43 = vmul.f32 %v7138_v7, %v10425_v13  ;;  %7155 = vrsqrt.f32 %v5023_v47  ;;  %v10440_v47 = vld [vmem:[#allocation52_spill] sm:$0xff] }
 0x64c   : > { %v5764_v61 = vadd.f32 %v5591_v38, %v5428_v60  ;;  %v5777_v48 = vadd.f32 %v5656_v39, %v5441_v29  ;;  %v5012_v60 = vadd.f32 0.001, %v4964_v24  ;;  %v4966_v29 = vmul.f32 0.020408163, %v10427_v33  ;;  %v7146_v9 = vpop.eup %7145  ;;  %v10438_v24 = vld [vmem:[#allocation80_spill] sm:$0xff]  ;;  %v10444_v33 = vld [vmem:[#allocation83_spill] sm:$0xff] }
 0x64d   : > { %v5434_v57 = vmul.f32 %v10428_v53, %v5098_v43  ;;  %v5447_v38 = vmul.f32 %v10429_v44, %v5111_v22  ;;  %v5025_v39 = vadd.f32 0.001, %v4977_v19  ;;  %v7148_v17 = vpop.eup %7147  ;;  %v5449_v0 = vmul.f32 %v10434_v36, %v5113_v62  ;;  %v10442_v43 = vld [vmem:[#allocation33_spill] sm:$0xff] }
 0x64e   : > { %5812 = vst.msk [vmem:[%s10256_s7 + $0x80] sm:$0xff] %vm4398_vm2, %v5764_v61  ;;  %5825 = vst.msk [vmem:[%s10256_s7 + $0xe8] sm:$0xff] %vm4398_vm2, %v5777_v48  ;;  %v10431_v61 = vld [vmem:[#allocation17_spill] sm:$0xff]  ;;  %7157 = vrsqrt.f32 %v5012_v60  ;;  %v5102_v18 = vmul.f32 %v7146_v9, %v10436_v26  ;;  %v4970_v12 = vmul.f32 0.020408163, %v10440_v47 }
 0x64f   : > { %v5601_v10 = vpop.permute.xlu1 %5600  ;;  %v5666_v50 = vpop.permute.xlu0 %5665  ;;  %v5100_v48 = vmul.f32 %v7142_v5, %v10431_v61  ;;  %7159 = vrsqrt.f32 %v5025_v39  ;;  %v10445_v39 = vld [vmem:[#allocation23_spill] sm:$0xff] }
 0x650   : > { %v5766_v23 = vadd.f32 %v5601_v10, %v5430_v16  ;;  %v5779_v55 = vadd.f32 %v5666_v50, %v5443_v15  ;;  %v5014_v16 = vadd.f32 0.001, %v4966_v29  ;;  %v4968_v10 = vmul.f32 0.020408163, %v10435_v51  ;;  %v7150_v30 = vpop.eup %7149 }
 0x651   : > { %v5436_v15 = vmul.f32 %v10433_v20, %v5100_v48  ;;  %v5027_v50 = vadd.f32 0.001, %v4979_v35  ;;  %v7152_v3 = vpop.eup %7151  ;;  %v5438_v42 = vmul.f32 %v10438_v24, %v5102_v18  ;;  %v5018_v53 = vadd.f32 0.001, %v4970_v12  ;;  %v10446_v35 = vld [vmem:[#allocation34_spill] sm:$0xff]  ;;  %v10448_v20 = vld [vmem:[#allocation35_spill] sm:$0xff] }
 0x652   : > { %5814 = vst.msk [vmem:[%s10256_s7 + $0x90] sm:$0xff] %vm4398_vm2, %v5766_v23  ;;  %5827 = vst.msk [vmem:[%s10256_s7 + $0xf8] sm:$0xff] %vm4398_vm2, %v5779_v55  ;;  %v10437_v23 = vld [vmem:[#allocation32_spill] sm:$0xff]  ;;  %7161 = vrsqrt.f32 %v5014_v16  ;;  %v5016_v5 = vadd.f32 0.001, %v4968_v10  ;;  %v5117_v6 = vmul.f32 %v7152_v3, %v10442_v43  ;;  %v10450_v10 = vld [vmem:[#allocation85_spill] sm:$0xff] }
 0x653   : > { %v5611_v45 = vpop.permute.xlu1 %5610  ;;  %v5676_v25 = vpop.permute.xlu0 %5675  ;;  %v5115_v55 = vmul.f32 %v7148_v17, %v10437_v23  ;;  %7163 = vrsqrt.f32 %v5027_v50  ;;  %v10447_v17 = vld [vmem:[#allocation25_spill] sm:$0xff]  ;;  %v10452_v18 = vld [vmem:[#allocation36_spill] sm:$0xff]  ;;  %v10453_v3 = vld [vmem:[#allocation86_spill] sm:$0xff] }
 0x654   : > { %v5768_v14 = vadd.f32 %v5611_v45, %v5432_v54  ;;  %v5781_v46 = vadd.f32 %v5676_v25, %v5445_v4  ;;  %v10439_v54 = vld [vmem:[#allocation81_spill] sm:$0xff]  ;;  %v7154_v4 = vpop.eup %7153  ;;  %v5453_v29 = vmul.f32 %v10444_v33, %v5117_v6  ;;  %7165 = vrsqrt.f32 %v5016_v5  ;;  %v10456_v43 = vld [vmem:[#allocation31_spill] sm:$0xff] }
 0x655   : > { %v5451_v37 = vmul.f32 %v10439_v54, %v5115_v55  ;;  %v10441_v25 = vld [vmem:[#allocation21_spill] sm:$0xff]  ;;  %v5106_v59 = vmul.f32 %v7154_v4, %v10445_v39  ;;  %7167 = vrsqrt.f32 %v5018_v53 }
 0x656   : > { %5816 = vst.msk [vmem:[%s10256_s7 + $0xa0] sm:$0xff] %vm4398_vm2, %v5768_v14  ;;  %5829 = vst.msk [vmem:[%s10256_s7 + $0x108] sm:$0xff] %vm4398_vm2, %v5781_v46  ;;  %v5104_v13 = vmul.f32 %v7150_v30, %v10441_v25  ;;  %v7156_v46 = vpop.eup %7155  ;;  %v10451_v30 = vld [vmem:[#allocation27_spill] sm:$0xff]  ;;  %v10455_v5 = vld [vmem:[#allocation29_spill] sm:$0xff] }
 0x657   : > { %v5621_v49 = vpop.permute.xlu1 %5620  ;;  %v5686_v34 = vpop.permute.xlu0 %5685  ;;  %v5442_v48 = vmul.f32 %v9884_v11, %v5106_v59 }
 0x658   : > { %v5770_v52 = vadd.f32 %v5621_v49, %v5434_v57  ;;  %v5783_v31 = vadd.f32 %v5686_v34, %v5447_v38  ;;  %v5440_v60 = vmul.f32 %v10443_v27, %v5104_v13  ;;  %v7158_v38 = vpop.eup %7157  ;;  %v5119_v49 = vmul.f32 %v7156_v46, %v10446_v35 }
 0x659   : > { %v7160_v61 = vpop.eup %7159  ;;  %v5108_v16 = vmul.f32 %v7158_v38, %v10447_v17 }
 0x65a   : > { %5818 = vst.msk [vmem:[%s10256_s7 + $0xb0] sm:$0xff] %vm4398_vm2, %v5770_v52  ;;  %5831 = vst.msk [vmem:[%s10256_s7 + $0x118] sm:$0xff] %vm4398_vm2, %v5783_v31  ;;  %v5455_v1 = vmul.f32 %v9886_v58, %v5119_v49  ;;  %v5121_v11 = vmul.f32 %v7160_v61, %v10448_v20 }
 0x65b   : > { %v5631_v7 = vpop.permute.xlu1 %5630  ;;  %v5696_v40 = vpop.permute.xlu0 %5695 }
 0x65c   : > { %v5772_v41 = vadd.f32 %v5631_v7, %v5436_v15  ;;  %v5785_v63 = vadd.f32 %v5696_v40, %v5449_v0  ;;  %v7162_v31 = vpop.eup %7161  ;;  %v10449_v0 = vld [vmem:[#allocation84_spill] sm:$0xff]  ;;  %v5457_v50 = vmul.f32 %v10450_v10, %v5121_v11 }
 0x65d   : > { %v7164_v36 = vpop.eup %7163  ;;  %v5444_v51 = vmul.f32 %v10449_v0, %v5108_v16  ;;  %v5110_v26 = vmul.f32 %v7162_v31, %v10451_v30 }
 0x65e   : > { %5820 = vst.msk [vmem:[%s10256_s7 + $0xc0] sm:$0xff] %vm4398_vm2, %v5772_v41  ;;  %5833 = vst.msk [vmem:[%s10256_s7 + $0x128] sm:$0xff] %vm4398_vm2, %v5785_v63  ;;  %v5123_v23 = vmul.f32 %v7164_v36, %v10452_v18  ;;  %v7166_v63 = vpop.eup %7165 }
 0x65f   : > { %v5641_v19 = vpop.permute.xlu1 %5640  ;;  %v5706_v45 = vpop.permute.xlu0 %5705  ;;  %v5446_v24 = vmul.f32 %v10453_v3, %v5110_v26  ;;  %v5112_v47 = vmul.f32 %v7166_v63, %v10455_v5 }
 0x660   : > { %v5774_v22 = vadd.f32 %v5641_v19, %v5438_v42  ;;  %v5787_v14 = vadd.f32 %v5706_v45, %v5451_v37  ;;  %v10454_v42 = vld [vmem:[#allocation87_spill] sm:$0xff]  ;;  %v7168_v45 = vpop.eup %7167 }
 0x661   : > { %v5459_v54 = vmul.f32 %v10454_v42, %v5123_v23  ;;  %v5448_v25 = vmul.f32 %v9905_v8, %v5112_v47  ;;  %v5114_v6 = vmul.f32 %v7168_v45, %v10456_v43 }
 0x662   : > { %5822 = vst.msk [vmem:[%s10256_s7 + $0xd0] sm:$0xff] %vm4398_vm2, %v5774_v22  ;;  %5835 = vst.msk [vmem:[%s10256_s7 + $0x138] sm:$0xff] %vm4398_vm2, %v5787_v14 }
 0x663   : > { %v5651_v57 = vpop.permute.xlu1 %5650  ;;  %v5716_v44 = vpop.permute.xlu0 %5715  ;;  %v5450_v14 = vmul.f32 %v9915_v28, %v5114_v6 }
 0x664   : > { %v5776_v34 = vadd.f32 %v5651_v57, %v5440_v60  ;;  %v5789_v9 = vadd.f32 %v5716_v44, %v5453_v29 }
 0x666   : > { %5824 = vst.msk [vmem:[%s10256_s7 + $0xe0] sm:$0xff] %vm4398_vm2, %v5776_v34  ;;  %5837 = vst.msk [vmem:[%s10256_s7 + $0x148] sm:$0xff] %vm4398_vm2, %v5789_v9 }
 0x667   : > { %v5661_v62 = vpop.permute.xlu1 %5660  ;;  %v5726_v52 = vpop.permute.xlu0 %5725 }
 0x668   : > { %v5778_v15 = vadd.f32 %v5661_v62, %v5442_v48  ;;  %v5791_v58 = vadd.f32 %v5726_v52, %v5455_v1 }
 0x66a   : > { %5826 = vst.msk [vmem:[%s10256_s7 + $0xf0] sm:$0xff] %vm4398_vm2, %v5778_v15  ;;  %5839 = vst.msk [vmem:[%s10256_s7 + $0x158] sm:$0xff] %vm4398_vm2, %v5791_v58 }
 0x66b   : > { %v5671_v7 = vpop.permute.xlu1 %5670  ;;  %v5736_v40 = vpop.permute.xlu0 %5735 }
 0x66c   : > { %v5780_v55 = vadd.f32 %v5671_v7, %v5444_v51  ;;  %v5793_v41 = vadd.f32 %v5736_v40, %v5457_v50 }
 0x66e   : > { %5828 = vst.msk [vmem:[%s10256_s7 + $0x100] sm:$0xff] %vm4398_vm2, %v5780_v55  ;;  %5841 = vst.msk [vmem:[%s10256_s7 + $0x168] sm:$0xff] %vm4398_vm2, %v5793_v41 }
 0x66f   : > { %v5681_v37 = vpop.permute.xlu1 %5680  ;;  %v5746_v4 = vpop.permute.xlu0 %5745 }
 0x670   : > { %v5782_v12 = vadd.f32 %v5681_v37, %v5446_v24  ;;  %v5795_v19 = vadd.f32 %v5746_v4, %v5459_v54 }
 0x672   : > { %5830 = vst.msk [vmem:[%s10256_s7 + $0x110] sm:$0xff] %vm4398_vm2, %v5782_v12  ;;  %5843 = vst.msk [vmem:[%s10256_s7 + $0x178] sm:$0xff] %vm4398_vm2, %v5795_v19 }
 0x673   : > { %v5691_v13 = vpop.permute.xlu1 %5690 }
 0x674   : > { %v5784_v22 = vadd.f32 %v5691_v13, %v5448_v25 }
 0x676   : > { %5832 = vst.msk [vmem:[%s10256_s7 + $0x120] sm:$0xff] %vm4398_vm2, %v5784_v22 }
 0x677   : > { %v5701_v8 = vpop.permute.xlu1 %5700 }
 0x678   : > { %v5786_v46 = vadd.f32 %v5701_v8, %v5450_v14 }
 0x67a   : > { %5834 = vst.msk [vmem:[%s10256_s7 + $0x130] sm:$0xff] %vm4398_vm2, %v5786_v46 }
 0x67b   : > { %v5711_v27 = vpop.permute.xlu1 %5710 }
 0x67c   : > { %v5788_v60 = vadd.f32 %v5711_v27, %v9927_v2 }
 0x67e   : > { %5836 = vst.msk [vmem:[%s10256_s7 + $0x140] sm:$0xff] %vm4398_vm2, %v5788_v60 }
 0x67f   : > { %v5721_v28 = vpop.permute.xlu1 %5720 }
 0x680   : > { %v5790_v33 = vadd.f32 %v5721_v28, %v9938_v32 }
 0x682   : > { %5838 = vst.msk [vmem:[%s10256_s7 + $0x150] sm:$0xff] %vm4398_vm2, %v5790_v33 }
 0x683   : > { %v5731_v29 = vpop.permute.xlu1 %5730 }
 0x684   : > { %v5792_v53 = vadd.f32 %v5731_v29, %v9949_v21 }
 0x686   : > { %5840 = vst.msk [vmem:[%s10256_s7 + $0x160] sm:$0xff] %vm4398_vm2, %v5792_v53 }
 0x687   : > { %v5741_v2 = vpop.permute.xlu1 %5740 }
 0x688   : > { %v5794_v57 = vadd.f32 %v5741_v2, %v9961_v56 }
 0x68a   : > { %5842 = vst.msk [vmem:[%s10256_s7 + $0x170] sm:$0xff] %vm4398_vm2, %v5794_v57 }
 0x68b PF: > { %p14_p11 = scmp.ge.s32.totalorder %s7255_s28, 5   ;;  %s10457_s24 = smov %s7187_s25 }
 0x68c   : > { %s10458_s25 = smov %s7264_s8  ;;  %s10459_s26 = smov %s7255_s28 }
 0x68d   :  { %16 = sbr.rel (!%p14_p11) target bundleno = 2 (0x2), region = 119 }

</bundles_post_ra>
